<compile_context>
chip_gen: v6e
topology: v6e:2x2x1
jax: 0.10.0
libtpu: 0.0.40
codegen_flags: <defaults>
</compile_context>

<pallas_src>
import functools

import jax
import jax.numpy as jnp
from jax.experimental import pallas as pl
from jax.experimental.pallas import tpu as pltpu

FEAT = 2048          # inception_v3 feature width feeding the fc
NUM_CLASSES = 102    # CLASS=102 default in the module
CLASS_PAD = 128      # fc output padded to a full lane group (sliced back)
CIN_PAD = 8          # input channels padded to a full sublane group


def _round_up(x, m):
    return ((x + m - 1) // m) * m


# ---------------------------------------------------------------------------
# Fused kernel: conv1x1 + folded BN + ReLU + global-avg-pool + fc
# ---------------------------------------------------------------------------
def _fused_kernel(hw, tm, x_ref, w_ref, scale_ref, shift_ref, fcw_ref, fcb_ref,
                  o_ref, acc_ref):
    h = pl.program_id(1)
    nh = pl.num_programs(1)

    @pl.when(h == 0)
    def _init():
        acc_ref[...] = jnp.zeros_like(acc_ref)

    x = x_ref[0]                                                   # (tm, 8)
    y = jnp.dot(x, w_ref[...], preferred_element_type=jnp.float32)  # (tm, 2048)
    y = y * scale_ref[...] + shift_ref[...]                        # folded BN
    y = jnp.maximum(y, 0.0)                                        # ReLU

    if hw % tm != 0:
        # mask spatial tail rows of the last (partial) block
        row = h * tm + jax.lax.broadcasted_iota(jnp.int32, (tm, 1), 0)
        y = jnp.where(row < hw, y, 0.0)

    # partial spatial sum for the adaptive average pool (kept in VMEM only)
    acc_ref[...] = acc_ref[...] + jnp.sum(y, axis=0, keepdims=True)

    @pl.when(h == nh - 1)
    def _finalize():
        pooled = acc_ref[...] * (1.0 / hw)           # (8, 2048), rows identical
        logits = jnp.dot(pooled, fcw_ref[...],
                         preferred_element_type=jnp.float32)       # (8, 128)
        out = logits[0:1, :] + fcb_ref[...]                        # (1, 128)
        o_ref[...] = out.reshape(1, 1, CLASS_PAD).astype(o_ref.dtype)


# ---------------------------------------------------------------------------
# Wrapper
# ---------------------------------------------------------------------------
def inception_v3_forward(x_nchw, params, tm=512):
    n, cin, hgt, wid = x_nchw.shape
    assert cin <= CIN_PAD
    hw = hgt * wid

    # NCHW -> (N, HW, Cin) -> zero-pad channels to 8 (dense, aligned tiles).
    x3 = jnp.transpose(x_nchw.reshape(n, cin, hw), (0, 2, 1))
    x3 = jnp.pad(x3, ((0, 0), (0, 0), (0, CIN_PAD - cin)))

    tm = max(8, min(tm, _round_up(hw, 8)))
    tm = _round_up(tm, 8)
    n_hw = pl.cdiv(hw, tm)

    kernel = functools.partial(_fused_kernel, hw, tm)

    out = pl.pallas_call(
        kernel,
        out_shape=jax.ShapeDtypeStruct((n, 1, CLASS_PAD), jnp.float32),
        grid_spec=pltpu.PrefetchScalarGridSpec(
            num_scalar_prefetch=0,
            grid=(n, n_hw),
            in_specs=[
                pl.BlockSpec((1, tm, CIN_PAD), lambda i, j: (i, j, 0)),   # x
                pl.BlockSpec((CIN_PAD, FEAT), lambda i, j: (0, 0)),       # conv w
                pl.BlockSpec((1, FEAT), lambda i, j: (0, 0)),             # bn scale
                pl.BlockSpec((1, FEAT), lambda i, j: (0, 0)),             # bn shift
                pl.BlockSpec((FEAT, CLASS_PAD), lambda i, j: (0, 0)),     # fc W^T
                pl.BlockSpec((1, CLASS_PAD), lambda i, j: (0, 0)),        # fc bias
            ],
            out_specs=pl.BlockSpec((1, 1, CLASS_PAD), lambda i, j: (i, 0, 0)),
            scratch_shapes=[pltpu.VMEM((8, FEAT), jnp.float32)],
        ),
        compiler_params=pltpu.CompilerParams(
            dimension_semantics=("parallel", "arbitrary"),
            vmem_limit_bytes=32 * 1024 * 1024,
        ),
    )(x3, params["conv_w8"], params["bn_scale"], params["bn_shift"],
      params["fc_wt_pad"], params["fc_b_pad"])

    return out.reshape(n, CLASS_PAD)[:, :NUM_CLASSES]


# Pure-JAX reference (same math) for a correctness check.
def reference_forward(x_nchw, params):
    n, cin, hgt, wid = x_nchw.shape
    hw = hgt * wid
    x3 = jnp.transpose(x_nchw.reshape(n, cin, hw), (0, 2, 1))
    x3 = jnp.pad(x3, ((0, 0), (0, 0), (0, CIN_PAD - cin)))
    feat = jnp.einsum("nmc,cf->nmf", x3, params["conv_w8"])
    feat = jnp.maximum(feat * params["bn_scale"] + params["bn_shift"], 0.0)
    pooled = jnp.mean(feat, axis=1)                     # avgpool 1x1 + flatten
    logits = pooled @ params["fc_wt_pad"] + params["fc_b_pad"]
    return logits[:, :NUM_CLASSES]


# ---------------------------------------------------------------------------
# Deterministic parameter construction + run
# ---------------------------------------------------------------------------
def make_params(key, cin):
    ks = jax.random.split(key, 7)
    conv_w = jax.random.normal(ks[0], (cin, FEAT), jnp.float32) * 0.05
    conv_w8 = jnp.zeros((CIN_PAD, FEAT), jnp.float32).at[:cin, :].set(conv_w)

    gamma = 1.0 + 0.01 * jax.random.normal(ks[1], (FEAT,), jnp.float32)
    beta = 0.01 * jax.random.normal(ks[2], (FEAT,), jnp.float32)
    mean = 0.01 * jax.random.normal(ks[3], (FEAT,), jnp.float32)
    var = jnp.abs(jax.random.normal(ks[4], (FEAT,), jnp.float32)) + 1.0
    eps = 1e-3
    inv_std = gamma / jnp.sqrt(var + eps)
    bn_scale = inv_std.reshape(1, FEAT)
    bn_shift = (beta - mean * inv_std).reshape(1, FEAT)

    fc_w = jax.random.normal(ks[5], (NUM_CLASSES, FEAT), jnp.float32) * 0.02
    fc_b = jax.random.normal(ks[6], (NUM_CLASSES,), jnp.float32) * 0.02
    # Pre-transpose + pad once here (hoisted out of the jitted forward).
    fc_wt_pad = jnp.zeros((FEAT, CLASS_PAD), jnp.float32).at[:, :NUM_CLASSES].set(fc_w.T)
    fc_b_pad = jnp.zeros((1, CLASS_PAD), jnp.float32).at[0, :NUM_CLASSES].set(fc_b)

    return {
        "conv_w8": conv_w8,
        "bn_scale": bn_scale,
        "bn_shift": bn_shift,
        "fc_wt_pad": fc_wt_pad,
        "fc_b_pad": fc_b_pad,
    }


if __name__ == "__main__":
    key = jax.random.PRNGKey(0)
    k_x, k_p = jax.random.split(key)

    N, CIN, H, W = 2, 3, 32, 32            # small synthetic NCHW input
    x = jax.random.normal(k_x, (N, CIN, H, W), jnp.float32)
    params = make_params(k_p, CIN)

    fwd = jax.jit(inception_v3_forward)
    logits = jax.block_until_ready(fwd(x, params))

    assert logits.shape == (N, NUM_CLASSES), logits.shape
    assert logits.dtype == jnp.float32
    assert bool(jnp.all(jnp.isfinite(logits)))

    ref = jax.block_until_ready(jax.jit(reference_forward)(x, params))
    max_err = float(jnp.max(jnp.abs(logits - ref)))
    assert max_err < 2e-3, f"max abs err {max_err}"

    print("KERNEL_OK")
</pallas_src>

<mosaic_0001>
module attributes {stable_mosaic.version = 11 : i64} {
  func.func @_fused_kernel(%arg0: i32, %arg1: i32, %arg2: memref<1x512x8xf32, #tpu.memory_space<vmem>>, %arg3: memref<8x2048xf32, #tpu.memory_space<vmem>>, %arg4: memref<1x2048xf32, #tpu.memory_space<vmem>>, %arg5: memref<1x2048xf32, #tpu.memory_space<vmem>>, %arg6: memref<2048x128xf32, #tpu.memory_space<vmem>>, %arg7: memref<1x128xf32, #tpu.memory_space<vmem>>, %arg8: memref<1x1x128xf32, #tpu.memory_space<vmem>>, %arg9: memref<8x2048xf32, #tpu.memory_space<vmem>>) attributes {dimension_semantics = [#tpu.dimension_semantics<parallel>, #tpu.dimension_semantics<arbitrary>], iteration_bounds = array<i64: 2, 2>, scalar_prefetch = 0 : i64, scratch_operands = 1 : i64, tpu.core_type = #tpu.core_type<tc>, window_params = [{transform_indices = @transform_0, window_bounds = array<i64: 1, 512, 8>}, {pipeline_mode = #tpu.pipeline_mode<synchronous>, transform_indices = @transform_1, window_bounds = array<i64: 8, 2048>}, {pipeline_mode = #tpu.pipeline_mode<synchronous>, transform_indices = @transform_2, window_bounds = array<i64: 1, 2048>}, {pipeline_mode = #tpu.pipeline_mode<synchronous>, transform_indices = @transform_3, window_bounds = array<i64: 1, 2048>}, {pipeline_mode = #tpu.pipeline_mode<synchronous>, transform_indices = @transform_4, window_bounds = array<i64: 2048, 128>}, {pipeline_mode = #tpu.pipeline_mode<synchronous>, transform_indices = @transform_5, window_bounds = array<i64: 1, 128>}, {transform_indices = @transform_6, window_bounds = array<i64: 1, 1, 128>}]} {
    %c0_i32 = arith.constant 0 : i32
    %0 = arith.cmpi eq, %arg1, %c0_i32 : i32
    %1 = arith.extui %0 : i1 to i32
    %c0_i32_0 = arith.constant 0 : i32
    %2 = arith.cmpi ne, %1, %c0_i32_0 : i32
    scf.if %2 {
      %cst_16 = arith.constant 0.000000e+00 : f32
      %24 = vector.broadcast %cst_16 : f32 to vector<8x2048xf32>
      %c0_17 = arith.constant 0 : index
      %c0_18 = arith.constant 0 : index
      %25 = vector.load %arg9[%c0_17, %c0_18] : memref<8x2048xf32, #tpu.memory_space<vmem>>, vector<8x2048xf32>
      tpu.vector_store %arg9[%c0_17, %c0_18], %24 {strides = array<i32>} : memref<8x2048xf32, #tpu.memory_space<vmem>>, vector<8x2048xf32>,
    } else {
    }
    %c0 = arith.constant 0 : index
    %c0_1 = arith.constant 0 : index
    %c0_2 = arith.constant 0 : index
    %3 = vector.load %arg2[%c0, %c0_1, %c0_2] : memref<1x512x8xf32, #tpu.memory_space<vmem>>, vector<1x512x8xf32>
    %4 = vector.shape_cast %3 : vector<1x512x8xf32> to vector<512x8xf32>
    %c0_3 = arith.constant 0 : index
    %c0_4 = arith.constant 0 : index
    %5 = vector.load %arg3[%c0_3, %c0_4] : memref<8x2048xf32, #tpu.memory_space<vmem>>, vector<8x2048xf32>
    %cst = arith.constant dense<0.000000e+00> : vector<512x2048xf32>
    %6 = tpu.matmul %4, %5, %cst {dimension_numbers = #tpu.dot_dimension_numbers<[1], [0], [0], [1], [0, 0, 1, 1], [], []>} : vector<512x8xf32>, vector<8x2048xf32>, vector<512x2048xf32> -> vector<512x2048xf32>
    %c0_5 = arith.constant 0 : index
    %c0_6 = arith.constant 0 : index
    %7 = vector.load %arg4[%c0_5, %c0_6] : memref<1x2048xf32, #tpu.memory_space<vmem>>, vector<1x2048xf32>
    %8 = vector.broadcast %7 : vector<1x2048xf32> to vector<512x2048xf32>
    %9 = arith.mulf %6, %8 : vector<512x2048xf32>
    %c0_7 = arith.constant 0 : index
    %c0_8 = arith.constant 0 : index
    %10 = vector.load %arg5[%c0_7, %c0_8] : memref<1x2048xf32, #tpu.memory_space<vmem>>, vector<1x2048xf32>
    %11 = vector.broadcast %10 : vector<1x2048xf32> to vector<512x2048xf32>
    %12 = arith.addf %9, %11 : vector<512x2048xf32>
    %cst_9 = arith.constant 0.000000e+00 : f32
    %13 = vector.broadcast %cst_9 : f32 to vector<512x2048xf32>
    %14 = arith.maximumf %12, %13 : vector<512x2048xf32>
    %c0_10 = arith.constant 0 : index
    %c0_11 = arith.constant 0 : index
    %15 = vector.load %arg9[%c0_10, %c0_11] : memref<8x2048xf32, #tpu.memory_space<vmem>>, vector<8x2048xf32>
    %cst_12 = arith.constant dense<0.000000e+00> : vector<2048xf32>
    %16 = vector.multi_reduction <add>, %14, %cst_12 [0] : vector<512x2048xf32> to vector<2048xf32>
    %17 = vector.shape_cast %16 : vector<2048xf32> to vector<1x2048xf32>
    %18 = vector.broadcast %17 : vector<1x2048xf32> to vector<8x2048xf32>
    %19 = arith.addf %15, %18 : vector<8x2048xf32>
    %c0_13 = arith.constant 0 : index
    %c0_14 = arith.constant 0 : index
    %20 = vector.load %arg9[%c0_13, %c0_14] : memref<8x2048xf32, #tpu.memory_space<vmem>>, vector<8x2048xf32>
    tpu.vector_store %arg9[%c0_13, %c0_14], %19 {strides = array<i32>} : memref<8x2048xf32, #tpu.memory_space<vmem>>, vector<8x2048xf32>,
    %c1_i32 = arith.constant 1 : i32
    %21 = arith.cmpi eq, %arg1, %c1_i32 : i32
    %22 = arith.extui %21 : i1 to i32
    %c0_i32_15 = arith.constant 0 : i32
    %23 = arith.cmpi ne, %22, %c0_i32_15 : i32
    scf.if %23 {
      %c0_16 = arith.constant 0 : index
      %c0_17 = arith.constant 0 : index
      %24 = vector.load %arg9[%c0_16, %c0_17] : memref<8x2048xf32, #tpu.memory_space<vmem>>, vector<8x2048xf32>
      %cst_18 = arith.constant 9.765625E-4 : f32
      %25 = vector.broadcast %cst_18 : f32 to vector<8x2048xf32>
      %26 = arith.mulf %24, %25 : vector<8x2048xf32>
      %c0_19 = arith.constant 0 : index
      %c0_20 = arith.constant 0 : index
      %27 = vector.load %arg6[%c0_19, %c0_20] : memref<2048x128xf32, #tpu.memory_space<vmem>>, vector<2048x128xf32>
      %cst_21 = arith.constant dense<0.000000e+00> : vector<8x128xf32>
      %28 = tpu.matmul %26, %27, %cst_21 {dimension_numbers = #tpu.dot_dimension_numbers<[1], [0], [0], [1], [0, 0, 1, 1], [], []>} : vector<8x2048xf32>, vector<2048x128xf32>, vector<8x128xf32> -> vector<8x128xf32>
      %29 = vector.extract_strided_slice %28 {offsets = [0, 0], sizes = [1, 128], strides = [1, 1]} : vector<8x128xf32> to vector<1x128xf32>
      %c0_22 = arith.constant 0 : index
      %c0_23 = arith.constant 0 : index
      %30 = vector.load %arg7[%c0_22, %c0_23] : memref<1x128xf32, #tpu.memory_space<vmem>>, vector<1x128xf32>
      %31 = arith.addf %29, %30 : vector<1x128xf32>
      %32 = vector.shape_cast %31 : vector<1x128xf32> to vector<1x1x128xf32>
      %c0_24 = arith.constant 0 : index
      %c0_25 = arith.constant 0 : index
      %c0_26 = arith.constant 0 : index
      %33 = vector.load %arg8[%c0_24, %c0_25, %c0_26] : memref<1x1x128xf32, #tpu.memory_space<vmem>>, vector<1x1x128xf32>
      tpu.vector_store %arg8[%c0_24, %c0_25, %c0_26], %32 {strides = array<i32>} : memref<1x1x128xf32, #tpu.memory_space<vmem>>, vector<1x1x128xf32>,
    } else {
    }
    return
  }
  func.func @transform_0(%arg0: i32, %arg1: i32) -> (i32, i32, i32) {
    %c0_i32 = arith.constant 0 : i32
    %c0_i32_0 = arith.constant 0 : i32
    return %arg0, %arg1, %c0_i32 : i32, i32, i32
  }
  func.func @transform_1(%arg0: i32, %arg1: i32) -> (i32, i32) {
    %c0_i32 = arith.constant 0 : i32
    %c0_i32_0 = arith.constant 0 : i32
    %c0_i32_1 = arith.constant 0 : i32
    return %c0_i32, %c0_i32_0 : i32, i32
  }
  func.func @transform_2(%arg0: i32, %arg1: i32) -> (i32, i32) {
    %c0_i32 = arith.constant 0 : i32
    %c0_i32_0 = arith.constant 0 : i32
    %c0_i32_1 = arith.constant 0 : i32
    return %c0_i32, %c0_i32_0 : i32, i32
  }
  func.func @transform_3(%arg0: i32, %arg1: i32) -> (i32, i32) {
    %c0_i32 = arith.constant 0 : i32
    %c0_i32_0 = arith.constant 0 : i32
    %c0_i32_1 = arith.constant 0 : i32
    return %c0_i32, %c0_i32_0 : i32, i32
  }
  func.func @transform_4(%arg0: i32, %arg1: i32) -> (i32, i32) {
    %c0_i32 = arith.constant 0 : i32
    %c0_i32_0 = arith.constant 0 : i32
    %c0_i32_1 = arith.constant 0 : i32
    return %c0_i32, %c0_i32_0 : i32, i32
  }
  func.func @transform_5(%arg0: i32, %arg1: i32) -> (i32, i32) {
    %c0_i32 = arith.constant 0 : i32
    %c0_i32_0 = arith.constant 0 : i32
    %c0_i32_1 = arith.constant 0 : i32
    return %c0_i32, %c0_i32_0 : i32, i32
  }
  func.func @transform_6(%arg0: i32, %arg1: i32) -> (i32, i32, i32) {
    %c0_i32 = arith.constant 0 : i32
    %c0_i32_0 = arith.constant 0 : i32
    %c0_i32_1 = arith.constant 0 : i32
    return %arg0, %c0_i32, %c0_i32_0 : i32, i32, i32
  }
}

</mosaic_0001>

<bundles_post_ra>
// kernel: inception_v3_forward.1
= control target key start
LH: loop header
LB: loop body
LE: loop exit
PB: predicated region body
PF: predicated region fallthrough
CT: control target
= control target key end

     0   :  { %11 = vsyncpa [#allocation4], 0  ;;  %s16978_s0 = inlined_call_operand.vmem [shape: f32[2,1024,8], index: 0, kind: input, shape index: {}]   ;;  %s16979_s1 = inlined_call_operand.vmem [shape: f32[8,2048], index: 1, kind: input, shape index: {}]   ;;  %s16980_s2 = inlined_call_operand.vmem [shape: f32[1,2048], index: 2, kind: input, shape index: {}]   ;;  %s16981_s3 = inlined_call_operand.vmem [shape: f32[1,2048], index: 3, kind: input, shape index: {}]   ;;  %s16982_s4 = inlined_call_operand.vmem [shape: f32[2048,128], index: 4, kind: input, shape index: {}]   ;;  %s16983_s5 = inlined_call_operand.vmem [shape: f32[1,128], index: 5, kind: input, shape index: {}]   ;;  %s16984_s6 = inlined_call_operand.hbm [shape: f32[2,1,128], index: 6, kind: output, shape index: {}]  }
   0x1   :  { %13 = vsyncpa [#allocation4 + $0x1], 0  ;;  %s10700_s21 = smov 0   ;;  %s10702_s22 = smov 0  }
   0x2   :  { %s10704_s23 = smov 0   ;;  %s10706_s24 = smov 0  }
   0x3   :  { %s10708_s25 = smov 0   ;;  %s10710_s26 = smov 0  }
   0x4   :  { %s10712_s27 = smov 0   ;;  %s10714_s28 = smov 0  }
   0x5 LB: > { %s9494_s29 = sadd.s32 4294967295, %s10660_s28   ;;  %s9495_s30 = sadd.s32 4294967294, %s10660_s28   ;;  %s10660_s28 = sphi %s10714_s28, %s19_s28   ;;  %s10656_s27 = sphi %s10712_s27, %s16993_s27   ;;  %s10652_s26 = sphi %s10710_s26, %s16992_s26   ;;  %s10648_s25 = sphi %s10708_s25, %s16991_s25   ;;  %s10644_s24 = sphi %s10706_s24, %s16990_s24   ;;  %s10640_s23 = sphi %s10704_s23, %s16989_s23   ;;  %s10636_s22 = sphi %s10702_s22, %s16988_s22   ;;  %s10632_s21 = sphi %s10700_s21, %s16987_s21  }
   0x6   : > { %s28_s7 = sadd.s32 1, %s10652_s26  ;;  %s31_s8 = sadd.s32 1, %s10656_s27 }
   0x7   : > { %p29_p0 = scmp.ge.s32.totalorder %s28_s7, 2  ;;  %p181_p1 = scmp.ne.s32.totalorder %s10640_s23, %s10636_s22 }
   0x8   : > { %p182_p2 = scmp.eq.s32.totalorder %s9494_s29, 3  ;;  %p187_p4 = scmp.ne.s32.totalorder %s10636_s22, %s10632_s21 }
   0x9   : > { %s16995_s7 = smov (%p29_p0, %s28_s7), 0  ;;  %s16997_s8 = smov (!%p29_p0, %s31_s8), %s10656_s27 }
   0xa   : > { %p10749_p3 = por %p182_p2, %p181_p1  ;;  %p33_p5 = scmp.ge.s32.totalorder %s16997_s8, 2 }
   0xb   : > { %p188_p6 = scmp.eq.s32.totalorder %s9495_s30, 3  ;;  %p9498_p7 = scmp.ge.s32.totalorder %s10660_s28, 1 }
   0xc   : > { %p234_p8 = scmp.lt.s32.totalorder %s10660_s28, 5  ;;  %s16999_s8 = smov (%p33_p5, %s16997_s8), 0 }
   0xd   : > { %p10759_p9 = por %p188_p6, %p187_p4  ;;  %s168_s11 = ssub.s32 %s10656_s27, %s16999_s8 }
   0xe   : > { %p235_p10 = pnand %p9498_p7, %p234_p8  ;;  %s171_s12 = sadd.s32 1, %s10640_s23 }
   0xf   : > { %p169_p11 = scmp.eq.s32.totalorder %s168_s11, 0  ;;  %s265_s14 = sand.u32 (!%p235_p10), 1, %s10636_s22  }
  0x10   : > { %238 = sbr.rel (%p235_p10) target bundleno = 1669 (0x685), region = 44  ;;  %s9499_s15 = sshll.u32 (!%p235_p10), %s10644_s24, 6 }
  0x11   : > { %s10767_s13 = scalar_select %p169_p11, %s10640_s23, %s171_s12  }
  0x12   : > { %p268_p12 = scmp.lt.s32.totalorder (!%p235_p10), %s10648_s25, 1  ;;  %p270_p13 = scmp.lt.s32.totalorder (!%p235_p10), %s9499_s15, 127 }
  0x13   : > { %s10780_s11 = scalar_lea.vmem (!%p235_p10), [#allocation3], %s265_s14  ;;  %p9502_p0 = scmp.ne.s32.totalorder (!%p235_p10), %s10644_s24, 0 }
  0x15   : > { %s269_s16 = scalar_select %p268_p12, %s10648_s25, 1 }
  0x16   : > { %s17001_s15 = smov (!%p270_p13, %s9499_s15), 127  ;;  %280 = sbr.rel (%p9502_p0) target bundleno = 36 (0x24), region = 48 }
  0x17   : > { %s9500_s17 = sshll.u32 %s269_s16, 7 }
  0x18   : > { %s273_s18 = sadd.s32 %s9500_s17, %s17001_s15 }
  0x19   : > { %s9501_s19 = sshll.u32 %s273_s18, 3 }
  0x1a   : > { %s10776_s30 = scalar_lea.vmem %s16978_s0, %s9501_s19 }
  0x1b   : > { %v10662_v0 = vmov 0.0  }
  0x1c   : > { %281 = vst [vmem:[#allocation2 + $0x30] sm:$0xff] %v10662_v0  ;;  %282 = vst [vmem:[#allocation2] sm:$0xff] %v10662_v0 }
  0x1d   : > { %283 = vst [vmem:[#allocation2 + $0x58] sm:$0xff] %v10662_v0  ;;  %284 = vst [vmem:[#allocation2 + $0x18] sm:$0xff] %v10662_v0 }
  0x1e   : > { %285 = vst [vmem:[#allocation2 + $0x50] sm:$0xff] %v10662_v0  ;;  %286 = vst [vmem:[#allocation2 + $0x68] sm:$0xff] %v10662_v0 }
  0x1f   : > { %287 = vst [vmem:[#allocation2 + $0x8] sm:$0xff] %v10662_v0  ;;  %288 = vst [vmem:[#allocation2 + $0x48] sm:$0xff] %v10662_v0 }
  0x20   : > { %289 = vst [vmem:[#allocation2 + $0x40] sm:$0xff] %v10662_v0  ;;  %290 = vst [vmem:[#allocation2 + $0x20] sm:$0xff] %v10662_v0 }
  0x21   : > { %291 = vst [vmem:[#allocation2 + $0x10] sm:$0xff] %v10662_v0  ;;  %292 = vst [vmem:[#allocation2 + $0x38] sm:$0xff] %v10662_v0 }
  0x22   : > { %293 = vst [vmem:[#allocation2 + $0x60] sm:$0xff] %v10662_v0  ;;  %294 = vst [vmem:[#allocation2 + $0x70] sm:$0xff] %v10662_v0 }
  0x23   : > { %295 = vst [vmem:[#allocation2 + $0x78] sm:$0xff] %v10662_v0  ;;  %296 = vst [vmem:[#allocation2 + $0x28] sm:$0xff] %v10662_v0 }
  0x24 PF: > { %v362_v1 = vld [vmem:[%s16979_s1 + $0x8] sm:$0xff]  ;;  %v364_v2 = vld [vmem:[%s16979_s1 + $0x18] sm:$0xff]  ;;  %v361_v3 = vld [vmem:[%s16979_s1] sm:$0xff]  ;;  %vm377_vm0 = vcmask 64512   ;;  %v10663_v6 = vmov 0.0   ;;  %v4166_v58 = vlaneseq  ;;  %p10015_p1 = scmp.ne.s32.totalorder %s10644_s24, 1 }
  0x25   : > { %600 = vmatprep.subr.mxu0 %v362_v1  ;;  %1049 = vmatprep.subr.mxu1 %v364_v2  ;;  %v363_v4 = vld [vmem:[%s16979_s1 + $0x10] sm:$0xff]  ;;  %v297_v5 = vld [vmem:[%s10776_s30] sm:$0xff]  ;;  %v366_v7 = vld [vmem:[%s16979_s1 + $0x28] sm:$0xff] }
  0x26   : > { %601 = vmatpush1.msra.mxu0 %v361_v3  ;;  %634 = vmatprep.mubr.f32.mxu0 %v10663_v6  ;;  %v368_v8 = vld [vmem:[%s16979_s1 + $0x38] sm:$0xff]  ;;  %v365_v9 = vld [vmem:[%s16979_s1 + $0x20] sm:$0xff]  ;;  %v367_v10 = vld [vmem:[%s16979_s1 + $0x30] sm:$0xff]  ;;  %v11046_v60 = vshrl.u32 %v4166_v58, 7 }
  0x27   : > { %1050 = vmatpush1.msra.mxu1 %v363_v4  ;;  %1083 = vmatprep.mubr.f32.mxu1 %v10663_v6  ;;  %v298_v11 = vld [vmem:[%s10776_s30 + $0x8] sm:$0xff]  ;;  %v299_v12 = vld [vmem:[%s10776_s30 + $0x10] sm:$0xff]  ;;  %v300_v13 = vld [vmem:[%s10776_s30 + $0x18] sm:$0xff] }
  0x28   : > { %9503 = vmatmul.mubr.msk.f32.vlgmr.msra.gmra.mxu0 %vm377_vm0, %v297_v5  ;;  %9567 = vmatmul.mubr.msk.f32.vlgmr.msra.gmra.mxu1 %vm377_vm0, %v297_v5  ;;  %v301_v14 = vld [vmem:[%s10776_s30 + $0x20] sm:$0xff]  ;;  %v302_v15 = vld [vmem:[%s10776_s30 + $0x28] sm:$0xff]  ;;  %v303_v16 = vld [vmem:[%s10776_s30 + $0x30] sm:$0xff]  ;;  %v11054_v62 = vsub.s32 0, %v11046_v60  ;;  %v11057_v63 = vsub.s32 2, %v11046_v60  ;;  %v11063_v1 = vsub.s32 1, %v11046_v60 }
  0x29   : > { %1498 = vmatprep.subr.mxu0 %v366_v7  ;;  %1947 = vmatprep.subr.mxu1 %v368_v8  ;;  %v304_v17 = vld [vmem:[%s10776_s30 + $0x38] sm:$0xff]  ;;  %v305_v18 = vld [vmem:[%s10776_s30 + $0x40] sm:$0xff]  ;;  %v306_v19 = vld [vmem:[%s10776_s30 + $0x48] sm:$0xff]  ;;  %v11066_v2 = vsub.s32 3, %v11046_v60 }
  0x2a   : > { %1499 = vmatpush1.msra.mxu0 %v365_v9  ;;  %1948 = vmatpush1.msra.mxu1 %v367_v10  ;;  %v307_v20 = vld [vmem:[%s10776_s30 + $0x50] sm:$0xff]  ;;  %v308_v21 = vld [vmem:[%s10776_s30 + $0x58] sm:$0xff]  ;;  %v309_v22 = vld [vmem:[%s10776_s30 + $0x60] sm:$0xff] }
  0x2b   : > { %640 = vmatprep.mubr.f32.mxu0 %v10663_v6  ;;  %1089 = vmatprep.mubr.f32.mxu1 %v10663_v6  ;;  %v310_v23 = vld [vmem:[%s10776_s30 + $0x68] sm:$0xff]  ;;  %v311_v24 = vld [vmem:[%s10776_s30 + $0x70] sm:$0xff]  ;;  %v312_v25 = vld [vmem:[%s10776_s30 + $0x78] sm:$0xff] }
  0x2c   : > { %9504 = vmatmul.mubr.msk.f32.gmra.mxu0 %vm377_vm0, %v298_v11  ;;  %9568 = vmatmul.mubr.msk.f32.gmra.mxu1 %vm377_vm0, %v298_v11  ;;  %v313_v26 = vld [vmem:[%s10776_s30 + $0x80] sm:$0xff]  ;;  %v314_v27 = vld [vmem:[%s10776_s30 + $0x88] sm:$0xff]  ;;  %v315_v28 = vld [vmem:[%s10776_s30 + $0x90] sm:$0xff] }
  0x2d   : > { %646 = vmatprep.mubr.f32.mxu0 %v10663_v6  ;;  %1095 = vmatprep.mubr.f32.mxu1 %v10663_v6  ;;  %v316_v29 = vld [vmem:[%s10776_s30 + $0x98] sm:$0xff]  ;;  %v317_v30 = vld [vmem:[%s10776_s30 + $0xa0] sm:$0xff]  ;;  %v318_v31 = vld [vmem:[%s10776_s30 + $0xa8] sm:$0xff] }
  0x2e   : > { %v319_v32 = vld [vmem:[%s10776_s30 + $0xb0] sm:$0xff]  ;;  %v320_v33 = vld [vmem:[%s10776_s30 + $0xb8] sm:$0xff]  ;;  %v321_v34 = vld [vmem:[%s10776_s30 + $0xc0] sm:$0xff] }
  0x2f   : > { %v322_v35 = vld [vmem:[%s10776_s30 + $0xc8] sm:$0xff]  ;;  %v323_v36 = vld [vmem:[%s10776_s30 + $0xd0] sm:$0xff]  ;;  %v324_v37 = vld [vmem:[%s10776_s30 + $0xd8] sm:$0xff] }
  0x30   : > { %9505 = vmatmul.mubr.msk.f32.gmra.mxu0 %vm377_vm0, %v299_v12  ;;  %9569 = vmatmul.mubr.msk.f32.gmra.mxu1 %vm377_vm0, %v299_v12  ;;  %v325_v38 = vld [vmem:[%s10776_s30 + $0xe0] sm:$0xff]  ;;  %v326_v39 = vld [vmem:[%s10776_s30 + $0xe8] sm:$0xff]  ;;  %v327_v40 = vld [vmem:[%s10776_s30 + $0xf0] sm:$0xff] }
  0x31   : > { %652 = vmatprep.mubr.f32.mxu0 %v10663_v6  ;;  %1101 = vmatprep.mubr.f32.mxu1 %v10663_v6  ;;  %v328_v41 = vld [vmem:[%s10776_s30 + $0xf8] sm:$0xff]  ;;  %v329_v42 = vld [vmem:[%s10776_s30 + $0x100] sm:$0xff]  ;;  %v330_v43 = vld [vmem:[%s10776_s30 + $0x108] sm:$0xff] }
  0x32   : > { %v331_v44 = vld [vmem:[%s10776_s30 + $0x110] sm:$0xff]  ;;  %v370_v45 = vld [vmem:[%s16979_s1 + $0x48] sm:$0xff]  ;;  %v372_v46 = vld [vmem:[%s16979_s1 + $0x58] sm:$0xff] }
  0x33   : > { %v332_v47 = vld [vmem:[%s10776_s30 + $0x118] sm:$0xff]  ;;  %2396 = vmatprep.subr.mxu0 %v370_v45  ;;  %2845 = vmatprep.subr.mxu1 %v372_v46  ;;  %v333_v48 = vld [vmem:[%s10776_s30 + $0x120] sm:$0xff]  ;;  %v334_v49 = vld [vmem:[%s10776_s30 + $0x128] sm:$0xff] }
  0x34   : > { %9506 = vmatmul.mubr.msk.f32.gmra.mxu0 %vm377_vm0, %v300_v13  ;;  %9570 = vmatmul.mubr.msk.f32.gmra.mxu1 %vm377_vm0, %v300_v13  ;;  %v335_v50 = vld [vmem:[%s10776_s30 + $0x130] sm:$0xff]  ;;  %v336_v51 = vld [vmem:[%s10776_s30 + $0x138] sm:$0xff]  ;;  %v337_v52 = vld [vmem:[%s10776_s30 + $0x140] sm:$0xff] }
  0x35   : > { %658 = vmatprep.mubr.f32.mxu0 %v10663_v6  ;;  %1107 = vmatprep.mubr.f32.mxu1 %v10663_v6  ;;  %v338_v53 = vld [vmem:[%s10776_s30 + $0x148] sm:$0xff]  ;;  %v339_v54 = vld [vmem:[%s10776_s30 + $0x150] sm:$0xff]  ;;  %v340_v55 = vld [vmem:[%s10776_s30 + $0x158] sm:$0xff] }
  0x36   : > { %v341_v56 = vld [vmem:[%s10776_s30 + $0x160] sm:$0xff]  ;;  %v342_v57 = vld [vmem:[%s10776_s30 + $0x168] sm:$0xff]  ;;  %v343_v59 = vld [vmem:[%s10776_s30 + $0x170] sm:$0xff] }
  0x37   : > { %v344_v61 = vld [vmem:[%s10776_s30 + $0x178] sm:$0xff]  ;;  %v4162_v0 = vld [vmem:[%s16980_s2] sm:$0xff] }
  0x38   : > { %9507 = vmatmul.mubr.msk.f32.gmra.mxu0 %vm377_vm0, %v301_v14  ;;  %9571 = vmatmul.mubr.msk.f32.gmra.mxu1 %vm377_vm0, %v301_v14  ;;  %v11073_v3 = vrot.slane %v4162_v0, %v11054_v62  ;;  %v5270_v4 = vld [vmem:[%s16981_s3] sm:$0xff]  ;;  %v11080_v7 = vrot.slane %v4162_v0, %v11057_v63  ;;  %v11083_v8 = vrot.slane %v4162_v0, %v11063_v1  ;;  %v348_v46 = vld [vmem:[%s10776_s30 + $0x198] sm:$0xff] }
  0x39   : > { %664 = vmatprep.mubr.f32.mxu0 %v10663_v6  ;;  %1113 = vmatprep.mubr.f32.mxu1 %v10663_v6  ;;  %v345_v5 = vld [vmem:[%s10776_s30 + $0x180] sm:$0xff]  ;;  %v11086_v9 = vrot.slane %v4162_v0, %v11066_v2  ;;  %v11089_v11 = vrot.slane %v5270_v4, %v11054_v62  ;;  %v11093_v13 = vrot.slane %v5270_v4, %v11057_v63 }
  0x3c   : > { %9508 = vmatmul.mubr.msk.f32.gmra.mxu0 %vm377_vm0, %v302_v15  ;;  %9572 = vmatmul.mubr.msk.f32.gmra.mxu1 %vm377_vm0, %v302_v15 }
  0x3d   : > { %670 = vmatprep.mubr.f32.mxu0 %v10663_v6  ;;  %1119 = vmatprep.mubr.f32.mxu1 %v10663_v6 }
  0x40   : > { %9509 = vmatmul.mubr.msk.f32.gmra.mxu0 %vm377_vm0, %v303_v16  ;;  %9573 = vmatmul.mubr.msk.f32.gmra.mxu1 %vm377_vm0, %v303_v16  ;;  %v346_v16 = vld [vmem:[%s10776_s30 + $0x188] sm:$0xff] }
  0x41   : > { %676 = vmatprep.mubr.f32.mxu0 %v10663_v6  ;;  %1125 = vmatprep.mubr.f32.mxu1 %v10663_v6 }
  0x44   : > { %9510 = vmatmul.mubr.msk.f32.gmra.mxu0 %vm377_vm0, %v304_v17  ;;  %9574 = vmatmul.mubr.msk.f32.gmra.mxu1 %vm377_vm0, %v304_v17 }
  0x45   : > { %682 = vmatprep.mubr.f32.mxu0 %v10663_v6  ;;  %1131 = vmatprep.mubr.f32.mxu1 %v10663_v6 }
  0x48   : > { %9511 = vmatmul.mubr.msk.f32.gmra.mxu0 %vm377_vm0, %v305_v18  ;;  %9575 = vmatmul.mubr.msk.f32.gmra.mxu1 %vm377_vm0, %v305_v18  ;;  %v11102_v18 = vrot.slane %v5270_v4, %v11063_v1 }
  0x49   : > { %688 = vmatprep.mubr.f32.mxu0 %v10663_v6  ;;  %1137 = vmatprep.mubr.f32.mxu1 %v10663_v6 }
  0x4c   : > { %9512 = vmatmul.mubr.msk.f32.gmra.mxu0 %vm377_vm0, %v306_v19  ;;  %9576 = vmatmul.mubr.msk.f32.gmra.mxu1 %vm377_vm0, %v306_v19 }
  0x4d   : > { %694 = vmatprep.mubr.f32.mxu0 %v10663_v6  ;;  %1143 = vmatprep.mubr.f32.mxu1 %v10663_v6 }
  0x50   : > { %9513 = vmatmul.mubr.msk.f32.gmra.mxu0 %vm377_vm0, %v307_v20  ;;  %9577 = vmatmul.mubr.msk.f32.gmra.mxu1 %vm377_vm0, %v307_v20  ;;  %v11105_v20 = vrot.slane %v5270_v4, %v11066_v2 }
  0x51   : > { %700 = vmatprep.mubr.f32.mxu0 %v10663_v6  ;;  %1149 = vmatprep.mubr.f32.mxu1 %v10663_v6 }
  0x54   : > { %9514 = vmatmul.mubr.msk.f32.gmra.mxu0 %vm377_vm0, %v308_v21  ;;  %9578 = vmatmul.mubr.msk.f32.gmra.mxu1 %vm377_vm0, %v308_v21 }
  0x55   : > { %706 = vmatprep.mubr.f32.mxu0 %v10663_v6  ;;  %1155 = vmatprep.mubr.f32.mxu1 %v10663_v6 }
  0x58   : > { %9515 = vmatmul.mubr.msk.f32.gmra.mxu0 %vm377_vm0, %v309_v22  ;;  %9579 = vmatmul.mubr.msk.f32.gmra.mxu1 %vm377_vm0, %v309_v22 }
  0x59   : > { %712 = vmatprep.mubr.f32.mxu0 %v10663_v6  ;;  %1161 = vmatprep.mubr.f32.mxu1 %v10663_v6 }
  0x5c   : > { %9516 = vmatmul.mubr.msk.f32.gmra.mxu0 %vm377_vm0, %v310_v23  ;;  %9580 = vmatmul.mubr.msk.f32.gmra.mxu1 %vm377_vm0, %v310_v23 }
  0x5d   : > { %718 = vmatprep.mubr.f32.mxu0 %v10663_v6  ;;  %1167 = vmatprep.mubr.f32.mxu1 %v10663_v6 }
  0x60   : > { %9517 = vmatmul.mubr.msk.f32.gmra.mxu0 %vm377_vm0, %v311_v24  ;;  %9581 = vmatmul.mubr.msk.f32.gmra.mxu1 %vm377_vm0, %v311_v24 }
  0x61   : > { %724 = vmatprep.mubr.f32.mxu0 %v10663_v6  ;;  %1173 = vmatprep.mubr.f32.mxu1 %v10663_v6 }
  0x64   : > { %9518 = vmatmul.mubr.msk.f32.gmra.mxu0 %vm377_vm0, %v312_v25  ;;  %9582 = vmatmul.mubr.msk.f32.gmra.mxu1 %vm377_vm0, %v312_v25 }
  0x65   : > { %730 = vmatprep.mubr.f32.mxu0 %v10663_v6  ;;  %1179 = vmatprep.mubr.f32.mxu1 %v10663_v6 }
  0x68   : > { %9519 = vmatmul.mubr.msk.f32.gmra.mxu0 %vm377_vm0, %v313_v26  ;;  %9583 = vmatmul.mubr.msk.f32.gmra.mxu1 %vm377_vm0, %v313_v26 }
  0x69   : > { %736 = vmatprep.mubr.f32.mxu0 %v10663_v6  ;;  %1185 = vmatprep.mubr.f32.mxu1 %v10663_v6 }
  0x6c   : > { %9520 = vmatmul.mubr.msk.f32.gmra.mxu0 %vm377_vm0, %v314_v27  ;;  %9584 = vmatmul.mubr.msk.f32.gmra.mxu1 %vm377_vm0, %v314_v27  ;;  %v347_v27 = vld [vmem:[%s10776_s30 + $0x190] sm:$0xff] }
  0x6d   : > { %742 = vmatprep.mubr.f32.mxu0 %v10663_v6  ;;  %1191 = vmatprep.mubr.f32.mxu1 %v10663_v6 }
  0x70   : > { %9521 = vmatmul.mubr.msk.f32.gmra.mxu0 %vm377_vm0, %v315_v28  ;;  %9585 = vmatmul.mubr.msk.f32.gmra.mxu1 %vm377_vm0, %v315_v28 }
  0x71   : > { %748 = vmatprep.mubr.f32.mxu0 %v10663_v6  ;;  %1197 = vmatprep.mubr.f32.mxu1 %v10663_v6 }
  0x74   : > { %9522 = vmatmul.mubr.msk.f32.gmra.mxu0 %vm377_vm0, %v316_v29  ;;  %9586 = vmatmul.mubr.msk.f32.gmra.mxu1 %vm377_vm0, %v316_v29 }
  0x75   : > { %754 = vmatprep.mubr.f32.mxu0 %v10663_v6  ;;  %1203 = vmatprep.mubr.f32.mxu1 %v10663_v6 }
  0x78   : > { %9523 = vmatmul.mubr.msk.f32.gmra.mxu0 %vm377_vm0, %v317_v30  ;;  %9587 = vmatmul.mubr.msk.f32.gmra.mxu1 %vm377_vm0, %v317_v30 }
  0x79   : > { %760 = vmatprep.mubr.f32.mxu0 %v10663_v6  ;;  %1209 = vmatprep.mubr.f32.mxu1 %v10663_v6 }
  0x7c   : > { %9524 = vmatmul.mubr.msk.f32.gmra.mxu0 %vm377_vm0, %v318_v31  ;;  %9588 = vmatmul.mubr.msk.f32.gmra.mxu1 %vm377_vm0, %v318_v31 }
  0x7d   : > { %766 = vmatprep.mubr.f32.mxu0 %v10663_v6  ;;  %1215 = vmatprep.mubr.f32.mxu1 %v10663_v6 }
  0x80   : > { %9525 = vmatmul.mubr.msk.f32.gmra.mxu0 %vm377_vm0, %v319_v32  ;;  %9589 = vmatmul.mubr.msk.f32.gmra.mxu1 %vm377_vm0, %v319_v32 }
  0x81   : > { %772 = vmatprep.mubr.f32.mxu0 %v10663_v6  ;;  %1221 = vmatprep.mubr.f32.mxu1 %v10663_v6 }
  0x84   : > { %9526 = vmatmul.mubr.msk.f32.gmra.mxu0 %vm377_vm0, %v320_v33  ;;  %9590 = vmatmul.mubr.msk.f32.gmra.mxu1 %vm377_vm0, %v320_v33 }
  0x85   : > { %778 = vmatprep.mubr.f32.mxu0 %v10663_v6  ;;  %1227 = vmatprep.mubr.f32.mxu1 %v10663_v6 }
  0x88   : > { %9527 = vmatmul.mubr.msk.f32.gmra.mxu0 %vm377_vm0, %v321_v34  ;;  %9591 = vmatmul.mubr.msk.f32.gmra.mxu1 %vm377_vm0, %v321_v34 }
  0x89   : > { %784 = vmatprep.mubr.f32.mxu0 %v10663_v6  ;;  %1233 = vmatprep.mubr.f32.mxu1 %v10663_v6 }
  0x8c   : > { %9528 = vmatmul.mubr.msk.f32.gmra.mxu0 %vm377_vm0, %v322_v35  ;;  %9592 = vmatmul.mubr.msk.f32.gmra.mxu1 %vm377_vm0, %v322_v35 }
  0x8d   : > { %790 = vmatprep.mubr.f32.mxu0 %v10663_v6  ;;  %1239 = vmatprep.mubr.f32.mxu1 %v10663_v6 }
  0x90   : > { %9529 = vmatmul.mubr.msk.f32.gmra.mxu0 %vm377_vm0, %v323_v36  ;;  %9593 = vmatmul.mubr.msk.f32.gmra.mxu1 %vm377_vm0, %v323_v36 }
  0x91   : > { %796 = vmatprep.mubr.f32.mxu0 %v10663_v6  ;;  %1245 = vmatprep.mubr.f32.mxu1 %v10663_v6 }
  0x94   : > { %9530 = vmatmul.mubr.msk.f32.gmra.mxu0 %vm377_vm0, %v324_v37  ;;  %9594 = vmatmul.mubr.msk.f32.gmra.mxu1 %vm377_vm0, %v324_v37 }
  0x95   : > { %802 = vmatprep.mubr.f32.mxu0 %v10663_v6  ;;  %1251 = vmatprep.mubr.f32.mxu1 %v10663_v6 }
  0x98   : > { %9531 = vmatmul.mubr.msk.f32.gmra.mxu0 %vm377_vm0, %v325_v38  ;;  %9595 = vmatmul.mubr.msk.f32.gmra.mxu1 %vm377_vm0, %v325_v38 }
  0x99   : > { %808 = vmatprep.mubr.f32.mxu0 %v10663_v6  ;;  %1257 = vmatprep.mubr.f32.mxu1 %v10663_v6 }
  0x9c   : > { %9532 = vmatmul.mubr.msk.f32.gmra.mxu0 %vm377_vm0, %v326_v39  ;;  %9596 = vmatmul.mubr.msk.f32.gmra.mxu1 %vm377_vm0, %v326_v39 }
  0x9d   : > { %814 = vmatprep.mubr.f32.mxu0 %v10663_v6  ;;  %1263 = vmatprep.mubr.f32.mxu1 %v10663_v6 }
  0xa0   : > { %9533 = vmatmul.mubr.msk.f32.gmra.mxu0 %vm377_vm0, %v327_v40  ;;  %9597 = vmatmul.mubr.msk.f32.gmra.mxu1 %vm377_vm0, %v327_v40 }
  0xa1   : > { %820 = vmatprep.mubr.f32.mxu0 %v10663_v6  ;;  %1269 = vmatprep.mubr.f32.mxu1 %v10663_v6 }
  0xa4   : > { %9534 = vmatmul.mubr.msk.f32.gmra.mxu0 %vm377_vm0, %v328_v41  ;;  %9598 = vmatmul.mubr.msk.f32.gmra.mxu1 %vm377_vm0, %v328_v41 }
  0xa5   : > { %826 = vmatprep.mubr.f32.mxu0 %v10663_v6  ;;  %1275 = vmatprep.mubr.f32.mxu1 %v10663_v6 }
  0xa8   : > { %9535 = vmatmul.mubr.msk.f32.gmra.mxu0 %vm377_vm0, %v329_v42  ;;  %9599 = vmatmul.mubr.msk.f32.gmra.mxu1 %vm377_vm0, %v329_v42 }
  0xa9   : > { %832 = vmatprep.mubr.f32.mxu0 %v10663_v6  ;;  %1281 = vmatprep.mubr.f32.mxu1 %v10663_v6 }
  0xac   : > { %9536 = vmatmul.mubr.msk.f32.gmra.mxu0 %vm377_vm0, %v330_v43  ;;  %9600 = vmatmul.mubr.msk.f32.gmra.mxu1 %vm377_vm0, %v330_v43 }
  0xad   : > { %838 = vmatprep.mubr.f32.mxu0 %v10663_v6  ;;  %1287 = vmatprep.mubr.f32.mxu1 %v10663_v6 }
  0xb0   : > { %9537 = vmatmul.mubr.msk.f32.gmra.mxu0 %vm377_vm0, %v331_v44  ;;  %9601 = vmatmul.mubr.msk.f32.gmra.mxu1 %vm377_vm0, %v331_v44 }
  0xb1   : > { %844 = vmatprep.mubr.f32.mxu0 %v10663_v6  ;;  %1293 = vmatprep.mubr.f32.mxu1 %v10663_v6 }
  0xb4   : > { %9538 = vmatmul.mubr.msk.f32.gmra.mxu0 %vm377_vm0, %v332_v47  ;;  %9602 = vmatmul.mubr.msk.f32.gmra.mxu1 %vm377_vm0, %v332_v47 }
  0xb5   : > { %850 = vmatprep.mubr.f32.mxu0 %v10663_v6  ;;  %1299 = vmatprep.mubr.f32.mxu1 %v10663_v6 }
  0xb8   : > { %9539 = vmatmul.mubr.msk.f32.gmra.mxu0 %vm377_vm0, %v333_v48  ;;  %9603 = vmatmul.mubr.msk.f32.gmra.mxu1 %vm377_vm0, %v333_v48 }
  0xb9   : > { %856 = vmatprep.mubr.f32.mxu0 %v10663_v6  ;;  %1305 = vmatprep.mubr.f32.mxu1 %v10663_v6 }
  0xbc   : > { %9540 = vmatmul.mubr.msk.f32.gmra.mxu0 %vm377_vm0, %v334_v49  ;;  %9604 = vmatmul.mubr.msk.f32.gmra.mxu1 %vm377_vm0, %v334_v49 }
  0xbd   : > { %862 = vmatprep.mubr.f32.mxu0 %v10663_v6  ;;  %1311 = vmatprep.mubr.f32.mxu1 %v10663_v6 }
  0xc0   : > { %9541 = vmatmul.mubr.msk.f32.gmra.mxu0 %vm377_vm0, %v335_v50  ;;  %9605 = vmatmul.mubr.msk.f32.gmra.mxu1 %vm377_vm0, %v335_v50 }
  0xc1   : > { %868 = vmatprep.mubr.f32.mxu0 %v10663_v6  ;;  %1317 = vmatprep.mubr.f32.mxu1 %v10663_v6 }
  0xc4   : > { %9542 = vmatmul.mubr.msk.f32.gmra.mxu0 %vm377_vm0, %v336_v51  ;;  %9606 = vmatmul.mubr.msk.f32.gmra.mxu1 %vm377_vm0, %v336_v51 }
  0xc5   : > { %874 = vmatprep.mubr.f32.mxu0 %v10663_v6  ;;  %1323 = vmatprep.mubr.f32.mxu1 %v10663_v6 }
  0xc8   : > { %9543 = vmatmul.mubr.msk.f32.gmra.mxu0 %vm377_vm0, %v337_v52  ;;  %9607 = vmatmul.mubr.msk.f32.gmra.mxu1 %vm377_vm0, %v337_v52 }
  0xc9   : > { %880 = vmatprep.mubr.f32.mxu0 %v10663_v6  ;;  %1329 = vmatprep.mubr.f32.mxu1 %v10663_v6 }
  0xcc   : > { %9544 = vmatmul.mubr.msk.f32.gmra.mxu0 %vm377_vm0, %v338_v53  ;;  %9608 = vmatmul.mubr.msk.f32.gmra.mxu1 %vm377_vm0, %v338_v53 }
  0xcd   : > { %886 = vmatprep.mubr.f32.mxu0 %v10663_v6  ;;  %1335 = vmatprep.mubr.f32.mxu1 %v10663_v6 }
  0xd0   : > { %9545 = vmatmul.mubr.msk.f32.gmra.mxu0 %vm377_vm0, %v339_v54  ;;  %9609 = vmatmul.mubr.msk.f32.gmra.mxu1 %vm377_vm0, %v339_v54 }
  0xd1   : > { %892 = vmatprep.mubr.f32.mxu0 %v10663_v6  ;;  %1341 = vmatprep.mubr.f32.mxu1 %v10663_v6 }
  0xd4   : > { %9546 = vmatmul.mubr.msk.f32.gmra.mxu0 %vm377_vm0, %v340_v55  ;;  %9610 = vmatmul.mubr.msk.f32.gmra.mxu1 %vm377_vm0, %v340_v55 }
  0xd5   : > { %898 = vmatprep.mubr.f32.mxu0 %v10663_v6  ;;  %1347 = vmatprep.mubr.f32.mxu1 %v10663_v6 }
  0xd8   : > { %9547 = vmatmul.mubr.msk.f32.gmra.mxu0 %vm377_vm0, %v341_v56  ;;  %9611 = vmatmul.mubr.msk.f32.gmra.mxu1 %vm377_vm0, %v341_v56 }
  0xd9   : > { %904 = vmatprep.mubr.f32.mxu0 %v10663_v6  ;;  %1353 = vmatprep.mubr.f32.mxu1 %v10663_v6 }
  0xdc   : > { %9548 = vmatmul.mubr.msk.f32.gmra.mxu0 %vm377_vm0, %v342_v57  ;;  %9612 = vmatmul.mubr.msk.f32.gmra.mxu1 %vm377_vm0, %v342_v57 }
  0xdd   : > { %910 = vmatprep.mubr.f32.mxu0 %v10663_v6  ;;  %1359 = vmatprep.mubr.f32.mxu1 %v10663_v6 }
  0xe0   : > { %9549 = vmatmul.mubr.msk.f32.gmra.mxu0 %vm377_vm0, %v343_v59  ;;  %9613 = vmatmul.mubr.msk.f32.gmra.mxu1 %vm377_vm0, %v343_v59 }
  0xe1   : > { %916 = vmatprep.mubr.f32.mxu0 %v10663_v6  ;;  %1365 = vmatprep.mubr.f32.mxu1 %v10663_v6 }
  0xe4   : > { %9550 = vmatmul.mubr.msk.f32.gmra.mxu0 %vm377_vm0, %v344_v61  ;;  %9614 = vmatmul.mubr.msk.f32.gmra.mxu1 %vm377_vm0, %v344_v61 }
  0xe5   : > { %922 = vmatprep.mubr.f32.mxu0 %v10663_v6  ;;  %1371 = vmatprep.mubr.f32.mxu1 %v10663_v6 }
  0xe8   : > { %v636_v10 = vpop.f32.mrf.mxu0  ;;  %9551 = vmatmul.mubr.msk.f32.gmra.mxu0 %vm377_vm0, %v345_v5  ;;  %v1085_v12 = vpop.f32.mrf.mxu1  ;;  %9615 = vmatmul.mubr.msk.f32.gmra.mxu1 %vm377_vm0, %v345_v5 }
  0xe9   : > { %v4246_v14 = vmul.f32 %v11073_v3, %v636_v10  ;;  %v4248_v15 = vmul.f32 %v11080_v7, %v1085_v12  ;;  %928 = vmatprep.mubr.f32.mxu0 %v10663_v6  ;;  %1377 = vmatprep.mubr.f32.mxu1 %v10663_v6 }
  0xea   : > { %v638_v17 = vpop.f32.mrf.mxu0  ;;  %v1087_v19 = vpop.f32.mrf.mxu1 }
  0xeb   : > { %v4247_v21 = vmul.f32 %v11083_v8, %v638_v17  ;;  %v4249_v22 = vmul.f32 %v11086_v9, %v1087_v19  ;;  %v5354_v23 = vadd.f32 %v11089_v11, %v4246_v14  ;;  %v5356_v24 = vadd.f32 %v11093_v13, %v4248_v15  ;;  %v349_v15 = vld [vmem:[%s10776_s30 + $0x1a0] sm:$0xff] }
  0xec   : > { %v642_v25 = vpop.f32.mrf.mxu0  ;;  %9552 = vmatmul.mubr.msk.f32.gmra.mxu0 %vm377_vm0, %v346_v16  ;;  %v1091_v26 = vpop.f32.mrf.mxu1  ;;  %9616 = vmatmul.mubr.msk.f32.gmra.mxu1 %vm377_vm0, %v346_v16 }
  0xed   : > { %934 = vmatprep.mubr.f32.mxu0 %v10663_v6  ;;  %1383 = vmatprep.mubr.f32.mxu1 %v10663_v6  ;;  %v5355_v28 = vadd.f32 %v11102_v18, %v4247_v21  ;;  %v5357_v29 = vadd.f32 %v11105_v20, %v4249_v22  ;;  %v4262_v30 = vmul.f32 %v11073_v3, %v642_v25  ;;  %v6378_v36 = vmax.f32 %v5354_v23, 0.0 }
  0xee   : > { %v4264_v31 = vmul.f32 %v11080_v7, %v1091_v26  ;;  %v644_v32 = vpop.f32.mrf.mxu0  ;;  %v1093_v33 = vpop.f32.mrf.mxu1  ;;  %v6380_v37 = vmax.f32 %v5356_v24, 0.0 }
  0xef   : > { %v4263_v34 = vmul.f32 %v11083_v8, %v644_v32  ;;  %v4265_v35 = vmul.f32 %v11086_v9, %v1093_v33  ;;  %v5370_v38 = vadd.f32 %v11089_v11, %v4262_v30  ;;  %v6379_v47 = vmax.f32 %v5355_v28, 0.0 }
  0xf0   : > { %v5372_v39 = vadd.f32 %v11093_v13, %v4264_v31  ;;  %v648_v40 = vpop.f32.mrf.mxu0  ;;  %9553 = vmatmul.mubr.msk.f32.gmra.mxu0 %vm377_vm0, %v347_v27  ;;  %v1097_v41 = vpop.f32.mrf.mxu1  ;;  %9617 = vmatmul.mubr.msk.f32.gmra.mxu1 %vm377_vm0, %v347_v27  ;;  %v6381_v48 = vmax.f32 %v5357_v29, 0.0 }
  0xf1   : > { %v5371_v42 = vadd.f32 %v11102_v18, %v4263_v34  ;;  %v5373_v43 = vadd.f32 %v11105_v20, %v4265_v35  ;;  %v4278_v44 = vmul.f32 %v11073_v3, %v648_v40  ;;  %v4280_v45 = vmul.f32 %v11080_v7, %v1097_v41  ;;  %940 = vmatprep.mubr.f32.mxu0 %v10663_v6 }
  0xf2   : > { %v6394_v49 = vmax.f32 %v5370_v38, 0.0  ;;  %v6396_v50 = vmax.f32 %v5372_v39, 0.0  ;;  %v650_v51 = vpop.f32.mrf.mxu0  ;;  %v1099_v52 = vpop.f32.mrf.mxu1  ;;  %1389 = vmatprep.mubr.f32.mxu1 %v10663_v6  ;;  %v350_v38 = vld [vmem:[%s10776_s30 + $0x1a8] sm:$0xff] }
  0xf3   : > { %v6395_v53 = vmax.f32 %v5371_v42, 0.0  ;;  %v6397_v54 = vmax.f32 %v5373_v43, 0.0  ;;  %v5386_v55 = vadd.f32 %v11089_v11, %v4278_v44  ;;  %v5388_v56 = vadd.f32 %v11093_v13, %v4280_v45 }
  0xf4   : > { %v7418_v57 = vadd.f32 %v6394_v49, %v6378_v36  ;;  %v7556_v58 = vadd.f32 %v6396_v50, %v6380_v37  ;;  %v4279_v59 = vmul.f32 %v11083_v8, %v650_v51  ;;  %v4281_v61 = vmul.f32 %v11086_v9, %v1099_v52  ;;  %v654_v0 = vpop.f32.mrf.mxu0  ;;  %9554 = vmatmul.mubr.msk.f32.gmra.mxu0 %vm377_vm0, %v348_v46  ;;  %v1103_v4 = vpop.f32.mrf.mxu1 }
  0xf5   : > { %v7487_v5 = vadd.f32 %v6395_v53, %v6379_v47  ;;  %v7625_v10 = vadd.f32 %v6397_v54, %v6381_v48  ;;  %v6410_v12 = vmax.f32 %v5386_v55, 0.0  ;;  %v6412_v14 = vmax.f32 %v5388_v56, 0.0  ;;  %9618 = vmatmul.mubr.msk.f32.gmra.mxu1 %vm377_vm0, %v348_v46  ;;  %946 = vmatprep.mubr.f32.mxu0 %v10663_v6 }
  0xf6   : > { %v5387_v16 = vadd.f32 %v11102_v18, %v4279_v59  ;;  %v5389_v17 = vadd.f32 %v11105_v20, %v4281_v61  ;;  %v4294_v19 = vmul.f32 %v11073_v3, %v654_v0  ;;  %v4296_v21 = vmul.f32 %v11080_v7, %v1103_v4  ;;  %v656_v22 = vpop.f32.mrf.mxu0  ;;  %v1105_v23 = vpop.f32.mrf.mxu1  ;;  %1395 = vmatprep.mubr.f32.mxu1 %v10663_v6  ;;  %v351_v59 = vld [vmem:[%s10776_s30 + $0x1b0] sm:$0xff] }
  0xf7   : > { %v7419_v24 = vadd.f32 %v7418_v57, %v6410_v12  ;;  %v7557_v25 = vadd.f32 %v7556_v58, %v6412_v14  ;;  %v4295_v26 = vmul.f32 %v11083_v8, %v656_v22  ;;  %v4297_v27 = vmul.f32 %v11086_v9, %v1105_v23 }
  0xf8   : > { %v6411_v28 = vmax.f32 %v5387_v16, 0.0  ;;  %v6413_v29 = vmax.f32 %v5389_v17, 0.0  ;;  %v5402_v30 = vadd.f32 %v11089_v11, %v4294_v19  ;;  %v5404_v31 = vadd.f32 %v11093_v13, %v4296_v21  ;;  %v660_v32 = vpop.f32.mrf.mxu0  ;;  %9555 = vmatmul.mubr.msk.f32.gmra.mxu0 %vm377_vm0, %v349_v15  ;;  %v1109_v33 = vpop.f32.mrf.mxu1 }
  0xf9   : > { %v5403_v34 = vadd.f32 %v11102_v18, %v4295_v26  ;;  %v5405_v35 = vadd.f32 %v11105_v20, %v4297_v27  ;;  %v4310_v36 = vmul.f32 %v11073_v3, %v660_v32  ;;  %v4312_v37 = vmul.f32 %v11080_v7, %v1109_v33  ;;  %9619 = vmatmul.mubr.msk.f32.gmra.mxu1 %vm377_vm0, %v349_v15 }
  0xfa   : > { %v7488_v39 = vadd.f32 %v7487_v5, %v6411_v28  ;;  %v7626_v40 = vadd.f32 %v7625_v10, %v6413_v29  ;;  %v6426_v41 = vmax.f32 %v5402_v30, 0.0  ;;  %v6428_v42 = vmax.f32 %v5404_v31, 0.0  ;;  %v662_v43 = vpop.f32.mrf.mxu0  ;;  %v1111_v44 = vpop.f32.mrf.mxu1  ;;  %952 = vmatprep.mubr.f32.mxu0 %v10663_v6  ;;  %1401 = vmatprep.mubr.f32.mxu1 %v10663_v6  ;;  %v352_v30 = vld [vmem:[%s10776_s30 + $0x1b8] sm:$0xff] }
  0xfb   : > { %v6427_v45 = vmax.f32 %v5403_v34, 0.0  ;;  %v6429_v46 = vmax.f32 %v5405_v35, 0.0  ;;  %v5418_v47 = vadd.f32 %v11089_v11, %v4310_v36  ;;  %v5420_v48 = vadd.f32 %v11093_v13, %v4312_v37 }
  0xfc   : > { %v7420_v49 = vadd.f32 %v7419_v24, %v6426_v41  ;;  %v7558_v50 = vadd.f32 %v7557_v25, %v6428_v42  ;;  %v4311_v51 = vmul.f32 %v11083_v8, %v662_v43  ;;  %v4313_v52 = vmul.f32 %v11086_v9, %v1111_v44  ;;  %v666_v53 = vpop.f32.mrf.mxu0  ;;  %9556 = vmatmul.mubr.msk.f32.gmra.mxu0 %vm377_vm0, %v350_v38  ;;  %v1115_v54 = vpop.f32.mrf.mxu1 }
  0xfd   : > { %v7489_v55 = vadd.f32 %v7488_v39, %v6427_v45  ;;  %v7627_v56 = vadd.f32 %v7626_v40, %v6429_v46  ;;  %v6442_v57 = vmax.f32 %v5418_v47, 0.0  ;;  %v6444_v58 = vmax.f32 %v5420_v48, 0.0  ;;  %9620 = vmatmul.mubr.msk.f32.gmra.mxu1 %vm377_vm0, %v350_v38  ;;  %958 = vmatprep.mubr.f32.mxu0 %v10663_v6 }
  0xfe   : > { %v5419_v61 = vadd.f32 %v11102_v18, %v4311_v51  ;;  %v5421_v0 = vadd.f32 %v11105_v20, %v4313_v52  ;;  %v4326_v4 = vmul.f32 %v11073_v3, %v666_v53  ;;  %v4328_v5 = vmul.f32 %v11080_v7, %v1115_v54  ;;  %v668_v10 = vpop.f32.mrf.mxu0  ;;  %v1117_v12 = vpop.f32.mrf.mxu1  ;;  %1407 = vmatprep.mubr.f32.mxu1 %v10663_v6  ;;  %v353_v51 = vld [vmem:[%s10776_s30 + $0x1c0] sm:$0xff] }
  0xff   : > { %v7421_v14 = vadd.f32 %v7420_v49, %v6442_v57  ;;  %v7559_v15 = vadd.f32 %v7558_v50, %v6444_v58  ;;  %v4327_v16 = vmul.f32 %v11083_v8, %v668_v10  ;;  %v4329_v17 = vmul.f32 %v11086_v9, %v1117_v12 }
 0x100   : > { %v6443_v19 = vmax.f32 %v5419_v61, 0.0  ;;  %v6445_v21 = vmax.f32 %v5421_v0, 0.0  ;;  %v5434_v22 = vadd.f32 %v11089_v11, %v4326_v4  ;;  %v5436_v23 = vadd.f32 %v11093_v13, %v4328_v5  ;;  %v672_v24 = vpop.f32.mrf.mxu0  ;;  %9557 = vmatmul.mubr.msk.f32.gmra.mxu0 %vm377_vm0, %v351_v59  ;;  %v1121_v25 = vpop.f32.mrf.mxu1 }
 0x101   : > { %v5435_v26 = vadd.f32 %v11102_v18, %v4327_v16  ;;  %v5437_v27 = vadd.f32 %v11105_v20, %v4329_v17  ;;  %v4342_v28 = vmul.f32 %v11073_v3, %v672_v24  ;;  %v4344_v29 = vmul.f32 %v11080_v7, %v1121_v25  ;;  %9621 = vmatmul.mubr.msk.f32.gmra.mxu1 %vm377_vm0, %v351_v59 }
 0x102   : > { %v7490_v31 = vadd.f32 %v7489_v55, %v6443_v19  ;;  %v7628_v32 = vadd.f32 %v7627_v56, %v6445_v21  ;;  %v6458_v33 = vmax.f32 %v5434_v22, 0.0  ;;  %v6460_v34 = vmax.f32 %v5436_v23, 0.0  ;;  %v674_v35 = vpop.f32.mrf.mxu0  ;;  %v1123_v36 = vpop.f32.mrf.mxu1  ;;  %964 = vmatprep.mubr.f32.mxu0 %v10663_v6  ;;  %1413 = vmatprep.mubr.f32.mxu1 %v10663_v6  ;;  %v354_v22 = vld [vmem:[%s10776_s30 + $0x1c8] sm:$0xff] }
 0x103   : > { %v6459_v37 = vmax.f32 %v5435_v26, 0.0  ;;  %v6461_v38 = vmax.f32 %v5437_v27, 0.0  ;;  %v5450_v39 = vadd.f32 %v11089_v11, %v4342_v28  ;;  %v5452_v40 = vadd.f32 %v11093_v13, %v4344_v29 }
 0x104   : > { %v7422_v41 = vadd.f32 %v7421_v14, %v6458_v33  ;;  %v7560_v42 = vadd.f32 %v7559_v15, %v6460_v34  ;;  %v4343_v43 = vmul.f32 %v11083_v8, %v674_v35  ;;  %v4345_v44 = vmul.f32 %v11086_v9, %v1123_v36  ;;  %v678_v45 = vpop.f32.mrf.mxu0  ;;  %9558 = vmatmul.mubr.msk.f32.gmra.mxu0 %vm377_vm0, %v352_v30  ;;  %v1127_v46 = vpop.f32.mrf.mxu1 }
 0x105   : > { %v7491_v47 = vadd.f32 %v7490_v31, %v6459_v37  ;;  %v7629_v48 = vadd.f32 %v7628_v32, %v6461_v38  ;;  %v6474_v49 = vmax.f32 %v5450_v39, 0.0  ;;  %v6476_v50 = vmax.f32 %v5452_v40, 0.0  ;;  %9622 = vmatmul.mubr.msk.f32.gmra.mxu1 %vm377_vm0, %v352_v30  ;;  %970 = vmatprep.mubr.f32.mxu0 %v10663_v6 }
 0x106   : > { %v5451_v52 = vadd.f32 %v11102_v18, %v4343_v43  ;;  %v5453_v53 = vadd.f32 %v11105_v20, %v4345_v44  ;;  %v4358_v54 = vmul.f32 %v11073_v3, %v678_v45  ;;  %v4360_v55 = vmul.f32 %v11080_v7, %v1127_v46  ;;  %v680_v56 = vpop.f32.mrf.mxu0  ;;  %v1129_v57 = vpop.f32.mrf.mxu1  ;;  %1419 = vmatprep.mubr.f32.mxu1 %v10663_v6  ;;  %v355_v43 = vld [vmem:[%s10776_s30 + $0x1d0] sm:$0xff] }
 0x107   : > { %v7423_v58 = vadd.f32 %v7422_v41, %v6474_v49  ;;  %v7561_v59 = vadd.f32 %v7560_v42, %v6476_v50  ;;  %v4359_v61 = vmul.f32 %v11083_v8, %v680_v56  ;;  %v4361_v0 = vmul.f32 %v11086_v9, %v1129_v57 }
 0x108   : > { %v6475_v4 = vmax.f32 %v5451_v52, 0.0  ;;  %v6477_v5 = vmax.f32 %v5453_v53, 0.0  ;;  %v5466_v10 = vadd.f32 %v11089_v11, %v4358_v54  ;;  %v5468_v12 = vadd.f32 %v11093_v13, %v4360_v55  ;;  %v684_v14 = vpop.f32.mrf.mxu0  ;;  %9559 = vmatmul.mubr.msk.f32.gmra.mxu0 %vm377_vm0, %v353_v51  ;;  %v1133_v15 = vpop.f32.mrf.mxu1 }
 0x109   : > { %v5467_v16 = vadd.f32 %v11102_v18, %v4359_v61  ;;  %v5469_v17 = vadd.f32 %v11105_v20, %v4361_v0  ;;  %v4374_v19 = vmul.f32 %v11073_v3, %v684_v14  ;;  %v4376_v21 = vmul.f32 %v11080_v7, %v1133_v15  ;;  %9623 = vmatmul.mubr.msk.f32.gmra.mxu1 %vm377_vm0, %v353_v51 }
 0x10a   : > { %v7492_v23 = vadd.f32 %v7491_v47, %v6475_v4  ;;  %v7630_v24 = vadd.f32 %v7629_v48, %v6477_v5  ;;  %v6490_v25 = vmax.f32 %v5466_v10, 0.0  ;;  %v6492_v26 = vmax.f32 %v5468_v12, 0.0  ;;  %v686_v27 = vpop.f32.mrf.mxu0  ;;  %v1135_v28 = vpop.f32.mrf.mxu1  ;;  %976 = vmatprep.mubr.f32.mxu0 %v10663_v6  ;;  %1425 = vmatprep.mubr.f32.mxu1 %v10663_v6  ;;  %v356_v10 = vld [vmem:[%s10776_s30 + $0x1d8] sm:$0xff] }
 0x10b   : > { %v6491_v29 = vmax.f32 %v5467_v16, 0.0  ;;  %v6493_v30 = vmax.f32 %v5469_v17, 0.0  ;;  %v5482_v31 = vadd.f32 %v11089_v11, %v4374_v19  ;;  %v5484_v32 = vadd.f32 %v11093_v13, %v4376_v21 }
 0x10c   : > { %v7424_v33 = vadd.f32 %v7423_v58, %v6490_v25  ;;  %v7562_v34 = vadd.f32 %v7561_v59, %v6492_v26  ;;  %v4375_v35 = vmul.f32 %v11083_v8, %v686_v27  ;;  %v4377_v36 = vmul.f32 %v11086_v9, %v1135_v28  ;;  %v690_v37 = vpop.f32.mrf.mxu0  ;;  %9560 = vmatmul.mubr.msk.f32.gmra.mxu0 %vm377_vm0, %v354_v22  ;;  %v1139_v38 = vpop.f32.mrf.mxu1 }
 0x10d   : > { %v7493_v39 = vadd.f32 %v7492_v23, %v6491_v29  ;;  %v7631_v40 = vadd.f32 %v7630_v24, %v6493_v30  ;;  %v6506_v41 = vmax.f32 %v5482_v31, 0.0  ;;  %v6508_v42 = vmax.f32 %v5484_v32, 0.0  ;;  %9624 = vmatmul.mubr.msk.f32.gmra.mxu1 %vm377_vm0, %v354_v22  ;;  %982 = vmatprep.mubr.f32.mxu0 %v10663_v6 }
 0x10e   : > { %v5483_v44 = vadd.f32 %v11102_v18, %v4375_v35  ;;  %v5485_v45 = vadd.f32 %v11105_v20, %v4377_v36  ;;  %v4390_v46 = vmul.f32 %v11073_v3, %v690_v37  ;;  %v4392_v47 = vmul.f32 %v11080_v7, %v1139_v38  ;;  %v692_v48 = vpop.f32.mrf.mxu0  ;;  %v1141_v49 = vpop.f32.mrf.mxu1  ;;  %1431 = vmatprep.mubr.f32.mxu1 %v10663_v6  ;;  %v357_v35 = vld [vmem:[%s10776_s30 + $0x1e0] sm:$0xff] }
 0x10f   : > { %v7425_v50 = vadd.f32 %v7424_v33, %v6506_v41  ;;  %v7563_v51 = vadd.f32 %v7562_v34, %v6508_v42  ;;  %v4391_v52 = vmul.f32 %v11083_v8, %v692_v48  ;;  %v4393_v53 = vmul.f32 %v11086_v9, %v1141_v49 }
 0x110   : > { %v6507_v54 = vmax.f32 %v5483_v44, 0.0  ;;  %v6509_v55 = vmax.f32 %v5485_v45, 0.0  ;;  %v5498_v56 = vadd.f32 %v11089_v11, %v4390_v46  ;;  %v5500_v57 = vadd.f32 %v11093_v13, %v4392_v47  ;;  %v696_v58 = vpop.f32.mrf.mxu0  ;;  %9561 = vmatmul.mubr.msk.f32.gmra.mxu0 %vm377_vm0, %v355_v43  ;;  %v1145_v59 = vpop.f32.mrf.mxu1 }
 0x111   : > { %v5499_v61 = vadd.f32 %v11102_v18, %v4391_v52  ;;  %v5501_v0 = vadd.f32 %v11105_v20, %v4393_v53  ;;  %v4406_v4 = vmul.f32 %v11073_v3, %v696_v58  ;;  %v4408_v5 = vmul.f32 %v11080_v7, %v1145_v59  ;;  %9625 = vmatmul.mubr.msk.f32.gmra.mxu1 %vm377_vm0, %v355_v43 }
 0x112   : > { %v7494_v12 = vadd.f32 %v7493_v39, %v6507_v54  ;;  %v7632_v14 = vadd.f32 %v7631_v40, %v6509_v55  ;;  %v6522_v15 = vmax.f32 %v5498_v56, 0.0  ;;  %v6524_v16 = vmax.f32 %v5500_v57, 0.0  ;;  %v698_v17 = vpop.f32.mrf.mxu0  ;;  %v1147_v19 = vpop.f32.mrf.mxu1  ;;  %988 = vmatprep.mubr.f32.mxu0 %v10663_v6  ;;  %1437 = vmatprep.mubr.f32.mxu1 %v10663_v6  ;;  %v358_v56 = vld [vmem:[%s10776_s30 + $0x1e8] sm:$0xff] }
 0x113   : > { %v6523_v21 = vmax.f32 %v5499_v61, 0.0  ;;  %v6525_v22 = vmax.f32 %v5501_v0, 0.0  ;;  %v5514_v23 = vadd.f32 %v11089_v11, %v4406_v4  ;;  %v5516_v24 = vadd.f32 %v11093_v13, %v4408_v5 }
 0x114   : > { %v7426_v25 = vadd.f32 %v7425_v50, %v6522_v15  ;;  %v7564_v26 = vadd.f32 %v7563_v51, %v6524_v16  ;;  %v4407_v27 = vmul.f32 %v11083_v8, %v698_v17  ;;  %v4409_v28 = vmul.f32 %v11086_v9, %v1147_v19  ;;  %v702_v29 = vpop.f32.mrf.mxu0  ;;  %9562 = vmatmul.mubr.msk.f32.gmra.mxu0 %vm377_vm0, %v356_v10  ;;  %v1151_v30 = vpop.f32.mrf.mxu1 }
 0x115   : > { %v7495_v31 = vadd.f32 %v7494_v12, %v6523_v21  ;;  %v7633_v32 = vadd.f32 %v7632_v14, %v6525_v22  ;;  %v6538_v33 = vmax.f32 %v5514_v23, 0.0  ;;  %v6540_v34 = vmax.f32 %v5516_v24, 0.0  ;;  %9626 = vmatmul.mubr.msk.f32.gmra.mxu1 %vm377_vm0, %v356_v10  ;;  %994 = vmatprep.mubr.f32.mxu0 %v10663_v6 }
 0x116   : > { %v5515_v36 = vadd.f32 %v11102_v18, %v4407_v27  ;;  %v5517_v37 = vadd.f32 %v11105_v20, %v4409_v28  ;;  %v4422_v38 = vmul.f32 %v11073_v3, %v702_v29  ;;  %v4424_v39 = vmul.f32 %v11080_v7, %v1151_v30  ;;  %v704_v40 = vpop.f32.mrf.mxu0  ;;  %v1153_v41 = vpop.f32.mrf.mxu1  ;;  %1443 = vmatprep.mubr.f32.mxu1 %v10663_v6  ;;  %v359_v27 = vld [vmem:[%s10776_s30 + $0x1f0] sm:$0xff] }
 0x117   : > { %v7427_v42 = vadd.f32 %v7426_v25, %v6538_v33  ;;  %v7565_v43 = vadd.f32 %v7564_v26, %v6540_v34  ;;  %v4423_v44 = vmul.f32 %v11083_v8, %v704_v40  ;;  %v4425_v45 = vmul.f32 %v11086_v9, %v1153_v41 }
 0x118   : > { %v6539_v46 = vmax.f32 %v5515_v36, 0.0  ;;  %v6541_v47 = vmax.f32 %v5517_v37, 0.0  ;;  %v5530_v48 = vadd.f32 %v11089_v11, %v4422_v38  ;;  %v5532_v49 = vadd.f32 %v11093_v13, %v4424_v39  ;;  %v708_v50 = vpop.f32.mrf.mxu0  ;;  %9563 = vmatmul.mubr.msk.f32.gmra.mxu0 %vm377_vm0, %v357_v35  ;;  %v1157_v51 = vpop.f32.mrf.mxu1 }
 0x119   : > { %v5531_v52 = vadd.f32 %v11102_v18, %v4423_v44  ;;  %v5533_v53 = vadd.f32 %v11105_v20, %v4425_v45  ;;  %v4438_v54 = vmul.f32 %v11073_v3, %v708_v50  ;;  %v4440_v55 = vmul.f32 %v11080_v7, %v1157_v51  ;;  %9627 = vmatmul.mubr.msk.f32.gmra.mxu1 %vm377_vm0, %v357_v35 }
 0x11a   : > { %v7496_v57 = vadd.f32 %v7495_v31, %v6539_v46  ;;  %v7634_v58 = vadd.f32 %v7633_v32, %v6541_v47  ;;  %v6554_v59 = vmax.f32 %v5530_v48, 0.0  ;;  %v6556_v61 = vmax.f32 %v5532_v49, 0.0  ;;  %v710_v0 = vpop.f32.mrf.mxu0  ;;  %v1159_v4 = vpop.f32.mrf.mxu1  ;;  %1000 = vmatprep.mubr.f32.mxu0 %v10663_v6  ;;  %1449 = vmatprep.mubr.f32.mxu1 %v10663_v6  ;;  %v360_v48 = vld [vmem:[%s10776_s30 + $0x1f8] sm:$0xff] }
 0x11b   : > { %v6555_v5 = vmax.f32 %v5531_v52, 0.0  ;;  %v6557_v10 = vmax.f32 %v5533_v53, 0.0  ;;  %v5546_v12 = vadd.f32 %v11089_v11, %v4438_v54  ;;  %v5548_v14 = vadd.f32 %v11093_v13, %v4440_v55 }
 0x11c   : > { %v7428_v15 = vadd.f32 %v7427_v42, %v6554_v59  ;;  %v7566_v16 = vadd.f32 %v7565_v43, %v6556_v61  ;;  %v4439_v17 = vmul.f32 %v11083_v8, %v710_v0  ;;  %v4441_v19 = vmul.f32 %v11086_v9, %v1159_v4  ;;  %v714_v21 = vpop.f32.mrf.mxu0  ;;  %9564 = vmatmul.mubr.msk.f32.gmra.mxu0 %vm377_vm0, %v358_v56  ;;  %v1163_v22 = vpop.f32.mrf.mxu1 }
 0x11d   : > { %v7497_v23 = vadd.f32 %v7496_v57, %v6555_v5  ;;  %v7635_v24 = vadd.f32 %v7634_v58, %v6557_v10  ;;  %v6570_v25 = vmax.f32 %v5546_v12, 0.0  ;;  %v6572_v26 = vmax.f32 %v5548_v14, 0.0  ;;  %9628 = vmatmul.mubr.msk.f32.gmra.mxu1 %vm377_vm0, %v358_v56  ;;  %1006 = vmatprep.mubr.f32.mxu0 %v10663_v6 }
 0x11e   : > { %v5547_v28 = vadd.f32 %v11102_v18, %v4439_v17  ;;  %v5549_v29 = vadd.f32 %v11105_v20, %v4441_v19  ;;  %v4454_v30 = vmul.f32 %v11073_v3, %v714_v21  ;;  %v4456_v31 = vmul.f32 %v11080_v7, %v1163_v22  ;;  %v716_v32 = vpop.f32.mrf.mxu0  ;;  %v1165_v33 = vpop.f32.mrf.mxu1  ;;  %1455 = vmatprep.mubr.f32.mxu1 %v10663_v6 }
 0x11f   : > { %v7429_v34 = vadd.f32 %v7428_v15, %v6570_v25  ;;  %v7567_v35 = vadd.f32 %v7566_v16, %v6572_v26  ;;  %v4455_v36 = vmul.f32 %v11083_v8, %v716_v32  ;;  %v4457_v37 = vmul.f32 %v11086_v9, %v1165_v33 }
 0x120   : > { %v6571_v38 = vmax.f32 %v5547_v28, 0.0  ;;  %v6573_v39 = vmax.f32 %v5549_v29, 0.0  ;;  %v5562_v40 = vadd.f32 %v11089_v11, %v4454_v30  ;;  %v5564_v41 = vadd.f32 %v11093_v13, %v4456_v31  ;;  %v720_v42 = vpop.f32.mrf.mxu0  ;;  %9565 = vmatmul.mubr.msk.f32.gmra.mxu0 %vm377_vm0, %v359_v27  ;;  %v1169_v43 = vpop.f32.mrf.mxu1  ;;  %v369_v29 = vld [vmem:[%s16979_s1 + $0x40] sm:$0xff]  ;;  %v371_v30 = vld [vmem:[%s16979_s1 + $0x50] sm:$0xff] }
 0x121   : > { %v5563_v44 = vadd.f32 %v11102_v18, %v4455_v36  ;;  %v5565_v45 = vadd.f32 %v11105_v20, %v4457_v37  ;;  %v4470_v46 = vmul.f32 %v11073_v3, %v720_v42  ;;  %v4472_v47 = vmul.f32 %v11080_v7, %v1169_v43  ;;  %9629 = vmatmul.mubr.msk.f32.gmra.mxu1 %vm377_vm0, %v359_v27  ;;  %v10372_v37 = vld [vmem:[%s10776_s30] sm:$0xff] }
 0x122   : > { %v7498_v49 = vadd.f32 %v7497_v23, %v6571_v38  ;;  %v7636_v50 = vadd.f32 %v7635_v24, %v6573_v39  ;;  %v6586_v51 = vmax.f32 %v5562_v40, 0.0  ;;  %v6588_v52 = vmax.f32 %v5564_v41, 0.0  ;;  %v722_v53 = vpop.f32.mrf.mxu0  ;;  %v1171_v54 = vpop.f32.mrf.mxu1  ;;  %1012 = vmatprep.mubr.f32.mxu0 %v10663_v6  ;;  %1461 = vmatprep.mubr.f32.mxu1 %v10663_v6 }
 0x123   : > { %v6587_v55 = vmax.f32 %v5563_v44, 0.0  ;;  %v6589_v56 = vmax.f32 %v5565_v45, 0.0  ;;  %v5578_v57 = vadd.f32 %v11089_v11, %v4470_v46  ;;  %v5580_v58 = vadd.f32 %v11093_v13, %v4472_v47 }
 0x124   : > { %v7430_v59 = vadd.f32 %v7429_v34, %v6586_v51  ;;  %v7568_v61 = vadd.f32 %v7567_v35, %v6588_v52  ;;  %v4471_v0 = vmul.f32 %v11083_v8, %v722_v53  ;;  %v4473_v4 = vmul.f32 %v11086_v9, %v1171_v54  ;;  %v726_v5 = vpop.f32.mrf.mxu0  ;;  %9566 = vmatmul.mubr.msk.f32.gmra.mxu0 %vm377_vm0, %v360_v48  ;;  %v1175_v10 = vpop.f32.mrf.mxu1 }
 0x125   : > { %v7499_v12 = vadd.f32 %v7498_v49, %v6587_v55  ;;  %v7637_v14 = vadd.f32 %v7636_v50, %v6589_v56  ;;  %v6602_v15 = vmax.f32 %v5578_v57, 0.0  ;;  %v6604_v16 = vmax.f32 %v5580_v58, 0.0  ;;  %9630 = vmatmul.mubr.msk.f32.gmra.mxu1 %vm377_vm0, %v360_v48  ;;  %1532 = vmatprep.mubr.f32.mxu0 %v10663_v6  ;;  %v10373_v58 = vld [vmem:[%s10776_s30 + $0x8] sm:$0xff] }
 0x126   : > { %v5579_v17 = vadd.f32 %v11102_v18, %v4471_v0  ;;  %v5581_v19 = vadd.f32 %v11105_v20, %v4473_v4  ;;  %v4486_v21 = vmul.f32 %v11073_v3, %v726_v5  ;;  %v4488_v22 = vmul.f32 %v11080_v7, %v1175_v10  ;;  %v728_v23 = vpop.f32.mrf.mxu0  ;;  %v1177_v24 = vpop.f32.mrf.mxu1  ;;  %1981 = vmatprep.mubr.f32.mxu1 %v10663_v6 }
 0x127   : > { %v7431_v25 = vadd.f32 %v7430_v59, %v6602_v15  ;;  %v7569_v26 = vadd.f32 %v7568_v61, %v6604_v16  ;;  %v4487_v27 = vmul.f32 %v11083_v8, %v728_v23  ;;  %v4489_v28 = vmul.f32 %v11086_v9, %v1177_v24 }
 0x128   : > { %v6603_v31 = vmax.f32 %v5579_v17, 0.0  ;;  %v6605_v32 = vmax.f32 %v5581_v19, 0.0  ;;  %v5594_v33 = vadd.f32 %v11089_v11, %v4486_v21  ;;  %v5596_v34 = vadd.f32 %v11093_v13, %v4488_v22  ;;  %v732_v35 = vpop.f32.mrf.mxu0  ;;  %v1181_v36 = vpop.f32.mrf.mxu1  ;;  %9631 = vmatmul.mubr.msk.f32.vlgmr.msra.gmra.mxu0 %vm377_vm0, %v10372_v37 }
 0x129   : > { %v5595_v38 = vadd.f32 %v11102_v18, %v4487_v27  ;;  %v5597_v39 = vadd.f32 %v11105_v20, %v4489_v28  ;;  %v4502_v40 = vmul.f32 %v11073_v3, %v732_v35  ;;  %v4504_v41 = vmul.f32 %v11080_v7, %v1181_v36  ;;  %9695 = vmatmul.mubr.msk.f32.vlgmr.msra.gmra.mxu1 %vm377_vm0, %v10372_v37 }
 0x12a   : > { %v7500_v42 = vadd.f32 %v7499_v12, %v6603_v31  ;;  %v7638_v43 = vadd.f32 %v7637_v14, %v6605_v32  ;;  %v6618_v44 = vmax.f32 %v5594_v33, 0.0  ;;  %v6620_v45 = vmax.f32 %v5596_v34, 0.0  ;;  %2397 = vmatpush1.msra.mxu0 %v369_v29  ;;  %2846 = vmatpush1.msra.mxu1 %v371_v30  ;;  %v734_v46 = vpop.f32.mrf.mxu0  ;;  %v1183_v47 = vpop.f32.mrf.mxu1  ;;  %v10374_v29 = vld [vmem:[%s10776_s30 + $0x10] sm:$0xff] }
 0x12b   : > { %v6619_v48 = vmax.f32 %v5595_v38, 0.0  ;;  %v6621_v49 = vmax.f32 %v5597_v39, 0.0  ;;  %v5610_v50 = vadd.f32 %v11089_v11, %v4502_v40  ;;  %v5612_v51 = vadd.f32 %v11093_v13, %v4504_v41  ;;  %1538 = vmatprep.mubr.f32.mxu0 %v10663_v6  ;;  %1987 = vmatprep.mubr.f32.mxu1 %v10663_v6 }
 0x12c   : > { %v7432_v52 = vadd.f32 %v7431_v25, %v6618_v44  ;;  %v7570_v53 = vadd.f32 %v7569_v26, %v6620_v45  ;;  %v4503_v54 = vmul.f32 %v11083_v8, %v734_v46  ;;  %v4505_v55 = vmul.f32 %v11086_v9, %v1183_v47  ;;  %v738_v56 = vpop.f32.mrf.mxu0  ;;  %v1187_v57 = vpop.f32.mrf.mxu1  ;;  %9632 = vmatmul.mubr.msk.f32.gmra.mxu0 %vm377_vm0, %v10373_v58 }
 0x12d   : > { %v7501_v59 = vadd.f32 %v7500_v42, %v6619_v48  ;;  %v7639_v61 = vadd.f32 %v7638_v43, %v6621_v49  ;;  %v6634_v0 = vmax.f32 %v5610_v50, 0.0  ;;  %v6636_v4 = vmax.f32 %v5612_v51, 0.0  ;;  %9696 = vmatmul.mubr.msk.f32.gmra.mxu1 %vm377_vm0, %v10373_v58  ;;  %1544 = vmatprep.mubr.f32.mxu0 %v10663_v6  ;;  %v10375_v50 = vld [vmem:[%s10776_s30 + $0x18] sm:$0xff] }
 0x12e   : > { %v5611_v5 = vadd.f32 %v11102_v18, %v4503_v54  ;;  %v5613_v10 = vadd.f32 %v11105_v20, %v4505_v55  ;;  %v4518_v12 = vmul.f32 %v11073_v3, %v738_v56  ;;  %v4520_v14 = vmul.f32 %v11080_v7, %v1187_v57  ;;  %v740_v15 = vpop.f32.mrf.mxu0  ;;  %v1189_v16 = vpop.f32.mrf.mxu1  ;;  %1993 = vmatprep.mubr.f32.mxu1 %v10663_v6 }
 0x12f   : > { %v7433_v17 = vadd.f32 %v7432_v52, %v6634_v0  ;;  %v7571_v19 = vadd.f32 %v7570_v53, %v6636_v4  ;;  %v4519_v21 = vmul.f32 %v11083_v8, %v740_v15  ;;  %v4521_v22 = vmul.f32 %v11086_v9, %v1189_v16 }
 0x130   : > { %v6635_v23 = vmax.f32 %v5611_v5, 0.0  ;;  %v6637_v24 = vmax.f32 %v5613_v10, 0.0  ;;  %v5626_v25 = vadd.f32 %v11089_v11, %v4518_v12  ;;  %v5628_v26 = vadd.f32 %v11093_v13, %v4520_v14  ;;  %v744_v27 = vpop.f32.mrf.mxu0  ;;  %v1193_v28 = vpop.f32.mrf.mxu1  ;;  %9633 = vmatmul.mubr.msk.f32.gmra.mxu0 %vm377_vm0, %v10374_v29 }
 0x131   : > { %v5627_v30 = vadd.f32 %v11102_v18, %v4519_v21  ;;  %v5629_v31 = vadd.f32 %v11105_v20, %v4521_v22  ;;  %v4534_v32 = vmul.f32 %v11073_v3, %v744_v27  ;;  %v4536_v33 = vmul.f32 %v11080_v7, %v1193_v28  ;;  %9697 = vmatmul.mubr.msk.f32.gmra.mxu1 %vm377_vm0, %v10374_v29  ;;  %v10376_v21 = vld [vmem:[%s10776_s30 + $0x20] sm:$0xff] }
 0x132   : > { %v7502_v34 = vadd.f32 %v7501_v59, %v6635_v23  ;;  %v7640_v35 = vadd.f32 %v7639_v61, %v6637_v24  ;;  %v6650_v36 = vmax.f32 %v5626_v25, 0.0  ;;  %v6652_v37 = vmax.f32 %v5628_v26, 0.0  ;;  %v746_v38 = vpop.f32.mrf.mxu0  ;;  %v1195_v39 = vpop.f32.mrf.mxu1  ;;  %1550 = vmatprep.mubr.f32.mxu0 %v10663_v6  ;;  %1999 = vmatprep.mubr.f32.mxu1 %v10663_v6 }
 0x133   : > { %v6651_v40 = vmax.f32 %v5627_v30, 0.0  ;;  %v6653_v41 = vmax.f32 %v5629_v31, 0.0  ;;  %v5642_v42 = vadd.f32 %v11089_v11, %v4534_v32  ;;  %v5644_v43 = vadd.f32 %v11093_v13, %v4536_v33 }
 0x134   : > { %v7434_v44 = vadd.f32 %v7433_v17, %v6650_v36  ;;  %v7572_v45 = vadd.f32 %v7571_v19, %v6652_v37  ;;  %v4535_v46 = vmul.f32 %v11083_v8, %v746_v38  ;;  %v4537_v47 = vmul.f32 %v11086_v9, %v1195_v39  ;;  %v750_v48 = vpop.f32.mrf.mxu0  ;;  %v1199_v49 = vpop.f32.mrf.mxu1  ;;  %9634 = vmatmul.mubr.msk.f32.gmra.mxu0 %vm377_vm0, %v10375_v50 }
 0x135   : > { %v7503_v51 = vadd.f32 %v7502_v34, %v6651_v40  ;;  %v7641_v52 = vadd.f32 %v7640_v35, %v6653_v41  ;;  %v6666_v53 = vmax.f32 %v5642_v42, 0.0  ;;  %v6668_v54 = vmax.f32 %v5644_v43, 0.0  ;;  %9698 = vmatmul.mubr.msk.f32.gmra.mxu1 %vm377_vm0, %v10375_v50  ;;  %1556 = vmatprep.mubr.f32.mxu0 %v10663_v6  ;;  %v10377_v42 = vld [vmem:[%s10776_s30 + $0x28] sm:$0xff] }
 0x136   : > { %v5643_v55 = vadd.f32 %v11102_v18, %v4535_v46  ;;  %v5645_v56 = vadd.f32 %v11105_v20, %v4537_v47  ;;  %v4550_v57 = vmul.f32 %v11073_v3, %v750_v48  ;;  %v4552_v58 = vmul.f32 %v11080_v7, %v1199_v49  ;;  %v752_v59 = vpop.f32.mrf.mxu0  ;;  %v1201_v61 = vpop.f32.mrf.mxu1  ;;  %2005 = vmatprep.mubr.f32.mxu1 %v10663_v6 }
 0x137   : > { %v7435_v0 = vadd.f32 %v7434_v44, %v6666_v53  ;;  %v7573_v4 = vadd.f32 %v7572_v45, %v6668_v54  ;;  %v4551_v5 = vmul.f32 %v11083_v8, %v752_v59  ;;  %v4553_v10 = vmul.f32 %v11086_v9, %v1201_v61 }
 0x138   : > { %v6667_v12 = vmax.f32 %v5643_v55, 0.0  ;;  %v6669_v14 = vmax.f32 %v5645_v56, 0.0  ;;  %v5658_v15 = vadd.f32 %v11089_v11, %v4550_v57  ;;  %v5660_v16 = vadd.f32 %v11093_v13, %v4552_v58  ;;  %v756_v17 = vpop.f32.mrf.mxu0  ;;  %v1205_v19 = vpop.f32.mrf.mxu1  ;;  %9635 = vmatmul.mubr.msk.f32.gmra.mxu0 %vm377_vm0, %v10376_v21 }
 0x139   : > { %v5659_v22 = vadd.f32 %v11102_v18, %v4551_v5  ;;  %v5661_v23 = vadd.f32 %v11105_v20, %v4553_v10  ;;  %v4566_v24 = vmul.f32 %v11073_v3, %v756_v17  ;;  %v4568_v25 = vmul.f32 %v11080_v7, %v1205_v19  ;;  %9699 = vmatmul.mubr.msk.f32.gmra.mxu1 %vm377_vm0, %v10376_v21  ;;  %v10378_v5 = vld [vmem:[%s10776_s30 + $0x30] sm:$0xff] }
 0x13a   : > { %v7504_v26 = vadd.f32 %v7503_v51, %v6667_v12  ;;  %v7642_v27 = vadd.f32 %v7641_v52, %v6669_v14  ;;  %v6682_v28 = vmax.f32 %v5658_v15, 0.0  ;;  %v6684_v29 = vmax.f32 %v5660_v16, 0.0  ;;  %v758_v30 = vpop.f32.mrf.mxu0  ;;  %v1207_v31 = vpop.f32.mrf.mxu1  ;;  %1562 = vmatprep.mubr.f32.mxu0 %v10663_v6  ;;  %2011 = vmatprep.mubr.f32.mxu1 %v10663_v6 }
 0x13b   : > { %v6683_v32 = vmax.f32 %v5659_v22, 0.0  ;;  %v6685_v33 = vmax.f32 %v5661_v23, 0.0  ;;  %v5674_v34 = vadd.f32 %v11089_v11, %v4566_v24  ;;  %v5676_v35 = vadd.f32 %v11093_v13, %v4568_v25 }
 0x13c   : > { %v7436_v36 = vadd.f32 %v7435_v0, %v6682_v28  ;;  %v7574_v37 = vadd.f32 %v7573_v4, %v6684_v29  ;;  %v4567_v38 = vmul.f32 %v11083_v8, %v758_v30  ;;  %v4569_v39 = vmul.f32 %v11086_v9, %v1207_v31  ;;  %v762_v40 = vpop.f32.mrf.mxu0  ;;  %v1211_v41 = vpop.f32.mrf.mxu1  ;;  %9636 = vmatmul.mubr.msk.f32.gmra.mxu0 %vm377_vm0, %v10377_v42 }
 0x13d   : > { %v7505_v43 = vadd.f32 %v7504_v26, %v6683_v32  ;;  %v7643_v44 = vadd.f32 %v7642_v27, %v6685_v33  ;;  %v6698_v45 = vmax.f32 %v5674_v34, 0.0  ;;  %v6700_v46 = vmax.f32 %v5676_v35, 0.0  ;;  %9700 = vmatmul.mubr.msk.f32.gmra.mxu1 %vm377_vm0, %v10377_v42  ;;  %1568 = vmatprep.mubr.f32.mxu0 %v10663_v6  ;;  %v10379_v34 = vld [vmem:[%s10776_s30 + $0x38] sm:$0xff] }
 0x13e   : > { %v5675_v47 = vadd.f32 %v11102_v18, %v4567_v38  ;;  %v5677_v48 = vadd.f32 %v11105_v20, %v4569_v39  ;;  %v4582_v49 = vmul.f32 %v11073_v3, %v762_v40  ;;  %v4584_v50 = vmul.f32 %v11080_v7, %v1211_v41  ;;  %v764_v51 = vpop.f32.mrf.mxu0  ;;  %v1213_v52 = vpop.f32.mrf.mxu1  ;;  %2017 = vmatprep.mubr.f32.mxu1 %v10663_v6 }
 0x13f   : > { %v7437_v53 = vadd.f32 %v7436_v36, %v6698_v45  ;;  %v7575_v54 = vadd.f32 %v7574_v37, %v6700_v46  ;;  %v4583_v55 = vmul.f32 %v11083_v8, %v764_v51  ;;  %v4585_v56 = vmul.f32 %v11086_v9, %v1213_v52 }
 0x140   : > { %v6699_v57 = vmax.f32 %v5675_v47, 0.0  ;;  %v6701_v58 = vmax.f32 %v5677_v48, 0.0  ;;  %v5690_v59 = vadd.f32 %v11089_v11, %v4582_v49  ;;  %v5692_v61 = vadd.f32 %v11093_v13, %v4584_v50  ;;  %v768_v0 = vpop.f32.mrf.mxu0  ;;  %v1217_v4 = vpop.f32.mrf.mxu1  ;;  %9637 = vmatmul.mubr.msk.f32.gmra.mxu0 %vm377_vm0, %v10378_v5 }
 0x141   : > { %v5691_v10 = vadd.f32 %v11102_v18, %v4583_v55  ;;  %v5693_v12 = vadd.f32 %v11105_v20, %v4585_v56  ;;  %v4598_v14 = vmul.f32 %v11073_v3, %v768_v0  ;;  %v4600_v15 = vmul.f32 %v11080_v7, %v1217_v4  ;;  %9701 = vmatmul.mubr.msk.f32.gmra.mxu1 %vm377_vm0, %v10378_v5  ;;  %v10380_v55 = vld [vmem:[%s10776_s30 + $0x40] sm:$0xff] }
 0x142   : > { %v7506_v16 = vadd.f32 %v7505_v43, %v6699_v57  ;;  %v7644_v17 = vadd.f32 %v7643_v44, %v6701_v58  ;;  %v6714_v19 = vmax.f32 %v5690_v59, 0.0  ;;  %v6716_v21 = vmax.f32 %v5692_v61, 0.0  ;;  %v770_v22 = vpop.f32.mrf.mxu0  ;;  %v1219_v23 = vpop.f32.mrf.mxu1  ;;  %1574 = vmatprep.mubr.f32.mxu0 %v10663_v6  ;;  %2023 = vmatprep.mubr.f32.mxu1 %v10663_v6 }
 0x143   : > { %v6715_v24 = vmax.f32 %v5691_v10, 0.0  ;;  %v6717_v25 = vmax.f32 %v5693_v12, 0.0  ;;  %v5706_v26 = vadd.f32 %v11089_v11, %v4598_v14  ;;  %v5708_v27 = vadd.f32 %v11093_v13, %v4600_v15 }
 0x144   : > { %v7438_v28 = vadd.f32 %v7437_v53, %v6714_v19  ;;  %v7576_v29 = vadd.f32 %v7575_v54, %v6716_v21  ;;  %v4599_v30 = vmul.f32 %v11083_v8, %v770_v22  ;;  %v4601_v31 = vmul.f32 %v11086_v9, %v1219_v23  ;;  %v774_v32 = vpop.f32.mrf.mxu0  ;;  %v1223_v33 = vpop.f32.mrf.mxu1  ;;  %9638 = vmatmul.mubr.msk.f32.gmra.mxu0 %vm377_vm0, %v10379_v34 }
 0x145   : > { %v7507_v35 = vadd.f32 %v7506_v16, %v6715_v24  ;;  %v7645_v36 = vadd.f32 %v7644_v17, %v6717_v25  ;;  %v6730_v37 = vmax.f32 %v5706_v26, 0.0  ;;  %v6732_v38 = vmax.f32 %v5708_v27, 0.0  ;;  %9702 = vmatmul.mubr.msk.f32.gmra.mxu1 %vm377_vm0, %v10379_v34  ;;  %1580 = vmatprep.mubr.f32.mxu0 %v10663_v6  ;;  %v10381_v26 = vld [vmem:[%s10776_s30 + $0x48] sm:$0xff] }
 0x146   : > { %v5707_v39 = vadd.f32 %v11102_v18, %v4599_v30  ;;  %v5709_v40 = vadd.f32 %v11105_v20, %v4601_v31  ;;  %v4614_v41 = vmul.f32 %v11073_v3, %v774_v32  ;;  %v4616_v42 = vmul.f32 %v11080_v7, %v1223_v33  ;;  %v776_v43 = vpop.f32.mrf.mxu0  ;;  %v1225_v44 = vpop.f32.mrf.mxu1  ;;  %2029 = vmatprep.mubr.f32.mxu1 %v10663_v6 }
 0x147   : > { %v7439_v45 = vadd.f32 %v7438_v28, %v6730_v37  ;;  %v7577_v46 = vadd.f32 %v7576_v29, %v6732_v38  ;;  %v4615_v47 = vmul.f32 %v11083_v8, %v776_v43  ;;  %v4617_v48 = vmul.f32 %v11086_v9, %v1225_v44 }
 0x148   : > { %v6731_v49 = vmax.f32 %v5707_v39, 0.0  ;;  %v6733_v50 = vmax.f32 %v5709_v40, 0.0  ;;  %v5722_v51 = vadd.f32 %v11089_v11, %v4614_v41  ;;  %v5724_v52 = vadd.f32 %v11093_v13, %v4616_v42  ;;  %v780_v53 = vpop.f32.mrf.mxu0  ;;  %v1229_v54 = vpop.f32.mrf.mxu1  ;;  %9639 = vmatmul.mubr.msk.f32.gmra.mxu0 %vm377_vm0, %v10380_v55 }
 0x149   : > { %v5723_v56 = vadd.f32 %v11102_v18, %v4615_v47  ;;  %v5725_v57 = vadd.f32 %v11105_v20, %v4617_v48  ;;  %v4630_v58 = vmul.f32 %v11073_v3, %v780_v53  ;;  %v4632_v59 = vmul.f32 %v11080_v7, %v1229_v54  ;;  %9703 = vmatmul.mubr.msk.f32.gmra.mxu1 %vm377_vm0, %v10380_v55  ;;  %v10382_v47 = vld [vmem:[%s10776_s30 + $0x50] sm:$0xff] }
 0x14a   : > { %v7508_v61 = vadd.f32 %v7507_v35, %v6731_v49  ;;  %v7646_v0 = vadd.f32 %v7645_v36, %v6733_v50  ;;  %v6746_v4 = vmax.f32 %v5722_v51, 0.0  ;;  %v6748_v5 = vmax.f32 %v5724_v52, 0.0  ;;  %v782_v10 = vpop.f32.mrf.mxu0  ;;  %v1231_v12 = vpop.f32.mrf.mxu1  ;;  %1586 = vmatprep.mubr.f32.mxu0 %v10663_v6  ;;  %2035 = vmatprep.mubr.f32.mxu1 %v10663_v6 }
 0x14b   : > { %v6747_v14 = vmax.f32 %v5723_v56, 0.0  ;;  %v6749_v15 = vmax.f32 %v5725_v57, 0.0  ;;  %v5738_v16 = vadd.f32 %v11089_v11, %v4630_v58  ;;  %v5740_v17 = vadd.f32 %v11093_v13, %v4632_v59 }
 0x14c   : > { %v7440_v19 = vadd.f32 %v7439_v45, %v6746_v4  ;;  %v7578_v21 = vadd.f32 %v7577_v46, %v6748_v5  ;;  %v4631_v22 = vmul.f32 %v11083_v8, %v782_v10  ;;  %v4633_v23 = vmul.f32 %v11086_v9, %v1231_v12  ;;  %v786_v24 = vpop.f32.mrf.mxu0  ;;  %v1235_v25 = vpop.f32.mrf.mxu1  ;;  %9640 = vmatmul.mubr.msk.f32.gmra.mxu0 %vm377_vm0, %v10381_v26 }
 0x14d   : > { %v7509_v27 = vadd.f32 %v7508_v61, %v6747_v14  ;;  %v7647_v28 = vadd.f32 %v7646_v0, %v6749_v15  ;;  %v6762_v29 = vmax.f32 %v5738_v16, 0.0  ;;  %v6764_v30 = vmax.f32 %v5740_v17, 0.0  ;;  %9704 = vmatmul.mubr.msk.f32.gmra.mxu1 %vm377_vm0, %v10381_v26  ;;  %1592 = vmatprep.mubr.f32.mxu0 %v10663_v6  ;;  %v10383_v16 = vld [vmem:[%s10776_s30 + $0x58] sm:$0xff] }
 0x14e   : > { %v5739_v31 = vadd.f32 %v11102_v18, %v4631_v22  ;;  %v5741_v32 = vadd.f32 %v11105_v20, %v4633_v23  ;;  %v4646_v33 = vmul.f32 %v11073_v3, %v786_v24  ;;  %v4648_v34 = vmul.f32 %v11080_v7, %v1235_v25  ;;  %v788_v35 = vpop.f32.mrf.mxu0  ;;  %v1237_v36 = vpop.f32.mrf.mxu1  ;;  %2041 = vmatprep.mubr.f32.mxu1 %v10663_v6 }
 0x14f   : > { %v7441_v37 = vadd.f32 %v7440_v19, %v6762_v29  ;;  %v7579_v38 = vadd.f32 %v7578_v21, %v6764_v30  ;;  %v4647_v39 = vmul.f32 %v11083_v8, %v788_v35  ;;  %v4649_v40 = vmul.f32 %v11086_v9, %v1237_v36 }
 0x150   : > { %v6763_v41 = vmax.f32 %v5739_v31, 0.0  ;;  %v6765_v42 = vmax.f32 %v5741_v32, 0.0  ;;  %v5754_v43 = vadd.f32 %v11089_v11, %v4646_v33  ;;  %v5756_v44 = vadd.f32 %v11093_v13, %v4648_v34  ;;  %v792_v45 = vpop.f32.mrf.mxu0  ;;  %v1241_v46 = vpop.f32.mrf.mxu1  ;;  %9641 = vmatmul.mubr.msk.f32.gmra.mxu0 %vm377_vm0, %v10382_v47 }
 0x151   : > { %v5755_v48 = vadd.f32 %v11102_v18, %v4647_v39  ;;  %v5757_v49 = vadd.f32 %v11105_v20, %v4649_v40  ;;  %v4662_v50 = vmul.f32 %v11073_v3, %v792_v45  ;;  %v4664_v51 = vmul.f32 %v11080_v7, %v1241_v46  ;;  %9705 = vmatmul.mubr.msk.f32.gmra.mxu1 %vm377_vm0, %v10382_v47  ;;  %v10384_v39 = vld [vmem:[%s10776_s30 + $0x60] sm:$0xff] }
 0x152   : > { %v7510_v52 = vadd.f32 %v7509_v27, %v6763_v41  ;;  %v7648_v53 = vadd.f32 %v7647_v28, %v6765_v42  ;;  %v6778_v54 = vmax.f32 %v5754_v43, 0.0  ;;  %v6780_v55 = vmax.f32 %v5756_v44, 0.0  ;;  %v794_v56 = vpop.f32.mrf.mxu0  ;;  %v1243_v57 = vpop.f32.mrf.mxu1  ;;  %1598 = vmatprep.mubr.f32.mxu0 %v10663_v6  ;;  %2047 = vmatprep.mubr.f32.mxu1 %v10663_v6 }
 0x153   : > { %v6779_v58 = vmax.f32 %v5755_v48, 0.0  ;;  %v6781_v59 = vmax.f32 %v5757_v49, 0.0  ;;  %v5770_v61 = vadd.f32 %v11089_v11, %v4662_v50  ;;  %v5772_v0 = vadd.f32 %v11093_v13, %v4664_v51 }
 0x154   : > { %v7442_v4 = vadd.f32 %v7441_v37, %v6778_v54  ;;  %v7580_v5 = vadd.f32 %v7579_v38, %v6780_v55  ;;  %v4663_v10 = vmul.f32 %v11083_v8, %v794_v56  ;;  %v4665_v12 = vmul.f32 %v11086_v9, %v1243_v57  ;;  %v798_v14 = vpop.f32.mrf.mxu0  ;;  %v1247_v15 = vpop.f32.mrf.mxu1  ;;  %9642 = vmatmul.mubr.msk.f32.gmra.mxu0 %vm377_vm0, %v10383_v16 }
 0x155   : > { %v7511_v17 = vadd.f32 %v7510_v52, %v6779_v58  ;;  %v7649_v19 = vadd.f32 %v7648_v53, %v6781_v59  ;;  %v6794_v21 = vmax.f32 %v5770_v61, 0.0  ;;  %v6796_v22 = vmax.f32 %v5772_v0, 0.0  ;;  %9706 = vmatmul.mubr.msk.f32.gmra.mxu1 %vm377_vm0, %v10383_v16  ;;  %1604 = vmatprep.mubr.f32.mxu0 %v10663_v6  ;;  %v10385_v61 = vld [vmem:[%s10776_s30 + $0x68] sm:$0xff] }
 0x156   : > { %v5771_v23 = vadd.f32 %v11102_v18, %v4663_v10  ;;  %v5773_v24 = vadd.f32 %v11105_v20, %v4665_v12  ;;  %v4678_v25 = vmul.f32 %v11073_v3, %v798_v14  ;;  %v4680_v26 = vmul.f32 %v11080_v7, %v1247_v15  ;;  %v800_v27 = vpop.f32.mrf.mxu0  ;;  %v1249_v28 = vpop.f32.mrf.mxu1  ;;  %2053 = vmatprep.mubr.f32.mxu1 %v10663_v6 }
 0x157   : > { %v7443_v29 = vadd.f32 %v7442_v4, %v6794_v21  ;;  %v7581_v30 = vadd.f32 %v7580_v5, %v6796_v22  ;;  %v4679_v31 = vmul.f32 %v11083_v8, %v800_v27  ;;  %v4681_v32 = vmul.f32 %v11086_v9, %v1249_v28 }
 0x158   : > { %v6795_v33 = vmax.f32 %v5771_v23, 0.0  ;;  %v6797_v34 = vmax.f32 %v5773_v24, 0.0  ;;  %v5786_v35 = vadd.f32 %v11089_v11, %v4678_v25  ;;  %v5788_v36 = vadd.f32 %v11093_v13, %v4680_v26  ;;  %v804_v37 = vpop.f32.mrf.mxu0  ;;  %v1253_v38 = vpop.f32.mrf.mxu1  ;;  %9643 = vmatmul.mubr.msk.f32.gmra.mxu0 %vm377_vm0, %v10384_v39 }
 0x159   : > { %v5787_v40 = vadd.f32 %v11102_v18, %v4679_v31  ;;  %v5789_v41 = vadd.f32 %v11105_v20, %v4681_v32  ;;  %v4694_v42 = vmul.f32 %v11073_v3, %v804_v37  ;;  %v4696_v43 = vmul.f32 %v11080_v7, %v1253_v38  ;;  %9707 = vmatmul.mubr.msk.f32.gmra.mxu1 %vm377_vm0, %v10384_v39  ;;  %v10386_v31 = vld [vmem:[%s10776_s30 + $0x70] sm:$0xff] }
 0x15a   : > { %v7512_v44 = vadd.f32 %v7511_v17, %v6795_v33  ;;  %v7650_v45 = vadd.f32 %v7649_v19, %v6797_v34  ;;  %v6810_v46 = vmax.f32 %v5786_v35, 0.0  ;;  %v6812_v47 = vmax.f32 %v5788_v36, 0.0  ;;  %v806_v48 = vpop.f32.mrf.mxu0  ;;  %v1255_v49 = vpop.f32.mrf.mxu1  ;;  %1610 = vmatprep.mubr.f32.mxu0 %v10663_v6  ;;  %2059 = vmatprep.mubr.f32.mxu1 %v10663_v6 }
 0x15b   : > { %v6811_v50 = vmax.f32 %v5787_v40, 0.0  ;;  %v6813_v51 = vmax.f32 %v5789_v41, 0.0  ;;  %v5802_v52 = vadd.f32 %v11089_v11, %v4694_v42  ;;  %v5804_v53 = vadd.f32 %v11093_v13, %v4696_v43 }
 0x15c   : > { %v7444_v54 = vadd.f32 %v7443_v29, %v6810_v46  ;;  %v7582_v55 = vadd.f32 %v7581_v30, %v6812_v47  ;;  %v4695_v56 = vmul.f32 %v11083_v8, %v806_v48  ;;  %v4697_v57 = vmul.f32 %v11086_v9, %v1255_v49  ;;  %v810_v58 = vpop.f32.mrf.mxu0  ;;  %v1259_v59 = vpop.f32.mrf.mxu1  ;;  %9644 = vmatmul.mubr.msk.f32.gmra.mxu0 %vm377_vm0, %v10385_v61 }
 0x15d   : > { %v7513_v0 = vadd.f32 %v7512_v44, %v6811_v50  ;;  %v7651_v4 = vadd.f32 %v7650_v45, %v6813_v51  ;;  %v6826_v5 = vmax.f32 %v5802_v52, 0.0  ;;  %v6828_v10 = vmax.f32 %v5804_v53, 0.0  ;;  %9708 = vmatmul.mubr.msk.f32.gmra.mxu1 %vm377_vm0, %v10385_v61  ;;  %1616 = vmatprep.mubr.f32.mxu0 %v10663_v6  ;;  %v10387_v52 = vld [vmem:[%s10776_s30 + $0x78] sm:$0xff] }
 0x15e   : > { %v5803_v12 = vadd.f32 %v11102_v18, %v4695_v56  ;;  %v5805_v14 = vadd.f32 %v11105_v20, %v4697_v57  ;;  %v4710_v15 = vmul.f32 %v11073_v3, %v810_v58  ;;  %v4712_v16 = vmul.f32 %v11080_v7, %v1259_v59  ;;  %v812_v17 = vpop.f32.mrf.mxu0  ;;  %v1261_v19 = vpop.f32.mrf.mxu1  ;;  %2065 = vmatprep.mubr.f32.mxu1 %v10663_v6 }
 0x15f   : > { %v7445_v21 = vadd.f32 %v7444_v54, %v6826_v5  ;;  %v7583_v22 = vadd.f32 %v7582_v55, %v6828_v10  ;;  %v4711_v23 = vmul.f32 %v11083_v8, %v812_v17  ;;  %v4713_v24 = vmul.f32 %v11086_v9, %v1261_v19 }
 0x160   : > { %v6827_v25 = vmax.f32 %v5803_v12, 0.0  ;;  %v6829_v26 = vmax.f32 %v5805_v14, 0.0  ;;  %v5818_v27 = vadd.f32 %v11089_v11, %v4710_v15  ;;  %v5820_v28 = vadd.f32 %v11093_v13, %v4712_v16  ;;  %v816_v29 = vpop.f32.mrf.mxu0  ;;  %v1265_v30 = vpop.f32.mrf.mxu1  ;;  %9645 = vmatmul.mubr.msk.f32.gmra.mxu0 %vm377_vm0, %v10386_v31 }
 0x161   : > { %v5819_v32 = vadd.f32 %v11102_v18, %v4711_v23  ;;  %v5821_v33 = vadd.f32 %v11105_v20, %v4713_v24  ;;  %v4726_v34 = vmul.f32 %v11073_v3, %v816_v29  ;;  %v4728_v35 = vmul.f32 %v11080_v7, %v1265_v30  ;;  %9709 = vmatmul.mubr.msk.f32.gmra.mxu1 %vm377_vm0, %v10386_v31  ;;  %v10388_v23 = vld [vmem:[%s10776_s30 + $0x80] sm:$0xff] }
 0x162   : > { %v7514_v36 = vadd.f32 %v7513_v0, %v6827_v25  ;;  %v7652_v37 = vadd.f32 %v7651_v4, %v6829_v26  ;;  %v6842_v38 = vmax.f32 %v5818_v27, 0.0  ;;  %v6844_v39 = vmax.f32 %v5820_v28, 0.0  ;;  %v818_v40 = vpop.f32.mrf.mxu0  ;;  %v1267_v41 = vpop.f32.mrf.mxu1  ;;  %1622 = vmatprep.mubr.f32.mxu0 %v10663_v6  ;;  %2071 = vmatprep.mubr.f32.mxu1 %v10663_v6 }
 0x163   : > { %v6843_v42 = vmax.f32 %v5819_v32, 0.0  ;;  %v6845_v43 = vmax.f32 %v5821_v33, 0.0  ;;  %v5834_v44 = vadd.f32 %v11089_v11, %v4726_v34  ;;  %v5836_v45 = vadd.f32 %v11093_v13, %v4728_v35 }
 0x164   : > { %v7446_v46 = vadd.f32 %v7445_v21, %v6842_v38  ;;  %v7584_v47 = vadd.f32 %v7583_v22, %v6844_v39  ;;  %v4727_v48 = vmul.f32 %v11083_v8, %v818_v40  ;;  %v4729_v49 = vmul.f32 %v11086_v9, %v1267_v41  ;;  %v822_v50 = vpop.f32.mrf.mxu0  ;;  %v1271_v51 = vpop.f32.mrf.mxu1  ;;  %9646 = vmatmul.mubr.msk.f32.gmra.mxu0 %vm377_vm0, %v10387_v52 }
 0x165   : > { %v7515_v53 = vadd.f32 %v7514_v36, %v6843_v42  ;;  %v7653_v54 = vadd.f32 %v7652_v37, %v6845_v43  ;;  %v6858_v55 = vmax.f32 %v5834_v44, 0.0  ;;  %v6860_v56 = vmax.f32 %v5836_v45, 0.0  ;;  %9710 = vmatmul.mubr.msk.f32.gmra.mxu1 %vm377_vm0, %v10387_v52  ;;  %1628 = vmatprep.mubr.f32.mxu0 %v10663_v6  ;;  %v10389_v44 = vld [vmem:[%s10776_s30 + $0x88] sm:$0xff] }
 0x166   : > { %v5835_v57 = vadd.f32 %v11102_v18, %v4727_v48  ;;  %v5837_v58 = vadd.f32 %v11105_v20, %v4729_v49  ;;  %v4742_v59 = vmul.f32 %v11073_v3, %v822_v50  ;;  %v4744_v61 = vmul.f32 %v11080_v7, %v1271_v51  ;;  %v824_v0 = vpop.f32.mrf.mxu0  ;;  %v1273_v4 = vpop.f32.mrf.mxu1  ;;  %2077 = vmatprep.mubr.f32.mxu1 %v10663_v6 }
 0x167   : > { %v7447_v5 = vadd.f32 %v7446_v46, %v6858_v55  ;;  %v7585_v10 = vadd.f32 %v7584_v47, %v6860_v56  ;;  %v4743_v12 = vmul.f32 %v11083_v8, %v824_v0  ;;  %v4745_v14 = vmul.f32 %v11086_v9, %v1273_v4 }
 0x168   : > { %v6859_v15 = vmax.f32 %v5835_v57, 0.0  ;;  %v6861_v16 = vmax.f32 %v5837_v58, 0.0  ;;  %v5850_v17 = vadd.f32 %v11089_v11, %v4742_v59  ;;  %v5852_v19 = vadd.f32 %v11093_v13, %v4744_v61  ;;  %v828_v21 = vpop.f32.mrf.mxu0  ;;  %v1277_v22 = vpop.f32.mrf.mxu1  ;;  %9647 = vmatmul.mubr.msk.f32.gmra.mxu0 %vm377_vm0, %v10388_v23 }
 0x169   : > { %v5851_v24 = vadd.f32 %v11102_v18, %v4743_v12  ;;  %v5853_v25 = vadd.f32 %v11105_v20, %v4745_v14  ;;  %v4758_v26 = vmul.f32 %v11073_v3, %v828_v21  ;;  %v4760_v27 = vmul.f32 %v11080_v7, %v1277_v22  ;;  %9711 = vmatmul.mubr.msk.f32.gmra.mxu1 %vm377_vm0, %v10388_v23  ;;  %v10390_v12 = vld [vmem:[%s10776_s30 + $0x90] sm:$0xff] }
 0x16a   : > { %v7516_v28 = vadd.f32 %v7515_v53, %v6859_v15  ;;  %v7654_v29 = vadd.f32 %v7653_v54, %v6861_v16  ;;  %v6874_v30 = vmax.f32 %v5850_v17, 0.0  ;;  %v6876_v31 = vmax.f32 %v5852_v19, 0.0  ;;  %v830_v32 = vpop.f32.mrf.mxu0  ;;  %v1279_v33 = vpop.f32.mrf.mxu1  ;;  %1634 = vmatprep.mubr.f32.mxu0 %v10663_v6  ;;  %2083 = vmatprep.mubr.f32.mxu1 %v10663_v6 }
 0x16b   : > { %v6875_v34 = vmax.f32 %v5851_v24, 0.0  ;;  %v6877_v35 = vmax.f32 %v5853_v25, 0.0  ;;  %v5866_v36 = vadd.f32 %v11089_v11, %v4758_v26  ;;  %v5868_v37 = vadd.f32 %v11093_v13, %v4760_v27 }
 0x16c   : > { %v7448_v38 = vadd.f32 %v7447_v5, %v6874_v30  ;;  %v7586_v39 = vadd.f32 %v7585_v10, %v6876_v31  ;;  %v4759_v40 = vmul.f32 %v11083_v8, %v830_v32  ;;  %v4761_v41 = vmul.f32 %v11086_v9, %v1279_v33  ;;  %v834_v42 = vpop.f32.mrf.mxu0  ;;  %v1283_v43 = vpop.f32.mrf.mxu1  ;;  %9648 = vmatmul.mubr.msk.f32.gmra.mxu0 %vm377_vm0, %v10389_v44 }
 0x16d   : > { %v7517_v45 = vadd.f32 %v7516_v28, %v6875_v34  ;;  %v7655_v46 = vadd.f32 %v7654_v29, %v6877_v35  ;;  %v6890_v47 = vmax.f32 %v5866_v36, 0.0  ;;  %v6892_v48 = vmax.f32 %v5868_v37, 0.0  ;;  %9712 = vmatmul.mubr.msk.f32.gmra.mxu1 %vm377_vm0, %v10389_v44  ;;  %1640 = vmatprep.mubr.f32.mxu0 %v10663_v6  ;;  %v10391_v36 = vld [vmem:[%s10776_s30 + $0x98] sm:$0xff] }
 0x16e   : > { %v5867_v49 = vadd.f32 %v11102_v18, %v4759_v40  ;;  %v5869_v50 = vadd.f32 %v11105_v20, %v4761_v41  ;;  %v4774_v51 = vmul.f32 %v11073_v3, %v834_v42  ;;  %v4776_v52 = vmul.f32 %v11080_v7, %v1283_v43  ;;  %v836_v53 = vpop.f32.mrf.mxu0  ;;  %v1285_v54 = vpop.f32.mrf.mxu1  ;;  %2089 = vmatprep.mubr.f32.mxu1 %v10663_v6 }
 0x16f   : > { %v7449_v55 = vadd.f32 %v7448_v38, %v6890_v47  ;;  %v7587_v56 = vadd.f32 %v7586_v39, %v6892_v48  ;;  %v4775_v57 = vmul.f32 %v11083_v8, %v836_v53  ;;  %v4777_v58 = vmul.f32 %v11086_v9, %v1285_v54 }
 0x170   : > { %v6891_v59 = vmax.f32 %v5867_v49, 0.0  ;;  %v6893_v61 = vmax.f32 %v5869_v50, 0.0  ;;  %v5882_v0 = vadd.f32 %v11089_v11, %v4774_v51  ;;  %v5884_v4 = vadd.f32 %v11093_v13, %v4776_v52  ;;  %v840_v5 = vpop.f32.mrf.mxu0  ;;  %v1289_v10 = vpop.f32.mrf.mxu1  ;;  %9649 = vmatmul.mubr.msk.f32.gmra.mxu0 %vm377_vm0, %v10390_v12 }
 0x171   : > { %v5883_v14 = vadd.f32 %v11102_v18, %v4775_v57  ;;  %v5885_v15 = vadd.f32 %v11105_v20, %v4777_v58  ;;  %v4790_v16 = vmul.f32 %v11073_v3, %v840_v5  ;;  %v4792_v17 = vmul.f32 %v11080_v7, %v1289_v10  ;;  %9713 = vmatmul.mubr.msk.f32.gmra.mxu1 %vm377_vm0, %v10390_v12  ;;  %v10392_v57 = vld [vmem:[%s10776_s30 + $0xa0] sm:$0xff] }
 0x172   : > { %v7518_v19 = vadd.f32 %v7517_v45, %v6891_v59  ;;  %v7656_v21 = vadd.f32 %v7655_v46, %v6893_v61  ;;  %v6906_v22 = vmax.f32 %v5882_v0, 0.0  ;;  %v6908_v23 = vmax.f32 %v5884_v4, 0.0  ;;  %v842_v24 = vpop.f32.mrf.mxu0  ;;  %v1291_v25 = vpop.f32.mrf.mxu1  ;;  %1646 = vmatprep.mubr.f32.mxu0 %v10663_v6  ;;  %2095 = vmatprep.mubr.f32.mxu1 %v10663_v6 }
 0x173   : > { %v6907_v26 = vmax.f32 %v5883_v14, 0.0  ;;  %v6909_v27 = vmax.f32 %v5885_v15, 0.0  ;;  %v5898_v28 = vadd.f32 %v11089_v11, %v4790_v16  ;;  %v5900_v29 = vadd.f32 %v11093_v13, %v4792_v17 }
 0x174   : > { %v7450_v30 = vadd.f32 %v7449_v55, %v6906_v22  ;;  %v7588_v31 = vadd.f32 %v7587_v56, %v6908_v23  ;;  %v4791_v32 = vmul.f32 %v11083_v8, %v842_v24  ;;  %v4793_v33 = vmul.f32 %v11086_v9, %v1291_v25  ;;  %v846_v34 = vpop.f32.mrf.mxu0  ;;  %v1295_v35 = vpop.f32.mrf.mxu1  ;;  %9650 = vmatmul.mubr.msk.f32.gmra.mxu0 %vm377_vm0, %v10391_v36 }
 0x175   : > { %v7519_v37 = vadd.f32 %v7518_v19, %v6907_v26  ;;  %v7657_v38 = vadd.f32 %v7656_v21, %v6909_v27  ;;  %v6922_v39 = vmax.f32 %v5898_v28, 0.0  ;;  %v6924_v40 = vmax.f32 %v5900_v29, 0.0  ;;  %9714 = vmatmul.mubr.msk.f32.gmra.mxu1 %vm377_vm0, %v10391_v36  ;;  %1652 = vmatprep.mubr.f32.mxu0 %v10663_v6  ;;  %v10393_v28 = vld [vmem:[%s10776_s30 + $0xa8] sm:$0xff] }
 0x176   : > { %v5899_v41 = vadd.f32 %v11102_v18, %v4791_v32  ;;  %v5901_v42 = vadd.f32 %v11105_v20, %v4793_v33  ;;  %v4806_v43 = vmul.f32 %v11073_v3, %v846_v34  ;;  %v4808_v44 = vmul.f32 %v11080_v7, %v1295_v35  ;;  %v848_v45 = vpop.f32.mrf.mxu0  ;;  %v1297_v46 = vpop.f32.mrf.mxu1  ;;  %2101 = vmatprep.mubr.f32.mxu1 %v10663_v6 }
 0x177   : > { %v7451_v47 = vadd.f32 %v7450_v30, %v6922_v39  ;;  %v7589_v48 = vadd.f32 %v7588_v31, %v6924_v40  ;;  %v4807_v49 = vmul.f32 %v11083_v8, %v848_v45  ;;  %v4809_v50 = vmul.f32 %v11086_v9, %v1297_v46 }
 0x178   : > { %v6923_v51 = vmax.f32 %v5899_v41, 0.0  ;;  %v6925_v52 = vmax.f32 %v5901_v42, 0.0  ;;  %v5914_v53 = vadd.f32 %v11089_v11, %v4806_v43  ;;  %v5916_v54 = vadd.f32 %v11093_v13, %v4808_v44  ;;  %v852_v55 = vpop.f32.mrf.mxu0  ;;  %v1301_v56 = vpop.f32.mrf.mxu1  ;;  %9651 = vmatmul.mubr.msk.f32.gmra.mxu0 %vm377_vm0, %v10392_v57 }
 0x179   : > { %v5915_v58 = vadd.f32 %v11102_v18, %v4807_v49  ;;  %v5917_v59 = vadd.f32 %v11105_v20, %v4809_v50  ;;  %v4822_v61 = vmul.f32 %v11073_v3, %v852_v55  ;;  %v4824_v0 = vmul.f32 %v11080_v7, %v1301_v56  ;;  %9715 = vmatmul.mubr.msk.f32.gmra.mxu1 %vm377_vm0, %v10392_v57  ;;  %v10394_v49 = vld [vmem:[%s10776_s30 + $0xb0] sm:$0xff] }
 0x17a   : > { %v7520_v4 = vadd.f32 %v7519_v37, %v6923_v51  ;;  %v7658_v5 = vadd.f32 %v7657_v38, %v6925_v52  ;;  %v6938_v10 = vmax.f32 %v5914_v53, 0.0  ;;  %v6940_v12 = vmax.f32 %v5916_v54, 0.0  ;;  %v854_v14 = vpop.f32.mrf.mxu0  ;;  %v1303_v15 = vpop.f32.mrf.mxu1  ;;  %1658 = vmatprep.mubr.f32.mxu0 %v10663_v6  ;;  %2107 = vmatprep.mubr.f32.mxu1 %v10663_v6 }
 0x17b   : > { %v6939_v16 = vmax.f32 %v5915_v58, 0.0  ;;  %v6941_v17 = vmax.f32 %v5917_v59, 0.0  ;;  %v5930_v19 = vadd.f32 %v11089_v11, %v4822_v61  ;;  %v5932_v21 = vadd.f32 %v11093_v13, %v4824_v0 }
 0x17c   : > { %v7452_v22 = vadd.f32 %v7451_v47, %v6938_v10  ;;  %v7590_v23 = vadd.f32 %v7589_v48, %v6940_v12  ;;  %v4823_v24 = vmul.f32 %v11083_v8, %v854_v14  ;;  %v4825_v25 = vmul.f32 %v11086_v9, %v1303_v15  ;;  %v858_v26 = vpop.f32.mrf.mxu0  ;;  %v1307_v27 = vpop.f32.mrf.mxu1  ;;  %9652 = vmatmul.mubr.msk.f32.gmra.mxu0 %vm377_vm0, %v10393_v28 }
 0x17d   : > { %v7521_v29 = vadd.f32 %v7520_v4, %v6939_v16  ;;  %v7659_v30 = vadd.f32 %v7658_v5, %v6941_v17  ;;  %v6954_v31 = vmax.f32 %v5930_v19, 0.0  ;;  %v6956_v32 = vmax.f32 %v5932_v21, 0.0  ;;  %9716 = vmatmul.mubr.msk.f32.gmra.mxu1 %vm377_vm0, %v10393_v28  ;;  %1664 = vmatprep.mubr.f32.mxu0 %v10663_v6  ;;  %v10395_v19 = vld [vmem:[%s10776_s30 + $0xb8] sm:$0xff] }
 0x17e   : > { %v5931_v33 = vadd.f32 %v11102_v18, %v4823_v24  ;;  %v5933_v34 = vadd.f32 %v11105_v20, %v4825_v25  ;;  %v4838_v35 = vmul.f32 %v11073_v3, %v858_v26  ;;  %v4840_v36 = vmul.f32 %v11080_v7, %v1307_v27  ;;  %v860_v37 = vpop.f32.mrf.mxu0  ;;  %v1309_v38 = vpop.f32.mrf.mxu1  ;;  %2113 = vmatprep.mubr.f32.mxu1 %v10663_v6 }
 0x17f   : > { %v7453_v39 = vadd.f32 %v7452_v22, %v6954_v31  ;;  %v7591_v40 = vadd.f32 %v7590_v23, %v6956_v32  ;;  %v4839_v41 = vmul.f32 %v11083_v8, %v860_v37  ;;  %v4841_v42 = vmul.f32 %v11086_v9, %v1309_v38 }
 0x180   : > { %v6955_v43 = vmax.f32 %v5931_v33, 0.0  ;;  %v6957_v44 = vmax.f32 %v5933_v34, 0.0  ;;  %v5946_v45 = vadd.f32 %v11089_v11, %v4838_v35  ;;  %v5948_v46 = vadd.f32 %v11093_v13, %v4840_v36  ;;  %v864_v47 = vpop.f32.mrf.mxu0  ;;  %v1313_v48 = vpop.f32.mrf.mxu1  ;;  %9653 = vmatmul.mubr.msk.f32.gmra.mxu0 %vm377_vm0, %v10394_v49 }
 0x181   : > { %v5947_v50 = vadd.f32 %v11102_v18, %v4839_v41  ;;  %v5949_v51 = vadd.f32 %v11105_v20, %v4841_v42  ;;  %v4854_v52 = vmul.f32 %v11073_v3, %v864_v47  ;;  %v4856_v53 = vmul.f32 %v11080_v7, %v1313_v48  ;;  %9717 = vmatmul.mubr.msk.f32.gmra.mxu1 %vm377_vm0, %v10394_v49  ;;  %v10396_v41 = vld [vmem:[%s10776_s30 + $0xc0] sm:$0xff] }
 0x182   : > { %v7522_v54 = vadd.f32 %v7521_v29, %v6955_v43  ;;  %v7660_v55 = vadd.f32 %v7659_v30, %v6957_v44  ;;  %v6970_v56 = vmax.f32 %v5946_v45, 0.0  ;;  %v6972_v57 = vmax.f32 %v5948_v46, 0.0  ;;  %v866_v58 = vpop.f32.mrf.mxu0  ;;  %v1315_v59 = vpop.f32.mrf.mxu1  ;;  %1670 = vmatprep.mubr.f32.mxu0 %v10663_v6  ;;  %2119 = vmatprep.mubr.f32.mxu1 %v10663_v6 }
 0x183   : > { %v6971_v61 = vmax.f32 %v5947_v50, 0.0  ;;  %v6973_v0 = vmax.f32 %v5949_v51, 0.0  ;;  %v5962_v4 = vadd.f32 %v11089_v11, %v4854_v52  ;;  %v5964_v5 = vadd.f32 %v11093_v13, %v4856_v53 }
 0x184   : > { %v7454_v10 = vadd.f32 %v7453_v39, %v6970_v56  ;;  %v7592_v12 = vadd.f32 %v7591_v40, %v6972_v57  ;;  %v4855_v14 = vmul.f32 %v11083_v8, %v866_v58  ;;  %v4857_v15 = vmul.f32 %v11086_v9, %v1315_v59  ;;  %v870_v16 = vpop.f32.mrf.mxu0  ;;  %v1319_v17 = vpop.f32.mrf.mxu1  ;;  %9654 = vmatmul.mubr.msk.f32.gmra.mxu0 %vm377_vm0, %v10395_v19 }
 0x185   : > { %v7523_v21 = vadd.f32 %v7522_v54, %v6971_v61  ;;  %v7661_v22 = vadd.f32 %v7660_v55, %v6973_v0  ;;  %v6986_v23 = vmax.f32 %v5962_v4, 0.0  ;;  %v6988_v24 = vmax.f32 %v5964_v5, 0.0  ;;  %9718 = vmatmul.mubr.msk.f32.gmra.mxu1 %vm377_vm0, %v10395_v19  ;;  %1676 = vmatprep.mubr.f32.mxu0 %v10663_v6  ;;  %v10397_v4 = vld [vmem:[%s10776_s30 + $0xc8] sm:$0xff] }
 0x186   : > { %v5963_v25 = vadd.f32 %v11102_v18, %v4855_v14  ;;  %v5965_v26 = vadd.f32 %v11105_v20, %v4857_v15  ;;  %v4870_v27 = vmul.f32 %v11073_v3, %v870_v16  ;;  %v4872_v28 = vmul.f32 %v11080_v7, %v1319_v17  ;;  %v872_v29 = vpop.f32.mrf.mxu0  ;;  %v1321_v30 = vpop.f32.mrf.mxu1  ;;  %2125 = vmatprep.mubr.f32.mxu1 %v10663_v6 }
 0x187   : > { %v7455_v31 = vadd.f32 %v7454_v10, %v6986_v23  ;;  %v7593_v32 = vadd.f32 %v7592_v12, %v6988_v24  ;;  %v4871_v33 = vmul.f32 %v11083_v8, %v872_v29  ;;  %v4873_v34 = vmul.f32 %v11086_v9, %v1321_v30 }
 0x188   : > { %v6987_v35 = vmax.f32 %v5963_v25, 0.0  ;;  %v6989_v36 = vmax.f32 %v5965_v26, 0.0  ;;  %v5978_v37 = vadd.f32 %v11089_v11, %v4870_v27  ;;  %v5980_v38 = vadd.f32 %v11093_v13, %v4872_v28  ;;  %v876_v39 = vpop.f32.mrf.mxu0  ;;  %v1325_v40 = vpop.f32.mrf.mxu1  ;;  %9655 = vmatmul.mubr.msk.f32.gmra.mxu0 %vm377_vm0, %v10396_v41 }
 0x189   : > { %v5979_v42 = vadd.f32 %v11102_v18, %v4871_v33  ;;  %v5981_v43 = vadd.f32 %v11105_v20, %v4873_v34  ;;  %v4886_v44 = vmul.f32 %v11073_v3, %v876_v39  ;;  %v4888_v45 = vmul.f32 %v11080_v7, %v1325_v40  ;;  %9719 = vmatmul.mubr.msk.f32.gmra.mxu1 %vm377_vm0, %v10396_v41  ;;  %v10398_v33 = vld [vmem:[%s10776_s30 + $0xd0] sm:$0xff] }
 0x18a   : > { %v7524_v46 = vadd.f32 %v7523_v21, %v6987_v35  ;;  %v7662_v47 = vadd.f32 %v7661_v22, %v6989_v36  ;;  %v7002_v48 = vmax.f32 %v5978_v37, 0.0  ;;  %v7004_v49 = vmax.f32 %v5980_v38, 0.0  ;;  %v878_v50 = vpop.f32.mrf.mxu0  ;;  %v1327_v51 = vpop.f32.mrf.mxu1  ;;  %1682 = vmatprep.mubr.f32.mxu0 %v10663_v6  ;;  %2131 = vmatprep.mubr.f32.mxu1 %v10663_v6 }
 0x18b   : > { %v7003_v52 = vmax.f32 %v5979_v42, 0.0  ;;  %v7005_v53 = vmax.f32 %v5981_v43, 0.0  ;;  %v5994_v54 = vadd.f32 %v11089_v11, %v4886_v44  ;;  %v5996_v55 = vadd.f32 %v11093_v13, %v4888_v45 }
 0x18c   : > { %v7456_v56 = vadd.f32 %v7455_v31, %v7002_v48  ;;  %v7594_v57 = vadd.f32 %v7593_v32, %v7004_v49  ;;  %v4887_v58 = vmul.f32 %v11083_v8, %v878_v50  ;;  %v4889_v59 = vmul.f32 %v11086_v9, %v1327_v51  ;;  %v882_v61 = vpop.f32.mrf.mxu0  ;;  %v1331_v0 = vpop.f32.mrf.mxu1  ;;  %9656 = vmatmul.mubr.msk.f32.gmra.mxu0 %vm377_vm0, %v10397_v4 }
 0x18d   : > { %v7525_v5 = vadd.f32 %v7524_v46, %v7003_v52  ;;  %v7663_v10 = vadd.f32 %v7662_v47, %v7005_v53  ;;  %v7018_v12 = vmax.f32 %v5994_v54, 0.0  ;;  %v7020_v14 = vmax.f32 %v5996_v55, 0.0  ;;  %9720 = vmatmul.mubr.msk.f32.gmra.mxu1 %vm377_vm0, %v10397_v4  ;;  %1688 = vmatprep.mubr.f32.mxu0 %v10663_v6  ;;  %v10399_v54 = vld [vmem:[%s10776_s30 + $0xd8] sm:$0xff] }
 0x18e   : > { %v5995_v15 = vadd.f32 %v11102_v18, %v4887_v58  ;;  %v5997_v16 = vadd.f32 %v11105_v20, %v4889_v59  ;;  %v4902_v17 = vmul.f32 %v11073_v3, %v882_v61  ;;  %v4904_v19 = vmul.f32 %v11080_v7, %v1331_v0  ;;  %v884_v21 = vpop.f32.mrf.mxu0  ;;  %v1333_v22 = vpop.f32.mrf.mxu1  ;;  %2137 = vmatprep.mubr.f32.mxu1 %v10663_v6 }
 0x18f   : > { %v7457_v23 = vadd.f32 %v7456_v56, %v7018_v12  ;;  %v7595_v24 = vadd.f32 %v7594_v57, %v7020_v14  ;;  %v4903_v25 = vmul.f32 %v11083_v8, %v884_v21  ;;  %v4905_v26 = vmul.f32 %v11086_v9, %v1333_v22 }
 0x190   : > { %v7019_v27 = vmax.f32 %v5995_v15, 0.0  ;;  %v7021_v28 = vmax.f32 %v5997_v16, 0.0  ;;  %v6010_v29 = vadd.f32 %v11089_v11, %v4902_v17  ;;  %v6012_v30 = vadd.f32 %v11093_v13, %v4904_v19  ;;  %v888_v31 = vpop.f32.mrf.mxu0  ;;  %v1337_v32 = vpop.f32.mrf.mxu1  ;;  %9657 = vmatmul.mubr.msk.f32.gmra.mxu0 %vm377_vm0, %v10398_v33 }
 0x191   : > { %v6011_v34 = vadd.f32 %v11102_v18, %v4903_v25  ;;  %v6013_v35 = vadd.f32 %v11105_v20, %v4905_v26  ;;  %v4918_v36 = vmul.f32 %v11073_v3, %v888_v31  ;;  %v4920_v37 = vmul.f32 %v11080_v7, %v1337_v32  ;;  %9721 = vmatmul.mubr.msk.f32.gmra.mxu1 %vm377_vm0, %v10398_v33  ;;  %v10400_v25 = vld [vmem:[%s10776_s30 + $0xe0] sm:$0xff] }
 0x192   : > { %v7526_v38 = vadd.f32 %v7525_v5, %v7019_v27  ;;  %v7664_v39 = vadd.f32 %v7663_v10, %v7021_v28  ;;  %v7034_v40 = vmax.f32 %v6010_v29, 0.0  ;;  %v7036_v41 = vmax.f32 %v6012_v30, 0.0  ;;  %v890_v42 = vpop.f32.mrf.mxu0  ;;  %v1339_v43 = vpop.f32.mrf.mxu1  ;;  %1694 = vmatprep.mubr.f32.mxu0 %v10663_v6  ;;  %2143 = vmatprep.mubr.f32.mxu1 %v10663_v6 }
 0x193   : > { %v7035_v44 = vmax.f32 %v6011_v34, 0.0  ;;  %v7037_v45 = vmax.f32 %v6013_v35, 0.0  ;;  %v6026_v46 = vadd.f32 %v11089_v11, %v4918_v36  ;;  %v6028_v47 = vadd.f32 %v11093_v13, %v4920_v37 }
 0x194   : > { %v7458_v48 = vadd.f32 %v7457_v23, %v7034_v40  ;;  %v7596_v49 = vadd.f32 %v7595_v24, %v7036_v41  ;;  %v4919_v50 = vmul.f32 %v11083_v8, %v890_v42  ;;  %v4921_v51 = vmul.f32 %v11086_v9, %v1339_v43  ;;  %v894_v52 = vpop.f32.mrf.mxu0  ;;  %v1343_v53 = vpop.f32.mrf.mxu1  ;;  %9658 = vmatmul.mubr.msk.f32.gmra.mxu0 %vm377_vm0, %v10399_v54 }
 0x195   : > { %v7527_v55 = vadd.f32 %v7526_v38, %v7035_v44  ;;  %v7665_v56 = vadd.f32 %v7664_v39, %v7037_v45  ;;  %v7050_v57 = vmax.f32 %v6026_v46, 0.0  ;;  %v7052_v58 = vmax.f32 %v6028_v47, 0.0  ;;  %9722 = vmatmul.mubr.msk.f32.gmra.mxu1 %vm377_vm0, %v10399_v54  ;;  %1700 = vmatprep.mubr.f32.mxu0 %v10663_v6  ;;  %v10401_v46 = vld [vmem:[%s10776_s30 + $0xe8] sm:$0xff] }
 0x196   : > { %v6027_v59 = vadd.f32 %v11102_v18, %v4919_v50  ;;  %v6029_v61 = vadd.f32 %v11105_v20, %v4921_v51  ;;  %v4934_v0 = vmul.f32 %v11073_v3, %v894_v52  ;;  %v4936_v4 = vmul.f32 %v11080_v7, %v1343_v53  ;;  %v896_v5 = vpop.f32.mrf.mxu0  ;;  %v1345_v10 = vpop.f32.mrf.mxu1  ;;  %2149 = vmatprep.mubr.f32.mxu1 %v10663_v6 }
 0x197   : > { %v7459_v12 = vadd.f32 %v7458_v48, %v7050_v57  ;;  %v7597_v14 = vadd.f32 %v7596_v49, %v7052_v58  ;;  %v4935_v15 = vmul.f32 %v11083_v8, %v896_v5  ;;  %v4937_v16 = vmul.f32 %v11086_v9, %v1345_v10 }
 0x198   : > { %v7051_v17 = vmax.f32 %v6027_v59, 0.0  ;;  %v7053_v19 = vmax.f32 %v6029_v61, 0.0  ;;  %v6042_v21 = vadd.f32 %v11089_v11, %v4934_v0  ;;  %v6044_v22 = vadd.f32 %v11093_v13, %v4936_v4  ;;  %v900_v23 = vpop.f32.mrf.mxu0  ;;  %v1349_v24 = vpop.f32.mrf.mxu1  ;;  %9659 = vmatmul.mubr.msk.f32.gmra.mxu0 %vm377_vm0, %v10400_v25 }
 0x199   : > { %v6043_v26 = vadd.f32 %v11102_v18, %v4935_v15  ;;  %v6045_v27 = vadd.f32 %v11105_v20, %v4937_v16  ;;  %v4950_v28 = vmul.f32 %v11073_v3, %v900_v23  ;;  %v4952_v29 = vmul.f32 %v11080_v7, %v1349_v24  ;;  %9723 = vmatmul.mubr.msk.f32.gmra.mxu1 %vm377_vm0, %v10400_v25  ;;  %v10402_v15 = vld [vmem:[%s10776_s30 + $0xf0] sm:$0xff] }
 0x19a   : > { %v7528_v30 = vadd.f32 %v7527_v55, %v7051_v17  ;;  %v7666_v31 = vadd.f32 %v7665_v56, %v7053_v19  ;;  %v7066_v32 = vmax.f32 %v6042_v21, 0.0  ;;  %v7068_v33 = vmax.f32 %v6044_v22, 0.0  ;;  %v902_v34 = vpop.f32.mrf.mxu0  ;;  %v1351_v35 = vpop.f32.mrf.mxu1  ;;  %1706 = vmatprep.mubr.f32.mxu0 %v10663_v6  ;;  %2155 = vmatprep.mubr.f32.mxu1 %v10663_v6 }
 0x19b   : > { %v7067_v36 = vmax.f32 %v6043_v26, 0.0  ;;  %v7069_v37 = vmax.f32 %v6045_v27, 0.0  ;;  %v6058_v38 = vadd.f32 %v11089_v11, %v4950_v28  ;;  %v6060_v39 = vadd.f32 %v11093_v13, %v4952_v29 }
 0x19c   : > { %v7460_v40 = vadd.f32 %v7459_v12, %v7066_v32  ;;  %v7598_v41 = vadd.f32 %v7597_v14, %v7068_v33  ;;  %v4951_v42 = vmul.f32 %v11083_v8, %v902_v34  ;;  %v4953_v43 = vmul.f32 %v11086_v9, %v1351_v35  ;;  %v906_v44 = vpop.f32.mrf.mxu0  ;;  %v1355_v45 = vpop.f32.mrf.mxu1  ;;  %9660 = vmatmul.mubr.msk.f32.gmra.mxu0 %vm377_vm0, %v10401_v46 }
 0x19d   : > { %v7529_v47 = vadd.f32 %v7528_v30, %v7067_v36  ;;  %v7667_v48 = vadd.f32 %v7666_v31, %v7069_v37  ;;  %v7082_v49 = vmax.f32 %v6058_v38, 0.0  ;;  %v7084_v50 = vmax.f32 %v6060_v39, 0.0  ;;  %9724 = vmatmul.mubr.msk.f32.gmra.mxu1 %vm377_vm0, %v10401_v46  ;;  %1712 = vmatprep.mubr.f32.mxu0 %v10663_v6  ;;  %v10403_v38 = vld [vmem:[%s10776_s30 + $0xf8] sm:$0xff] }
 0x19e   : > { %v6059_v51 = vadd.f32 %v11102_v18, %v4951_v42  ;;  %v6061_v52 = vadd.f32 %v11105_v20, %v4953_v43  ;;  %v4966_v53 = vmul.f32 %v11073_v3, %v906_v44  ;;  %v4968_v54 = vmul.f32 %v11080_v7, %v1355_v45  ;;  %v908_v55 = vpop.f32.mrf.mxu0  ;;  %v1357_v56 = vpop.f32.mrf.mxu1  ;;  %2161 = vmatprep.mubr.f32.mxu1 %v10663_v6 }
 0x19f   : > { %v7461_v57 = vadd.f32 %v7460_v40, %v7082_v49  ;;  %v7599_v58 = vadd.f32 %v7598_v41, %v7084_v50  ;;  %v4967_v59 = vmul.f32 %v11083_v8, %v908_v55  ;;  %v4969_v61 = vmul.f32 %v11086_v9, %v1357_v56 }
 0x1a0   : > { %v7083_v0 = vmax.f32 %v6059_v51, 0.0  ;;  %v7085_v4 = vmax.f32 %v6061_v52, 0.0  ;;  %v6074_v5 = vadd.f32 %v11089_v11, %v4966_v53  ;;  %v6076_v10 = vadd.f32 %v11093_v13, %v4968_v54  ;;  %v912_v12 = vpop.f32.mrf.mxu0  ;;  %v1361_v14 = vpop.f32.mrf.mxu1  ;;  %9661 = vmatmul.mubr.msk.f32.gmra.mxu0 %vm377_vm0, %v10402_v15 }
 0x1a1   : > { %v6075_v16 = vadd.f32 %v11102_v18, %v4967_v59  ;;  %v6077_v17 = vadd.f32 %v11105_v20, %v4969_v61  ;;  %v4982_v19 = vmul.f32 %v11073_v3, %v912_v12  ;;  %v4984_v21 = vmul.f32 %v11080_v7, %v1361_v14  ;;  %9725 = vmatmul.mubr.msk.f32.gmra.mxu1 %vm377_vm0, %v10402_v15  ;;  %v10404_v59 = vld [vmem:[%s10776_s30 + $0x100] sm:$0xff] }
 0x1a2   : > { %v7530_v22 = vadd.f32 %v7529_v47, %v7083_v0  ;;  %v7668_v23 = vadd.f32 %v7667_v48, %v7085_v4  ;;  %v7098_v24 = vmax.f32 %v6074_v5, 0.0  ;;  %v7100_v25 = vmax.f32 %v6076_v10, 0.0  ;;  %v914_v26 = vpop.f32.mrf.mxu0  ;;  %v1363_v27 = vpop.f32.mrf.mxu1  ;;  %1718 = vmatprep.mubr.f32.mxu0 %v10663_v6  ;;  %2167 = vmatprep.mubr.f32.mxu1 %v10663_v6 }
 0x1a3   : > { %v7099_v28 = vmax.f32 %v6075_v16, 0.0  ;;  %v7101_v29 = vmax.f32 %v6077_v17, 0.0  ;;  %v6090_v30 = vadd.f32 %v11089_v11, %v4982_v19  ;;  %v6092_v31 = vadd.f32 %v11093_v13, %v4984_v21 }
 0x1a4   : > { %v7462_v32 = vadd.f32 %v7461_v57, %v7098_v24  ;;  %v7600_v33 = vadd.f32 %v7599_v58, %v7100_v25  ;;  %v4983_v34 = vmul.f32 %v11083_v8, %v914_v26  ;;  %v4985_v35 = vmul.f32 %v11086_v9, %v1363_v27  ;;  %v918_v36 = vpop.f32.mrf.mxu0  ;;  %v1367_v37 = vpop.f32.mrf.mxu1  ;;  %9662 = vmatmul.mubr.msk.f32.gmra.mxu0 %vm377_vm0, %v10403_v38 }
 0x1a5   : > { %v7531_v39 = vadd.f32 %v7530_v22, %v7099_v28  ;;  %v7669_v40 = vadd.f32 %v7668_v23, %v7101_v29  ;;  %v7114_v41 = vmax.f32 %v6090_v30, 0.0  ;;  %v7116_v42 = vmax.f32 %v6092_v31, 0.0  ;;  %9726 = vmatmul.mubr.msk.f32.gmra.mxu1 %vm377_vm0, %v10403_v38  ;;  %1724 = vmatprep.mubr.f32.mxu0 %v10663_v6  ;;  %v10405_v30 = vld [vmem:[%s10776_s30 + $0x108] sm:$0xff] }
 0x1a6   : > { %v6091_v43 = vadd.f32 %v11102_v18, %v4983_v34  ;;  %v6093_v44 = vadd.f32 %v11105_v20, %v4985_v35  ;;  %v4998_v45 = vmul.f32 %v11073_v3, %v918_v36  ;;  %v5000_v46 = vmul.f32 %v11080_v7, %v1367_v37  ;;  %v920_v47 = vpop.f32.mrf.mxu0  ;;  %v1369_v48 = vpop.f32.mrf.mxu1  ;;  %2173 = vmatprep.mubr.f32.mxu1 %v10663_v6 }
 0x1a7   : > { %v7463_v49 = vadd.f32 %v7462_v32, %v7114_v41  ;;  %v7601_v50 = vadd.f32 %v7600_v33, %v7116_v42  ;;  %v4999_v51 = vmul.f32 %v11083_v8, %v920_v47  ;;  %v5001_v52 = vmul.f32 %v11086_v9, %v1369_v48 }
 0x1a8   : > { %v7115_v53 = vmax.f32 %v6091_v43, 0.0  ;;  %v7117_v54 = vmax.f32 %v6093_v44, 0.0  ;;  %v6106_v55 = vadd.f32 %v11089_v11, %v4998_v45  ;;  %v6108_v56 = vadd.f32 %v11093_v13, %v5000_v46  ;;  %v924_v57 = vpop.f32.mrf.mxu0  ;;  %v1373_v58 = vpop.f32.mrf.mxu1  ;;  %9663 = vmatmul.mubr.msk.f32.gmra.mxu0 %vm377_vm0, %v10404_v59 }
 0x1a9   : > { %v6107_v61 = vadd.f32 %v11102_v18, %v4999_v51  ;;  %v6109_v0 = vadd.f32 %v11105_v20, %v5001_v52  ;;  %v5014_v4 = vmul.f32 %v11073_v3, %v924_v57  ;;  %v5016_v5 = vmul.f32 %v11080_v7, %v1373_v58  ;;  %9727 = vmatmul.mubr.msk.f32.gmra.mxu1 %vm377_vm0, %v10404_v59  ;;  %v10406_v51 = vld [vmem:[%s10776_s30 + $0x110] sm:$0xff] }
 0x1aa   : > { %v7532_v10 = vadd.f32 %v7531_v39, %v7115_v53  ;;  %v7670_v12 = vadd.f32 %v7669_v40, %v7117_v54  ;;  %v7130_v14 = vmax.f32 %v6106_v55, 0.0  ;;  %v7132_v15 = vmax.f32 %v6108_v56, 0.0  ;;  %v926_v16 = vpop.f32.mrf.mxu0  ;;  %v1375_v17 = vpop.f32.mrf.mxu1  ;;  %1730 = vmatprep.mubr.f32.mxu0 %v10663_v6  ;;  %2179 = vmatprep.mubr.f32.mxu1 %v10663_v6 }
 0x1ab   : > { %v7131_v19 = vmax.f32 %v6107_v61, 0.0  ;;  %v7133_v21 = vmax.f32 %v6109_v0, 0.0  ;;  %v6122_v22 = vadd.f32 %v11089_v11, %v5014_v4  ;;  %v6124_v23 = vadd.f32 %v11093_v13, %v5016_v5 }
 0x1ac   : > { %v7464_v24 = vadd.f32 %v7463_v49, %v7130_v14  ;;  %v7602_v25 = vadd.f32 %v7601_v50, %v7132_v15  ;;  %v5015_v26 = vmul.f32 %v11083_v8, %v926_v16  ;;  %v5017_v27 = vmul.f32 %v11086_v9, %v1375_v17  ;;  %v930_v28 = vpop.f32.mrf.mxu0  ;;  %v1379_v29 = vpop.f32.mrf.mxu1  ;;  %9664 = vmatmul.mubr.msk.f32.gmra.mxu0 %vm377_vm0, %v10405_v30 }
 0x1ad   : > { %v7533_v31 = vadd.f32 %v7532_v10, %v7131_v19  ;;  %v7671_v32 = vadd.f32 %v7670_v12, %v7133_v21  ;;  %v7146_v33 = vmax.f32 %v6122_v22, 0.0  ;;  %v7148_v34 = vmax.f32 %v6124_v23, 0.0  ;;  %9728 = vmatmul.mubr.msk.f32.gmra.mxu1 %vm377_vm0, %v10405_v30  ;;  %1736 = vmatprep.mubr.f32.mxu0 %v10663_v6  ;;  %v10407_v21 = vld [vmem:[%s10776_s30 + $0x118] sm:$0xff] }
 0x1ae   : > { %v6123_v35 = vadd.f32 %v11102_v18, %v5015_v26  ;;  %v6125_v36 = vadd.f32 %v11105_v20, %v5017_v27  ;;  %v5030_v37 = vmul.f32 %v11073_v3, %v930_v28  ;;  %v5032_v38 = vmul.f32 %v11080_v7, %v1379_v29  ;;  %v932_v39 = vpop.f32.mrf.mxu0  ;;  %v1381_v40 = vpop.f32.mrf.mxu1  ;;  %2185 = vmatprep.mubr.f32.mxu1 %v10663_v6 }
 0x1af   : > { %v7465_v41 = vadd.f32 %v7464_v24, %v7146_v33  ;;  %v7603_v42 = vadd.f32 %v7602_v25, %v7148_v34  ;;  %v5031_v43 = vmul.f32 %v11083_v8, %v932_v39  ;;  %v5033_v44 = vmul.f32 %v11086_v9, %v1381_v40 }
 0x1b0   : > { %v7147_v45 = vmax.f32 %v6123_v35, 0.0  ;;  %v7149_v46 = vmax.f32 %v6125_v36, 0.0  ;;  %v6138_v47 = vadd.f32 %v11089_v11, %v5030_v37  ;;  %v6140_v48 = vadd.f32 %v11093_v13, %v5032_v38  ;;  %v936_v49 = vpop.f32.mrf.mxu0  ;;  %v1385_v50 = vpop.f32.mrf.mxu1  ;;  %9665 = vmatmul.mubr.msk.f32.gmra.mxu0 %vm377_vm0, %v10406_v51 }
 0x1b1   : > { %v6139_v52 = vadd.f32 %v11102_v18, %v5031_v43  ;;  %v6141_v53 = vadd.f32 %v11105_v20, %v5033_v44  ;;  %v5046_v54 = vmul.f32 %v11073_v3, %v936_v49  ;;  %v5048_v55 = vmul.f32 %v11080_v7, %v1385_v50  ;;  %9729 = vmatmul.mubr.msk.f32.gmra.mxu1 %vm377_vm0, %v10406_v51 }
 0x1b2   : > { %v7534_v56 = vadd.f32 %v7533_v31, %v7147_v45  ;;  %v7672_v57 = vadd.f32 %v7671_v32, %v7149_v46  ;;  %v7162_v58 = vmax.f32 %v6138_v47, 0.0  ;;  %v7164_v59 = vmax.f32 %v6140_v48, 0.0  ;;  %v938_v61 = vpop.f32.mrf.mxu0  ;;  %v1387_v0 = vpop.f32.mrf.mxu1  ;;  %1742 = vmatprep.mubr.f32.mxu0 %v10663_v6  ;;  %2191 = vmatprep.mubr.f32.mxu1 %v10663_v6 }
 0x1b3   : > { %v7163_v4 = vmax.f32 %v6139_v52, 0.0  ;;  %v7165_v5 = vmax.f32 %v6141_v53, 0.0  ;;  %v6154_v10 = vadd.f32 %v11089_v11, %v5046_v54  ;;  %v6156_v12 = vadd.f32 %v11093_v13, %v5048_v55  ;;  %v374_v53 = vld [vmem:[%s16979_s1 + $0x68] sm:$0xff]  ;;  %v376_v54 = vld [vmem:[%s16979_s1 + $0x78] sm:$0xff] }
 0x1b4   : > { %v7466_v14 = vadd.f32 %v7465_v41, %v7162_v58  ;;  %v7604_v15 = vadd.f32 %v7603_v42, %v7164_v59  ;;  %v5047_v16 = vmul.f32 %v11083_v8, %v938_v61  ;;  %v5049_v17 = vmul.f32 %v11086_v9, %v1387_v0  ;;  %v942_v19 = vpop.f32.mrf.mxu0  ;;  %9666 = vmatmul.mubr.msk.f32.gmra.mxu0 %vm377_vm0, %v10407_v21  ;;  %v10408_v42 = vld [vmem:[%s10776_s30 + $0x120] sm:$0xff] }
 0x1b5   : > { %v7535_v22 = vadd.f32 %v7534_v56, %v7163_v4  ;;  %v7673_v23 = vadd.f32 %v7672_v57, %v7165_v5  ;;  %v7178_v24 = vmax.f32 %v6154_v10, 0.0  ;;  %v7180_v25 = vmax.f32 %v6156_v12, 0.0  ;;  %v1391_v26 = vpop.f32.mrf.mxu1  ;;  %9730 = vmatmul.mubr.msk.f32.gmra.mxu1 %vm377_vm0, %v10407_v21  ;;  %1748 = vmatprep.mubr.f32.mxu0 %v10663_v6  ;;  %v10409_v12 = vld [vmem:[%s10776_s30 + $0x128] sm:$0xff] }
 0x1b6   : > { %v6155_v27 = vadd.f32 %v11102_v18, %v5047_v16  ;;  %v6157_v28 = vadd.f32 %v11105_v20, %v5049_v17  ;;  %v5062_v29 = vmul.f32 %v11073_v3, %v942_v19  ;;  %v5064_v30 = vmul.f32 %v11080_v7, %v1391_v26  ;;  %v944_v31 = vpop.f32.mrf.mxu0  ;;  %2197 = vmatprep.mubr.f32.mxu1 %v10663_v6 }
 0x1b7   : > { %v7467_v32 = vadd.f32 %v7466_v14, %v7178_v24  ;;  %v7605_v33 = vadd.f32 %v7604_v15, %v7180_v25  ;;  %v5063_v34 = vmul.f32 %v11083_v8, %v944_v31  ;;  %v1393_v35 = vpop.f32.mrf.mxu1  ;;  %v11777_v36 = vsub.s32 4, %v11046_v60  ;;  %3294 = vmatprep.subr.mxu0 %v374_v53  ;;  %3743 = vmatprep.subr.mxu1 %v376_v54 }
 0x1b8   : > { %v7179_v37 = vmax.f32 %v6155_v27, 0.0  ;;  %v7181_v38 = vmax.f32 %v6157_v28, 0.0  ;;  %v6170_v39 = vadd.f32 %v11089_v11, %v5062_v29  ;;  %v6172_v40 = vadd.f32 %v11093_v13, %v5064_v30  ;;  %v948_v41 = vpop.f32.mrf.mxu0  ;;  %9667 = vmatmul.mubr.msk.f32.gmra.mxu0 %vm377_vm0, %v10408_v42 }
 0x1b9   : > { %v6171_v43 = vadd.f32 %v11102_v18, %v5063_v34  ;;  %v5065_v44 = vmul.f32 %v11086_v9, %v1393_v35  ;;  %v5078_v45 = vmul.f32 %v11073_v3, %v948_v41  ;;  %v1397_v46 = vpop.f32.mrf.mxu1  ;;  %9731 = vmatmul.mubr.msk.f32.gmra.mxu1 %vm377_vm0, %v10408_v42  ;;  %1754 = vmatprep.mubr.f32.mxu0 %v10663_v6  ;;  %v11789_v47 = vsub.s32 6, %v11046_v60 }
 0x1ba   : > { %v7536_v48 = vadd.f32 %v7535_v22, %v7179_v37  ;;  %v7674_v49 = vadd.f32 %v7673_v23, %v7181_v38  ;;  %v7194_v50 = vmax.f32 %v6170_v39, 0.0  ;;  %v7196_v51 = vmax.f32 %v6172_v40, 0.0  ;;  %v950_v52 = vpop.f32.mrf.mxu0  ;;  %2203 = vmatprep.mubr.f32.mxu1 %v10663_v6  ;;  %v10410_v37 = vld [vmem:[%s10776_s30 + $0x130] sm:$0xff] }
 0x1bb   : > { %v7195_v55 = vmax.f32 %v6171_v43, 0.0  ;;  %v6173_v56 = vadd.f32 %v11105_v20, %v5065_v44  ;;  %v6186_v57 = vadd.f32 %v11089_v11, %v5078_v45  ;;  %v5080_v58 = vmul.f32 %v11080_v7, %v1397_v46  ;;  %v1399_v59 = vpop.f32.mrf.mxu1 }
 0x1bc   : > { %v7468_v61 = vadd.f32 %v7467_v32, %v7194_v50  ;;  %v7606_v0 = vadd.f32 %v7605_v33, %v7196_v51  ;;  %v5079_v4 = vmul.f32 %v11083_v8, %v950_v52  ;;  %v5081_v5 = vmul.f32 %v11086_v9, %v1399_v59  ;;  %v954_v10 = vpop.f32.mrf.mxu0  ;;  %9668 = vmatmul.mubr.msk.f32.gmra.mxu0 %vm377_vm0, %v10409_v12  ;;  %v10411_v59 = vld [vmem:[%s10776_s30 + $0x138] sm:$0xff] }
 0x1bd   : > { %v7537_v14 = vadd.f32 %v7536_v48, %v7195_v55  ;;  %v7197_v15 = vmax.f32 %v6173_v56, 0.0  ;;  %v7210_v16 = vmax.f32 %v6186_v57, 0.0  ;;  %v6188_v17 = vadd.f32 %v11093_v13, %v5080_v58  ;;  %v1403_v19 = vpop.f32.mrf.mxu1  ;;  %9732 = vmatmul.mubr.msk.f32.gmra.mxu1 %vm377_vm0, %v10409_v12  ;;  %1760 = vmatprep.mubr.f32.mxu0 %v10663_v6 }
 0x1be   : > { %v6187_v21 = vadd.f32 %v11102_v18, %v5079_v4  ;;  %v6189_v22 = vadd.f32 %v11105_v20, %v5081_v5  ;;  %v5094_v23 = vmul.f32 %v11073_v3, %v954_v10  ;;  %v5096_v24 = vmul.f32 %v11080_v7, %v1403_v19  ;;  %v956_v25 = vpop.f32.mrf.mxu0  ;;  %2209 = vmatprep.mubr.f32.mxu1 %v10663_v6 }
 0x1bf   : > { %v7675_v26 = vadd.f32 %v7674_v49, %v7197_v15  ;;  %v7469_v27 = vadd.f32 %v7468_v61, %v7210_v16  ;;  %v7212_v28 = vmax.f32 %v6188_v17, 0.0  ;;  %v5095_v29 = vmul.f32 %v11083_v8, %v956_v25  ;;  %v1405_v30 = vpop.f32.mrf.mxu1 }
 0x1c0   : > { %v7211_v31 = vmax.f32 %v6187_v21, 0.0  ;;  %v7213_v32 = vmax.f32 %v6189_v22, 0.0  ;;  %v6202_v33 = vadd.f32 %v11089_v11, %v5094_v23  ;;  %v6204_v34 = vadd.f32 %v11093_v13, %v5096_v24  ;;  %v960_v35 = vpop.f32.mrf.mxu0  ;;  %9669 = vmatmul.mubr.msk.f32.gmra.mxu0 %vm377_vm0, %v10410_v37 }
 0x1c1   : > { %v7607_v38 = vadd.f32 %v7606_v0, %v7212_v28  ;;  %v6203_v39 = vadd.f32 %v11102_v18, %v5095_v29  ;;  %v5097_v40 = vmul.f32 %v11086_v9, %v1405_v30  ;;  %v5110_v41 = vmul.f32 %v11073_v3, %v960_v35  ;;  %v1409_v42 = vpop.f32.mrf.mxu1  ;;  %9733 = vmatmul.mubr.msk.f32.gmra.mxu1 %vm377_vm0, %v10410_v37  ;;  %v10412_v30 = vld [vmem:[%s10776_s30 + $0x140] sm:$0xff] }
 0x1c2   : > { %v7538_v43 = vadd.f32 %v7537_v14, %v7211_v31  ;;  %v7676_v44 = vadd.f32 %v7675_v26, %v7213_v32  ;;  %v7226_v45 = vmax.f32 %v6202_v33, 0.0  ;;  %v7228_v46 = vmax.f32 %v6204_v34, 0.0  ;;  %v962_v48 = vpop.f32.mrf.mxu0  ;;  %1766 = vmatprep.mubr.f32.mxu0 %v10663_v6  ;;  %2215 = vmatprep.mubr.f32.mxu1 %v10663_v6 }
 0x1c3   : > { %v7227_v49 = vmax.f32 %v6203_v39, 0.0  ;;  %v6205_v50 = vadd.f32 %v11105_v20, %v5097_v40  ;;  %v6218_v51 = vadd.f32 %v11089_v11, %v5110_v41  ;;  %v5112_v52 = vmul.f32 %v11080_v7, %v1409_v42  ;;  %v1411_v53 = vpop.f32.mrf.mxu1 }
 0x1c4   : > { %v7470_v54 = vadd.f32 %v7469_v27, %v7226_v45  ;;  %v7608_v55 = vadd.f32 %v7607_v38, %v7228_v46  ;;  %v5111_v56 = vmul.f32 %v11083_v8, %v962_v48  ;;  %v5113_v57 = vmul.f32 %v11086_v9, %v1411_v53  ;;  %v966_v58 = vpop.f32.mrf.mxu0  ;;  %9670 = vmatmul.mubr.msk.f32.gmra.mxu0 %vm377_vm0, %v10411_v59  ;;  %v10413_v53 = vld [vmem:[%s10776_s30 + $0x148] sm:$0xff] }
 0x1c5   : > { %v7539_v61 = vadd.f32 %v7538_v43, %v7227_v49  ;;  %v7229_v0 = vmax.f32 %v6205_v50, 0.0  ;;  %v7242_v4 = vmax.f32 %v6218_v51, 0.0  ;;  %v6220_v5 = vadd.f32 %v11093_v13, %v5112_v52  ;;  %v1415_v10 = vpop.f32.mrf.mxu1  ;;  %9734 = vmatmul.mubr.msk.f32.gmra.mxu1 %vm377_vm0, %v10411_v59  ;;  %1772 = vmatprep.mubr.f32.mxu0 %v10663_v6 }
 0x1c6   : > { %v6219_v12 = vadd.f32 %v11102_v18, %v5111_v56  ;;  %v6221_v14 = vadd.f32 %v11105_v20, %v5113_v57  ;;  %v5126_v15 = vmul.f32 %v11073_v3, %v966_v58  ;;  %v5128_v16 = vmul.f32 %v11080_v7, %v1415_v10  ;;  %v968_v17 = vpop.f32.mrf.mxu0  ;;  %2221 = vmatprep.mubr.f32.mxu1 %v10663_v6 }
 0x1c7   : > { %v7677_v19 = vadd.f32 %v7676_v44, %v7229_v0  ;;  %v7471_v21 = vadd.f32 %v7470_v54, %v7242_v4  ;;  %v7244_v22 = vmax.f32 %v6220_v5, 0.0  ;;  %v5127_v23 = vmul.f32 %v11083_v8, %v968_v17  ;;  %v1417_v24 = vpop.f32.mrf.mxu1 }
 0x1c8   : > { %v7243_v25 = vmax.f32 %v6219_v12, 0.0  ;;  %v7245_v26 = vmax.f32 %v6221_v14, 0.0  ;;  %v6234_v27 = vadd.f32 %v11089_v11, %v5126_v15  ;;  %v6236_v28 = vadd.f32 %v11093_v13, %v5128_v16  ;;  %v972_v29 = vpop.f32.mrf.mxu0  ;;  %9671 = vmatmul.mubr.msk.f32.gmra.mxu0 %vm377_vm0, %v10412_v30 }
 0x1c9   : > { %v7609_v31 = vadd.f32 %v7608_v55, %v7244_v22  ;;  %v6235_v32 = vadd.f32 %v11102_v18, %v5127_v23  ;;  %v5129_v33 = vmul.f32 %v11086_v9, %v1417_v24  ;;  %v5142_v34 = vmul.f32 %v11073_v3, %v972_v29  ;;  %v1421_v35 = vpop.f32.mrf.mxu1  ;;  %9735 = vmatmul.mubr.msk.f32.gmra.mxu1 %vm377_vm0, %v10412_v30  ;;  %v10414_v24 = vld [vmem:[%s10776_s30 + $0x150] sm:$0xff] }
 0x1ca   : > { %v7540_v37 = vadd.f32 %v7539_v61, %v7243_v25  ;;  %v7678_v38 = vadd.f32 %v7677_v19, %v7245_v26  ;;  %v7258_v39 = vmax.f32 %v6234_v27, 0.0  ;;  %v7260_v40 = vmax.f32 %v6236_v28, 0.0  ;;  %v974_v41 = vpop.f32.mrf.mxu0  ;;  %1778 = vmatprep.mubr.f32.mxu0 %v10663_v6  ;;  %2227 = vmatprep.mubr.f32.mxu1 %v10663_v6 }
 0x1cb   : > { %v7259_v42 = vmax.f32 %v6235_v32, 0.0  ;;  %v6237_v43 = vadd.f32 %v11105_v20, %v5129_v33  ;;  %v6250_v44 = vadd.f32 %v11089_v11, %v5142_v34  ;;  %v5144_v45 = vmul.f32 %v11080_v7, %v1421_v35  ;;  %v1423_v46 = vpop.f32.mrf.mxu1 }
 0x1cc   : > { %v7472_v48 = vadd.f32 %v7471_v21, %v7258_v39  ;;  %v7610_v49 = vadd.f32 %v7609_v31, %v7260_v40  ;;  %v5143_v50 = vmul.f32 %v11083_v8, %v974_v41  ;;  %v5145_v51 = vmul.f32 %v11086_v9, %v1423_v46  ;;  %v978_v52 = vpop.f32.mrf.mxu0  ;;  %9672 = vmatmul.mubr.msk.f32.gmra.mxu0 %vm377_vm0, %v10413_v53  ;;  %v10415_v46 = vld [vmem:[%s10776_s30 + $0x158] sm:$0xff] }
 0x1cd   : > { %v7541_v54 = vadd.f32 %v7540_v37, %v7259_v42  ;;  %v7261_v55 = vmax.f32 %v6237_v43, 0.0  ;;  %v7274_v56 = vmax.f32 %v6250_v44, 0.0  ;;  %v6252_v57 = vadd.f32 %v11093_v13, %v5144_v45  ;;  %v1427_v58 = vpop.f32.mrf.mxu1  ;;  %9736 = vmatmul.mubr.msk.f32.gmra.mxu1 %vm377_vm0, %v10413_v53  ;;  %1784 = vmatprep.mubr.f32.mxu0 %v10663_v6 }
 0x1ce   : > { %v6251_v59 = vadd.f32 %v11102_v18, %v5143_v50  ;;  %v6253_v61 = vadd.f32 %v11105_v20, %v5145_v51  ;;  %v5158_v0 = vmul.f32 %v11073_v3, %v978_v52  ;;  %v5160_v4 = vmul.f32 %v11080_v7, %v1427_v58  ;;  %v980_v5 = vpop.f32.mrf.mxu0  ;;  %2233 = vmatprep.mubr.f32.mxu1 %v10663_v6 }
 0x1cf   : > { %v7679_v10 = vadd.f32 %v7678_v38, %v7261_v55  ;;  %v7473_v12 = vadd.f32 %v7472_v48, %v7274_v56  ;;  %v7276_v14 = vmax.f32 %v6252_v57, 0.0  ;;  %v5159_v15 = vmul.f32 %v11083_v8, %v980_v5  ;;  %v1429_v16 = vpop.f32.mrf.mxu1 }
 0x1d0   : > { %v7275_v17 = vmax.f32 %v6251_v59, 0.0  ;;  %v7277_v19 = vmax.f32 %v6253_v61, 0.0  ;;  %v6266_v21 = vadd.f32 %v11089_v11, %v5158_v0  ;;  %v6268_v22 = vadd.f32 %v11093_v13, %v5160_v4  ;;  %v984_v23 = vpop.f32.mrf.mxu0  ;;  %9673 = vmatmul.mubr.msk.f32.gmra.mxu0 %vm377_vm0, %v10414_v24 }
 0x1d1   : > { %v7611_v25 = vadd.f32 %v7610_v49, %v7276_v14  ;;  %v6267_v26 = vadd.f32 %v11102_v18, %v5159_v15  ;;  %v5161_v27 = vmul.f32 %v11086_v9, %v1429_v16  ;;  %v5174_v28 = vmul.f32 %v11073_v3, %v984_v23  ;;  %v1433_v29 = vpop.f32.mrf.mxu1  ;;  %9737 = vmatmul.mubr.msk.f32.gmra.mxu1 %vm377_vm0, %v10414_v24  ;;  %v10416_v16 = vld [vmem:[%s10776_s30 + $0x160] sm:$0xff] }
 0x1d2   : > { %v7542_v30 = vadd.f32 %v7541_v54, %v7275_v17  ;;  %v7680_v31 = vadd.f32 %v7679_v10, %v7277_v19  ;;  %v7290_v32 = vmax.f32 %v6266_v21, 0.0  ;;  %v7292_v33 = vmax.f32 %v6268_v22, 0.0  ;;  %v986_v34 = vpop.f32.mrf.mxu0  ;;  %1790 = vmatprep.mubr.f32.mxu0 %v10663_v6  ;;  %2239 = vmatprep.mubr.f32.mxu1 %v10663_v6 }
 0x1d3   : > { %v7291_v35 = vmax.f32 %v6267_v26, 0.0  ;;  %v6269_v37 = vadd.f32 %v11105_v20, %v5161_v27  ;;  %v6282_v38 = vadd.f32 %v11089_v11, %v5174_v28  ;;  %v5176_v39 = vmul.f32 %v11080_v7, %v1433_v29  ;;  %v1435_v40 = vpop.f32.mrf.mxu1 }
 0x1d4   : > { %v7474_v41 = vadd.f32 %v7473_v12, %v7290_v32  ;;  %v7612_v42 = vadd.f32 %v7611_v25, %v7292_v33  ;;  %v5175_v43 = vmul.f32 %v11083_v8, %v986_v34  ;;  %v5177_v44 = vmul.f32 %v11086_v9, %v1435_v40  ;;  %v990_v45 = vpop.f32.mrf.mxu0  ;;  %9674 = vmatmul.mubr.msk.f32.gmra.mxu0 %vm377_vm0, %v10415_v46  ;;  %v10417_v40 = vld [vmem:[%s10776_s30 + $0x168] sm:$0xff] }
 0x1d5   : > { %v7543_v48 = vadd.f32 %v7542_v30, %v7291_v35  ;;  %v7293_v49 = vmax.f32 %v6269_v37, 0.0  ;;  %v7306_v50 = vmax.f32 %v6282_v38, 0.0  ;;  %v6284_v51 = vadd.f32 %v11093_v13, %v5176_v39  ;;  %v1439_v52 = vpop.f32.mrf.mxu1  ;;  %9738 = vmatmul.mubr.msk.f32.gmra.mxu1 %vm377_vm0, %v10415_v46  ;;  %1796 = vmatprep.mubr.f32.mxu0 %v10663_v6 }
 0x1d6   : > { %v6283_v53 = vadd.f32 %v11102_v18, %v5175_v43  ;;  %v6285_v54 = vadd.f32 %v11105_v20, %v5177_v44  ;;  %v5190_v55 = vmul.f32 %v11073_v3, %v990_v45  ;;  %v5192_v56 = vmul.f32 %v11080_v7, %v1439_v52  ;;  %v992_v57 = vpop.f32.mrf.mxu0  ;;  %2245 = vmatprep.mubr.f32.mxu1 %v10663_v6 }
 0x1d7   : > { %v7681_v58 = vadd.f32 %v7680_v31, %v7293_v49  ;;  %v7475_v59 = vadd.f32 %v7474_v41, %v7306_v50  ;;  %v7308_v61 = vmax.f32 %v6284_v51, 0.0  ;;  %v5191_v0 = vmul.f32 %v11083_v8, %v992_v57  ;;  %v1441_v4 = vpop.f32.mrf.mxu1 }
 0x1d8   : > { %v7307_v5 = vmax.f32 %v6283_v53, 0.0  ;;  %v7309_v10 = vmax.f32 %v6285_v54, 0.0  ;;  %v6298_v12 = vadd.f32 %v11089_v11, %v5190_v55  ;;  %v6300_v14 = vadd.f32 %v11093_v13, %v5192_v56  ;;  %v996_v15 = vpop.f32.mrf.mxu0  ;;  %9675 = vmatmul.mubr.msk.f32.gmra.mxu0 %vm377_vm0, %v10416_v16 }
 0x1d9   : > { %v7613_v17 = vadd.f32 %v7612_v42, %v7308_v61  ;;  %v6299_v19 = vadd.f32 %v11102_v18, %v5191_v0  ;;  %v5193_v21 = vmul.f32 %v11086_v9, %v1441_v4  ;;  %v5206_v22 = vmul.f32 %v11073_v3, %v996_v15  ;;  %v1445_v23 = vpop.f32.mrf.mxu1  ;;  %9739 = vmatmul.mubr.msk.f32.gmra.mxu1 %vm377_vm0, %v10416_v16  ;;  %v10418_v4 = vld [vmem:[%s10776_s30 + $0x170] sm:$0xff] }
 0x1da   : > { %v7544_v24 = vadd.f32 %v7543_v48, %v7307_v5  ;;  %v7682_v25 = vadd.f32 %v7681_v58, %v7309_v10  ;;  %v7322_v26 = vmax.f32 %v6298_v12, 0.0  ;;  %v7324_v27 = vmax.f32 %v6300_v14, 0.0  ;;  %v998_v28 = vpop.f32.mrf.mxu0  ;;  %1802 = vmatprep.mubr.f32.mxu0 %v10663_v6  ;;  %2251 = vmatprep.mubr.f32.mxu1 %v10663_v6 }
 0x1db   : > { %v7323_v29 = vmax.f32 %v6299_v19, 0.0  ;;  %v6301_v30 = vadd.f32 %v11105_v20, %v5193_v21  ;;  %v6314_v31 = vadd.f32 %v11089_v11, %v5206_v22  ;;  %v5208_v32 = vmul.f32 %v11080_v7, %v1445_v23  ;;  %v1447_v33 = vpop.f32.mrf.mxu1 }
 0x1dc   : > { %v7476_v34 = vadd.f32 %v7475_v59, %v7322_v26  ;;  %v7614_v35 = vadd.f32 %v7613_v17, %v7324_v27  ;;  %v5207_v37 = vmul.f32 %v11083_v8, %v998_v28  ;;  %v5209_v38 = vmul.f32 %v11086_v9, %v1447_v33  ;;  %v1002_v39 = vpop.f32.mrf.mxu0  ;;  %9676 = vmatmul.mubr.msk.f32.gmra.mxu0 %vm377_vm0, %v10417_v40  ;;  %v10419_v33 = vld [vmem:[%s10776_s30 + $0x178] sm:$0xff] }
 0x1dd   : > { %v7545_v41 = vadd.f32 %v7544_v24, %v7323_v29  ;;  %v7325_v42 = vmax.f32 %v6301_v30, 0.0  ;;  %v7338_v43 = vmax.f32 %v6314_v31, 0.0  ;;  %v6316_v44 = vadd.f32 %v11093_v13, %v5208_v32  ;;  %v1451_v45 = vpop.f32.mrf.mxu1  ;;  %9740 = vmatmul.mubr.msk.f32.gmra.mxu1 %vm377_vm0, %v10417_v40  ;;  %1808 = vmatprep.mubr.f32.mxu0 %v10663_v6 }
 0x1de   : > { %v6315_v46 = vadd.f32 %v11102_v18, %v5207_v37  ;;  %v6317_v48 = vadd.f32 %v11105_v20, %v5209_v38  ;;  %v5222_v49 = vmul.f32 %v11073_v3, %v1002_v39  ;;  %v5224_v50 = vmul.f32 %v11080_v7, %v1451_v45  ;;  %v1004_v51 = vpop.f32.mrf.mxu0  ;;  %2257 = vmatprep.mubr.f32.mxu1 %v10663_v6 }
 0x1df   : > { %v7683_v52 = vadd.f32 %v7682_v25, %v7325_v42  ;;  %v7477_v53 = vadd.f32 %v7476_v34, %v7338_v43  ;;  %v7340_v54 = vmax.f32 %v6316_v44, 0.0  ;;  %v5223_v55 = vmul.f32 %v11083_v8, %v1004_v51  ;;  %v1453_v56 = vpop.f32.mrf.mxu1 }
 0x1e0   : > { %v7339_v57 = vmax.f32 %v6315_v46, 0.0  ;;  %v7341_v58 = vmax.f32 %v6317_v48, 0.0  ;;  %v6330_v59 = vadd.f32 %v11089_v11, %v5222_v49  ;;  %v6332_v61 = vadd.f32 %v11093_v13, %v5224_v50  ;;  %v1008_v0 = vpop.f32.mrf.mxu0  ;;  %9677 = vmatmul.mubr.msk.f32.gmra.mxu0 %vm377_vm0, %v10418_v4 }
 0x1e1   : > { %v7615_v5 = vadd.f32 %v7614_v35, %v7340_v54  ;;  %v6331_v10 = vadd.f32 %v11102_v18, %v5223_v55  ;;  %v5225_v12 = vmul.f32 %v11086_v9, %v1453_v56  ;;  %v5238_v14 = vmul.f32 %v11073_v3, %v1008_v0  ;;  %v1457_v15 = vpop.f32.mrf.mxu1  ;;  %9741 = vmatmul.mubr.msk.f32.gmra.mxu1 %vm377_vm0, %v10418_v4  ;;  %v10420_v56 = vld [vmem:[%s10776_s30 + $0x180] sm:$0xff] }
 0x1e2   : > { %v7546_v16 = vadd.f32 %v7545_v41, %v7339_v57  ;;  %v7684_v17 = vadd.f32 %v7683_v52, %v7341_v58  ;;  %v7354_v19 = vmax.f32 %v6330_v59, 0.0  ;;  %v7356_v21 = vmax.f32 %v6332_v61, 0.0  ;;  %v1010_v22 = vpop.f32.mrf.mxu0  ;;  %1814 = vmatprep.mubr.f32.mxu0 %v10663_v6  ;;  %2263 = vmatprep.mubr.f32.mxu1 %v10663_v6 }
 0x1e3   : > { %v7355_v23 = vmax.f32 %v6331_v10, 0.0  ;;  %v6333_v24 = vadd.f32 %v11105_v20, %v5225_v12  ;;  %v6346_v25 = vadd.f32 %v11089_v11, %v5238_v14  ;;  %v5240_v26 = vmul.f32 %v11080_v7, %v1457_v15  ;;  %v1459_v27 = vpop.f32.mrf.mxu1  ;;  %v10422_v10 = vld [vmem:[%s16981_s3] sm:$0xff] }
 0x1e4   : > { %v7478_v28 = vadd.f32 %v7477_v53, %v7354_v19  ;;  %v7616_v29 = vadd.f32 %v7615_v5, %v7356_v21  ;;  %v5239_v30 = vmul.f32 %v11083_v8, %v1010_v22  ;;  %v5241_v31 = vmul.f32 %v11086_v9, %v1459_v27  ;;  %v1014_v32 = vpop.f32.mrf.mxu0  ;;  %9678 = vmatmul.mubr.msk.f32.gmra.mxu0 %vm377_vm0, %v10419_v33 }
 0x1e5   : > { %v7547_v34 = vadd.f32 %v7546_v16, %v7355_v23  ;;  %v7357_v35 = vmax.f32 %v6333_v24, 0.0  ;;  %v7370_v37 = vmax.f32 %v6346_v25, 0.0  ;;  %v6348_v38 = vadd.f32 %v11093_v13, %v5240_v26  ;;  %v1463_v39 = vpop.f32.mrf.mxu1  ;;  %9742 = vmatmul.mubr.msk.f32.gmra.mxu1 %vm377_vm0, %v10419_v33  ;;  %1820 = vmatprep.mubr.f32.mxu0 %v10663_v6 }
 0x1e6   : > { %v6347_v40 = vadd.f32 %v11102_v18, %v5239_v30  ;;  %v6349_v41 = vadd.f32 %v11105_v20, %v5241_v31  ;;  %v5254_v42 = vmul.f32 %v11073_v3, %v1014_v32  ;;  %v5256_v43 = vmul.f32 %v11080_v7, %v1463_v39  ;;  %v1016_v44 = vpop.f32.mrf.mxu0  ;;  %2269 = vmatprep.mubr.f32.mxu1 %v10663_v6 }
 0x1e7   : > { %v7685_v45 = vadd.f32 %v7684_v17, %v7357_v35  ;;  %v7479_v46 = vadd.f32 %v7478_v28, %v7370_v37  ;;  %v7372_v48 = vmax.f32 %v6348_v38, 0.0  ;;  %v5255_v49 = vmul.f32 %v11083_v8, %v1016_v44  ;;  %v1465_v50 = vpop.f32.mrf.mxu1  ;;  %v10421_v8 = vld [vmem:[%s16980_s2] sm:$0xff] }
 0x1e8   : > { %v7371_v51 = vmax.f32 %v6347_v40, 0.0  ;;  %v7373_v52 = vmax.f32 %v6349_v41, 0.0  ;;  %v6362_v53 = vadd.f32 %v11089_v11, %v5254_v42  ;;  %v6364_v54 = vadd.f32 %v11093_v13, %v5256_v43  ;;  %v1534_v55 = vpop.f32.mrf.mxu0  ;;  %9679 = vmatmul.mubr.msk.f32.gmra.mxu0 %vm377_vm0, %v10420_v56  ;;  %v10424_v42 = vld [vmem:[%s10776_s30 + $0x190] sm:$0xff] }
 0x1e9   : > { %v7617_v3 = vadd.f32 %v7616_v29, %v7372_v48  ;;  %v6363_v7 = vadd.f32 %v11102_v18, %v5255_v49  ;;  %v5257_v57 = vmul.f32 %v11086_v9, %v1465_v50  ;;  %v11954_v58 = vrot.slane %v10421_v8, %v11777_v36  ;;  %v1983_v59 = vpop.f32.mrf.mxu1  ;;  %9743 = vmatmul.mubr.msk.f32.gmra.mxu1 %vm377_vm0, %v10420_v56 }
 0x1ea   : > { %v7548_v11 = vadd.f32 %v7547_v34, %v7371_v51  ;;  %v7686_v13 = vadd.f32 %v7685_v45, %v7373_v52  ;;  %v7386_v61 = vmax.f32 %v6362_v53, 0.0  ;;  %v7388_v0 = vmax.f32 %v6364_v54, 0.0  ;;  %v1536_v4 = vpop.f32.mrf.mxu0  ;;  %1826 = vmatprep.mubr.f32.mxu0 %v10663_v6  ;;  %2275 = vmatprep.mubr.f32.mxu1 %v10663_v6 }
 0x1eb   : > { %v7387_v9 = vmax.f32 %v6363_v7, 0.0  ;;  %v6365_v18 = vadd.f32 %v11105_v20, %v5257_v57  ;;  %v4250_v5 = vmul.f32 %v11954_v58, %v1534_v55  ;;  %v11965_v12 = vrot.slane %v10422_v10, %v11777_v36  ;;  %v1985_v14 = vpop.f32.mrf.mxu1  ;;  %v10423_v20 = vld [vmem:[%s10776_s30 + $0x188] sm:$0xff] }
 0x1ec   : > { %v7480_v15 = vadd.f32 %v7479_v46, %v7386_v61  ;;  %v7618_v16 = vadd.f32 %v7617_v3, %v7388_v0  ;;  %v11968_v17 = vrot.slane %v10421_v8, %v11789_v47  ;;  %v11971_v19 = vrot.slane %v10422_v10, %v11789_v47  ;;  %v1540_v21 = vpop.f32.mrf.mxu0  ;;  %9680 = vmatmul.mubr.msk.f32.gmra.mxu0 %vm377_vm0, %v10423_v20  ;;  %v10425_v61 = vld [vmem:[%s10776_s30 + $0x198] sm:$0xff] }
 0x1ed   : > { %v7549_v22 = vadd.f32 %v7548_v11, %v7387_v9  ;;  %v7389_v23 = vmax.f32 %v6365_v18, 0.0  ;;  %v11976_v24 = vadd.f32 %v11965_v12, %v4250_v5  ;;  %v11979_v25 = vsub.s32 5, %v11046_v60  ;;  %v1989_v26 = vpop.f32.mrf.mxu1  ;;  %9744 = vmatmul.mubr.msk.f32.gmra.mxu1 %vm377_vm0, %v10423_v20  ;;  %1832 = vmatprep.mubr.f32.mxu0 %v10663_v6  ;;  %v7402_v20 = vld [vmem:[#allocation2 + $0x30] sm:$0xff] }
 0x1ee   : > { %v7481_v27 = vrot.slane %v7480_v15, 4  ;;  %v7619_v28 = vrot.slane %v7618_v16, 4  ;;  %v4252_v29 = vmul.f32 %v11968_v17, %v1983_v59  ;;  %v11985_v30 = vsub.s32 7, %v11046_v60  ;;  %v1542_v31 = vpop.f32.mrf.mxu0  ;;  %2281 = vmatprep.mubr.f32.mxu1 %v10663_v6 }
 0x1ef   : > { %v7550_v32 = vrot.slane %v7549_v22, 4  ;;  %v7687_v33 = vadd.f32 %v7686_v13, %v7389_v23  ;;  %v6382_v34 = vmax.f32 %v11976_v24, 0.0  ;;  %v11990_v35 = vrot.slane %v10421_v8, %v11979_v25  ;;  %v11992_v37 = vpop.f32.mrf.mxu1 }
 0x1f0   : > { %v7482_v38 = vadd.f32 %v7481_v27, %v7480_v15  ;;  %v7620_v39 = vadd.f32 %v7619_v28, %v7618_v16  ;;  %v11995_v40 = vadd.f32 %v11971_v19, %v4252_v29  ;;  %v11998_v60 = vrot.slane %v10422_v10, %v11979_v25  ;;  %v12000_v41 = vpop.f32.mrf.mxu0  ;;  %9681 = vmatmul.mubr.msk.f32.gmra.mxu0 %vm377_vm0, %v10424_v42 }
 0x1f1   : > { %v7551_v43 = vadd.f32 %v7550_v32, %v7549_v22  ;;  %v7688_v44 = vrot.slane %v7687_v33, 4  ;;  %v4251_v45 = vmul.f32 %v11990_v35, %v1536_v4  ;;  %v12006_v46 = vrot.slane %v10421_v8, %v11985_v30  ;;  %v12008_v48 = vpop.f32.mrf.mxu1  ;;  %9745 = vmatmul.mubr.msk.f32.gmra.mxu1 %vm377_vm0, %v10424_v42  ;;  %1838 = vmatprep.mubr.f32.mxu0 %v10663_v6  ;;  %v7404_v22 = vld [vmem:[#allocation2 + $0x58] sm:$0xff] }
 0x1f2   : > { %v7483_v49 = vrot.slane %v7482_v38, 2  ;;  %v7621_v50 = vrot.slane %v7620_v39, 2  ;;  %v6384_v51 = vmax.f32 %v11995_v40, 0.0  ;;  %v12014_v52 = vrot.slane %v10422_v10, %v11985_v30  ;;  %v12016_v53 = vpop.f32.mrf.mxu0  ;;  %2287 = vmatprep.mubr.f32.mxu1 %v10663_v6 }
 0x1f3   : > { %v7552_v54 = vrot.slane %v7551_v43, 2  ;;  %v7689_v55 = vadd.f32 %v7688_v44, %v7687_v33  ;;  %v12020_v56 = vadd.f32 %v11998_v60, %v4251_v45  ;;  %v4253_v3 = vmul.f32 %v12006_v46, %v1985_v14  ;;  %v1997_v7 = vpop.f32.mrf.mxu1 }
 0x1f4   : > { %v7484_v57 = vadd.f32 %v7483_v49, %v7482_v38  ;;  %v7622_v8 = vadd.f32 %v7621_v50, %v7620_v39  ;;  %v4266_v59 = vmul.f32 %v11954_v58, %v1540_v21  ;;  %v4268_v11 = vmul.f32 %v11968_v17, %v1989_v26  ;;  %v12025_v13 = vpop.f32.mrf.mxu0  ;;  %9682 = vmatmul.mubr.msk.f32.gmra.mxu0 %vm377_vm0, %v10425_v61  ;;  %v7403_v38 = vld [vmem:[#allocation2] sm:$0xff] }
 0x1f5   : > { %v7553_v0 = vadd.f32 %v7552_v54, %v7551_v43  ;;  %v7690_v4 = vrot.slane %v7689_v55, 2  ;;  %v6383_v9 = vmax.f32 %v12020_v56, 0.0  ;;  %v12031_v18 = vadd.f32 %v12014_v52, %v4253_v3  ;;  %v12033_v5 = vpop.f32.mrf.mxu1  ;;  %9746 = vmatmul.mubr.msk.f32.gmra.mxu1 %vm377_vm0, %v10425_v61  ;;  %1844 = vmatprep.mubr.f32.mxu0 %v10663_v6  ;;  %v10426_v43 = vld [vmem:[%s10776_s30 + $0x1a0] sm:$0xff]  ;;  %v7405_v56 = vld [vmem:[#allocation2 + $0x18] sm:$0xff] }
 0x1f6   : > { %v7485_v10 = vrot.slane %v7484_v57, 1  ;;  %v7623_v14 = vrot.slane %v7622_v8, 1  ;;  %v5374_v15 = vadd.f32 %v11965_v12, %v4266_v59  ;;  %v5376_v16 = vadd.f32 %v11971_v19, %v4268_v11  ;;  %v12039_v21 = vpop.f32.mrf.mxu0  ;;  %2293 = vmatprep.mubr.f32.mxu1 %v10663_v6 }
 0x1f7   : > { %v7554_v23 = vrot.slane %v7553_v0, 1  ;;  %v7691_v26 = vadd.f32 %v7690_v4, %v7689_v55  ;;  %v6385_v27 = vmax.f32 %v12031_v18, 0.0  ;;  %v4267_v28 = vmul.f32 %v11990_v35, %v1542_v31  ;;  %v12044_v29 = vpop.f32.mrf.mxu1 }
 0x1f8   : > { %v7486_v32 = vadd.f32 %v7485_v10, %v7484_v57  ;;  %v7624_v33 = vadd.f32 %v7623_v14, %v7622_v8  ;;  %v6398_v39 = vmax.f32 %v5374_v15, 0.0  ;;  %v6400_v40 = vmax.f32 %v5376_v16, 0.0  ;;  %v12046_v42 = vpop.f32.mrf.mxu0  ;;  %9683 = vmatmul.mubr.msk.f32.gmra.mxu0 %vm377_vm0, %v10426_v43  ;;  %v10427_v10 = vld [vmem:[%s10776_s30 + $0x1a8] sm:$0xff] }
 0x1f9   : > { %v7555_v44 = vadd.f32 %v7554_v23, %v7553_v0  ;;  %v7692_v45 = vrot.slane %v7691_v26, 1  ;;  %v5375_v49 = vadd.f32 %v11998_v60, %v4267_v28  ;;  %v4269_v50 = vmul.f32 %v12006_v46, %v11992_v37  ;;  %v12053_v31 = vpop.f32.mrf.mxu1  ;;  %9747 = vmatmul.mubr.msk.f32.gmra.mxu1 %vm377_vm0, %v10426_v43  ;;  %1850 = vmatprep.mubr.f32.mxu0 %v10663_v6 }
 0x1fa   : > { %v8522_v54 = vadd.f32 %v7486_v32, %v7402_v20  ;;  %v8524_v55 = vadd.f32 %v7624_v33, %v7404_v22  ;;  %v7694_v3 = vadd.f32 %v6398_v39, %v6382_v34  ;;  %v7832_v57 = vadd.f32 %v6400_v40, %v6384_v51  ;;  %v12059_v8 = vpop.f32.mrf.mxu0  ;;  %2299 = vmatprep.mubr.f32.mxu1 %v10663_v6 }
 0x1fb   : > { %v8523_v59 = vadd.f32 %v7555_v44, %v7403_v38  ;;  %v7693_v37 = vadd.f32 %v7692_v45, %v7691_v26  ;;  %v6399_v11 = vmax.f32 %v5375_v49, 0.0  ;;  %v5377_v61 = vadd.f32 %v12014_v52, %v4269_v50  ;;  %v2009_v0 = vpop.f32.mrf.mxu1  ;;  %v10428_v44 = vld [vmem:[%s10776_s30 + $0x1b0] sm:$0xff] }
 0x1fc   : > { %8538 = vst [vmem:[#allocation2 + $0x30] sm:$0xff] %v8522_v54  ;;  %8540 = vst [vmem:[#allocation2 + $0x58] sm:$0xff] %v8524_v55  ;;  %v4282_v4 = vmul.f32 %v11954_v58, %v12000_v41  ;;  %v4284_v24 = vmul.f32 %v11968_v17, %v12008_v48  ;;  %v4283_v34 = vmul.f32 %v11990_v35, %v12016_v53  ;;  %v12070_v18 = vpop.f32.mrf.mxu0  ;;  %9684 = vmatmul.mubr.msk.f32.gmra.mxu0 %vm377_vm0, %v10427_v10 }
 0x1fd   : > { %v4285_v51 = vmul.f32 %v12006_v46, %v1997_v7  ;;  %8539 = vst [vmem:[#allocation2] sm:$0xff] %v8523_v59  ;;  %v8525_v14 = vadd.f32 %v7693_v37, %v7405_v56  ;;  %v7763_v15 = vadd.f32 %v6399_v11, %v6383_v9  ;;  %v6401_v16 = vmax.f32 %v5377_v61, 0.0  ;;  %v2013_v20 = vpop.f32.mrf.mxu1  ;;  %9748 = vmatmul.mubr.msk.f32.gmra.mxu1 %vm377_vm0, %v10427_v10  ;;  %v10429_v10 = vld [vmem:[%s10776_s30 + $0x1b8] sm:$0xff] }
 0x1fe   : > { %v4298_v41 = vmul.f32 %v11954_v58, %v12025_v13  ;;  %1856 = vmatprep.mubr.f32.mxu0 %v10663_v6  ;;  %v5390_v48 = vadd.f32 %v11965_v12, %v4282_v4  ;;  %v5392_v53 = vadd.f32 %v11971_v19, %v4284_v24  ;;  %v5391_v7 = vadd.f32 %v11998_v60, %v4283_v34  ;;  %v1566_v23 = vpop.f32.mrf.mxu0 }
 0x1ff   : > { %v5393_v22 = vadd.f32 %v12014_v52, %v4285_v51  ;;  %2305 = vmatprep.mubr.f32.mxu1 %v10663_v6  ;;  %8541 = vst [vmem:[#allocation2 + $0x18] sm:$0xff] %v8525_v14  ;;  %v7901_v9 = vadd.f32 %v6401_v16, %v6385_v27  ;;  %v4300_v26 = vmul.f32 %v11968_v17, %v12033_v5  ;;  %v2015_v32 = vpop.f32.mrf.mxu1 }
 0x200   : > { %v5406_v13 = vadd.f32 %v11965_v12, %v4298_v41  ;;  %v4299_v28 = vmul.f32 %v11990_v35, %v12039_v21  ;;  %v6414_v33 = vmax.f32 %v5390_v48, 0.0  ;;  %v6416_v38 = vmax.f32 %v5392_v53, 0.0  ;;  %v12088_v43 = vpop.f32.mrf.mxu0  ;;  %9685 = vmatmul.mubr.msk.f32.gmra.mxu0 %vm377_vm0, %v10428_v44 }
 0x201   : > { %v6415_v39 = vmax.f32 %v5391_v7, 0.0  ;;  %v6417_v40 = vmax.f32 %v5393_v22, 0.0  ;;  %v5408_v27 = vadd.f32 %v11971_v19, %v4300_v26  ;;  %v4301_v5 = vmul.f32 %v12006_v46, %v12044_v29  ;;  %v12096_v50 = vpop.f32.mrf.mxu1  ;;  %9749 = vmatmul.mubr.msk.f32.gmra.mxu1 %vm377_vm0, %v10428_v44  ;;  %1862 = vmatprep.mubr.f32.mxu0 %v10663_v6  ;;  %v10430_v44 = vld [vmem:[%s10776_s30 + $0x1c0] sm:$0xff] }
 0x202   : > { %v6430_v45 = vmax.f32 %v5406_v13, 0.0  ;;  %v5407_v49 = vadd.f32 %v11998_v60, %v4299_v28  ;;  %v7695_v21 = vadd.f32 %v7694_v3, %v6414_v33  ;;  %v7833_v54 = vadd.f32 %v7832_v57, %v6416_v38  ;;  %v1572_v59 = vpop.f32.mrf.mxu0  ;;  %2311 = vmatprep.mubr.f32.mxu1 %v10663_v6 }
 0x203   : > { %v7764_v55 = vadd.f32 %v7763_v15, %v6415_v39  ;;  %v7902_v56 = vadd.f32 %v7901_v9, %v6417_v40  ;;  %v6432_v37 = vmax.f32 %v5408_v27, 0.0  ;;  %v5409_v61 = vadd.f32 %v12014_v52, %v4301_v5  ;;  %v2021_v4 = vpop.f32.mrf.mxu1 }
 0x204   : > { %v6431_v11 = vmax.f32 %v5407_v49, 0.0  ;;  %v4314_v29 = vmul.f32 %v11954_v58, %v12046_v42  ;;  %v7696_v24 = vadd.f32 %v7695_v21, %v6430_v45  ;;  %v4316_v34 = vmul.f32 %v11968_v17, %v12053_v31  ;;  %v12109_v51 = vpop.f32.mrf.mxu0  ;;  %9686 = vmatmul.mubr.msk.f32.gmra.mxu0 %vm377_vm0, %v10429_v10 }
 0x205   : > { %v4315_v3 = vmul.f32 %v11990_v35, %v12059_v8  ;;  %v4317_v57 = vmul.f32 %v12006_v46, %v2009_v0  ;;  %v7834_v14 = vadd.f32 %v7833_v54, %v6432_v37  ;;  %v6433_v16 = vmax.f32 %v5409_v61, 0.0  ;;  %v2025_v41 = vpop.f32.mrf.mxu1  ;;  %9750 = vmatmul.mubr.msk.f32.gmra.mxu1 %vm377_vm0, %v10429_v10  ;;  %1868 = vmatprep.mubr.f32.mxu0 %v10663_v6  ;;  %v10431_v10 = vld [vmem:[%s10776_s30 + $0x1c8] sm:$0xff] }
 0x206   : > { %v7765_v15 = vadd.f32 %v7764_v55, %v6431_v11  ;;  %v5422_v42 = vadd.f32 %v11965_v12, %v4314_v29  ;;  %v5424_v31 = vadd.f32 %v11971_v19, %v4316_v34  ;;  %v4330_v48 = vmul.f32 %v11954_v58, %v12070_v18  ;;  %v1578_v53 = vpop.f32.mrf.mxu0  ;;  %2317 = vmatprep.mubr.f32.mxu1 %v10663_v6 }
 0x207   : > { %v5423_v8 = vadd.f32 %v11998_v60, %v4315_v3  ;;  %v5425_v0 = vadd.f32 %v12014_v52, %v4317_v57  ;;  %v7903_v7 = vadd.f32 %v7902_v56, %v6433_v16  ;;  %v4332_v9 = vmul.f32 %v11968_v17, %v2013_v20  ;;  %v2027_v26 = vpop.f32.mrf.mxu1 }
 0x208   : > { %v6446_v22 = vmax.f32 %v5422_v42, 0.0  ;;  %v4331_v13 = vmul.f32 %v11990_v35, %v1566_v23  ;;  %v6448_v28 = vmax.f32 %v5424_v31, 0.0  ;;  %v5438_v39 = vadd.f32 %v11965_v12, %v4330_v48  ;;  %v12125_v40 = vpop.f32.mrf.mxu0  ;;  %9687 = vmatmul.mubr.msk.f32.gmra.mxu0 %vm377_vm0, %v10430_v44 }
 0x209   : > { %v6447_v33 = vmax.f32 %v5423_v8, 0.0  ;;  %v6449_v38 = vmax.f32 %v5425_v0, 0.0  ;;  %v5440_v45 = vadd.f32 %v11971_v19, %v4332_v9  ;;  %v4333_v20 = vmul.f32 %v12006_v46, %v2015_v32  ;;  %v12132_v49 = vpop.f32.mrf.mxu1  ;;  %9751 = vmatmul.mubr.msk.f32.gmra.mxu1 %vm377_vm0, %v10430_v44  ;;  %1874 = vmatprep.mubr.f32.mxu0 %v10663_v6  ;;  %v10432_v44 = vld [vmem:[%s10776_s30 + $0x1d0] sm:$0xff] }
 0x20a   : > { %v7697_v18 = vadd.f32 %v7696_v24, %v6446_v22  ;;  %v5439_v27 = vadd.f32 %v11998_v60, %v4331_v13  ;;  %v7835_v23 = vadd.f32 %v7834_v14, %v6448_v28  ;;  %v6462_v54 = vmax.f32 %v5438_v39, 0.0  ;;  %v1584_v55 = vpop.f32.mrf.mxu0  ;;  %2323 = vmatprep.mubr.f32.mxu1 %v10663_v6 }
 0x20b   : > { %v7766_v5 = vadd.f32 %v7765_v15, %v6447_v33  ;;  %v7904_v21 = vadd.f32 %v7903_v7, %v6449_v38  ;;  %v6464_v56 = vmax.f32 %v5440_v45, 0.0  ;;  %v5441_v11 = vadd.f32 %v12014_v52, %v4333_v20  ;;  %v2033_v61 = vpop.f32.mrf.mxu1 }
 0x20c   : > { %v6463_v37 = vmax.f32 %v5439_v27, 0.0  ;;  %v4346_v32 = vmul.f32 %v11954_v58, %v12088_v43  ;;  %v7698_v29 = vadd.f32 %v7697_v18, %v6462_v54  ;;  %v4348_v24 = vmul.f32 %v11968_v17, %v12096_v50  ;;  %v12144_v57 = vpop.f32.mrf.mxu0  ;;  %9688 = vmatmul.mubr.msk.f32.gmra.mxu0 %vm377_vm0, %v10431_v10 }
 0x20d   : > { %v4347_v34 = vmul.f32 %v11990_v35, %v1572_v59  ;;  %v4349_v3 = vmul.f32 %v12006_v46, %v2021_v4  ;;  %v7836_v14 = vadd.f32 %v7835_v23, %v6464_v56  ;;  %v6465_v16 = vmax.f32 %v5441_v11, 0.0  ;;  %v2037_v43 = vpop.f32.mrf.mxu1  ;;  %9752 = vmatmul.mubr.msk.f32.gmra.mxu1 %vm377_vm0, %v10431_v10  ;;  %1880 = vmatprep.mubr.f32.mxu0 %v10663_v6  ;;  %v10433_v10 = vld [vmem:[%s10776_s30 + $0x1d8] sm:$0xff] }
 0x20e   : > { %v7767_v15 = vadd.f32 %v7766_v5, %v6463_v37  ;;  %v5454_v42 = vadd.f32 %v11965_v12, %v4346_v32  ;;  %v5456_v50 = vadd.f32 %v11971_v19, %v4348_v24  ;;  %v4362_v31 = vmul.f32 %v11954_v58, %v12109_v51  ;;  %v1590_v8 = vpop.f32.mrf.mxu0  ;;  %2329 = vmatprep.mubr.f32.mxu1 %v10663_v6 }
 0x20f   : > { %v5455_v59 = vadd.f32 %v11998_v60, %v4347_v34  ;;  %v5457_v4 = vadd.f32 %v12014_v52, %v4349_v3  ;;  %v7905_v0 = vadd.f32 %v7904_v21, %v6465_v16  ;;  %v4364_v7 = vmul.f32 %v11968_v17, %v2025_v41  ;;  %v2039_v9 = vpop.f32.mrf.mxu1 }
 0x210   : > { %v6478_v48 = vmax.f32 %v5454_v42, 0.0  ;;  %v4363_v22 = vmul.f32 %v11990_v35, %v1578_v53  ;;  %v6480_v13 = vmax.f32 %v5456_v50, 0.0  ;;  %v5470_v38 = vadd.f32 %v11965_v12, %v4362_v31  ;;  %v12160_v39 = vpop.f32.mrf.mxu0  ;;  %9689 = vmatmul.mubr.msk.f32.gmra.mxu0 %vm377_vm0, %v10432_v44 }
 0x211   : > { %v6479_v28 = vmax.f32 %v5455_v59, 0.0  ;;  %v6481_v33 = vmax.f32 %v5457_v4, 0.0  ;;  %v5472_v18 = vadd.f32 %v11971_v19, %v4364_v7  ;;  %v4365_v41 = vmul.f32 %v12006_v46, %v2027_v26  ;;  %v12167_v27 = vpop.f32.mrf.mxu1  ;;  %9753 = vmatmul.mubr.msk.f32.gmra.mxu1 %vm377_vm0, %v10432_v44  ;;  %1886 = vmatprep.mubr.f32.mxu0 %v10663_v6  ;;  %v10434_v44 = vld [vmem:[%s10776_s30 + $0x1e0] sm:$0xff] }
 0x212   : > { %v7699_v51 = vadd.f32 %v7698_v29, %v6478_v48  ;;  %v5471_v45 = vadd.f32 %v11998_v60, %v4363_v22  ;;  %v7837_v53 = vadd.f32 %v7836_v14, %v6480_v13  ;;  %v6494_v5 = vmax.f32 %v5470_v38, 0.0  ;;  %v1596_v21 = vpop.f32.mrf.mxu0  ;;  %2335 = vmatprep.mubr.f32.mxu1 %v10663_v6 }
 0x213   : > { %v7768_v20 = vadd.f32 %v7767_v15, %v6479_v28  ;;  %v7906_v23 = vadd.f32 %v7905_v0, %v6481_v33  ;;  %v6496_v54 = vmax.f32 %v5472_v18, 0.0  ;;  %v5473_v37 = vadd.f32 %v12014_v52, %v4365_v41  ;;  %v2045_v11 = vpop.f32.mrf.mxu1 }
 0x214   : > { %v6495_v56 = vmax.f32 %v5471_v45, 0.0  ;;  %v4378_v26 = vmul.f32 %v11954_v58, %v12125_v40  ;;  %v7700_v32 = vadd.f32 %v7699_v51, %v6494_v5  ;;  %v4380_v29 = vmul.f32 %v11968_v17, %v12132_v49  ;;  %v12179_v3 = vpop.f32.mrf.mxu0  ;;  %9690 = vmatmul.mubr.msk.f32.gmra.mxu0 %vm377_vm0, %v10433_v10 }
 0x215   : > { %v4379_v24 = vmul.f32 %v11990_v35, %v1584_v55  ;;  %v4381_v34 = vmul.f32 %v12006_v46, %v2033_v61  ;;  %v7838_v14 = vadd.f32 %v7837_v53, %v6496_v54  ;;  %v6497_v16 = vmax.f32 %v5473_v37, 0.0  ;;  %v2049_v40 = vpop.f32.mrf.mxu1  ;;  %9754 = vmatmul.mubr.msk.f32.gmra.mxu1 %vm377_vm0, %v10433_v10  ;;  %1892 = vmatprep.mubr.f32.mxu0 %v10663_v6  ;;  %v10435_v10 = vld [vmem:[%s10776_s30 + $0x1e8] sm:$0xff] }
 0x216   : > { %v7769_v15 = vadd.f32 %v7768_v20, %v6495_v56  ;;  %v5486_v42 = vadd.f32 %v11965_v12, %v4378_v26  ;;  %v5488_v49 = vadd.f32 %v11971_v19, %v4380_v29  ;;  %v4394_v50 = vmul.f32 %v11954_v58, %v12144_v57  ;;  %v1602_v59 = vpop.f32.mrf.mxu0  ;;  %2341 = vmatprep.mubr.f32.mxu1 %v10663_v6 }
 0x217   : > { %v5487_v55 = vadd.f32 %v11998_v60, %v4379_v24  ;;  %v5489_v61 = vadd.f32 %v12014_v52, %v4381_v34  ;;  %v7907_v4 = vadd.f32 %v7906_v23, %v6497_v16  ;;  %v4396_v0 = vmul.f32 %v11968_v17, %v2037_v43  ;;  %v2051_v7 = vpop.f32.mrf.mxu1 }
 0x218   : > { %v6510_v31 = vmax.f32 %v5486_v42, 0.0  ;;  %v4395_v48 = vmul.f32 %v11990_v35, %v1590_v8  ;;  %v6512_v22 = vmax.f32 %v5488_v49, 0.0  ;;  %v5502_v33 = vadd.f32 %v11965_v12, %v4394_v50  ;;  %v12195_v38 = vpop.f32.mrf.mxu0  ;;  %9691 = vmatmul.mubr.msk.f32.gmra.mxu0 %vm377_vm0, %v10434_v44 }
 0x219   : > { %v6511_v13 = vmax.f32 %v5487_v55, 0.0  ;;  %v6513_v28 = vmax.f32 %v5489_v61, 0.0  ;;  %v5504_v51 = vadd.f32 %v11971_v19, %v4396_v0  ;;  %v4397_v43 = vmul.f32 %v12006_v46, %v2039_v9  ;;  %v12202_v45 = vpop.f32.mrf.mxu1  ;;  %9755 = vmatmul.mubr.msk.f32.gmra.mxu1 %vm377_vm0, %v10434_v44  ;;  %1898 = vmatprep.mubr.f32.mxu0 %v10663_v6  ;;  %v10436_v44 = vld [vmem:[%s10776_s30 + $0x1f0] sm:$0xff] }
 0x21a   : > { %v7701_v57 = vadd.f32 %v7700_v32, %v6510_v31  ;;  %v5503_v18 = vadd.f32 %v11998_v60, %v4395_v48  ;;  %v7839_v8 = vadd.f32 %v7838_v14, %v6512_v22  ;;  %v6526_v20 = vmax.f32 %v5502_v33, 0.0  ;;  %v1608_v23 = vpop.f32.mrf.mxu0  ;;  %2347 = vmatprep.mubr.f32.mxu1 %v10663_v6 }
 0x21b   : > { %v7770_v41 = vadd.f32 %v7769_v15, %v6511_v13  ;;  %v7908_v53 = vadd.f32 %v7907_v4, %v6513_v28  ;;  %v6528_v5 = vmax.f32 %v5504_v51, 0.0  ;;  %v5505_v56 = vadd.f32 %v12014_v52, %v4397_v43  ;;  %v2057_v37 = vpop.f32.mrf.mxu1 }
 0x21c   : > { %v6527_v54 = vmax.f32 %v5503_v18, 0.0  ;;  %v4410_v9 = vmul.f32 %v11954_v58, %v12160_v39  ;;  %v7702_v26 = vadd.f32 %v7701_v57, %v6526_v20  ;;  %v4412_v32 = vmul.f32 %v11968_v17, %v12167_v27  ;;  %v12214_v34 = vpop.f32.mrf.mxu0  ;;  %9692 = vmatmul.mubr.msk.f32.gmra.mxu0 %vm377_vm0, %v10435_v10 }
 0x21d   : > { %v4411_v29 = vmul.f32 %v11990_v35, %v1596_v21  ;;  %v4413_v24 = vmul.f32 %v12006_v46, %v2045_v11  ;;  %v7840_v14 = vadd.f32 %v7839_v8, %v6528_v5  ;;  %v6529_v16 = vmax.f32 %v5505_v56, 0.0  ;;  %v2061_v39 = vpop.f32.mrf.mxu1  ;;  %9756 = vmatmul.mubr.msk.f32.gmra.mxu1 %vm377_vm0, %v10435_v10  ;;  %1904 = vmatprep.mubr.f32.mxu0 %v10663_v6  ;;  %v10437_v10 = vld [vmem:[%s10776_s30 + $0x1f8] sm:$0xff] }
 0x21e   : > { %v7771_v15 = vadd.f32 %v7770_v41, %v6527_v54  ;;  %v5518_v42 = vadd.f32 %v11965_v12, %v4410_v9  ;;  %v5520_v27 = vadd.f32 %v11971_v19, %v4412_v32  ;;  %v4426_v49 = vmul.f32 %v11954_v58, %v12179_v3  ;;  %v1614_v55 = vpop.f32.mrf.mxu0  ;;  %2353 = vmatprep.mubr.f32.mxu1 %v10663_v6 }
 0x21f   : > { %v5519_v21 = vadd.f32 %v11998_v60, %v4411_v29  ;;  %v5521_v11 = vadd.f32 %v12014_v52, %v4413_v24  ;;  %v7909_v61 = vadd.f32 %v7908_v53, %v6529_v16  ;;  %v4428_v4 = vmul.f32 %v11968_v17, %v2049_v40  ;;  %v12229_v0 = vpop.f32.mrf.mxu1 }
 0x220   : > { %v6542_v50 = vmax.f32 %v5518_v42, 0.0  ;;  %v4427_v31 = vmul.f32 %v11990_v35, %v1602_v59  ;;  %v6544_v48 = vmax.f32 %v5520_v27, 0.0  ;;  %v5534_v28 = vadd.f32 %v11965_v12, %v4426_v49  ;;  %v12232_v33 = vpop.f32.mrf.mxu0  ;;  %9693 = vmatmul.mubr.msk.f32.gmra.mxu0 %vm377_vm0, %v10436_v44 }
 0x221   : > { %v6543_v22 = vmax.f32 %v5519_v21, 0.0  ;;  %v6545_v13 = vmax.f32 %v5521_v11, 0.0  ;;  %v5536_v57 = vadd.f32 %v11971_v19, %v4428_v4  ;;  %v4429_v40 = vmul.f32 %v12006_v46, %v2051_v7  ;;  %v12239_v59 = vpop.f32.mrf.mxu1  ;;  %9757 = vmatmul.mubr.msk.f32.gmra.mxu1 %vm377_vm0, %v10436_v44  ;;  %1910 = vmatprep.mubr.f32.mxu0 %v10663_v6 }
 0x222   : > { %v7703_v3 = vadd.f32 %v7702_v26, %v6542_v50  ;;  %v5535_v51 = vadd.f32 %v11998_v60, %v4427_v31  ;;  %v7841_v18 = vadd.f32 %v7840_v14, %v6544_v48  ;;  %v6558_v41 = vmax.f32 %v5534_v28, 0.0  ;;  %v12242_v53 = vpop.f32.mrf.mxu0  ;;  %2359 = vmatprep.mubr.f32.mxu1 %v10663_v6  ;;  %v373_v31 = vld [vmem:[%s16979_s1 + $0x60] sm:$0xff]  ;;  %v375_v48 = vld [vmem:[%s16979_s1 + $0x70] sm:$0xff] }
 0x223   : > { %v7772_v43 = vadd.f32 %v7771_v15, %v6543_v22  ;;  %v7910_v8 = vadd.f32 %v7909_v61, %v6545_v13  ;;  %v6560_v20 = vmax.f32 %v5536_v57, 0.0  ;;  %v5537_v54 = vadd.f32 %v12014_v52, %v4429_v40  ;;  %v2069_v56 = vpop.f32.mrf.mxu1 }
 0x224   : > { %v6559_v5 = vmax.f32 %v5535_v51, 0.0  ;;  %v4442_v7 = vmul.f32 %v11954_v58, %v12195_v38  ;;  %v7704_v9 = vadd.f32 %v7703_v3, %v6558_v41  ;;  %v4444_v26 = vmul.f32 %v11968_v17, %v12202_v45  ;;  %v12253_v24 = vpop.f32.mrf.mxu0  ;;  %9694 = vmatmul.mubr.msk.f32.gmra.mxu0 %vm377_vm0, %v10437_v10 }
 0x225   : > { %v4443_v32 = vmul.f32 %v11990_v35, %v1608_v23  ;;  %v4445_v29 = vmul.f32 %v12006_v46, %v2057_v37  ;;  %v7842_v14 = vadd.f32 %v7841_v18, %v6560_v20  ;;  %v6561_v16 = vmax.f32 %v5537_v54, 0.0  ;;  %v12258_v38 = vpop.f32.mrf.mxu1  ;;  %9758 = vmatmul.mubr.msk.f32.gmra.mxu1 %vm377_vm0, %v10437_v10  ;;  %2430 = vmatprep.mubr.f32.mxu0 %v10663_v6 }
 0x226   : > { %v7773_v15 = vadd.f32 %v7772_v43, %v6559_v5  ;;  %v5550_v42 = vadd.f32 %v11965_v12, %v4442_v7  ;;  %v5552_v45 = vadd.f32 %v11971_v19, %v4444_v26  ;;  %v4458_v27 = vmul.f32 %v11954_v58, %v12214_v34  ;;  %v1626_v21 = vpop.f32.mrf.mxu0  ;;  %2879 = vmatprep.mubr.f32.mxu1 %v10663_v6 }
 0x227   : > { %v5551_v23 = vadd.f32 %v11998_v60, %v4443_v32  ;;  %v5553_v37 = vadd.f32 %v12014_v52, %v4445_v29  ;;  %v7911_v11 = vadd.f32 %v7910_v8, %v6561_v16  ;;  %v4460_v61 = vmul.f32 %v11968_v17, %v2061_v39  ;;  %v12270_v4 = vpop.f32.mrf.mxu1  ;;  %v10438_v39 = vld [vmem:[%s10776_s30] sm:$0xff] }
 0x228   : > { %v6574_v49 = vmax.f32 %v5550_v42, 0.0  ;;  %v4459_v50 = vmul.f32 %v11990_v35, %v1614_v55  ;;  %v6576_v34 = vmax.f32 %v5552_v45, 0.0  ;;  %v5566_v28 = vadd.f32 %v11965_v12, %v4458_v27  ;;  %v12279_v44 = vpop.f32.mrf.mxu0  ;;  %9759 = vmatmul.mubr.msk.f32.vlgmr.msra.gmra.mxu0 %vm377_vm0, %v10438_v39 }
 0x229   : > { %v6575_v22 = vmax.f32 %v5551_v23, 0.0  ;;  %v6577_v13 = vmax.f32 %v5553_v37, 0.0  ;;  %v5568_v3 = vadd.f32 %v11971_v19, %v4460_v61  ;;  %v4461_v51 = vmul.f32 %v12006_v46, %v12229_v0  ;;  %v12287_v40 = vpop.f32.mrf.mxu1  ;;  %9823 = vmatmul.mubr.msk.f32.vlgmr.msra.gmra.mxu1 %vm377_vm0, %v10438_v39  ;;  %3295 = vmatpush1.msra.mxu0 %v373_v31  ;;  %v10440_v39 = vld [vmem:[%s10776_s30 + $0x10] sm:$0xff] }
 0x22a   : > { %v7705_v55 = vadd.f32 %v7704_v9, %v6574_v49  ;;  %v5567_v57 = vadd.f32 %v11998_v60, %v4459_v50  ;;  %v7843_v18 = vadd.f32 %v7842_v14, %v6576_v34  ;;  %v6590_v41 = vmax.f32 %v5566_v28, 0.0  ;;  %3744 = vmatpush1.msra.mxu1 %v375_v48  ;;  %v1632_v20 = vpop.f32.mrf.mxu0  ;;  %2436 = vmatprep.mubr.f32.mxu0 %v10663_v6 }
 0x22b   : > { %v7774_v43 = vadd.f32 %v7773_v15, %v6575_v22  ;;  %v7912_v8 = vadd.f32 %v7911_v11, %v6577_v13  ;;  %v6592_v5 = vmax.f32 %v5568_v3, 0.0  ;;  %v5569_v7 = vadd.f32 %v12014_v52, %v4461_v51  ;;  %v2081_v0 = vpop.f32.mrf.mxu1  ;;  %2885 = vmatprep.mubr.f32.mxu1 %v10663_v6  ;;  %v10439_v15 = vld [vmem:[%s10776_s30 + $0x8] sm:$0xff] }
 0x22c   : > { %v6591_v54 = vmax.f32 %v5567_v57, 0.0  ;;  %v4474_v9 = vmul.f32 %v11954_v58, %v12232_v33  ;;  %v7706_v26 = vadd.f32 %v7705_v55, %v6590_v41  ;;  %v4476_v32 = vmul.f32 %v11968_v17, %v12239_v59  ;;  %v12300_v14 = vpop.f32.mrf.mxu0  ;;  %9760 = vmatmul.mubr.msk.f32.gmra.mxu0 %vm377_vm0, %v10439_v15 }
 0x22d   : > { %v4475_v29 = vmul.f32 %v11990_v35, %v12242_v53  ;;  %v4477_v10 = vmul.f32 %v12006_v46, %v2069_v56  ;;  %v7844_v33 = vadd.f32 %v7843_v18, %v6592_v5  ;;  %v6593_v42 = vmax.f32 %v5569_v7, 0.0  ;;  %v2085_v23 = vpop.f32.mrf.mxu1  ;;  %9824 = vmatmul.mubr.msk.f32.gmra.mxu1 %vm377_vm0, %v10439_v15  ;;  %2442 = vmatprep.mubr.f32.mxu0 %v10663_v6  ;;  %v10441_v15 = vld [vmem:[%s10776_s30 + $0x18] sm:$0xff] }
 0x22e   : > { %v7775_v16 = vadd.f32 %v7774_v43, %v6591_v54  ;;  %v5582_v45 = vadd.f32 %v11965_v12, %v4474_v9  ;;  %v5584_v59 = vadd.f32 %v11971_v19, %v4476_v32  ;;  %v4490_v37 = vmul.f32 %v11954_v58, %v12253_v24  ;;  %v1638_v27 = vpop.f32.mrf.mxu0  ;;  %2891 = vmatprep.mubr.f32.mxu1 %v10663_v6 }
 0x22f   : > { %v5583_v53 = vadd.f32 %v11998_v60, %v4475_v29  ;;  %v5585_v56 = vadd.f32 %v12014_v52, %v4477_v10  ;;  %v7913_v11 = vadd.f32 %v7912_v8, %v6593_v42  ;;  %v4492_v61 = vmul.f32 %v11968_v17, %v12258_v38  ;;  %v2087_v31 = vpop.f32.mrf.mxu1 }
 0x230   : > { %v6606_v49 = vmax.f32 %v5582_v45, 0.0  ;;  %v4491_v50 = vmul.f32 %v11990_v35, %v1626_v21  ;;  %v6608_v48 = vmax.f32 %v5584_v59, 0.0  ;;  %v5598_v13 = vadd.f32 %v11965_v12, %v4490_v37  ;;  %v12317_v28 = vpop.f32.mrf.mxu0  ;;  %9761 = vmatmul.mubr.msk.f32.gmra.mxu0 %vm377_vm0, %v10440_v39 }
 0x231   : > { %v6607_v34 = vmax.f32 %v5583_v53, 0.0  ;;  %v6609_v22 = vmax.f32 %v5585_v56, 0.0  ;;  %v5600_v55 = vadd.f32 %v11971_v19, %v4492_v61  ;;  %v4493_v38 = vmul.f32 %v12006_v46, %v12270_v4  ;;  %v12325_v21 = vpop.f32.mrf.mxu1  ;;  %9825 = vmatmul.mubr.msk.f32.gmra.mxu1 %vm377_vm0, %v10440_v39  ;;  %2448 = vmatprep.mubr.f32.mxu0 %v10663_v6  ;;  %v10442_v39 = vld [vmem:[%s10776_s30 + $0x20] sm:$0xff] }
 0x232   : > { %v7707_v24 = vadd.f32 %v7706_v26, %v6606_v49  ;;  %v5599_v3 = vadd.f32 %v11998_v60, %v4491_v50  ;;  %v7845_v57 = vadd.f32 %v7844_v33, %v6608_v48  ;;  %v6622_v43 = vmax.f32 %v5598_v13, 0.0  ;;  %v1644_v8 = vpop.f32.mrf.mxu0  ;;  %2897 = vmatprep.mubr.f32.mxu1 %v10663_v6 }
 0x233   : > { %v7776_v51 = vadd.f32 %v7775_v16, %v6607_v34  ;;  %v7914_v18 = vadd.f32 %v7913_v11, %v6609_v22  ;;  %v6624_v41 = vmax.f32 %v5600_v55, 0.0  ;;  %v5601_v54 = vadd.f32 %v12014_v52, %v4493_v38  ;;  %v2093_v7 = vpop.f32.mrf.mxu1 }
 0x234   : > { %v6623_v5 = vmax.f32 %v5599_v3, 0.0  ;;  %v4506_v4 = vmul.f32 %v11954_v58, %v12279_v44  ;;  %v7708_v9 = vadd.f32 %v7707_v24, %v6622_v43  ;;  %v4508_v26 = vmul.f32 %v11968_v17, %v12287_v40  ;;  %v12337_v10 = vpop.f32.mrf.mxu0  ;;  %9762 = vmatmul.mubr.msk.f32.gmra.mxu0 %vm377_vm0, %v10441_v15 }
 0x235   : > { %v4507_v32 = vmul.f32 %v11990_v35, %v1632_v20  ;;  %v4509_v29 = vmul.f32 %v12006_v46, %v2081_v0  ;;  %v7846_v33 = vadd.f32 %v7845_v57, %v6624_v41  ;;  %v6625_v42 = vmax.f32 %v5601_v54, 0.0  ;;  %v2097_v44 = vpop.f32.mrf.mxu1  ;;  %9826 = vmatmul.mubr.msk.f32.gmra.mxu1 %vm377_vm0, %v10441_v15  ;;  %2454 = vmatprep.mubr.f32.mxu0 %v10663_v6  ;;  %v10443_v15 = vld [vmem:[%s10776_s30 + $0x28] sm:$0xff] }
 0x236   : > { %v7777_v16 = vadd.f32 %v7776_v51, %v6623_v5  ;;  %v5614_v45 = vadd.f32 %v11965_v12, %v4506_v4  ;;  %v5616_v40 = vadd.f32 %v11971_v19, %v4508_v26  ;;  %v4522_v59 = vmul.f32 %v11954_v58, %v12300_v14  ;;  %v1650_v53 = vpop.f32.mrf.mxu0  ;;  %2903 = vmatprep.mubr.f32.mxu1 %v10663_v6 }
 0x237   : > { %v5615_v20 = vadd.f32 %v11998_v60, %v4507_v32  ;;  %v5617_v0 = vadd.f32 %v12014_v52, %v4509_v29  ;;  %v7915_v56 = vadd.f32 %v7914_v18, %v6625_v42  ;;  %v4524_v11 = vmul.f32 %v11968_v17, %v2085_v23  ;;  %v2099_v61 = vpop.f32.mrf.mxu1 }
 0x238   : > { %v6638_v37 = vmax.f32 %v5614_v45, 0.0  ;;  %v4523_v49 = vmul.f32 %v11990_v35, %v1638_v27  ;;  %v6640_v50 = vmax.f32 %v5616_v40, 0.0  ;;  %v5630_v22 = vadd.f32 %v11965_v12, %v4522_v59  ;;  %v12353_v13 = vpop.f32.mrf.mxu0  ;;  %9763 = vmatmul.mubr.msk.f32.gmra.mxu0 %vm377_vm0, %v10442_v39 }
 0x239   : > { %v6639_v48 = vmax.f32 %v5615_v20, 0.0  ;;  %v6641_v34 = vmax.f32 %v5617_v0, 0.0  ;;  %v5632_v24 = vadd.f32 %v11971_v19, %v4524_v11  ;;  %v4525_v23 = vmul.f32 %v12006_v46, %v2087_v31  ;;  %v12360_v3 = vpop.f32.mrf.mxu1  ;;  %9827 = vmatmul.mubr.msk.f32.gmra.mxu1 %vm377_vm0, %v10442_v39  ;;  %2460 = vmatprep.mubr.f32.mxu0 %v10663_v6  ;;  %v10444_v39 = vld [vmem:[%s10776_s30 + $0x30] sm:$0xff] }
 0x23a   : > { %v7709_v14 = vadd.f32 %v7708_v9, %v6638_v37  ;;  %v5631_v55 = vadd.f32 %v11998_v60, %v4523_v49  ;;  %v7847_v27 = vadd.f32 %v7846_v33, %v6640_v50  ;;  %v6654_v51 = vmax.f32 %v5630_v22, 0.0  ;;  %v1656_v18 = vpop.f32.mrf.mxu0  ;;  %2909 = vmatprep.mubr.f32.mxu1 %v10663_v6 }
 0x23b   : > { %v7778_v38 = vadd.f32 %v7777_v16, %v6639_v48  ;;  %v7916_v57 = vadd.f32 %v7915_v56, %v6641_v34  ;;  %v6656_v43 = vmax.f32 %v5632_v24, 0.0  ;;  %v5633_v5 = vadd.f32 %v12014_v52, %v4525_v23  ;;  %v2105_v54 = vpop.f32.mrf.mxu1 }
 0x23c   : > { %v6655_v41 = vmax.f32 %v5631_v55, 0.0  ;;  %v4538_v31 = vmul.f32 %v11954_v58, %v12317_v28  ;;  %v7710_v4 = vadd.f32 %v7709_v14, %v6654_v51  ;;  %v4540_v9 = vmul.f32 %v11968_v17, %v12325_v21  ;;  %v12372_v29 = vpop.f32.mrf.mxu0  ;;  %9764 = vmatmul.mubr.msk.f32.gmra.mxu0 %vm377_vm0, %v10443_v15 }
 0x23d   : > { %v4539_v26 = vmul.f32 %v11990_v35, %v1644_v8  ;;  %v4541_v32 = vmul.f32 %v12006_v46, %v2093_v7  ;;  %v7848_v33 = vadd.f32 %v7847_v27, %v6656_v43  ;;  %v6657_v42 = vmax.f32 %v5633_v5, 0.0  ;;  %v2109_v28 = vpop.f32.mrf.mxu1  ;;  %9828 = vmatmul.mubr.msk.f32.gmra.mxu1 %vm377_vm0, %v10443_v15  ;;  %2466 = vmatprep.mubr.f32.mxu0 %v10663_v6  ;;  %v10445_v15 = vld [vmem:[%s10776_s30 + $0x38] sm:$0xff] }
 0x23e   : > { %v7779_v16 = vadd.f32 %v7778_v38, %v6655_v41  ;;  %v5646_v45 = vadd.f32 %v11965_v12, %v4538_v31  ;;  %v5648_v21 = vadd.f32 %v11971_v19, %v4540_v9  ;;  %v4554_v40 = vmul.f32 %v11954_v58, %v12337_v10  ;;  %v1662_v20 = vpop.f32.mrf.mxu0  ;;  %2915 = vmatprep.mubr.f32.mxu1 %v10663_v6 }
 0x23f   : > { %v5647_v8 = vadd.f32 %v11998_v60, %v4539_v26  ;;  %v5649_v7 = vadd.f32 %v12014_v52, %v4541_v32  ;;  %v7917_v0 = vadd.f32 %v7916_v57, %v6657_v42  ;;  %v4556_v56 = vmul.f32 %v11968_v17, %v2097_v44  ;;  %v2111_v11 = vpop.f32.mrf.mxu1 }
 0x240   : > { %v6670_v59 = vmax.f32 %v5646_v45, 0.0  ;;  %v4555_v37 = vmul.f32 %v11990_v35, %v1650_v53  ;;  %v6672_v49 = vmax.f32 %v5648_v21, 0.0  ;;  %v5662_v34 = vadd.f32 %v11965_v12, %v4554_v40  ;;  %v12388_v22 = vpop.f32.mrf.mxu0  ;;  %9765 = vmatmul.mubr.msk.f32.gmra.mxu0 %vm377_vm0, %v10444_v39 }
 0x241   : > { %v6671_v50 = vmax.f32 %v5647_v8, 0.0  ;;  %v6673_v48 = vmax.f32 %v5649_v7, 0.0  ;;  %v5664_v14 = vadd.f32 %v11971_v19, %v4556_v56  ;;  %v4557_v44 = vmul.f32 %v12006_v46, %v2099_v61  ;;  %v12395_v55 = vpop.f32.mrf.mxu1  ;;  %9829 = vmatmul.mubr.msk.f32.gmra.mxu1 %vm377_vm0, %v10444_v39  ;;  %2472 = vmatprep.mubr.f32.mxu0 %v10663_v6  ;;  %v10446_v39 = vld [vmem:[%s10776_s30 + $0x40] sm:$0xff] }
 0x242   : > { %v7711_v10 = vadd.f32 %v7710_v4, %v6670_v59  ;;  %v5663_v24 = vadd.f32 %v11998_v60, %v4555_v37  ;;  %v7849_v53 = vadd.f32 %v7848_v33, %v6672_v49  ;;  %v6686_v38 = vmax.f32 %v5662_v34, 0.0  ;;  %v1668_v57 = vpop.f32.mrf.mxu0  ;;  %2921 = vmatprep.mubr.f32.mxu1 %v10663_v6 }
 0x243   : > { %v7780_v23 = vadd.f32 %v7779_v16, %v6671_v50  ;;  %v7918_v27 = vadd.f32 %v7917_v0, %v6673_v48  ;;  %v6688_v51 = vmax.f32 %v5664_v14, 0.0  ;;  %v5665_v41 = vadd.f32 %v12014_v52, %v4557_v44  ;;  %v2117_v5 = vpop.f32.mrf.mxu1 }
 0x244   : > { %v6687_v43 = vmax.f32 %v5663_v24, 0.0  ;;  %v4570_v61 = vmul.f32 %v11954_v58, %v12353_v13  ;;  %v7712_v31 = vadd.f32 %v7711_v10, %v6686_v38  ;;  %v4572_v4 = vmul.f32 %v11968_v17, %v12360_v3  ;;  %v12407_v32 = vpop.f32.mrf.mxu0  ;;  %9766 = vmatmul.mubr.msk.f32.gmra.mxu0 %vm377_vm0, %v10445_v15 }
 0x245   : > { %v4571_v9 = vmul.f32 %v11990_v35, %v1656_v18  ;;  %v4573_v26 = vmul.f32 %v12006_v46, %v2105_v54  ;;  %v7850_v33 = vadd.f32 %v7849_v53, %v6688_v51  ;;  %v6689_v42 = vmax.f32 %v5665_v41, 0.0  ;;  %v2121_v13 = vpop.f32.mrf.mxu1  ;;  %9830 = vmatmul.mubr.msk.f32.gmra.mxu1 %vm377_vm0, %v10445_v15  ;;  %2478 = vmatprep.mubr.f32.mxu0 %v10663_v6  ;;  %v10447_v15 = vld [vmem:[%s10776_s30 + $0x48] sm:$0xff] }
 0x246   : > { %v7781_v16 = vadd.f32 %v7780_v23, %v6687_v43  ;;  %v5678_v45 = vadd.f32 %v11965_v12, %v4570_v61  ;;  %v5680_v3 = vadd.f32 %v11971_v19, %v4572_v4  ;;  %v4586_v21 = vmul.f32 %v11954_v58, %v12372_v29  ;;  %v1674_v8 = vpop.f32.mrf.mxu0  ;;  %2927 = vmatprep.mubr.f32.mxu1 %v10663_v6 }
 0x247   : > { %v5679_v18 = vadd.f32 %v11998_v60, %v4571_v9  ;;  %v5681_v54 = vadd.f32 %v12014_v52, %v4573_v26  ;;  %v7919_v7 = vadd.f32 %v7918_v27, %v6689_v42  ;;  %v4588_v0 = vmul.f32 %v11968_v17, %v2109_v28  ;;  %v2123_v56 = vpop.f32.mrf.mxu1 }
 0x248   : > { %v6702_v40 = vmax.f32 %v5678_v45, 0.0  ;;  %v4587_v59 = vmul.f32 %v11990_v35, %v1662_v20  ;;  %v6704_v37 = vmax.f32 %v5680_v3, 0.0  ;;  %v5694_v48 = vadd.f32 %v11965_v12, %v4586_v21  ;;  %v12423_v34 = vpop.f32.mrf.mxu0  ;;  %9767 = vmatmul.mubr.msk.f32.gmra.mxu0 %vm377_vm0, %v10446_v39 }
 0x249   : > { %v6703_v49 = vmax.f32 %v5679_v18, 0.0  ;;  %v6705_v50 = vmax.f32 %v5681_v54, 0.0  ;;  %v5696_v10 = vadd.f32 %v11971_v19, %v4588_v0  ;;  %v4589_v28 = vmul.f32 %v12006_v46, %v2111_v11  ;;  %v12430_v24 = vpop.f32.mrf.mxu1  ;;  %9831 = vmatmul.mubr.msk.f32.gmra.mxu1 %vm377_vm0, %v10446_v39  ;;  %2484 = vmatprep.mubr.f32.mxu0 %v10663_v6  ;;  %v10448_v39 = vld [vmem:[%s10776_s30 + $0x50] sm:$0xff] }
 0x24a   : > { %v7713_v29 = vadd.f32 %v7712_v31, %v6702_v40  ;;  %v5695_v14 = vadd.f32 %v11998_v60, %v4587_v59  ;;  %v7851_v20 = vadd.f32 %v7850_v33, %v6704_v37  ;;  %v6718_v23 = vmax.f32 %v5694_v48, 0.0  ;;  %v1680_v27 = vpop.f32.mrf.mxu0  ;;  %2933 = vmatprep.mubr.f32.mxu1 %v10663_v6 }
 0x24b   : > { %v7782_v44 = vadd.f32 %v7781_v16, %v6703_v49  ;;  %v7920_v53 = vadd.f32 %v7919_v7, %v6705_v50  ;;  %v6720_v38 = vmax.f32 %v5696_v10, 0.0  ;;  %v5697_v43 = vadd.f32 %v12014_v52, %v4589_v28  ;;  %v2129_v41 = vpop.f32.mrf.mxu1 }
 0x24c   : > { %v6719_v51 = vmax.f32 %v5695_v14, 0.0  ;;  %v4602_v11 = vmul.f32 %v11954_v58, %v12388_v22  ;;  %v7714_v61 = vadd.f32 %v7713_v29, %v6718_v23  ;;  %v4604_v31 = vmul.f32 %v11968_v17, %v12395_v55  ;;  %v12442_v26 = vpop.f32.mrf.mxu0  ;;  %9768 = vmatmul.mubr.msk.f32.gmra.mxu0 %vm377_vm0, %v10447_v15 }
 0x24d   : > { %v4603_v4 = vmul.f32 %v11990_v35, %v1668_v57  ;;  %v4605_v9 = vmul.f32 %v12006_v46, %v2117_v5  ;;  %v7852_v33 = vadd.f32 %v7851_v20, %v6720_v38  ;;  %v6721_v42 = vmax.f32 %v5697_v43, 0.0  ;;  %v2133_v22 = vpop.f32.mrf.mxu1  ;;  %9832 = vmatmul.mubr.msk.f32.gmra.mxu1 %vm377_vm0, %v10447_v15  ;;  %2490 = vmatprep.mubr.f32.mxu0 %v10663_v6  ;;  %v10449_v15 = vld [vmem:[%s10776_s30 + $0x58] sm:$0xff] }
 0x24e   : > { %v7783_v16 = vadd.f32 %v7782_v44, %v6719_v51  ;;  %v5710_v45 = vadd.f32 %v11965_v12, %v4602_v11  ;;  %v5712_v55 = vadd.f32 %v11971_v19, %v4604_v31  ;;  %v4618_v3 = vmul.f32 %v11954_v58, %v12407_v32  ;;  %v1686_v18 = vpop.f32.mrf.mxu0  ;;  %2939 = vmatprep.mubr.f32.mxu1 %v10663_v6 }
 0x24f   : > { %v5711_v57 = vadd.f32 %v11998_v60, %v4603_v4  ;;  %v5713_v5 = vadd.f32 %v12014_v52, %v4605_v9  ;;  %v7921_v54 = vadd.f32 %v7920_v53, %v6721_v42  ;;  %v4620_v7 = vmul.f32 %v11968_v17, %v2121_v13  ;;  %v2135_v0 = vpop.f32.mrf.mxu1 }
 0x250   : > { %v6734_v21 = vmax.f32 %v5710_v45, 0.0  ;;  %v4619_v40 = vmul.f32 %v11990_v35, %v1674_v8  ;;  %v6736_v59 = vmax.f32 %v5712_v55, 0.0  ;;  %v5726_v50 = vadd.f32 %v11965_v12, %v4618_v3  ;;  %v12458_v48 = vpop.f32.mrf.mxu0  ;;  %9769 = vmatmul.mubr.msk.f32.gmra.mxu0 %vm377_vm0, %v10448_v39 }
 0x251   : > { %v6735_v37 = vmax.f32 %v5711_v57, 0.0  ;;  %v6737_v49 = vmax.f32 %v5713_v5, 0.0  ;;  %v5728_v29 = vadd.f32 %v11971_v19, %v4620_v7  ;;  %v4621_v13 = vmul.f32 %v12006_v46, %v2123_v56  ;;  %v12465_v14 = vpop.f32.mrf.mxu1  ;;  %9833 = vmatmul.mubr.msk.f32.gmra.mxu1 %vm377_vm0, %v10448_v39  ;;  %2496 = vmatprep.mubr.f32.mxu0 %v10663_v6  ;;  %v10450_v39 = vld [vmem:[%s10776_s30 + $0x60] sm:$0xff] }
 0x252   : > { %v7715_v32 = vadd.f32 %v7714_v61, %v6734_v21  ;;  %v5727_v10 = vadd.f32 %v11998_v60, %v4619_v40  ;;  %v7853_v8 = vadd.f32 %v7852_v33, %v6736_v59  ;;  %v6750_v44 = vmax.f32 %v5726_v50, 0.0  ;;  %v1692_v53 = vpop.f32.mrf.mxu0  ;;  %2945 = vmatprep.mubr.f32.mxu1 %v10663_v6 }
 0x253   : > { %v7784_v28 = vadd.f32 %v7783_v16, %v6735_v37  ;;  %v7922_v20 = vadd.f32 %v7921_v54, %v6737_v49  ;;  %v6752_v23 = vmax.f32 %v5728_v29, 0.0  ;;  %v5729_v51 = vadd.f32 %v12014_v52, %v4621_v13  ;;  %v2141_v43 = vpop.f32.mrf.mxu1 }
 0x254   : > { %v6751_v38 = vmax.f32 %v5727_v10, 0.0  ;;  %v4634_v56 = vmul.f32 %v11954_v58, %v12423_v34  ;;  %v7716_v11 = vadd.f32 %v7715_v32, %v6750_v44  ;;  %v4636_v61 = vmul.f32 %v11968_v17, %v12430_v24  ;;  %v12477_v9 = vpop.f32.mrf.mxu0  ;;  %9770 = vmatmul.mubr.msk.f32.gmra.mxu0 %vm377_vm0, %v10449_v15 }
 0x255   : > { %v4635_v31 = vmul.f32 %v11990_v35, %v1680_v27  ;;  %v4637_v4 = vmul.f32 %v12006_v46, %v2129_v41  ;;  %v7854_v33 = vadd.f32 %v7853_v8, %v6752_v23  ;;  %v6753_v42 = vmax.f32 %v5729_v51, 0.0  ;;  %v2145_v34 = vpop.f32.mrf.mxu1  ;;  %9834 = vmatmul.mubr.msk.f32.gmra.mxu1 %vm377_vm0, %v10449_v15  ;;  %2502 = vmatprep.mubr.f32.mxu0 %v10663_v6  ;;  %v10451_v15 = vld [vmem:[%s10776_s30 + $0x68] sm:$0xff] }
 0x256   : > { %v7785_v16 = vadd.f32 %v7784_v28, %v6751_v38  ;;  %v5742_v45 = vadd.f32 %v11965_v12, %v4634_v56  ;;  %v5744_v24 = vadd.f32 %v11971_v19, %v4636_v61  ;;  %v4650_v55 = vmul.f32 %v11954_v58, %v12442_v26  ;;  %v1698_v57 = vpop.f32.mrf.mxu0  ;;  %2951 = vmatprep.mubr.f32.mxu1 %v10663_v6 }
 0x257   : > { %v5743_v27 = vadd.f32 %v11998_v60, %v4635_v31  ;;  %v5745_v41 = vadd.f32 %v12014_v52, %v4637_v4  ;;  %v7923_v5 = vadd.f32 %v7922_v20, %v6753_v42  ;;  %v4652_v54 = vmul.f32 %v11968_v17, %v2133_v22  ;;  %v2147_v7 = vpop.f32.mrf.mxu1 }
 0x258   : > { %v6766_v3 = vmax.f32 %v5742_v45, 0.0  ;;  %v4651_v21 = vmul.f32 %v11990_v35, %v1686_v18  ;;  %v6768_v40 = vmax.f32 %v5744_v24, 0.0  ;;  %v5758_v49 = vadd.f32 %v11965_v12, %v4650_v55  ;;  %v12493_v50 = vpop.f32.mrf.mxu0  ;;  %9771 = vmatmul.mubr.msk.f32.gmra.mxu0 %vm377_vm0, %v10450_v39 }
 0x259   : > { %v6767_v59 = vmax.f32 %v5743_v27, 0.0  ;;  %v6769_v37 = vmax.f32 %v5745_v41, 0.0  ;;  %v5760_v32 = vadd.f32 %v11971_v19, %v4652_v54  ;;  %v4653_v22 = vmul.f32 %v12006_v46, %v2135_v0  ;;  %v12500_v10 = vpop.f32.mrf.mxu1  ;;  %9835 = vmatmul.mubr.msk.f32.gmra.mxu1 %vm377_vm0, %v10450_v39  ;;  %2508 = vmatprep.mubr.f32.mxu0 %v10663_v6  ;;  %v10452_v39 = vld [vmem:[%s10776_s30 + $0x70] sm:$0xff] }
 0x25a   : > { %v7717_v26 = vadd.f32 %v7716_v11, %v6766_v3  ;;  %v5759_v29 = vadd.f32 %v11998_v60, %v4651_v21  ;;  %v7855_v18 = vadd.f32 %v7854_v33, %v6768_v40  ;;  %v6782_v28 = vmax.f32 %v5758_v49, 0.0  ;;  %v1704_v20 = vpop.f32.mrf.mxu0  ;;  %2957 = vmatprep.mubr.f32.mxu1 %v10663_v6 }
 0x25b   : > { %v7786_v13 = vadd.f32 %v7785_v16, %v6767_v59  ;;  %v7924_v8 = vadd.f32 %v7923_v5, %v6769_v37  ;;  %v6784_v44 = vmax.f32 %v5760_v32, 0.0  ;;  %v5761_v38 = vadd.f32 %v12014_v52, %v4653_v22  ;;  %v2153_v51 = vpop.f32.mrf.mxu1 }
 0x25c   : > { %v6783_v23 = vmax.f32 %v5759_v29, 0.0  ;;  %v4666_v0 = vmul.f32 %v11954_v58, %v12458_v48  ;;  %v7718_v56 = vadd.f32 %v7717_v26, %v6782_v28  ;;  %v4668_v11 = vmul.f32 %v11968_v17, %v12465_v14  ;;  %v12512_v4 = vpop.f32.mrf.mxu0  ;;  %9772 = vmatmul.mubr.msk.f32.gmra.mxu0 %vm377_vm0, %v10451_v15 }
 0x25d   : > { %v4667_v61 = vmul.f32 %v11990_v35, %v1692_v53  ;;  %v4669_v31 = vmul.f32 %v12006_v46, %v2141_v43  ;;  %v7856_v33 = vadd.f32 %v7855_v18, %v6784_v44  ;;  %v6785_v42 = vmax.f32 %v5761_v38, 0.0  ;;  %v2157_v48 = vpop.f32.mrf.mxu1  ;;  %9836 = vmatmul.mubr.msk.f32.gmra.mxu1 %vm377_vm0, %v10451_v15  ;;  %2514 = vmatprep.mubr.f32.mxu0 %v10663_v6  ;;  %v10453_v15 = vld [vmem:[%s10776_s30 + $0x78] sm:$0xff] }
 0x25e   : > { %v7787_v16 = vadd.f32 %v7786_v13, %v6783_v23  ;;  %v5774_v45 = vadd.f32 %v11965_v12, %v4666_v0  ;;  %v5776_v14 = vadd.f32 %v11971_v19, %v4668_v11  ;;  %v4682_v24 = vmul.f32 %v11954_v58, %v12477_v9  ;;  %v1710_v27 = vpop.f32.mrf.mxu0  ;;  %2963 = vmatprep.mubr.f32.mxu1 %v10663_v6 }
 0x25f   : > { %v5775_v53 = vadd.f32 %v11998_v60, %v4667_v61  ;;  %v5777_v43 = vadd.f32 %v12014_v52, %v4669_v31  ;;  %v7925_v41 = vadd.f32 %v7924_v8, %v6785_v42  ;;  %v4684_v5 = vmul.f32 %v11968_v17, %v2145_v34  ;;  %v2159_v54 = vpop.f32.mrf.mxu1 }
 0x260   : > { %v6798_v55 = vmax.f32 %v5774_v45, 0.0  ;;  %v4683_v3 = vmul.f32 %v11990_v35, %v1698_v57  ;;  %v6800_v21 = vmax.f32 %v5776_v14, 0.0  ;;  %v5790_v37 = vadd.f32 %v11965_v12, %v4682_v24  ;;  %v12528_v49 = vpop.f32.mrf.mxu0  ;;  %9773 = vmatmul.mubr.msk.f32.gmra.mxu0 %vm377_vm0, %v10452_v39 }
 0x261   : > { %v6799_v40 = vmax.f32 %v5775_v53, 0.0  ;;  %v6801_v59 = vmax.f32 %v5777_v43, 0.0  ;;  %v5792_v26 = vadd.f32 %v11971_v19, %v4684_v5  ;;  %v4685_v34 = vmul.f32 %v12006_v46, %v2147_v7  ;;  %v12535_v29 = vpop.f32.mrf.mxu1  ;;  %9837 = vmatmul.mubr.msk.f32.gmra.mxu1 %vm377_vm0, %v10452_v39  ;;  %2520 = vmatprep.mubr.f32.mxu0 %v10663_v6  ;;  %v10454_v39 = vld [vmem:[%s10776_s30 + $0x80] sm:$0xff] }
 0x262   : > { %v7719_v9 = vadd.f32 %v7718_v56, %v6798_v55  ;;  %v5791_v32 = vadd.f32 %v11998_v60, %v4683_v3  ;;  %v7857_v57 = vadd.f32 %v7856_v33, %v6800_v21  ;;  %v6814_v13 = vmax.f32 %v5790_v37, 0.0  ;;  %v1716_v8 = vpop.f32.mrf.mxu0  ;;  %2969 = vmatprep.mubr.f32.mxu1 %v10663_v6 }
 0x263   : > { %v7788_v22 = vadd.f32 %v7787_v16, %v6799_v40  ;;  %v7926_v18 = vadd.f32 %v7925_v41, %v6801_v59  ;;  %v6816_v28 = vmax.f32 %v5792_v26, 0.0  ;;  %v5793_v23 = vadd.f32 %v12014_v52, %v4685_v34  ;;  %v2165_v38 = vpop.f32.mrf.mxu1 }
 0x264   : > { %v6815_v44 = vmax.f32 %v5791_v32, 0.0  ;;  %v4698_v7 = vmul.f32 %v11954_v58, %v12493_v50  ;;  %v7720_v0 = vadd.f32 %v7719_v9, %v6814_v13  ;;  %v4700_v56 = vmul.f32 %v11968_v17, %v12500_v10  ;;  %v12547_v31 = vpop.f32.mrf.mxu0  ;;  %9774 = vmatmul.mubr.msk.f32.gmra.mxu0 %vm377_vm0, %v10453_v15 }
 0x265   : > { %v4699_v11 = vmul.f32 %v11990_v35, %v1704_v20  ;;  %v4701_v61 = vmul.f32 %v12006_v46, %v2153_v51  ;;  %v7858_v33 = vadd.f32 %v7857_v57, %v6816_v28  ;;  %v6817_v42 = vmax.f32 %v5793_v23, 0.0  ;;  %v2169_v50 = vpop.f32.mrf.mxu1  ;;  %9838 = vmatmul.mubr.msk.f32.gmra.mxu1 %vm377_vm0, %v10453_v15  ;;  %2526 = vmatprep.mubr.f32.mxu0 %v10663_v6  ;;  %v10455_v15 = vld [vmem:[%s10776_s30 + $0x88] sm:$0xff] }
 0x266   : > { %v7789_v16 = vadd.f32 %v7788_v22, %v6815_v44  ;;  %v5806_v45 = vadd.f32 %v11965_v12, %v4698_v7  ;;  %v5808_v10 = vadd.f32 %v11971_v19, %v4700_v56  ;;  %v4714_v14 = vmul.f32 %v11954_v58, %v12512_v4  ;;  %v1722_v53 = vpop.f32.mrf.mxu0  ;;  %2975 = vmatprep.mubr.f32.mxu1 %v10663_v6 }
 0x267   : > { %v5807_v20 = vadd.f32 %v11998_v60, %v4699_v11  ;;  %v5809_v51 = vadd.f32 %v12014_v52, %v4701_v61  ;;  %v7927_v43 = vadd.f32 %v7926_v18, %v6817_v42  ;;  %v4716_v41 = vmul.f32 %v11968_v17, %v2157_v48  ;;  %v2171_v5 = vpop.f32.mrf.mxu1 }
 0x268   : > { %v6830_v24 = vmax.f32 %v5806_v45, 0.0  ;;  %v4715_v55 = vmul.f32 %v11990_v35, %v1710_v27  ;;  %v6832_v3 = vmax.f32 %v5808_v10, 0.0  ;;  %v5822_v59 = vadd.f32 %v11965_v12, %v4714_v14  ;;  %v12563_v37 = vpop.f32.mrf.mxu0  ;;  %9775 = vmatmul.mubr.msk.f32.gmra.mxu0 %vm377_vm0, %v10454_v39 }
 0x269   : > { %v6831_v21 = vmax.f32 %v5807_v20, 0.0  ;;  %v6833_v40 = vmax.f32 %v5809_v51, 0.0  ;;  %v5824_v9 = vadd.f32 %v11971_v19, %v4716_v41  ;;  %v4717_v48 = vmul.f32 %v12006_v46, %v2159_v54  ;;  %v12570_v32 = vpop.f32.mrf.mxu1  ;;  %9839 = vmatmul.mubr.msk.f32.gmra.mxu1 %vm377_vm0, %v10454_v39  ;;  %2532 = vmatprep.mubr.f32.mxu0 %v10663_v6  ;;  %v10456_v39 = vld [vmem:[%s10776_s30 + $0x90] sm:$0xff] }
 0x26a   : > { %v7721_v4 = vadd.f32 %v7720_v0, %v6830_v24  ;;  %v5823_v26 = vadd.f32 %v11998_v60, %v4715_v55  ;;  %v7859_v27 = vadd.f32 %v7858_v33, %v6832_v3  ;;  %v6846_v22 = vmax.f32 %v5822_v59, 0.0  ;;  %v1728_v18 = vpop.f32.mrf.mxu0  ;;  %2981 = vmatprep.mubr.f32.mxu1 %v10663_v6 }
 0x26b   : > { %v7790_v34 = vadd.f32 %v7789_v16, %v6831_v21  ;;  %v7928_v57 = vadd.f32 %v7927_v43, %v6833_v40  ;;  %v6848_v13 = vmax.f32 %v5824_v9, 0.0  ;;  %v5825_v44 = vadd.f32 %v12014_v52, %v4717_v48  ;;  %v2177_v23 = vpop.f32.mrf.mxu1 }
 0x26c   : > { %v6847_v28 = vmax.f32 %v5823_v26, 0.0  ;;  %v4730_v54 = vmul.f32 %v11954_v58, %v12528_v49  ;;  %v7722_v7 = vadd.f32 %v7721_v4, %v6846_v22  ;;  %v4732_v0 = vmul.f32 %v11968_v17, %v12535_v29  ;;  %v12582_v61 = vpop.f32.mrf.mxu0  ;;  %9776 = vmatmul.mubr.msk.f32.gmra.mxu0 %vm377_vm0, %v10455_v15 }
 0x26d   : > { %v4731_v56 = vmul.f32 %v11990_v35, %v1716_v8  ;;  %v4733_v11 = vmul.f32 %v12006_v46, %v2165_v38  ;;  %v7860_v33 = vadd.f32 %v7859_v27, %v6848_v13  ;;  %v6849_v42 = vmax.f32 %v5825_v44, 0.0  ;;  %v2181_v49 = vpop.f32.mrf.mxu1  ;;  %9840 = vmatmul.mubr.msk.f32.gmra.mxu1 %vm377_vm0, %v10455_v15  ;;  %2538 = vmatprep.mubr.f32.mxu0 %v10663_v6  ;;  %v10457_v15 = vld [vmem:[%s10776_s30 + $0x98] sm:$0xff] }
 0x26e   : > { %v7791_v16 = vadd.f32 %v7790_v34, %v6847_v28  ;;  %v5838_v45 = vadd.f32 %v11965_v12, %v4730_v54  ;;  %v5840_v29 = vadd.f32 %v11971_v19, %v4732_v0  ;;  %v4746_v10 = vmul.f32 %v11954_v58, %v12547_v31  ;;  %v1734_v20 = vpop.f32.mrf.mxu0  ;;  %2987 = vmatprep.mubr.f32.mxu1 %v10663_v6 }
 0x26f   : > { %v5839_v8 = vadd.f32 %v11998_v60, %v4731_v56  ;;  %v5841_v38 = vadd.f32 %v12014_v52, %v4733_v11  ;;  %v7929_v51 = vadd.f32 %v7928_v57, %v6849_v42  ;;  %v4748_v43 = vmul.f32 %v11968_v17, %v2169_v50  ;;  %v2183_v41 = vpop.f32.mrf.mxu1 }
 0x270   : > { %v6862_v14 = vmax.f32 %v5838_v45, 0.0  ;;  %v4747_v24 = vmul.f32 %v11990_v35, %v1722_v53  ;;  %v6864_v55 = vmax.f32 %v5840_v29, 0.0  ;;  %v5854_v40 = vadd.f32 %v11965_v12, %v4746_v10  ;;  %v12598_v59 = vpop.f32.mrf.mxu0  ;;  %9777 = vmatmul.mubr.msk.f32.gmra.mxu0 %vm377_vm0, %v10456_v39 }
 0x271   : > { %v6863_v3 = vmax.f32 %v5839_v8, 0.0  ;;  %v6865_v21 = vmax.f32 %v5841_v38, 0.0  ;;  %v5856_v4 = vadd.f32 %v11971_v19, %v4748_v43  ;;  %v4749_v50 = vmul.f32 %v12006_v46, %v2171_v5  ;;  %v12605_v26 = vpop.f32.mrf.mxu1  ;;  %9841 = vmatmul.mubr.msk.f32.gmra.mxu1 %vm377_vm0, %v10456_v39  ;;  %2544 = vmatprep.mubr.f32.mxu0 %v10663_v6  ;;  %v10458_v39 = vld [vmem:[%s10776_s30 + $0xa0] sm:$0xff] }
 0x272   : > { %v7723_v31 = vadd.f32 %v7722_v7, %v6862_v14  ;;  %v5855_v9 = vadd.f32 %v11998_v60, %v4747_v24  ;;  %v7861_v53 = vadd.f32 %v7860_v33, %v6864_v55  ;;  %v6878_v34 = vmax.f32 %v5854_v40, 0.0  ;;  %v1740_v57 = vpop.f32.mrf.mxu0  ;;  %2993 = vmatprep.mubr.f32.mxu1 %v10663_v6 }
 0x273   : > { %v7792_v48 = vadd.f32 %v7791_v16, %v6863_v3  ;;  %v7930_v27 = vadd.f32 %v7929_v51, %v6865_v21  ;;  %v6880_v22 = vmax.f32 %v5856_v4, 0.0  ;;  %v5857_v28 = vadd.f32 %v12014_v52, %v4749_v50  ;;  %v2189_v44 = vpop.f32.mrf.mxu1 }
 0x274   : > { %v6879_v13 = vmax.f32 %v5855_v9, 0.0  ;;  %v4762_v5 = vmul.f32 %v11954_v58, %v12563_v37  ;;  %v7724_v54 = vadd.f32 %v7723_v31, %v6878_v34  ;;  %v4764_v7 = vmul.f32 %v11968_v17, %v12570_v32  ;;  %v12617_v11 = vpop.f32.mrf.mxu0  ;;  %9778 = vmatmul.mubr.msk.f32.gmra.mxu0 %vm377_vm0, %v10457_v15 }
 0x275   : > { %v4763_v0 = vmul.f32 %v11990_v35, %v1728_v18  ;;  %v4765_v56 = vmul.f32 %v12006_v46, %v2177_v23  ;;  %v7862_v33 = vadd.f32 %v7861_v53, %v6880_v22  ;;  %v6881_v42 = vmax.f32 %v5857_v28, 0.0  ;;  %v2193_v37 = vpop.f32.mrf.mxu1  ;;  %9842 = vmatmul.mubr.msk.f32.gmra.mxu1 %vm377_vm0, %v10457_v15  ;;  %2550 = vmatprep.mubr.f32.mxu0 %v10663_v6  ;;  %v10459_v15 = vld [vmem:[%s10776_s30 + $0xa8] sm:$0xff] }
 0x276   : > { %v7793_v16 = vadd.f32 %v7792_v48, %v6879_v13  ;;  %v5870_v45 = vadd.f32 %v11965_v12, %v4762_v5  ;;  %v5872_v32 = vadd.f32 %v11971_v19, %v4764_v7  ;;  %v4778_v29 = vmul.f32 %v11954_v58, %v12582_v61  ;;  %v1746_v8 = vpop.f32.mrf.mxu0  ;;  %2999 = vmatprep.mubr.f32.mxu1 %v10663_v6 }
 0x277   : > { %v5871_v18 = vadd.f32 %v11998_v60, %v4763_v0  ;;  %v5873_v23 = vadd.f32 %v12014_v52, %v4765_v56  ;;  %v7931_v38 = vadd.f32 %v7930_v27, %v6881_v42  ;;  %v4780_v51 = vmul.f32 %v11968_v17, %v2181_v49  ;;  %v2195_v43 = vpop.f32.mrf.mxu1 }
 0x278   : > { %v6894_v10 = vmax.f32 %v5870_v45, 0.0  ;;  %v4779_v14 = vmul.f32 %v11990_v35, %v1734_v20  ;;  %v6896_v24 = vmax.f32 %v5872_v32, 0.0  ;;  %v5886_v21 = vadd.f32 %v11965_v12, %v4778_v29  ;;  %v12633_v40 = vpop.f32.mrf.mxu0  ;;  %9779 = vmatmul.mubr.msk.f32.gmra.mxu0 %vm377_vm0, %v10458_v39 }
 0x279   : > { %v6895_v55 = vmax.f32 %v5871_v18, 0.0  ;;  %v6897_v3 = vmax.f32 %v5873_v23, 0.0  ;;  %v5888_v31 = vadd.f32 %v11971_v19, %v4780_v51  ;;  %v4781_v49 = vmul.f32 %v12006_v46, %v2183_v41  ;;  %v12640_v9 = vpop.f32.mrf.mxu1  ;;  %9843 = vmatmul.mubr.msk.f32.gmra.mxu1 %vm377_vm0, %v10458_v39  ;;  %2556 = vmatprep.mubr.f32.mxu0 %v10663_v6  ;;  %v10460_v39 = vld [vmem:[%s10776_s30 + $0xb0] sm:$0xff] }
 0x27a   : > { %v7725_v61 = vadd.f32 %v7724_v54, %v6894_v10  ;;  %v5887_v4 = vadd.f32 %v11998_v60, %v4779_v14  ;;  %v7863_v20 = vadd.f32 %v7862_v33, %v6896_v24  ;;  %v6910_v48 = vmax.f32 %v5886_v21, 0.0  ;;  %v1752_v27 = vpop.f32.mrf.mxu0  ;;  %3005 = vmatprep.mubr.f32.mxu1 %v10663_v6 }
 0x27b   : > { %v7794_v50 = vadd.f32 %v7793_v16, %v6895_v55  ;;  %v7932_v53 = vadd.f32 %v7931_v38, %v6897_v3  ;;  %v6912_v34 = vmax.f32 %v5888_v31, 0.0  ;;  %v5889_v13 = vadd.f32 %v12014_v52, %v4781_v49  ;;  %v2201_v28 = vpop.f32.mrf.mxu1 }
 0x27c   : > { %v6911_v22 = vmax.f32 %v5887_v4, 0.0  ;;  %v4794_v41 = vmul.f32 %v11954_v58, %v12598_v59  ;;  %v7726_v5 = vadd.f32 %v7725_v61, %v6910_v48  ;;  %v4796_v54 = vmul.f32 %v11968_v17, %v12605_v26  ;;  %v12652_v56 = vpop.f32.mrf.mxu0  ;;  %9780 = vmatmul.mubr.msk.f32.gmra.mxu0 %vm377_vm0, %v10459_v15 }
 0x27d   : > { %v4795_v7 = vmul.f32 %v11990_v35, %v1740_v57  ;;  %v4797_v0 = vmul.f32 %v12006_v46, %v2189_v44  ;;  %v7864_v33 = vadd.f32 %v7863_v20, %v6912_v34  ;;  %v6913_v42 = vmax.f32 %v5889_v13, 0.0  ;;  %v2205_v59 = vpop.f32.mrf.mxu1  ;;  %9844 = vmatmul.mubr.msk.f32.gmra.mxu1 %vm377_vm0, %v10459_v15  ;;  %2562 = vmatprep.mubr.f32.mxu0 %v10663_v6  ;;  %v10461_v15 = vld [vmem:[%s10776_s30 + $0xb8] sm:$0xff] }
 0x27e   : > { %v7795_v16 = vadd.f32 %v7794_v50, %v6911_v22  ;;  %v5902_v45 = vadd.f32 %v11965_v12, %v4794_v41  ;;  %v5904_v26 = vadd.f32 %v11971_v19, %v4796_v54  ;;  %v4810_v32 = vmul.f32 %v11954_v58, %v12617_v11  ;;  %v1758_v18 = vpop.f32.mrf.mxu0  ;;  %3011 = vmatprep.mubr.f32.mxu1 %v10663_v6 }
 0x27f   : > { %v5903_v57 = vadd.f32 %v11998_v60, %v4795_v7  ;;  %v5905_v44 = vadd.f32 %v12014_v52, %v4797_v0  ;;  %v7933_v23 = vadd.f32 %v7932_v53, %v6913_v42  ;;  %v4812_v38 = vmul.f32 %v11968_v17, %v2193_v37  ;;  %v2207_v51 = vpop.f32.mrf.mxu1 }
 0x280   : > { %v6926_v29 = vmax.f32 %v5902_v45, 0.0  ;;  %v4811_v10 = vmul.f32 %v11990_v35, %v1746_v8  ;;  %v6928_v14 = vmax.f32 %v5904_v26, 0.0  ;;  %v5918_v3 = vadd.f32 %v11965_v12, %v4810_v32  ;;  %v12668_v21 = vpop.f32.mrf.mxu0  ;;  %9781 = vmatmul.mubr.msk.f32.gmra.mxu0 %vm377_vm0, %v10460_v39 }
 0x281   : > { %v6927_v24 = vmax.f32 %v5903_v57, 0.0  ;;  %v6929_v55 = vmax.f32 %v5905_v44, 0.0  ;;  %v5920_v61 = vadd.f32 %v11971_v19, %v4812_v38  ;;  %v4813_v37 = vmul.f32 %v12006_v46, %v2195_v43  ;;  %v12675_v4 = vpop.f32.mrf.mxu1  ;;  %9845 = vmatmul.mubr.msk.f32.gmra.mxu1 %vm377_vm0, %v10460_v39  ;;  %2568 = vmatprep.mubr.f32.mxu0 %v10663_v6  ;;  %v10462_v39 = vld [vmem:[%s10776_s30 + $0xc0] sm:$0xff] }
 0x282   : > { %v7727_v11 = vadd.f32 %v7726_v5, %v6926_v29  ;;  %v5919_v31 = vadd.f32 %v11998_v60, %v4811_v10  ;;  %v7865_v8 = vadd.f32 %v7864_v33, %v6928_v14  ;;  %v6942_v50 = vmax.f32 %v5918_v3, 0.0  ;;  %v1764_v53 = vpop.f32.mrf.mxu0  ;;  %3017 = vmatprep.mubr.f32.mxu1 %v10663_v6 }
 0x283   : > { %v7796_v49 = vadd.f32 %v7795_v16, %v6927_v24  ;;  %v7934_v20 = vadd.f32 %v7933_v23, %v6929_v55  ;;  %v6944_v48 = vmax.f32 %v5920_v61, 0.0  ;;  %v5921_v22 = vadd.f32 %v12014_v52, %v4813_v37  ;;  %v2213_v13 = vpop.f32.mrf.mxu1 }
 0x284   : > { %v6943_v34 = vmax.f32 %v5919_v31, 0.0  ;;  %v4826_v43 = vmul.f32 %v11954_v58, %v12633_v40  ;;  %v7728_v41 = vadd.f32 %v7727_v11, %v6942_v50  ;;  %v4828_v5 = vmul.f32 %v11968_v17, %v12640_v9  ;;  %v12687_v0 = vpop.f32.mrf.mxu0  ;;  %9782 = vmatmul.mubr.msk.f32.gmra.mxu0 %vm377_vm0, %v10461_v15 }
 0x285   : > { %v4827_v54 = vmul.f32 %v11990_v35, %v1752_v27  ;;  %v4829_v7 = vmul.f32 %v12006_v46, %v2201_v28  ;;  %v7866_v33 = vadd.f32 %v7865_v8, %v6944_v48  ;;  %v6945_v42 = vmax.f32 %v5921_v22, 0.0  ;;  %v2217_v40 = vpop.f32.mrf.mxu1  ;;  %9846 = vmatmul.mubr.msk.f32.gmra.mxu1 %vm377_vm0, %v10461_v15  ;;  %2574 = vmatprep.mubr.f32.mxu0 %v10663_v6  ;;  %v10463_v15 = vld [vmem:[%s10776_s30 + $0xc8] sm:$0xff] }
 0x286   : > { %v7797_v16 = vadd.f32 %v7796_v49, %v6943_v34  ;;  %v5934_v45 = vadd.f32 %v11965_v12, %v4826_v43  ;;  %v5936_v9 = vadd.f32 %v11971_v19, %v4828_v5  ;;  %v4842_v26 = vmul.f32 %v11954_v58, %v12652_v56  ;;  %v1770_v57 = vpop.f32.mrf.mxu0  ;;  %3023 = vmatprep.mubr.f32.mxu1 %v10663_v6 }
 0x287   : > { %v5935_v27 = vadd.f32 %v11998_v60, %v4827_v54  ;;  %v5937_v28 = vadd.f32 %v12014_v52, %v4829_v7  ;;  %v7935_v44 = vadd.f32 %v7934_v20, %v6945_v42  ;;  %v4844_v23 = vmul.f32 %v11968_v17, %v2205_v59  ;;  %v2219_v38 = vpop.f32.mrf.mxu1 }
 0x288   : > { %v6958_v32 = vmax.f32 %v5934_v45, 0.0  ;;  %v4843_v29 = vmul.f32 %v11990_v35, %v1758_v18  ;;  %v6960_v10 = vmax.f32 %v5936_v9, 0.0  ;;  %v5950_v55 = vadd.f32 %v11965_v12, %v4842_v26  ;;  %v12703_v3 = vpop.f32.mrf.mxu0  ;;  %9783 = vmatmul.mubr.msk.f32.gmra.mxu0 %vm377_vm0, %v10462_v39 }
 0x289   : > { %v6959_v14 = vmax.f32 %v5935_v27, 0.0  ;;  %v6961_v24 = vmax.f32 %v5937_v28, 0.0  ;;  %v5952_v11 = vadd.f32 %v11971_v19, %v4844_v23  ;;  %v4845_v59 = vmul.f32 %v12006_v46, %v2207_v51  ;;  %v12710_v31 = vpop.f32.mrf.mxu1  ;;  %9847 = vmatmul.mubr.msk.f32.gmra.mxu1 %vm377_vm0, %v10462_v39  ;;  %2580 = vmatprep.mubr.f32.mxu0 %v10663_v6  ;;  %v10464_v39 = vld [vmem:[%s10776_s30 + $0xd0] sm:$0xff] }
 0x28a   : > { %v7729_v56 = vadd.f32 %v7728_v41, %v6958_v32  ;;  %v5951_v61 = vadd.f32 %v11998_v60, %v4843_v29  ;;  %v7867_v18 = vadd.f32 %v7866_v33, %v6960_v10  ;;  %v6974_v49 = vmax.f32 %v5950_v55, 0.0  ;;  %v1776_v20 = vpop.f32.mrf.mxu0  ;;  %3029 = vmatprep.mubr.f32.mxu1 %v10663_v6 }
 0x28b   : > { %v7798_v37 = vadd.f32 %v7797_v16, %v6959_v14  ;;  %v7936_v8 = vadd.f32 %v7935_v44, %v6961_v24  ;;  %v6976_v50 = vmax.f32 %v5952_v11, 0.0  ;;  %v5953_v34 = vadd.f32 %v12014_v52, %v4845_v59  ;;  %v2225_v22 = vpop.f32.mrf.mxu1 }
 0x28c   : > { %v6975_v48 = vmax.f32 %v5951_v61, 0.0  ;;  %v4858_v51 = vmul.f32 %v11954_v58, %v12668_v21  ;;  %v7730_v43 = vadd.f32 %v7729_v56, %v6974_v49  ;;  %v4860_v41 = vmul.f32 %v11968_v17, %v12675_v4  ;;  %v12722_v7 = vpop.f32.mrf.mxu0  ;;  %9784 = vmatmul.mubr.msk.f32.gmra.mxu0 %vm377_vm0, %v10463_v15 }
 0x28d   : > { %v4859_v5 = vmul.f32 %v11990_v35, %v1764_v53  ;;  %v4861_v54 = vmul.f32 %v12006_v46, %v2213_v13  ;;  %v7868_v33 = vadd.f32 %v7867_v18, %v6976_v50  ;;  %v6977_v42 = vmax.f32 %v5953_v34, 0.0  ;;  %v2229_v21 = vpop.f32.mrf.mxu1  ;;  %9848 = vmatmul.mubr.msk.f32.gmra.mxu1 %vm377_vm0, %v10463_v15  ;;  %2586 = vmatprep.mubr.f32.mxu0 %v10663_v6  ;;  %v10465_v15 = vld [vmem:[%s10776_s30 + $0xd8] sm:$0xff] }
 0x28e   : > { %v7799_v16 = vadd.f32 %v7798_v37, %v6975_v48  ;;  %v5966_v45 = vadd.f32 %v11965_v12, %v4858_v51  ;;  %v5968_v4 = vadd.f32 %v11971_v19, %v4860_v41  ;;  %v4874_v9 = vmul.f32 %v11954_v58, %v12687_v0  ;;  %v1782_v27 = vpop.f32.mrf.mxu0  ;;  %3035 = vmatprep.mubr.f32.mxu1 %v10663_v6 }
 0x28f   : > { %v5967_v53 = vadd.f32 %v11998_v60, %v4859_v5  ;;  %v5969_v13 = vadd.f32 %v12014_v52, %v4861_v54  ;;  %v7937_v28 = vadd.f32 %v7936_v8, %v6977_v42  ;;  %v4876_v44 = vmul.f32 %v11968_v17, %v2217_v40  ;;  %v2231_v23 = vpop.f32.mrf.mxu1 }
 0x290   : > { %v6990_v26 = vmax.f32 %v5966_v45, 0.0  ;;  %v4875_v32 = vmul.f32 %v11990_v35, %v1770_v57  ;;  %v6992_v29 = vmax.f32 %v5968_v4, 0.0  ;;  %v5982_v24 = vadd.f32 %v11965_v12, %v4874_v9  ;;  %v12738_v55 = vpop.f32.mrf.mxu0  ;;  %9785 = vmatmul.mubr.msk.f32.gmra.mxu0 %vm377_vm0, %v10464_v39 }
 0x291   : > { %v6991_v10 = vmax.f32 %v5967_v53, 0.0  ;;  %v6993_v14 = vmax.f32 %v5969_v13, 0.0  ;;  %v5984_v56 = vadd.f32 %v11971_v19, %v4876_v44  ;;  %v4877_v40 = vmul.f32 %v12006_v46, %v2219_v38  ;;  %v12745_v61 = vpop.f32.mrf.mxu1  ;;  %9849 = vmatmul.mubr.msk.f32.gmra.mxu1 %vm377_vm0, %v10464_v39  ;;  %2592 = vmatprep.mubr.f32.mxu0 %v10663_v6  ;;  %v10466_v39 = vld [vmem:[%s10776_s30 + $0xe0] sm:$0xff] }
 0x292   : > { %v7731_v0 = vadd.f32 %v7730_v43, %v6990_v26  ;;  %v5983_v11 = vadd.f32 %v11998_v60, %v4875_v32  ;;  %v7869_v57 = vadd.f32 %v7868_v33, %v6992_v29  ;;  %v7006_v37 = vmax.f32 %v5982_v24, 0.0  ;;  %v1788_v8 = vpop.f32.mrf.mxu0  ;;  %3041 = vmatprep.mubr.f32.mxu1 %v10663_v6 }
 0x293   : > { %v7800_v59 = vadd.f32 %v7799_v16, %v6991_v10  ;;  %v7938_v18 = vadd.f32 %v7937_v28, %v6993_v14  ;;  %v7008_v49 = vmax.f32 %v5984_v56, 0.0  ;;  %v5985_v48 = vadd.f32 %v12014_v52, %v4877_v40  ;;  %v2237_v34 = vpop.f32.mrf.mxu1 }
 0x294   : > { %v7007_v50 = vmax.f32 %v5983_v11, 0.0  ;;  %v4890_v38 = vmul.f32 %v11954_v58, %v12703_v3  ;;  %v7732_v51 = vadd.f32 %v7731_v0, %v7006_v37  ;;  %v4892_v43 = vmul.f32 %v11968_v17, %v12710_v31  ;;  %v12757_v54 = vpop.f32.mrf.mxu0  ;;  %9786 = vmatmul.mubr.msk.f32.gmra.mxu0 %vm377_vm0, %v10465_v15 }
 0x295   : > { %v4891_v41 = vmul.f32 %v11990_v35, %v1776_v20  ;;  %v4893_v5 = vmul.f32 %v12006_v46, %v2225_v22  ;;  %v7870_v33 = vadd.f32 %v7869_v57, %v7008_v49  ;;  %v7009_v42 = vmax.f32 %v5985_v48, 0.0  ;;  %v2241_v3 = vpop.f32.mrf.mxu1  ;;  %9850 = vmatmul.mubr.msk.f32.gmra.mxu1 %vm377_vm0, %v10465_v15  ;;  %2598 = vmatprep.mubr.f32.mxu0 %v10663_v6  ;;  %v10467_v15 = vld [vmem:[%s10776_s30 + $0xe8] sm:$0xff] }
 0x296   : > { %v7801_v16 = vadd.f32 %v7800_v59, %v7007_v50  ;;  %v5998_v45 = vadd.f32 %v11965_v12, %v4890_v38  ;;  %v6000_v31 = vadd.f32 %v11971_v19, %v4892_v43  ;;  %v4906_v4 = vmul.f32 %v11954_v58, %v12722_v7  ;;  %v1794_v53 = vpop.f32.mrf.mxu0  ;;  %3047 = vmatprep.mubr.f32.mxu1 %v10663_v6 }
 0x297   : > { %v5999_v20 = vadd.f32 %v11998_v60, %v4891_v41  ;;  %v6001_v22 = vadd.f32 %v12014_v52, %v4893_v5  ;;  %v7939_v13 = vadd.f32 %v7938_v18, %v7009_v42  ;;  %v4908_v28 = vmul.f32 %v11968_v17, %v2229_v21  ;;  %v2243_v44 = vpop.f32.mrf.mxu1 }
 0x298   : > { %v7022_v9 = vmax.f32 %v5998_v45, 0.0  ;;  %v4907_v26 = vmul.f32 %v11990_v35, %v1782_v27  ;;  %v7024_v32 = vmax.f32 %v6000_v31, 0.0  ;;  %v6014_v14 = vadd.f32 %v11965_v12, %v4906_v4  ;;  %v12773_v24 = vpop.f32.mrf.mxu0  ;;  %9787 = vmatmul.mubr.msk.f32.gmra.mxu0 %vm377_vm0, %v10466_v39 }
 0x299   : > { %v7023_v29 = vmax.f32 %v5999_v20, 0.0  ;;  %v7025_v10 = vmax.f32 %v6001_v22, 0.0  ;;  %v6016_v0 = vadd.f32 %v11971_v19, %v4908_v28  ;;  %v4909_v21 = vmul.f32 %v12006_v46, %v2231_v23  ;;  %v12780_v11 = vpop.f32.mrf.mxu1  ;;  %9851 = vmatmul.mubr.msk.f32.gmra.mxu1 %vm377_vm0, %v10466_v39  ;;  %2604 = vmatprep.mubr.f32.mxu0 %v10663_v6  ;;  %v10468_v39 = vld [vmem:[%s10776_s30 + $0xf0] sm:$0xff] }
 0x29a   : > { %v7733_v7 = vadd.f32 %v7732_v51, %v7022_v9  ;;  %v6015_v56 = vadd.f32 %v11998_v60, %v4907_v26  ;;  %v7871_v27 = vadd.f32 %v7870_v33, %v7024_v32  ;;  %v7038_v59 = vmax.f32 %v6014_v14, 0.0  ;;  %v1800_v18 = vpop.f32.mrf.mxu0  ;;  %3053 = vmatprep.mubr.f32.mxu1 %v10663_v6 }
 0x29b   : > { %v7802_v40 = vadd.f32 %v7801_v16, %v7023_v29  ;;  %v7940_v57 = vadd.f32 %v7939_v13, %v7025_v10  ;;  %v7040_v37 = vmax.f32 %v6016_v0, 0.0  ;;  %v6017_v50 = vadd.f32 %v12014_v52, %v4909_v21  ;;  %v2249_v48 = vpop.f32.mrf.mxu1 }
 0x29c   : > { %v7039_v49 = vmax.f32 %v6015_v56, 0.0  ;;  %v4922_v23 = vmul.f32 %v11954_v58, %v12738_v55  ;;  %v7734_v38 = vadd.f32 %v7733_v7, %v7038_v59  ;;  %v4924_v51 = vmul.f32 %v11968_v17, %v12745_v61  ;;  %v12792_v5 = vpop.f32.mrf.mxu0  ;;  %9788 = vmatmul.mubr.msk.f32.gmra.mxu0 %vm377_vm0, %v10467_v15 }
 0x29d   : > { %v4923_v43 = vmul.f32 %v11990_v35, %v1788_v8  ;;  %v4925_v41 = vmul.f32 %v12006_v46, %v2237_v34  ;;  %v7872_v33 = vadd.f32 %v7871_v27, %v7040_v37  ;;  %v7041_v42 = vmax.f32 %v6017_v50, 0.0  ;;  %v2253_v55 = vpop.f32.mrf.mxu1  ;;  %9852 = vmatmul.mubr.msk.f32.gmra.mxu1 %vm377_vm0, %v10467_v15  ;;  %2610 = vmatprep.mubr.f32.mxu0 %v10663_v6  ;;  %v10469_v15 = vld [vmem:[%s10776_s30 + $0xf8] sm:$0xff] }
 0x29e   : > { %v7803_v16 = vadd.f32 %v7802_v40, %v7039_v49  ;;  %v6030_v45 = vadd.f32 %v11965_v12, %v4922_v23  ;;  %v6032_v61 = vadd.f32 %v11971_v19, %v4924_v51  ;;  %v4938_v31 = vmul.f32 %v11954_v58, %v12757_v54  ;;  %v1806_v20 = vpop.f32.mrf.mxu0  ;;  %3059 = vmatprep.mubr.f32.mxu1 %v10663_v6 }
 0x29f   : > { %v6031_v8 = vadd.f32 %v11998_v60, %v4923_v43  ;;  %v6033_v34 = vadd.f32 %v12014_v52, %v4925_v41  ;;  %v7941_v22 = vadd.f32 %v7940_v57, %v7041_v42  ;;  %v4940_v13 = vmul.f32 %v11968_v17, %v2241_v3  ;;  %v2255_v28 = vpop.f32.mrf.mxu1 }
 0x2a0   : > { %v7054_v4 = vmax.f32 %v6030_v45, 0.0  ;;  %v4939_v9 = vmul.f32 %v11990_v35, %v1794_v53  ;;  %v7056_v26 = vmax.f32 %v6032_v61, 0.0  ;;  %v6046_v10 = vadd.f32 %v11965_v12, %v4938_v31  ;;  %v12808_v14 = vpop.f32.mrf.mxu0  ;;  %9789 = vmatmul.mubr.msk.f32.gmra.mxu0 %vm377_vm0, %v10468_v39 }
 0x2a1   : > { %v7055_v32 = vmax.f32 %v6031_v8, 0.0  ;;  %v7057_v29 = vmax.f32 %v6033_v34, 0.0  ;;  %v6048_v7 = vadd.f32 %v11971_v19, %v4940_v13  ;;  %v4941_v3 = vmul.f32 %v12006_v46, %v2243_v44  ;;  %v12815_v56 = vpop.f32.mrf.mxu1  ;;  %9853 = vmatmul.mubr.msk.f32.gmra.mxu1 %vm377_vm0, %v10468_v39  ;;  %2616 = vmatprep.mubr.f32.mxu0 %v10663_v6  ;;  %v10470_v39 = vld [vmem:[%s10776_s30 + $0x100] sm:$0xff] }
 0x2a2   : > { %v7735_v54 = vadd.f32 %v7734_v38, %v7054_v4  ;;  %v6047_v0 = vadd.f32 %v11998_v60, %v4939_v9  ;;  %v7873_v53 = vadd.f32 %v7872_v33, %v7056_v26  ;;  %v7070_v40 = vmax.f32 %v6046_v10, 0.0  ;;  %v1812_v57 = vpop.f32.mrf.mxu0  ;;  %3065 = vmatprep.mubr.f32.mxu1 %v10663_v6 }
 0x2a3   : > { %v7804_v21 = vadd.f32 %v7803_v16, %v7055_v32  ;;  %v7942_v27 = vadd.f32 %v7941_v22, %v7057_v29  ;;  %v7072_v59 = vmax.f32 %v6048_v7, 0.0  ;;  %v6049_v49 = vadd.f32 %v12014_v52, %v4941_v3  ;;  %v2261_v50 = vpop.f32.mrf.mxu1 }
 0x2a4   : > { %v7071_v37 = vmax.f32 %v6047_v0, 0.0  ;;  %v4954_v44 = vmul.f32 %v11954_v58, %v12773_v24  ;;  %v7736_v23 = vadd.f32 %v7735_v54, %v7070_v40  ;;  %v4956_v38 = vmul.f32 %v11968_v17, %v12780_v11  ;;  %v12827_v41 = vpop.f32.mrf.mxu0  ;;  %9790 = vmatmul.mubr.msk.f32.gmra.mxu0 %vm377_vm0, %v10469_v15 }
 0x2a5   : > { %v4955_v51 = vmul.f32 %v11990_v35, %v1800_v18  ;;  %v4957_v43 = vmul.f32 %v12006_v46, %v2249_v48  ;;  %v7874_v33 = vadd.f32 %v7873_v53, %v7072_v59  ;;  %v7073_v42 = vmax.f32 %v6049_v49, 0.0  ;;  %v2265_v24 = vpop.f32.mrf.mxu1  ;;  %9854 = vmatmul.mubr.msk.f32.gmra.mxu1 %vm377_vm0, %v10469_v15  ;;  %2622 = vmatprep.mubr.f32.mxu0 %v10663_v6  ;;  %v10471_v15 = vld [vmem:[%s10776_s30 + $0x108] sm:$0xff] }
 0x2a6   : > { %v7805_v16 = vadd.f32 %v7804_v21, %v7071_v37  ;;  %v6062_v45 = vadd.f32 %v11965_v12, %v4954_v44  ;;  %v6064_v11 = vadd.f32 %v11971_v19, %v4956_v38  ;;  %v4970_v61 = vmul.f32 %v11954_v58, %v12792_v5  ;;  %v1818_v8 = vpop.f32.mrf.mxu0  ;;  %3071 = vmatprep.mubr.f32.mxu1 %v10663_v6 }
 0x2a7   : > { %v6063_v18 = vadd.f32 %v11998_v60, %v4955_v51  ;;  %v6065_v48 = vadd.f32 %v12014_v52, %v4957_v43  ;;  %v7943_v34 = vadd.f32 %v7942_v27, %v7073_v42  ;;  %v4972_v22 = vmul.f32 %v11968_v17, %v2253_v55  ;;  %v2267_v13 = vpop.f32.mrf.mxu1 }
 0x2a8   : > { %v7086_v31 = vmax.f32 %v6062_v45, 0.0  ;;  %v4971_v4 = vmul.f32 %v11990_v35, %v1806_v20  ;;  %v7088_v9 = vmax.f32 %v6064_v11, 0.0  ;;  %v6078_v29 = vadd.f32 %v11965_v12, %v4970_v61  ;;  %v12843_v10 = vpop.f32.mrf.mxu0  ;;  %9791 = vmatmul.mubr.msk.f32.gmra.mxu0 %vm377_vm0, %v10470_v39 }
 0x2a9   : > { %v7087_v26 = vmax.f32 %v6063_v18, 0.0  ;;  %v7089_v32 = vmax.f32 %v6065_v48, 0.0  ;;  %v6080_v54 = vadd.f32 %v11971_v19, %v4972_v22  ;;  %v4973_v55 = vmul.f32 %v12006_v46, %v2255_v28  ;;  %v12850_v0 = vpop.f32.mrf.mxu1  ;;  %9855 = vmatmul.mubr.msk.f32.gmra.mxu1 %vm377_vm0, %v10470_v39  ;;  %2628 = vmatprep.mubr.f32.mxu0 %v10663_v6  ;;  %v10472_v39 = vld [vmem:[%s10776_s30 + $0x110] sm:$0xff] }
 0x2aa   : > { %v7737_v5 = vadd.f32 %v7736_v23, %v7086_v31  ;;  %v6079_v7 = vadd.f32 %v11998_v60, %v4971_v4  ;;  %v7875_v20 = vadd.f32 %v7874_v33, %v7088_v9  ;;  %v7102_v21 = vmax.f32 %v6078_v29, 0.0  ;;  %v1824_v27 = vpop.f32.mrf.mxu0  ;;  %3077 = vmatprep.mubr.f32.mxu1 %v10663_v6 }
 0x2ab   : > { %v7806_v3 = vadd.f32 %v7805_v16, %v7087_v26  ;;  %v7944_v53 = vadd.f32 %v7943_v34, %v7089_v32  ;;  %v7104_v40 = vmax.f32 %v6080_v54, 0.0  ;;  %v6081_v37 = vadd.f32 %v12014_v52, %v4973_v55  ;;  %v2273_v49 = vpop.f32.mrf.mxu1 }
 0x2ac   : > { %v7103_v59 = vmax.f32 %v6079_v7, 0.0  ;;  %v4986_v28 = vmul.f32 %v11954_v58, %v12808_v14  ;;  %v7738_v44 = vadd.f32 %v7737_v5, %v7102_v21  ;;  %v4988_v23 = vmul.f32 %v11968_v17, %v12815_v56  ;;  %v12862_v43 = vpop.f32.mrf.mxu0  ;;  %9792 = vmatmul.mubr.msk.f32.gmra.mxu0 %vm377_vm0, %v10471_v15 }
 0x2ad   : > { %v4987_v38 = vmul.f32 %v11990_v35, %v1812_v57  ;;  %v4989_v51 = vmul.f32 %v12006_v46, %v2261_v50  ;;  %v7876_v33 = vadd.f32 %v7875_v20, %v7104_v40  ;;  %v7105_v42 = vmax.f32 %v6081_v37, 0.0  ;;  %v2277_v14 = vpop.f32.mrf.mxu1  ;;  %9856 = vmatmul.mubr.msk.f32.gmra.mxu1 %vm377_vm0, %v10471_v15  ;;  %2634 = vmatprep.mubr.f32.mxu0 %v10663_v6  ;;  %v10473_v15 = vld [vmem:[%s10776_s30 + $0x118] sm:$0xff] }
 0x2ae   : > { %v7807_v16 = vadd.f32 %v7806_v3, %v7103_v59  ;;  %v6094_v45 = vadd.f32 %v11965_v12, %v4986_v28  ;;  %v6096_v56 = vadd.f32 %v11971_v19, %v4988_v23  ;;  %v5002_v11 = vmul.f32 %v11954_v58, %v12827_v41  ;;  %v1830_v18 = vpop.f32.mrf.mxu0  ;;  %3083 = vmatprep.mubr.f32.mxu1 %v10663_v6 }
 0x2af   : > { %v6095_v57 = vadd.f32 %v11998_v60, %v4987_v38  ;;  %v6097_v50 = vadd.f32 %v12014_v52, %v4989_v51  ;;  %v7945_v48 = vadd.f32 %v7944_v53, %v7105_v42  ;;  %v5004_v34 = vmul.f32 %v11968_v17, %v2265_v24  ;;  %v2279_v22 = vpop.f32.mrf.mxu1 }
 0x2b0   : > { %v7118_v61 = vmax.f32 %v6094_v45, 0.0  ;;  %v5003_v31 = vmul.f32 %v11990_v35, %v1818_v8  ;;  %v7120_v4 = vmax.f32 %v6096_v56, 0.0  ;;  %v6110_v32 = vadd.f32 %v11965_v12, %v5002_v11  ;;  %v12878_v29 = vpop.f32.mrf.mxu0  ;;  %9793 = vmatmul.mubr.msk.f32.gmra.mxu0 %vm377_vm0, %v10472_v39 }
 0x2b1   : > { %v7119_v9 = vmax.f32 %v6095_v57, 0.0  ;;  %v7121_v26 = vmax.f32 %v6097_v50, 0.0  ;;  %v6112_v5 = vadd.f32 %v11971_v19, %v5004_v34  ;;  %v5005_v24 = vmul.f32 %v12006_v46, %v2267_v13  ;;  %v12885_v7 = vpop.f32.mrf.mxu1  ;;  %9857 = vmatmul.mubr.msk.f32.gmra.mxu1 %vm377_vm0, %v10472_v39  ;;  %2640 = vmatprep.mubr.f32.mxu0 %v10663_v6  ;;  %v10474_v39 = vld [vmem:[%s10776_s30 + $0x120] sm:$0xff] }
 0x2b2   : > { %v7739_v41 = vadd.f32 %v7738_v44, %v7118_v61  ;;  %v6111_v54 = vadd.f32 %v11998_v60, %v5003_v31  ;;  %v7877_v8 = vadd.f32 %v7876_v33, %v7120_v4  ;;  %v7134_v3 = vmax.f32 %v6110_v32, 0.0  ;;  %v1836_v53 = vpop.f32.mrf.mxu0  ;;  %3089 = vmatprep.mubr.f32.mxu1 %v10663_v6 }
 0x2b3   : > { %v7808_v55 = vadd.f32 %v7807_v16, %v7119_v9  ;;  %v7946_v20 = vadd.f32 %v7945_v48, %v7121_v26  ;;  %v7136_v21 = vmax.f32 %v6112_v5, 0.0  ;;  %v6113_v59 = vadd.f32 %v12014_v52, %v5005_v24  ;;  %v2285_v37 = vpop.f32.mrf.mxu1 }
 0x2b4   : > { %v7135_v40 = vmax.f32 %v6111_v54, 0.0  ;;  %v5018_v13 = vmul.f32 %v11954_v58, %v12843_v10  ;;  %v7740_v28 = vadd.f32 %v7739_v41, %v7134_v3  ;;  %v5020_v44 = vmul.f32 %v11968_v17, %v12850_v0  ;;  %v12897_v51 = vpop.f32.mrf.mxu0  ;;  %9794 = vmatmul.mubr.msk.f32.gmra.mxu0 %vm377_vm0, %v10473_v15 }
 0x2b5   : > { %v5019_v23 = vmul.f32 %v11990_v35, %v1824_v27  ;;  %v5021_v38 = vmul.f32 %v12006_v46, %v2273_v49  ;;  %v7878_v33 = vadd.f32 %v7877_v8, %v7136_v21  ;;  %v7137_v42 = vmax.f32 %v6113_v59, 0.0  ;;  %v2289_v10 = vpop.f32.mrf.mxu1  ;;  %9858 = vmatmul.mubr.msk.f32.gmra.mxu1 %vm377_vm0, %v10473_v15  ;;  %2646 = vmatprep.mubr.f32.mxu0 %v10663_v6  ;;  %v10475_v15 = vld [vmem:[%s10776_s30 + $0x128] sm:$0xff] }
 0x2b6   : > { %v7809_v16 = vadd.f32 %v7808_v55, %v7135_v40  ;;  %v6126_v45 = vadd.f32 %v11965_v12, %v5018_v13  ;;  %v6128_v0 = vadd.f32 %v11971_v19, %v5020_v44  ;;  %v5034_v56 = vmul.f32 %v11954_v58, %v12862_v43  ;;  %v1842_v57 = vpop.f32.mrf.mxu0  ;;  %3095 = vmatprep.mubr.f32.mxu1 %v10663_v6 }
 0x2b7   : > { %v6127_v27 = vadd.f32 %v11998_v60, %v5019_v23  ;;  %v6129_v49 = vadd.f32 %v12014_v52, %v5021_v38  ;;  %v7947_v50 = vadd.f32 %v7946_v20, %v7137_v42  ;;  %v5036_v48 = vmul.f32 %v11968_v17, %v2277_v14  ;;  %v2291_v34 = vpop.f32.mrf.mxu1 }
 0x2b8   : > { %v7150_v11 = vmax.f32 %v6126_v45, 0.0  ;;  %v5035_v61 = vmul.f32 %v11990_v35, %v1830_v18  ;;  %v7152_v31 = vmax.f32 %v6128_v0, 0.0  ;;  %v6142_v26 = vadd.f32 %v11965_v12, %v5034_v56  ;;  %v12913_v32 = vpop.f32.mrf.mxu0  ;;  %9795 = vmatmul.mubr.msk.f32.gmra.mxu0 %vm377_vm0, %v10474_v39 }
 0x2b9   : > { %v7151_v4 = vmax.f32 %v6127_v27, 0.0  ;;  %v7153_v9 = vmax.f32 %v6129_v49, 0.0  ;;  %v6144_v41 = vadd.f32 %v11971_v19, %v5036_v48  ;;  %v5037_v14 = vmul.f32 %v12006_v46, %v2279_v22  ;;  %v12920_v54 = vpop.f32.mrf.mxu1  ;;  %9859 = vmatmul.mubr.msk.f32.gmra.mxu1 %vm377_vm0, %v10474_v39  ;;  %2652 = vmatprep.mubr.f32.mxu0 %v10663_v6  ;;  %v10476_v39 = vld [vmem:[%s10776_s30 + $0x130] sm:$0xff] }
 0x2ba   : > { %v7741_v43 = vadd.f32 %v7740_v28, %v7150_v11  ;;  %v6143_v5 = vadd.f32 %v11998_v60, %v5035_v61  ;;  %v7879_v18 = vadd.f32 %v7878_v33, %v7152_v31  ;;  %v7166_v55 = vmax.f32 %v6142_v26, 0.0  ;;  %v1848_v20 = vpop.f32.mrf.mxu0  ;;  %3101 = vmatprep.mubr.f32.mxu1 %v10663_v6 }
 0x2bb   : > { %v7810_v24 = vadd.f32 %v7809_v16, %v7151_v4  ;;  %v7948_v8 = vadd.f32 %v7947_v50, %v7153_v9  ;;  %v7168_v3 = vmax.f32 %v6144_v41, 0.0  ;;  %v6145_v40 = vadd.f32 %v12014_v52, %v5037_v14  ;;  %v2297_v59 = vpop.f32.mrf.mxu1 }
 0x2bc   : > { %v7167_v21 = vmax.f32 %v6143_v5, 0.0  ;;  %v5050_v22 = vmul.f32 %v11954_v58, %v12878_v29  ;;  %v7742_v13 = vadd.f32 %v7741_v43, %v7166_v55  ;;  %v5052_v28 = vmul.f32 %v11968_v17, %v12885_v7  ;;  %v12932_v38 = vpop.f32.mrf.mxu0  ;;  %9796 = vmatmul.mubr.msk.f32.gmra.mxu0 %vm377_vm0, %v10475_v15 }
 0x2bd   : > { %v5051_v44 = vmul.f32 %v11990_v35, %v1836_v53  ;;  %v5053_v23 = vmul.f32 %v12006_v46, %v2285_v37  ;;  %v7880_v33 = vadd.f32 %v7879_v18, %v7168_v3  ;;  %v7169_v42 = vmax.f32 %v6145_v40, 0.0  ;;  %v2301_v29 = vpop.f32.mrf.mxu1  ;;  %9860 = vmatmul.mubr.msk.f32.gmra.mxu1 %vm377_vm0, %v10475_v15  ;;  %2658 = vmatprep.mubr.f32.mxu0 %v10663_v6  ;;  %v10477_v15 = vld [vmem:[%s10776_s30 + $0x138] sm:$0xff] }
 0x2be   : > { %v7811_v16 = vadd.f32 %v7810_v24, %v7167_v21  ;;  %v6158_v45 = vadd.f32 %v11965_v12, %v5050_v22  ;;  %v6160_v7 = vadd.f32 %v11971_v19, %v5052_v28  ;;  %v5066_v0 = vmul.f32 %v11954_v58, %v12897_v51  ;;  %v1854_v27 = vpop.f32.mrf.mxu0  ;;  %3107 = vmatprep.mubr.f32.mxu1 %v10663_v6 }
 0x2bf   : > { %v6159_v53 = vadd.f32 %v11998_v60, %v5051_v44  ;;  %v6161_v37 = vadd.f32 %v12014_v52, %v5053_v23  ;;  %v7949_v49 = vadd.f32 %v7948_v8, %v7169_v42  ;;  %v5068_v50 = vmul.f32 %v11968_v17, %v2289_v10  ;;  %v2303_v48 = vpop.f32.mrf.mxu1 }
 0x2c0   : > { %v7182_v56 = vmax.f32 %v6158_v45, 0.0  ;;  %v5067_v11 = vmul.f32 %v11990_v35, %v1842_v57  ;;  %v7184_v61 = vmax.f32 %v6160_v7, 0.0  ;;  %v6174_v9 = vadd.f32 %v11965_v12, %v5066_v0  ;;  %v12948_v26 = vpop.f32.mrf.mxu0  ;;  %9797 = vmatmul.mubr.msk.f32.gmra.mxu0 %vm377_vm0, %v10476_v39 }
 0x2c1   : > { %v7183_v31 = vmax.f32 %v6159_v53, 0.0  ;;  %v7185_v4 = vmax.f32 %v6161_v37, 0.0  ;;  %v6176_v43 = vadd.f32 %v11971_v19, %v5068_v50  ;;  %v5069_v10 = vmul.f32 %v12006_v46, %v2291_v34  ;;  %v12955_v5 = vpop.f32.mrf.mxu1  ;;  %9861 = vmatmul.mubr.msk.f32.gmra.mxu1 %vm377_vm0, %v10476_v39  ;;  %2664 = vmatprep.mubr.f32.mxu0 %v10663_v6  ;;  %v10478_v39 = vld [vmem:[%s10776_s30 + $0x140] sm:$0xff] }
 0x2c2   : > { %v7743_v51 = vadd.f32 %v7742_v13, %v7182_v56  ;;  %v6175_v41 = vadd.f32 %v11998_v60, %v5067_v11  ;;  %v7881_v57 = vadd.f32 %v7880_v33, %v7184_v61  ;;  %v7198_v24 = vmax.f32 %v6174_v9, 0.0  ;;  %v1860_v8 = vpop.f32.mrf.mxu0  ;;  %3113 = vmatprep.mubr.f32.mxu1 %v10663_v6 }
 0x2c3   : > { %v7812_v14 = vadd.f32 %v7811_v16, %v7183_v31  ;;  %v7950_v18 = vadd.f32 %v7949_v49, %v7185_v4  ;;  %v7200_v55 = vmax.f32 %v6176_v43, 0.0  ;;  %v6177_v21 = vadd.f32 %v12014_v52, %v5069_v10  ;;  %v2309_v40 = vpop.f32.mrf.mxu1 }
 0x2c4   : > { %v7199_v3 = vmax.f32 %v6175_v41, 0.0  ;;  %v5082_v34 = vmul.f32 %v11954_v58, %v12913_v32  ;;  %v7744_v22 = vadd.f32 %v7743_v51, %v7198_v24  ;;  %v5084_v13 = vmul.f32 %v11968_v17, %v12920_v54  ;;  %v12967_v23 = vpop.f32.mrf.mxu0  ;;  %9798 = vmatmul.mubr.msk.f32.gmra.mxu0 %vm377_vm0, %v10477_v15 }
 0x2c5   : > { %v5083_v28 = vmul.f32 %v11990_v35, %v1848_v20  ;;  %v5085_v44 = vmul.f32 %v12006_v46, %v2297_v59  ;;  %v7882_v33 = vadd.f32 %v7881_v57, %v7200_v55  ;;  %v7201_v42 = vmax.f32 %v6177_v21, 0.0  ;;  %v2313_v32 = vpop.f32.mrf.mxu1  ;;  %9862 = vmatmul.mubr.msk.f32.gmra.mxu1 %vm377_vm0, %v10477_v15  ;;  %2670 = vmatprep.mubr.f32.mxu0 %v10663_v6  ;;  %v10479_v15 = vld [vmem:[%s10776_s30 + $0x148] sm:$0xff] }
 0x2c6   : > { %v7813_v16 = vadd.f32 %v7812_v14, %v7199_v3  ;;  %v6190_v45 = vadd.f32 %v11965_v12, %v5082_v34  ;;  %v6192_v54 = vadd.f32 %v11971_v19, %v5084_v13  ;;  %v5098_v7 = vmul.f32 %v11954_v58, %v12932_v38  ;;  %v1866_v53 = vpop.f32.mrf.mxu0  ;;  %3119 = vmatprep.mubr.f32.mxu1 %v10663_v6 }
 0x2c7   : > { %v6191_v20 = vadd.f32 %v11998_v60, %v5083_v28  ;;  %v6193_v59 = vadd.f32 %v12014_v52, %v5085_v44  ;;  %v7951_v37 = vadd.f32 %v7950_v18, %v7201_v42  ;;  %v5100_v49 = vmul.f32 %v11968_v17, %v2301_v29  ;;  %v2315_v50 = vpop.f32.mrf.mxu1 }
 0x2c8   : > { %v7214_v0 = vmax.f32 %v6190_v45, 0.0  ;;  %v5099_v56 = vmul.f32 %v11990_v35, %v1854_v27  ;;  %v7216_v11 = vmax.f32 %v6192_v54, 0.0  ;;  %v6206_v4 = vadd.f32 %v11965_v12, %v5098_v7  ;;  %v12983_v9 = vpop.f32.mrf.mxu0  ;;  %9799 = vmatmul.mubr.msk.f32.gmra.mxu0 %vm377_vm0, %v10478_v39 }
 0x2c9   : > { %v7215_v61 = vmax.f32 %v6191_v20, 0.0  ;;  %v7217_v31 = vmax.f32 %v6193_v59, 0.0  ;;  %v6208_v51 = vadd.f32 %v11971_v19, %v5100_v49  ;;  %v5101_v29 = vmul.f32 %v12006_v46, %v2303_v48  ;;  %v12990_v41 = vpop.f32.mrf.mxu1  ;;  %9863 = vmatmul.mubr.msk.f32.gmra.mxu1 %vm377_vm0, %v10478_v39  ;;  %2676 = vmatprep.mubr.f32.mxu0 %v10663_v6  ;;  %v10480_v39 = vld [vmem:[%s10776_s30 + $0x150] sm:$0xff] }
 0x2ca   : > { %v7745_v38 = vadd.f32 %v7744_v22, %v7214_v0  ;;  %v6207_v43 = vadd.f32 %v11998_v60, %v5099_v56  ;;  %v7883_v27 = vadd.f32 %v7882_v33, %v7216_v11  ;;  %v7230_v14 = vmax.f32 %v6206_v4, 0.0  ;;  %v1872_v18 = vpop.f32.mrf.mxu0  ;;  %3125 = vmatprep.mubr.f32.mxu1 %v10663_v6 }
 0x2cb   : > { %v7814_v10 = vadd.f32 %v7813_v16, %v7215_v61  ;;  %v7952_v57 = vadd.f32 %v7951_v37, %v7217_v31  ;;  %v7232_v24 = vmax.f32 %v6208_v51, 0.0  ;;  %v6209_v3 = vadd.f32 %v12014_v52, %v5101_v29  ;;  %v2321_v21 = vpop.f32.mrf.mxu1 }
 0x2cc   : > { %v7231_v55 = vmax.f32 %v6207_v43, 0.0  ;;  %v5114_v48 = vmul.f32 %v11954_v58, %v12948_v26  ;;  %v7746_v34 = vadd.f32 %v7745_v38, %v7230_v14  ;;  %v5116_v22 = vmul.f32 %v11968_v17, %v12955_v5  ;;  %v13002_v44 = vpop.f32.mrf.mxu0  ;;  %9800 = vmatmul.mubr.msk.f32.gmra.mxu0 %vm377_vm0, %v10479_v15 }
 0x2cd   : > { %v5115_v13 = vmul.f32 %v11990_v35, %v1860_v8  ;;  %v5117_v28 = vmul.f32 %v12006_v46, %v2309_v40  ;;  %v7884_v33 = vadd.f32 %v7883_v27, %v7232_v24  ;;  %v7233_v42 = vmax.f32 %v6209_v3, 0.0  ;;  %v2325_v26 = vpop.f32.mrf.mxu1  ;;  %9864 = vmatmul.mubr.msk.f32.gmra.mxu1 %vm377_vm0, %v10479_v15  ;;  %2682 = vmatprep.mubr.f32.mxu0 %v10663_v6  ;;  %v10481_v15 = vld [vmem:[%s10776_s30 + $0x158] sm:$0xff] }
 0x2ce   : > { %v7815_v16 = vadd.f32 %v7814_v10, %v7231_v55  ;;  %v6222_v45 = vadd.f32 %v11965_v12, %v5114_v48  ;;  %v6224_v5 = vadd.f32 %v11971_v19, %v5116_v22  ;;  %v5130_v54 = vmul.f32 %v11954_v58, %v12967_v23  ;;  %v1878_v20 = vpop.f32.mrf.mxu0  ;;  %3131 = vmatprep.mubr.f32.mxu1 %v10663_v6 }
 0x2cf   : > { %v6223_v8 = vadd.f32 %v11998_v60, %v5115_v13  ;;  %v6225_v40 = vadd.f32 %v12014_v52, %v5117_v28  ;;  %v7953_v59 = vadd.f32 %v7952_v57, %v7233_v42  ;;  %v5132_v37 = vmul.f32 %v11968_v17, %v2313_v32  ;;  %v2327_v49 = vpop.f32.mrf.mxu1 }
 0x2d0   : > { %v7246_v7 = vmax.f32 %v6222_v45, 0.0  ;;  %v5131_v0 = vmul.f32 %v11990_v35, %v1866_v53  ;;  %v7248_v56 = vmax.f32 %v6224_v5, 0.0  ;;  %v6238_v31 = vadd.f32 %v11965_v12, %v5130_v54  ;;  %v13018_v4 = vpop.f32.mrf.mxu0  ;;  %9801 = vmatmul.mubr.msk.f32.gmra.mxu0 %vm377_vm0, %v10480_v39 }
 0x2d1   : > { %v7247_v11 = vmax.f32 %v6223_v8, 0.0  ;;  %v7249_v61 = vmax.f32 %v6225_v40, 0.0  ;;  %v6240_v38 = vadd.f32 %v11971_v19, %v5132_v37  ;;  %v5133_v32 = vmul.f32 %v12006_v46, %v2315_v50  ;;  %v13025_v43 = vpop.f32.mrf.mxu1  ;;  %9865 = vmatmul.mubr.msk.f32.gmra.mxu1 %vm377_vm0, %v10480_v39  ;;  %2688 = vmatprep.mubr.f32.mxu0 %v10663_v6  ;;  %v10482_v39 = vld [vmem:[%s10776_s30 + $0x160] sm:$0xff] }
 0x2d2   : > { %v7747_v23 = vadd.f32 %v7746_v34, %v7246_v7  ;;  %v6239_v51 = vadd.f32 %v11998_v60, %v5131_v0  ;;  %v7885_v53 = vadd.f32 %v7884_v33, %v7248_v56  ;;  %v7262_v10 = vmax.f32 %v6238_v31, 0.0  ;;  %v1884_v57 = vpop.f32.mrf.mxu0  ;;  %3137 = vmatprep.mubr.f32.mxu1 %v10663_v6 }
 0x2d3   : > { %v7816_v29 = vadd.f32 %v7815_v16, %v7247_v11  ;;  %v7954_v27 = vadd.f32 %v7953_v59, %v7249_v61  ;;  %v7264_v14 = vmax.f32 %v6240_v38, 0.0  ;;  %v6241_v55 = vadd.f32 %v12014_v52, %v5133_v32  ;;  %v2333_v3 = vpop.f32.mrf.mxu1 }
 0x2d4   : > { %v7263_v24 = vmax.f32 %v6239_v51, 0.0  ;;  %v5146_v50 = vmul.f32 %v11954_v58, %v12983_v9  ;;  %v7748_v48 = vadd.f32 %v7747_v23, %v7262_v10  ;;  %v5148_v34 = vmul.f32 %v11968_v17, %v12990_v41  ;;  %v13037_v28 = vpop.f32.mrf.mxu0  ;;  %9802 = vmatmul.mubr.msk.f32.gmra.mxu0 %vm377_vm0, %v10481_v15 }
 0x2d5   : > { %v5147_v22 = vmul.f32 %v11990_v35, %v1872_v18  ;;  %v5149_v13 = vmul.f32 %v12006_v46, %v2321_v21  ;;  %v7886_v33 = vadd.f32 %v7885_v53, %v7264_v14  ;;  %v7265_v42 = vmax.f32 %v6241_v55, 0.0  ;;  %v2337_v9 = vpop.f32.mrf.mxu1  ;;  %9866 = vmatmul.mubr.msk.f32.gmra.mxu1 %vm377_vm0, %v10481_v15  ;;  %2694 = vmatprep.mubr.f32.mxu0 %v10663_v6  ;;  %v10483_v15 = vld [vmem:[%s10776_s30 + $0x168] sm:$0xff] }
 0x2d6   : > { %v7817_v16 = vadd.f32 %v7816_v29, %v7263_v24  ;;  %v6254_v45 = vadd.f32 %v11965_v12, %v5146_v50  ;;  %v6256_v41 = vadd.f32 %v11971_v19, %v5148_v34  ;;  %v5162_v5 = vmul.f32 %v11954_v58, %v13002_v44  ;;  %v1890_v8 = vpop.f32.mrf.mxu0  ;;  %3143 = vmatprep.mubr.f32.mxu1 %v10663_v6 }
 0x2d7   : > { %v6255_v18 = vadd.f32 %v11998_v60, %v5147_v22  ;;  %v6257_v21 = vadd.f32 %v12014_v52, %v5149_v13  ;;  %v7955_v40 = vadd.f32 %v7954_v27, %v7265_v42  ;;  %v5164_v59 = vmul.f32 %v11968_v17, %v2325_v26  ;;  %v2339_v37 = vpop.f32.mrf.mxu1 }
 0x2d8   : > { %v7278_v54 = vmax.f32 %v6254_v45, 0.0  ;;  %v5163_v7 = vmul.f32 %v11990_v35, %v1878_v20  ;;  %v7280_v0 = vmax.f32 %v6256_v41, 0.0  ;;  %v6270_v61 = vadd.f32 %v11965_v12, %v5162_v5  ;;  %v13053_v31 = vpop.f32.mrf.mxu0  ;;  %9803 = vmatmul.mubr.msk.f32.gmra.mxu0 %vm377_vm0, %v10482_v39 }
 0x2d9   : > { %v7279_v56 = vmax.f32 %v6255_v18, 0.0  ;;  %v7281_v11 = vmax.f32 %v6257_v21, 0.0  ;;  %v6272_v23 = vadd.f32 %v11971_v19, %v5164_v59  ;;  %v5165_v26 = vmul.f32 %v12006_v46, %v2327_v49  ;;  %v13060_v51 = vpop.f32.mrf.mxu1  ;;  %9867 = vmatmul.mubr.msk.f32.gmra.mxu1 %vm377_vm0, %v10482_v39  ;;  %2700 = vmatprep.mubr.f32.mxu0 %v10663_v6  ;;  %v10484_v39 = vld [vmem:[%s10776_s30 + $0x170] sm:$0xff] }
 0x2da   : > { %v7749_v44 = vadd.f32 %v7748_v48, %v7278_v54  ;;  %v6271_v38 = vadd.f32 %v11998_v60, %v5163_v7  ;;  %v7887_v20 = vadd.f32 %v7886_v33, %v7280_v0  ;;  %v7294_v29 = vmax.f32 %v6270_v61, 0.0  ;;  %v1896_v27 = vpop.f32.mrf.mxu0  ;;  %3149 = vmatprep.mubr.f32.mxu1 %v10663_v6 }
 0x2db   : > { %v7818_v32 = vadd.f32 %v7817_v16, %v7279_v56  ;;  %v7956_v53 = vadd.f32 %v7955_v40, %v7281_v11  ;;  %v7296_v10 = vmax.f32 %v6272_v23, 0.0  ;;  %v6273_v24 = vadd.f32 %v12014_v52, %v5165_v26  ;;  %v2345_v55 = vpop.f32.mrf.mxu1 }
 0x2dc   : > { %v7295_v14 = vmax.f32 %v6271_v38, 0.0  ;;  %v5178_v49 = vmul.f32 %v11954_v58, %v13018_v4  ;;  %v7750_v50 = vadd.f32 %v7749_v44, %v7294_v29  ;;  %v5180_v48 = vmul.f32 %v11968_v17, %v13025_v43  ;;  %v13072_v13 = vpop.f32.mrf.mxu0  ;;  %9804 = vmatmul.mubr.msk.f32.gmra.mxu0 %vm377_vm0, %v10483_v15 }
 0x2dd   : > { %v5179_v34 = vmul.f32 %v11990_v35, %v1884_v57  ;;  %v5181_v22 = vmul.f32 %v12006_v46, %v2333_v3  ;;  %v7888_v33 = vadd.f32 %v7887_v20, %v7296_v10  ;;  %v7297_v42 = vmax.f32 %v6273_v24, 0.0  ;;  %v2349_v4 = vpop.f32.mrf.mxu1  ;;  %9868 = vmatmul.mubr.msk.f32.gmra.mxu1 %vm377_vm0, %v10483_v15  ;;  %2706 = vmatprep.mubr.f32.mxu0 %v10663_v6  ;;  %v10485_v15 = vld [vmem:[%s10776_s30 + $0x178] sm:$0xff] }
 0x2de   : > { %v7819_v16 = vadd.f32 %v7818_v32, %v7295_v14  ;;  %v6286_v45 = vadd.f32 %v11965_v12, %v5178_v49  ;;  %v6288_v43 = vadd.f32 %v11971_v19, %v5180_v48  ;;  %v5194_v41 = vmul.f32 %v11954_v58, %v13037_v28  ;;  %v1902_v18 = vpop.f32.mrf.mxu0  ;;  %3155 = vmatprep.mubr.f32.mxu1 %v10663_v6 }
 0x2df   : > { %v6287_v57 = vadd.f32 %v11998_v60, %v5179_v34  ;;  %v6289_v3 = vadd.f32 %v12014_v52, %v5181_v22  ;;  %v7957_v21 = vadd.f32 %v7956_v53, %v7297_v42  ;;  %v5196_v40 = vmul.f32 %v11968_v17, %v2337_v9  ;;  %v2351_v59 = vpop.f32.mrf.mxu1 }
 0x2e0   : > { %v7310_v5 = vmax.f32 %v6286_v45, 0.0  ;;  %v5195_v54 = vmul.f32 %v11990_v35, %v1890_v8  ;;  %v7312_v7 = vmax.f32 %v6288_v43, 0.0  ;;  %v6302_v11 = vadd.f32 %v11965_v12, %v5194_v41  ;;  %v13088_v61 = vpop.f32.mrf.mxu0  ;;  %9805 = vmatmul.mubr.msk.f32.gmra.mxu0 %vm377_vm0, %v10484_v39 }
 0x2e1   : > { %v7311_v0 = vmax.f32 %v6287_v57, 0.0  ;;  %v7313_v56 = vmax.f32 %v6289_v3, 0.0  ;;  %v6304_v44 = vadd.f32 %v11971_v19, %v5196_v40  ;;  %v5197_v9 = vmul.f32 %v12006_v46, %v2339_v37  ;;  %v13095_v38 = vpop.f32.mrf.mxu1  ;;  %9869 = vmatmul.mubr.msk.f32.gmra.mxu1 %vm377_vm0, %v10484_v39  ;;  %2712 = vmatprep.mubr.f32.mxu0 %v10663_v6  ;;  %v10486_v39 = vld [vmem:[%s10776_s30 + $0x180] sm:$0xff] }
 0x2e2   : > { %v7751_v28 = vadd.f32 %v7750_v50, %v7310_v5  ;;  %v6303_v23 = vadd.f32 %v11998_v60, %v5195_v54  ;;  %v7889_v8 = vadd.f32 %v7888_v33, %v7312_v7  ;;  %v7326_v32 = vmax.f32 %v6302_v11, 0.0  ;;  %v1908_v53 = vpop.f32.mrf.mxu0  ;;  %3161 = vmatprep.mubr.f32.mxu1 %v10663_v6 }
 0x2e3   : > { %v7820_v26 = vadd.f32 %v7819_v16, %v7311_v0  ;;  %v7958_v20 = vadd.f32 %v7957_v21, %v7313_v56  ;;  %v7328_v29 = vmax.f32 %v6304_v44, 0.0  ;;  %v6305_v14 = vadd.f32 %v12014_v52, %v5197_v9  ;;  %v2357_v24 = vpop.f32.mrf.mxu1 }
 0x2e4   : > { %v7327_v10 = vmax.f32 %v6303_v23, 0.0  ;;  %v5210_v37 = vmul.f32 %v11954_v58, %v13053_v31  ;;  %v7752_v49 = vadd.f32 %v7751_v28, %v7326_v32  ;;  %v5212_v50 = vmul.f32 %v11968_v17, %v13060_v51  ;;  %v13107_v22 = vpop.f32.mrf.mxu0  ;;  %9806 = vmatmul.mubr.msk.f32.gmra.mxu0 %vm377_vm0, %v10485_v15 }
 0x2e5   : > { %v5211_v48 = vmul.f32 %v11990_v35, %v1896_v27  ;;  %v5213_v34 = vmul.f32 %v12006_v46, %v2345_v55  ;;  %v7890_v33 = vadd.f32 %v7889_v8, %v7328_v29  ;;  %v7329_v42 = vmax.f32 %v6305_v14, 0.0  ;;  %v2361_v31 = vpop.f32.mrf.mxu1  ;;  %9870 = vmatmul.mubr.msk.f32.gmra.mxu1 %vm377_vm0, %v10485_v15  ;;  %2718 = vmatprep.mubr.f32.mxu0 %v10663_v6  ;;  %v10487_v15 = vld [vmem:[%s10776_s30 + $0x188] sm:$0xff] }
 0x2e6   : > { %v7821_v16 = vadd.f32 %v7820_v26, %v7327_v10  ;;  %v6318_v45 = vadd.f32 %v11965_v12, %v5210_v37  ;;  %v6320_v51 = vadd.f32 %v11971_v19, %v5212_v50  ;;  %v5226_v43 = vmul.f32 %v11954_v58, %v13072_v13  ;;  %v1914_v57 = vpop.f32.mrf.mxu0  ;;  %3167 = vmatprep.mubr.f32.mxu1 %v10663_v6 }
 0x2e7   : > { %v6319_v27 = vadd.f32 %v11998_v60, %v5211_v48  ;;  %v6321_v55 = vadd.f32 %v12014_v52, %v5213_v34  ;;  %v7959_v3 = vadd.f32 %v7958_v20, %v7329_v42  ;;  %v5228_v21 = vmul.f32 %v11968_v17, %v2349_v4  ;;  %v2363_v40 = vpop.f32.mrf.mxu1 }
 0x2e8   : > { %v7342_v41 = vmax.f32 %v6318_v45, 0.0  ;;  %v5227_v5 = vmul.f32 %v11990_v35, %v1902_v18  ;;  %v7344_v54 = vmax.f32 %v6320_v51, 0.0  ;;  %v6334_v56 = vadd.f32 %v11965_v12, %v5226_v43  ;;  %v13123_v11 = vpop.f32.mrf.mxu0  ;;  %9807 = vmatmul.mubr.msk.f32.gmra.mxu0 %vm377_vm0, %v10486_v39 }
 0x2e9   : > { %v7343_v7 = vmax.f32 %v6319_v27, 0.0  ;;  %v7345_v0 = vmax.f32 %v6321_v55, 0.0  ;;  %v6336_v28 = vadd.f32 %v11971_v19, %v5228_v21  ;;  %v5229_v4 = vmul.f32 %v12006_v46, %v2351_v59  ;;  %v13130_v23 = vpop.f32.mrf.mxu1  ;;  %9871 = vmatmul.mubr.msk.f32.gmra.mxu1 %vm377_vm0, %v10486_v39  ;;  %2724 = vmatprep.mubr.f32.mxu0 %v10663_v6 }
 0x2ea   : > { %v7753_v13 = vadd.f32 %v7752_v49, %v7342_v41  ;;  %v6335_v44 = vadd.f32 %v11998_v60, %v5227_v5  ;;  %v7891_v18 = vadd.f32 %v7890_v33, %v7344_v54  ;;  %v7358_v26 = vmax.f32 %v6334_v56, 0.0  ;;  %v13133_v20 = vpop.f32.mrf.mxu0  ;;  %3173 = vmatprep.mubr.f32.mxu1 %v10663_v6  ;;  %v10488_v56 = vld [vmem:[%s10776_s30 + $0x190] sm:$0xff] }
 0x2eb   : > { %v7822_v9 = vadd.f32 %v7821_v16, %v7343_v7  ;;  %v7960_v8 = vadd.f32 %v7959_v3, %v7345_v0  ;;  %v7360_v32 = vmax.f32 %v6336_v28, 0.0  ;;  %v6337_v10 = vadd.f32 %v12014_v52, %v5229_v4  ;;  %v13140_v14 = vpop.f32.mrf.mxu1 }
 0x2ec   : > { %v7359_v29 = vmax.f32 %v6335_v44, 0.0  ;;  %v5242_v59 = vmul.f32 %v11954_v58, %v13088_v61  ;;  %v7754_v37 = vadd.f32 %v7753_v13, %v7358_v26  ;;  %v5244_v49 = vmul.f32 %v11968_v17, %v13095_v38  ;;  %v13146_v34 = vpop.f32.mrf.mxu0  ;;  %9808 = vmatmul.mubr.msk.f32.gmra.mxu0 %vm377_vm0, %v10487_v15 }
 0x2ed   : > { %v5243_v50 = vmul.f32 %v11990_v35, %v1908_v53  ;;  %v5245_v48 = vmul.f32 %v12006_v46, %v2357_v24  ;;  %v7892_v33 = vadd.f32 %v7891_v18, %v7360_v32  ;;  %v7361_v42 = vmax.f32 %v6337_v10, 0.0  ;;  %v13151_v45 = vpop.f32.mrf.mxu1  ;;  %9872 = vmatmul.mubr.msk.f32.gmra.mxu1 %vm377_vm0, %v10487_v15  ;;  %2730 = vmatprep.mubr.f32.mxu0 %v10663_v6 }
 0x2ee   : > { %v7823_v16 = vadd.f32 %v7822_v9, %v7359_v29  ;;  %v6350_v61 = vadd.f32 %v11965_v12, %v5242_v59  ;;  %v6352_v38 = vadd.f32 %v11971_v19, %v5244_v49  ;;  %v5258_v51 = vmul.f32 %v11954_v58, %v13107_v22  ;;  %v13160_v27 = vpop.f32.mrf.mxu0  ;;  %3179 = vmatprep.mubr.f32.mxu1 %v10663_v6  ;;  %v4163_v58 = vld [vmem:[%s16980_s2 + $0x8] sm:$0xff] }
 0x2ef   : > { %v6351_v53 = vadd.f32 %v11998_v60, %v5243_v50  ;;  %v6353_v24 = vadd.f32 %v12014_v52, %v5245_v48  ;;  %v7961_v55 = vadd.f32 %v7960_v8, %v7361_v42  ;;  %v5260_v3 = vmul.f32 %v11968_v17, %v2361_v31  ;;  %v13165_v21 = vpop.f32.mrf.mxu1 }
 0x2f0   : > { %v7374_v43 = vmax.f32 %v6350_v61, 0.0  ;;  %v5259_v41 = vmul.f32 %v11990_v35, %v1914_v57  ;;  %v7376_v5 = vmax.f32 %v6352_v38, 0.0  ;;  %v6366_v0 = vadd.f32 %v11965_v12, %v5258_v51  ;;  %v13171_v22 = vpop.f32.mrf.mxu0  ;;  %9809 = vmatmul.mubr.msk.f32.gmra.mxu0 %vm377_vm0, %v10488_v56  ;;  %v13181_v12 = vld [vmem:[%s16981_s3 + $0x8] sm:$0xff] }
 0x2f1   : > { %v7375_v54 = vmax.f32 %v6351_v53, 0.0  ;;  %v7377_v7 = vmax.f32 %v6353_v24, 0.0  ;;  %v6368_v17 = vadd.f32 %v11971_v19, %v5260_v3  ;;  %v5261_v31 = vmul.f32 %v12006_v46, %v2363_v40  ;;  %v13183_v57 = vpop.f32.mrf.mxu1  ;;  %9873 = vmatmul.mubr.msk.f32.gmra.mxu1 %vm377_vm0, %v10488_v56  ;;  %2736 = vmatprep.mubr.f32.mxu0 %v10663_v6 }
 0x2f2   : > { %v7755_v39 = vadd.f32 %v7754_v37, %v7374_v43  ;;  %v6367_v35 = vadd.f32 %v11998_v60, %v5259_v41  ;;  %v7893_v13 = vadd.f32 %v7892_v33, %v7376_v5  ;;  %v7390_v4 = vmax.f32 %v6366_v0, 0.0  ;;  %v13186_v18 = vpop.f32.mrf.mxu0  ;;  %3185 = vmatprep.mubr.f32.mxu1 %v10663_v6  ;;  %v10490_v43 = vld [vmem:[%s10776_s30 + $0x1a0] sm:$0xff] }
 0x2f3   : > { %v7824_v28 = vadd.f32 %v7823_v16, %v7375_v54  ;;  %v7962_v44 = vadd.f32 %v7961_v55, %v7377_v7  ;;  %v7392_v19 = vmax.f32 %v6368_v17, 0.0  ;;  %v6369_v46 = vadd.f32 %v12014_v52, %v5261_v31  ;;  %v13194_v9 = vpop.f32.mrf.mxu1  ;;  %v10489_v52 = vld [vmem:[%s10776_s30 + $0x198] sm:$0xff] }
 0x2f4   : > { %v7391_v60 = vmax.f32 %v6367_v35, 0.0  ;;  %v13192_v40 = vrot.slane %v4163_v58, %v11054_v62  ;;  %v7756_v8 = vadd.f32 %v7755_v39, %v7390_v4  ;;  %v13198_v26 = vrot.slane %v13181_v12, %v11054_v62  ;;  %v13207_v10 = vpop.f32.mrf.mxu0  ;;  %9810 = vmatmul.mubr.msk.f32.gmra.mxu0 %vm377_vm0, %v10489_v52 }
 0x2f5   : > { %v13201_v32 = vrot.slane %v4163_v58, %v11057_v63  ;;  %v13205_v29 = vrot.slane %v13181_v12, %v11057_v63  ;;  %v7894_v59 = vadd.f32 %v7893_v13, %v7392_v19  ;;  %v7393_v49 = vmax.f32 %v6369_v46, 0.0  ;;  %v13213_v62 = vpop.f32.mrf.mxu1  ;;  %9874 = vmatmul.mubr.msk.f32.gmra.mxu1 %vm377_vm0, %v10489_v52  ;;  %2742 = vmatprep.mubr.f32.mxu0 %v10663_v6  ;;  %v10491_v46 = vld [vmem:[%s10776_s30 + $0x1a8] sm:$0xff] }
 0x2f6   : > { %v7825_v37 = vadd.f32 %v7824_v28, %v7391_v60  ;;  %v4254_v50 = vmul.f32 %v13192_v40, %v13123_v11  ;;  %v7757_v48 = vrot.slane %v7756_v8, 4  ;;  %v13220_v15 = vrot.slane %v4163_v58, %v11063_v1  ;;  %v13226_v16 = vpop.f32.mrf.mxu0  ;;  %3191 = vmatprep.mubr.f32.mxu1 %v10663_v6 }
 0x2f7   : > { %v4256_v63 = vmul.f32 %v13201_v32, %v13130_v23  ;;  %v13224_v33 = vrot.slane %v13181_v12, %v11063_v1  ;;  %v7895_v11 = vrot.slane %v7894_v59, 4  ;;  %v7963_v61 = vadd.f32 %v7962_v44, %v7393_v49  ;;  %v13232_v53 = vpop.f32.mrf.mxu1 }
 0x2f8   : > { %v7826_v42 = vrot.slane %v7825_v37, 4  ;;  %v13230_v38 = vadd.f32 %v13198_v26, %v4254_v50  ;;  %v7758_v23 = vadd.f32 %v7757_v48, %v7756_v8  ;;  %v4255_v1 = vmul.f32 %v13220_v15, %v13133_v20  ;;  %v13242_v55 = vpop.f32.mrf.mxu0  ;;  %9811 = vmatmul.mubr.msk.f32.gmra.mxu0 %vm377_vm0, %v10490_v43  ;;  %v7406_v48 = vld [vmem:[#allocation2 + $0x50] sm:$0xff] }
 0x2f9   : > { %v13235_v24 = vadd.f32 %v13205_v29, %v4256_v63  ;;  %v13240_v51 = vrot.slane %v4163_v58, %v11066_v2  ;;  %v7896_v3 = vadd.f32 %v7895_v11, %v7894_v59  ;;  %v7964_v5 = vrot.slane %v7963_v61, 4  ;;  %v13247_v7 = vpop.f32.mrf.mxu1  ;;  %9875 = vmatmul.mubr.msk.f32.gmra.mxu1 %vm377_vm0, %v10490_v43  ;;  %2748 = vmatprep.mubr.f32.mxu0 %v10663_v6 }
 0x2fa   : > { %v7827_v41 = vadd.f32 %v7826_v42, %v7825_v37  ;;  %v6386_v54 = vmax.f32 %v13230_v38, 0.0  ;;  %v7759_v20 = vrot.slane %v7758_v23, 2  ;;  %v13253_v58 = vadd.f32 %v13224_v33, %v4255_v1  ;;  %v13257_v39 = vpop.f32.mrf.mxu0  ;;  %3197 = vmatprep.mubr.f32.mxu1 %v10663_v6  ;;  %v7407_v1 = vld [vmem:[#allocation2 + $0x68] sm:$0xff] }
 0x2fb   : > { %v6388_v0 = vmax.f32 %v13235_v24, 0.0  ;;  %v4257_v56 = vmul.f32 %v13240_v51, %v13140_v14  ;;  %v7897_v17 = vrot.slane %v7896_v3, 2  ;;  %v7965_v31 = vadd.f32 %v7964_v5, %v7963_v61  ;;  %v13264_v28 = vpop.f32.mrf.mxu1  ;;  %v7408_v24 = vld [vmem:[#allocation2 + $0x8] sm:$0xff]  ;;  %v10492_v5 = vld [vmem:[%s10776_s30 + $0x1b0] sm:$0xff] }
 0x2fc   : > { %v7828_v35 = vrot.slane %v7827_v41, 2  ;;  %v13262_v13 = vrot.slane %v13181_v12, %v11066_v2  ;;  %v7760_v44 = vadd.f32 %v7759_v20, %v7758_v23  ;;  %v6387_v4 = vmax.f32 %v13253_v58, 0.0  ;;  %v13271_v60 = vpop.f32.mrf.mxu0  ;;  %9812 = vmatmul.mubr.msk.f32.gmra.mxu0 %vm377_vm0, %v10491_v46 }
 0x2fd   : > { %v4270_v19 = vmul.f32 %v13192_v40, %v13146_v34  ;;  %v4272_v14 = vmul.f32 %v13201_v32, %v13151_v45  ;;  %v7898_v8 = vadd.f32 %v7897_v17, %v7896_v3  ;;  %v7966_v2 = vrot.slane %v7965_v31, 2  ;;  %v13278_v59 = vpop.f32.mrf.mxu1  ;;  %9876 = vmatmul.mubr.msk.f32.gmra.mxu1 %vm377_vm0, %v10491_v46  ;;  %2754 = vmatprep.mubr.f32.mxu0 %v10663_v6 }
 0x2fe   : > { %v7829_v52 = vadd.f32 %v7828_v35, %v7827_v41  ;;  %v13276_v12 = vadd.f32 %v13262_v13, %v4257_v56  ;;  %v7761_v34 = vrot.slane %v7760_v44, 1  ;;  %v4271_v49 = vmul.f32 %v13220_v15, %v13160_v27  ;;  %v13286_v50 = vpop.f32.mrf.mxu0  ;;  %3203 = vmatprep.mubr.f32.mxu1 %v10663_v6 }
 0x2ff   : > { %v5378_v45 = vadd.f32 %v13198_v26, %v4270_v19  ;;  %v5380_v37 = vadd.f32 %v13205_v29, %v4272_v14  ;;  %v7899_v63 = vrot.slane %v7898_v8, 1  ;;  %v7967_v42 = vadd.f32 %v7966_v2, %v7965_v31  ;;  %v13290_v38 = vpop.f32.mrf.mxu1 }
 0x300   : > { %v7830_v11 = vrot.slane %v7829_v52, 1  ;;  %v6389_v61 = vmax.f32 %v13276_v12, 0.0  ;;  %v7762_v23 = vadd.f32 %v7761_v34, %v7760_v44  ;;  %v5379_v27 = vadd.f32 %v13224_v33, %v4271_v49  ;;  %v13293_v41 = vpop.f32.mrf.mxu0  ;;  %9813 = vmatmul.mubr.msk.f32.gmra.mxu0 %vm377_vm0, %v10492_v5  ;;  %v7409_v44 = vld [vmem:[#allocation2 + $0x48] sm:$0xff] }
 0x301   : > { %v6402_v43 = vmax.f32 %v5378_v45, 0.0  ;;  %v6404_v3 = vmax.f32 %v5380_v37, 0.0  ;;  %v7900_v20 = vadd.f32 %v7899_v63, %v7898_v8  ;;  %v7968_v56 = vrot.slane %v7967_v42, 1  ;;  %v13299_v35 = vpop.f32.mrf.mxu1  ;;  %9877 = vmatmul.mubr.msk.f32.gmra.mxu1 %vm377_vm0, %v10492_v5  ;;  %2760 = vmatprep.mubr.f32.mxu0 %v10663_v6 }
 0x302   : > { %v7831_v58 = vadd.f32 %v7830_v11, %v7829_v52  ;;  %v4273_v17 = vmul.f32 %v13240_v51, %v13165_v21  ;;  %v8526_v31 = vadd.f32 %v7762_v23, %v7406_v48  ;;  %v6403_v46 = vmax.f32 %v5379_v27, 0.0  ;;  %v13303_v2 = vpop.f32.mrf.mxu0  ;;  %3209 = vmatprep.mubr.f32.mxu1 %v10663_v6  ;;  %v10493_v48 = vld [vmem:[%s10776_s30 + $0x1b8] sm:$0xff] }
 0x303   : > { %v7970_v19 = vadd.f32 %v6402_v43, %v6386_v54  ;;  %v8108_v14 = vadd.f32 %v6404_v3, %v6388_v0  ;;  %v8528_v8 = vadd.f32 %v7900_v20, %v7408_v24  ;;  %v7969_v12 = vadd.f32 %v7968_v56, %v7967_v42  ;;  %v13307_v34 = vpop.f32.mrf.mxu1 }
 0x304   : > { %v8527_v52 = vadd.f32 %v7831_v58, %v7407_v1  ;;  %v5381_v21 = vadd.f32 %v13262_v13, %v4273_v17  ;;  %8542 = vst [vmem:[#allocation2 + $0x50] sm:$0xff] %v8526_v31  ;;  %v8039_v45 = vadd.f32 %v6403_v46, %v6387_v4  ;;  %v4286_v37 = vmul.f32 %v13192_v40, %v13171_v22  ;;  %v13315_v49 = vpop.f32.mrf.mxu0  ;;  %v10494_v17 = vld [vmem:[%s10776_s30 + $0x1c0] sm:$0xff] }
 0x305   : > { %v4288_v54 = vmul.f32 %v13201_v32, %v13183_v57  ;;  %v4287_v0 = vmul.f32 %v13220_v15, %v13186_v18  ;;  %9814 = vmatmul.mubr.msk.f32.gmra.mxu0 %vm377_vm0, %v10493_v48  ;;  %8544 = vst [vmem:[#allocation2 + $0x8] sm:$0xff] %v8528_v8  ;;  %v8529_v63 = vadd.f32 %v7969_v12, %v7409_v44  ;;  %v13323_v42 = vpop.f32.mrf.mxu1 }
 0x306   : > { %8543 = vst [vmem:[#allocation2 + $0x68] sm:$0xff] %v8527_v52  ;;  %v6405_v11 = vmax.f32 %v5381_v21, 0.0  ;;  %v4289_v4 = vmul.f32 %v13240_v51, %v13194_v9  ;;  %v4302_v22 = vmul.f32 %v13192_v40, %v13207_v10  ;;  %9878 = vmatmul.mubr.msk.f32.gmra.mxu1 %vm377_vm0, %v10493_v48  ;;  %2766 = vmatprep.mubr.f32.mxu0 %v10663_v6  ;;  %v13332_v9 = vpop.f32.mrf.mxu0 }
 0x307   : > { %v5394_v57 = vadd.f32 %v13198_v26, %v4286_v37  ;;  %v5396_v18 = vadd.f32 %v13205_v29, %v4288_v54  ;;  %v5395_v23 = vadd.f32 %v13224_v33, %v4287_v0  ;;  %v4304_v24 = vmul.f32 %v13201_v32, %v13213_v62  ;;  %3215 = vmatprep.mubr.f32.mxu1 %v10663_v6  ;;  %v13339_v27 = vpop.f32.mrf.mxu1 }
 0x308   : > { %8545 = vst [vmem:[#allocation2 + $0x48] sm:$0xff] %v8529_v63  ;;  %v8177_v10 = vadd.f32 %v6405_v11, %v6389_v61  ;;  %v5397_v1 = vadd.f32 %v13262_v13, %v4289_v4  ;;  %v5410_v43 = vadd.f32 %v13198_v26, %v4302_v22  ;;  %v4303_v3 = vmul.f32 %v13220_v15, %v13226_v16  ;;  %v13342_v56 = vpop.f32.mrf.mxu0  ;;  %v10495_v22 = vld [vmem:[%s10776_s30 + $0x1c8] sm:$0xff] }
 0x309   : > { %v6418_v5 = vmax.f32 %v5394_v57, 0.0  ;;  %v6420_v20 = vmax.f32 %v5396_v18, 0.0  ;;  %v6419_v58 = vmax.f32 %v5395_v23, 0.0  ;;  %v5412_v62 = vadd.f32 %v13205_v29, %v4304_v24  ;;  %9815 = vmatmul.mubr.msk.f32.gmra.mxu0 %vm377_vm0, %v10494_v17  ;;  %v13349_v16 = vpop.f32.mrf.mxu1 }
 0x30a   : > { %v6421_v61 = vmax.f32 %v5397_v1, 0.0  ;;  %v6434_v31 = vmax.f32 %v5410_v43, 0.0  ;;  %v5411_v44 = vadd.f32 %v13224_v33, %v4303_v3  ;;  %v4305_v46 = vmul.f32 %v13240_v51, %v13232_v53  ;;  %9879 = vmatmul.mubr.msk.f32.gmra.mxu1 %vm377_vm0, %v10494_v17  ;;  %2772 = vmatprep.mubr.f32.mxu0 %v10663_v6  ;;  %v13353_v37 = vpop.f32.mrf.mxu0 }
 0x30b   : > { %v7971_v8 = vadd.f32 %v7970_v19, %v6418_v5  ;;  %v8109_v52 = vadd.f32 %v8108_v14, %v6420_v20  ;;  %v8040_v12 = vadd.f32 %v8039_v45, %v6419_v58  ;;  %v6436_v21 = vmax.f32 %v5412_v62, 0.0  ;;  %3221 = vmatprep.mubr.f32.mxu1 %v10663_v6  ;;  %v13359_v63 = vpop.f32.mrf.mxu1 }
 0x30c   : > { %v8178_v54 = vadd.f32 %v8177_v10, %v6421_v61  ;;  %v6435_v0 = vmax.f32 %v5411_v44, 0.0  ;;  %v5413_v48 = vadd.f32 %v13262_v13, %v4305_v46  ;;  %v4318_v53 = vmul.f32 %v13192_v40, %v13242_v55  ;;  %v13365_v45 = vpop.f32.mrf.mxu0 }
 0x30d   : > { %v7972_v11 = vadd.f32 %v7971_v8, %v6434_v31  ;;  %v8110_v4 = vadd.f32 %v8109_v52, %v6436_v21  ;;  %v4320_v19 = vmul.f32 %v13201_v32, %v13247_v7  ;;  %v4319_v14 = vmul.f32 %v13220_v15, %v13257_v39  ;;  %9816 = vmatmul.mubr.msk.f32.gmra.mxu0 %vm377_vm0, %v10495_v22  ;;  %v13372_v24 = vpop.f32.mrf.mxu1  ;;  %v10496_v31 = vld [vmem:[%s10776_s30 + $0x1d0] sm:$0xff] }
 0x30e   : > { %v8041_v57 = vadd.f32 %v8040_v12, %v6435_v0  ;;  %v6437_v18 = vmax.f32 %v5413_v48, 0.0  ;;  %v5426_v23 = vadd.f32 %v13198_v26, %v4318_v53  ;;  %v4321_v55 = vmul.f32 %v13240_v51, %v13264_v28  ;;  %9880 = vmatmul.mubr.msk.f32.gmra.mxu1 %vm377_vm0, %v10495_v22  ;;  %2778 = vmatprep.mubr.f32.mxu0 %v10663_v6  ;;  %v13382_v43 = vpop.f32.mrf.mxu0 }
 0x30f   : > { %v5428_v7 = vadd.f32 %v13205_v29, %v4320_v19  ;;  %v5427_v39 = vadd.f32 %v13224_v33, %v4319_v14  ;;  %v4334_v10 = vmul.f32 %v13192_v40, %v13271_v60  ;;  %v4336_v1 = vmul.f32 %v13201_v32, %v13278_v59  ;;  %3227 = vmatprep.mubr.f32.mxu1 %v10663_v6  ;;  %v13388_v58 = vpop.f32.mrf.mxu1 }
 0x310   : > { %v8179_v28 = vadd.f32 %v8178_v54, %v6437_v18  ;;  %v6450_v3 = vmax.f32 %v5426_v23, 0.0  ;;  %v5429_v5 = vadd.f32 %v13262_v13, %v4321_v55  ;;  %v4335_v20 = vmul.f32 %v13220_v15, %v13286_v50  ;;  %v13392_v59 = vpop.f32.mrf.mxu0  ;;  %v10497_v55 = vld [vmem:[%s10776_s30 + $0x1d8] sm:$0xff] }
 0x311   : > { %v6452_v62 = vmax.f32 %v5428_v7, 0.0  ;;  %v6451_v17 = vmax.f32 %v5427_v39, 0.0  ;;  %v5442_v60 = vadd.f32 %v13198_v26, %v4334_v10  ;;  %v5444_v61 = vadd.f32 %v13205_v29, %v4336_v1  ;;  %9817 = vmatmul.mubr.msk.f32.gmra.mxu0 %vm377_vm0, %v10496_v31  ;;  %v13399_v52 = vpop.f32.mrf.mxu1 }
 0x312   : > { %v7973_v44 = vadd.f32 %v7972_v11, %v6450_v3  ;;  %v6453_v46 = vmax.f32 %v5429_v5, 0.0  ;;  %v5443_v8 = vadd.f32 %v13224_v33, %v4335_v20  ;;  %v4337_v50 = vmul.f32 %v13240_v51, %v13290_v38  ;;  %9881 = vmatmul.mubr.msk.f32.gmra.mxu1 %vm377_vm0, %v10496_v31  ;;  %2784 = vmatprep.mubr.f32.mxu0 %v10663_v6  ;;  %v13403_v48 = vpop.f32.mrf.mxu0 }
 0x313   : > { %v8111_v12 = vadd.f32 %v8110_v4, %v6452_v62  ;;  %v8042_v21 = vadd.f32 %v8041_v57, %v6451_v17  ;;  %v6466_v54 = vmax.f32 %v5442_v60, 0.0  ;;  %v6468_v0 = vmax.f32 %v5444_v61, 0.0  ;;  %3233 = vmatprep.mubr.f32.mxu1 %v10663_v6  ;;  %v13409_v14 = vpop.f32.mrf.mxu1 }
 0x314   : > { %v8180_v53 = vadd.f32 %v8179_v28, %v6453_v46  ;;  %v6467_v11 = vmax.f32 %v5443_v8, 0.0  ;;  %v5445_v19 = vadd.f32 %v13262_v13, %v4337_v50  ;;  %v4350_v38 = vmul.f32 %v13192_v40, %v13293_v41  ;;  %v13415_v23 = vpop.f32.mrf.mxu0  ;;  %v10498_v46 = vld [vmem:[%s10776_s30 + $0x1e0] sm:$0xff] }
 0x315   : > { %v7974_v22 = vadd.f32 %v7973_v44, %v6466_v54  ;;  %v8112_v18 = vadd.f32 %v8111_v12, %v6468_v0  ;;  %v4352_v4 = vmul.f32 %v13201_v32, %v13299_v35  ;;  %v4351_v57 = vmul.f32 %v13220_v15, %v13303_v2  ;;  %9818 = vmatmul.mubr.msk.f32.gmra.mxu0 %vm377_vm0, %v10497_v55  ;;  %v13422_v1 = vpop.f32.mrf.mxu1 }
 0x316   : > { %v8043_v7 = vadd.f32 %v8042_v21, %v6467_v11  ;;  %v6469_v39 = vmax.f32 %v5445_v19, 0.0  ;;  %v5458_v10 = vadd.f32 %v13198_v26, %v4350_v38  ;;  %v4353_v41 = vmul.f32 %v13240_v51, %v13307_v34  ;;  %9882 = vmatmul.mubr.msk.f32.gmra.mxu1 %vm377_vm0, %v10497_v55  ;;  %2790 = vmatprep.mubr.f32.mxu0 %v10663_v6  ;;  %v13432_v5 = vpop.f32.mrf.mxu0 }
 0x317   : > { %v5460_v35 = vadd.f32 %v13205_v29, %v4352_v4  ;;  %v5459_v2 = vadd.f32 %v13224_v33, %v4351_v57  ;;  %v4366_v28 = vmul.f32 %v13192_v40, %v13315_v49  ;;  %v4368_v3 = vmul.f32 %v13201_v32, %v13323_v42  ;;  %3239 = vmatprep.mubr.f32.mxu1 %v10663_v6  ;;  %v13438_v60 = vpop.f32.mrf.mxu1 }
 0x318   : > { %v8181_v34 = vadd.f32 %v8180_v53, %v6469_v39  ;;  %v6482_v20 = vmax.f32 %v5458_v10, 0.0  ;;  %v5461_v62 = vadd.f32 %v13262_v13, %v4353_v41  ;;  %v4367_v17 = vmul.f32 %v13220_v15, %v13332_v9  ;;  %v13442_v42 = vpop.f32.mrf.mxu0  ;;  %v10499_v41 = vld [vmem:[%s10776_s30 + $0x1e8] sm:$0xff] }
 0x319   : > { %v6484_v61 = vmax.f32 %v5460_v35, 0.0  ;;  %v6483_v31 = vmax.f32 %v5459_v2, 0.0  ;;  %v5474_v49 = vadd.f32 %v13198_v26, %v4366_v28  ;;  %v5476_v44 = vadd.f32 %v13205_v29, %v4368_v3  ;;  %9819 = vmatmul.mubr.msk.f32.gmra.mxu0 %vm377_vm0, %v10498_v46  ;;  %v13449_v21 = vpop.f32.mrf.mxu1 }
 0x31a   : > { %v7975_v8 = vadd.f32 %v7974_v22, %v6482_v20  ;;  %v6485_v50 = vmax.f32 %v5461_v62, 0.0  ;;  %v5475_v12 = vadd.f32 %v13224_v33, %v4367_v17  ;;  %v4369_v9 = vmul.f32 %v13240_v51, %v13339_v27  ;;  %9883 = vmatmul.mubr.msk.f32.gmra.mxu1 %vm377_vm0, %v10498_v46  ;;  %2796 = vmatprep.mubr.f32.mxu0 %v10663_v6  ;;  %v13453_v19 = vpop.f32.mrf.mxu0 }
 0x31b   : > { %v8113_v54 = vadd.f32 %v8112_v18, %v6484_v61  ;;  %v8044_v0 = vadd.f32 %v8043_v7, %v6483_v31  ;;  %v6498_v53 = vmax.f32 %v5474_v49, 0.0  ;;  %v6500_v11 = vmax.f32 %v5476_v44, 0.0  ;;  %3245 = vmatprep.mubr.f32.mxu1 %v10663_v6  ;;  %v13459_v57 = vpop.f32.mrf.mxu1 }
 0x31c   : > { %v8182_v38 = vadd.f32 %v8181_v34, %v6485_v50  ;;  %v6499_v22 = vmax.f32 %v5475_v12, 0.0  ;;  %v5477_v4 = vadd.f32 %v13262_v13, %v4369_v9  ;;  %v4382_v27 = vmul.f32 %v13192_v40, %v13342_v56  ;;  %v13465_v10 = vpop.f32.mrf.mxu0  ;;  %v10500_v50 = vld [vmem:[%s10776_s30 + $0x1f0] sm:$0xff] }
 0x31d   : > { %v7976_v55 = vadd.f32 %v7975_v8, %v6498_v53  ;;  %v8114_v39 = vadd.f32 %v8113_v54, %v6500_v11  ;;  %v4384_v18 = vmul.f32 %v13201_v32, %v13349_v16  ;;  %v4383_v7 = vmul.f32 %v13220_v15, %v13353_v37  ;;  %9820 = vmatmul.mubr.msk.f32.gmra.mxu0 %vm377_vm0, %v10499_v41  ;;  %v13472_v3 = vpop.f32.mrf.mxu1 }
 0x31e   : > { %v8045_v35 = vadd.f32 %v8044_v0, %v6499_v22  ;;  %v6501_v2 = vmax.f32 %v5477_v4, 0.0  ;;  %v5490_v28 = vadd.f32 %v13198_v26, %v4382_v27  ;;  %v4385_v56 = vmul.f32 %v13240_v51, %v13359_v63  ;;  %9884 = vmatmul.mubr.msk.f32.gmra.mxu1 %vm377_vm0, %v10499_v41  ;;  %2802 = vmatprep.mubr.f32.mxu0 %v10663_v6  ;;  %v13482_v62 = vpop.f32.mrf.mxu0 }
 0x31f   : > { %v5492_v16 = vadd.f32 %v13205_v29, %v4384_v18  ;;  %v5491_v37 = vadd.f32 %v13224_v33, %v4383_v7  ;;  %v4398_v34 = vmul.f32 %v13192_v40, %v13365_v45  ;;  %v4400_v20 = vmul.f32 %v13201_v32, %v13372_v24  ;;  %3251 = vmatprep.mubr.f32.mxu1 %v10663_v6  ;;  %v13488_v49 = vpop.f32.mrf.mxu1 }
 0x320   : > { %v8183_v63 = vadd.f32 %v8182_v38, %v6501_v2  ;;  %v6514_v17 = vmax.f32 %v5490_v28, 0.0  ;;  %v5493_v61 = vadd.f32 %v13262_v13, %v4385_v56  ;;  %v4399_v31 = vmul.f32 %v13220_v15, %v13382_v43  ;;  %v13492_v24 = vpop.f32.mrf.mxu0  ;;  %v10501_v56 = vld [vmem:[%s10776_s30 + $0x1f8] sm:$0xff] }
 0x321   : > { %v6516_v44 = vmax.f32 %v5492_v16, 0.0  ;;  %v6515_v46 = vmax.f32 %v5491_v37, 0.0  ;;  %v5506_v45 = vadd.f32 %v13198_v26, %v4398_v34  ;;  %v5508_v8 = vadd.f32 %v13205_v29, %v4400_v20  ;;  %9821 = vmatmul.mubr.msk.f32.gmra.mxu0 %vm377_vm0, %v10500_v50  ;;  %v13499_v0 = vpop.f32.mrf.mxu1 }
 0x322   : > { %v7977_v12 = vadd.f32 %v7976_v55, %v6514_v17  ;;  %v6517_v9 = vmax.f32 %v5493_v61, 0.0  ;;  %v5507_v54 = vadd.f32 %v13224_v33, %v4399_v31  ;;  %v4401_v43 = vmul.f32 %v13240_v51, %v13388_v58  ;;  %9885 = vmatmul.mubr.msk.f32.gmra.mxu1 %vm377_vm0, %v10500_v50  ;;  %2808 = vmatprep.mubr.f32.mxu0 %v10663_v6  ;;  %v13503_v4 = vpop.f32.mrf.mxu0 }
 0x323   : > { %v8115_v53 = vadd.f32 %v8114_v39, %v6516_v44  ;;  %v8046_v11 = vadd.f32 %v8045_v35, %v6515_v46  ;;  %v6530_v38 = vmax.f32 %v5506_v45, 0.0  ;;  %v6532_v22 = vmax.f32 %v5508_v8, 0.0  ;;  %3257 = vmatprep.mubr.f32.mxu1 %v10663_v6  ;;  %v13509_v7 = vpop.f32.mrf.mxu1 }
 0x324   : > { %v8184_v27 = vadd.f32 %v8183_v63, %v6517_v9  ;;  %v6531_v55 = vmax.f32 %v5507_v54, 0.0  ;;  %v5509_v18 = vadd.f32 %v13262_v13, %v4401_v43  ;;  %v4414_v58 = vmul.f32 %v13192_v40, %v13392_v59  ;;  %v13515_v28 = vpop.f32.mrf.mxu0  ;;  %v10502_v9 = vld [vmem:[%s10776_s30] sm:$0xff] }
 0x325   : > { %v7978_v41 = vadd.f32 %v7977_v12, %v6530_v38  ;;  %v8116_v2 = vadd.f32 %v8115_v53, %v6532_v22  ;;  %v4416_v39 = vmul.f32 %v13201_v32, %v13399_v52  ;;  %v4415_v35 = vmul.f32 %v13220_v15, %v13403_v48  ;;  %9822 = vmatmul.mubr.msk.f32.gmra.mxu0 %vm377_vm0, %v10501_v56  ;;  %v13522_v20 = vpop.f32.mrf.mxu1 }
 0x326   : > { %v8047_v16 = vadd.f32 %v8046_v11, %v6531_v55  ;;  %v6533_v37 = vmax.f32 %v5509_v18, 0.0  ;;  %v5522_v34 = vadd.f32 %v13198_v26, %v4414_v58  ;;  %v4417_v59 = vmul.f32 %v13240_v51, %v13409_v14  ;;  %9886 = vmatmul.mubr.msk.f32.gmra.mxu1 %vm377_vm0, %v10501_v56  ;;  %3328 = vmatprep.mubr.f32.mxu0 %v10663_v6  ;;  %v13532_v61 = vpop.f32.mrf.mxu0 }
 0x327   : > { %v5524_v52 = vadd.f32 %v13205_v29, %v4416_v39  ;;  %v5523_v48 = vadd.f32 %v13224_v33, %v4415_v35  ;;  %v4430_v63 = vmul.f32 %v13192_v40, %v13415_v23  ;;  %v4432_v17 = vmul.f32 %v13201_v32, %v13422_v1  ;;  %3777 = vmatprep.mubr.f32.mxu1 %v10663_v6  ;;  %v13538_v45 = vpop.f32.mrf.mxu1 }
 0x328   : > { %v8185_v14 = vadd.f32 %v8184_v27, %v6533_v37  ;;  %v6546_v31 = vmax.f32 %v5522_v34, 0.0  ;;  %v5525_v44 = vadd.f32 %v13262_v13, %v4417_v59  ;;  %v4431_v46 = vmul.f32 %v13220_v15, %v13432_v5  ;;  %v13542_v1 = vpop.f32.mrf.mxu0  ;;  %v10503_v59 = vld [vmem:[%s10776_s30 + $0x8] sm:$0xff] }
 0x329   : > { %v6548_v8 = vmax.f32 %v5524_v52, 0.0  ;;  %v6547_v50 = vmax.f32 %v5523_v48, 0.0  ;;  %v5538_v23 = vadd.f32 %v13198_v26, %v4430_v63  ;;  %v5540_v12 = vadd.f32 %v13205_v29, %v4432_v17  ;;  %9887 = vmatmul.mubr.msk.f32.vlgmr.msra.gmra.mxu0 %vm377_vm0, %v10502_v9  ;;  %v13549_v11 = vpop.f32.mrf.mxu1 }
 0x32a   : > { %v7979_v54 = vadd.f32 %v7978_v41, %v6546_v31  ;;  %v6549_v43 = vmax.f32 %v5525_v44, 0.0  ;;  %v5539_v53 = vadd.f32 %v13224_v33, %v4431_v46  ;;  %v4433_v5 = vmul.f32 %v13240_v51, %v13438_v60  ;;  %9951 = vmatmul.mubr.msk.f32.vlgmr.msra.gmra.mxu1 %vm377_vm0, %v10502_v9  ;;  %3334 = vmatprep.mubr.f32.mxu0 %v10663_v6  ;;  %v13553_v18 = vpop.f32.mrf.mxu0 }
 0x32b   : > { %v8117_v38 = vadd.f32 %v8116_v2, %v6548_v8  ;;  %v8048_v22 = vadd.f32 %v8047_v16, %v6547_v50  ;;  %v6562_v27 = vmax.f32 %v5538_v23, 0.0  ;;  %v6564_v55 = vmax.f32 %v5540_v12, 0.0  ;;  %3783 = vmatprep.mubr.f32.mxu1 %v10663_v6  ;;  %v13559_v35 = vpop.f32.mrf.mxu1 }
 0x32c   : > { %v8186_v58 = vadd.f32 %v8185_v14, %v6549_v43  ;;  %v6563_v41 = vmax.f32 %v5539_v53, 0.0  ;;  %v5541_v39 = vadd.f32 %v13262_v13, %v4433_v5  ;;  %v4446_v60 = vmul.f32 %v13192_v40, %v13442_v42  ;;  %v13565_v34 = vpop.f32.mrf.mxu0  ;;  %v10504_v43 = vld [vmem:[%s10776_s30 + $0x10] sm:$0xff] }
 0x32d   : > { %v7980_v56 = vadd.f32 %v7979_v54, %v6562_v27  ;;  %v8118_v37 = vadd.f32 %v8117_v38, %v6564_v55  ;;  %v4448_v2 = vmul.f32 %v13201_v32, %v13449_v21  ;;  %v4447_v16 = vmul.f32 %v13220_v15, %v13453_v19  ;;  %9888 = vmatmul.mubr.msk.f32.gmra.mxu0 %vm377_vm0, %v10503_v59  ;;  %v13572_v17 = vpop.f32.mrf.mxu1 }
 0x32e   : > { %v8049_v52 = vadd.f32 %v8048_v22, %v6563_v41  ;;  %v6565_v48 = vmax.f32 %v5541_v39, 0.0  ;;  %v5554_v63 = vadd.f32 %v13198_v26, %v4446_v60  ;;  %v4449_v42 = vmul.f32 %v13240_v51, %v13459_v57  ;;  %9952 = vmatmul.mubr.msk.f32.gmra.mxu1 %vm377_vm0, %v10503_v59  ;;  %3340 = vmatprep.mubr.f32.mxu0 %v10663_v6  ;;  %v13582_v44 = vpop.f32.mrf.mxu0 }
 0x32f   : > { %v5556_v21 = vadd.f32 %v13205_v29, %v4448_v2  ;;  %v5555_v19 = vadd.f32 %v13224_v33, %v4447_v16  ;;  %v4462_v14 = vmul.f32 %v13192_v40, %v13465_v10  ;;  %v4464_v31 = vmul.f32 %v13201_v32, %v13472_v3  ;;  %3789 = vmatprep.mubr.f32.mxu1 %v10663_v6  ;;  %v13588_v23 = vpop.f32.mrf.mxu1 }
 0x330   : > { %v8187_v57 = vadd.f32 %v8186_v58, %v6565_v48  ;;  %v6578_v46 = vmax.f32 %v5554_v63, 0.0  ;;  %v5557_v8 = vadd.f32 %v13262_v13, %v4449_v42  ;;  %v4463_v50 = vmul.f32 %v13220_v15, %v13482_v62  ;;  %v13592_v3 = vpop.f32.mrf.mxu0  ;;  %v10505_v42 = vld [vmem:[%s10776_s30 + $0x18] sm:$0xff] }
 0x331   : > { %v6580_v12 = vmax.f32 %v5556_v21, 0.0  ;;  %v6579_v9 = vmax.f32 %v5555_v19, 0.0  ;;  %v5570_v10 = vadd.f32 %v13198_v26, %v4462_v14  ;;  %v5572_v54 = vadd.f32 %v13205_v29, %v4464_v31  ;;  %9889 = vmatmul.mubr.msk.f32.gmra.mxu0 %vm377_vm0, %v10504_v43  ;;  %v13599_v22 = vpop.f32.mrf.mxu1 }
 0x332   : > { %v7981_v53 = vadd.f32 %v7980_v56, %v6578_v46  ;;  %v6581_v5 = vmax.f32 %v5557_v8, 0.0  ;;  %v5571_v38 = vadd.f32 %v13224_v33, %v4463_v50  ;;  %v4465_v62 = vmul.f32 %v13240_v51, %v13488_v49  ;;  %9953 = vmatmul.mubr.msk.f32.gmra.mxu1 %vm377_vm0, %v10504_v43  ;;  %3346 = vmatprep.mubr.f32.mxu0 %v10663_v6  ;;  %v13603_v39 = vpop.f32.mrf.mxu0 }
 0x333   : > { %v8119_v27 = vadd.f32 %v8118_v37, %v6580_v12  ;;  %v8050_v55 = vadd.f32 %v8049_v52, %v6579_v9  ;;  %v6594_v58 = vmax.f32 %v5570_v10, 0.0  ;;  %v6596_v41 = vmax.f32 %v5572_v54, 0.0  ;;  %3795 = vmatprep.mubr.f32.mxu1 %v10663_v6  ;;  %v13609_v16 = vpop.f32.mrf.mxu1 }
 0x334   : > { %v8188_v60 = vadd.f32 %v8187_v57, %v6581_v5  ;;  %v6595_v56 = vmax.f32 %v5571_v38, 0.0  ;;  %v5573_v2 = vadd.f32 %v13262_v13, %v4465_v62  ;;  %v4478_v49 = vmul.f32 %v13192_v40, %v13492_v24  ;;  %v13615_v63 = vpop.f32.mrf.mxu0  ;;  %v10506_v5 = vld [vmem:[%s10776_s30 + $0x20] sm:$0xff] }
 0x335   : > { %v7982_v59 = vadd.f32 %v7981_v53, %v6594_v58  ;;  %v8120_v48 = vadd.f32 %v8119_v27, %v6596_v41  ;;  %v4480_v37 = vmul.f32 %v13201_v32, %v13499_v0  ;;  %v4479_v52 = vmul.f32 %v13220_v15, %v13503_v4  ;;  %9890 = vmatmul.mubr.msk.f32.gmra.mxu0 %vm377_vm0, %v10505_v42  ;;  %v13622_v31 = vpop.f32.mrf.mxu1 }
 0x336   : > { %v8051_v21 = vadd.f32 %v8050_v55, %v6595_v56  ;;  %v6597_v19 = vmax.f32 %v5573_v2, 0.0  ;;  %v5586_v14 = vadd.f32 %v13198_v26, %v4478_v49  ;;  %v4481_v24 = vmul.f32 %v13240_v51, %v13509_v7  ;;  %9954 = vmatmul.mubr.msk.f32.gmra.mxu1 %vm377_vm0, %v10505_v42  ;;  %3352 = vmatprep.mubr.f32.mxu0 %v10663_v6  ;;  %v13632_v8 = vpop.f32.mrf.mxu0 }
 0x337   : > { %v5588_v0 = vadd.f32 %v13205_v29, %v4480_v37  ;;  %v5587_v4 = vadd.f32 %v13224_v33, %v4479_v52  ;;  %v4494_v57 = vmul.f32 %v13192_v40, %v13515_v28  ;;  %v4496_v46 = vmul.f32 %v13201_v32, %v13522_v20  ;;  %3801 = vmatprep.mubr.f32.mxu1 %v10663_v6  ;;  %v13638_v10 = vpop.f32.mrf.mxu1 }
 0x338   : > { %v8189_v7 = vadd.f32 %v8188_v60, %v6597_v19  ;;  %v6610_v50 = vmax.f32 %v5586_v14, 0.0  ;;  %v5589_v12 = vadd.f32 %v13262_v13, %v4481_v24  ;;  %v4495_v9 = vmul.f32 %v13220_v15, %v13532_v61  ;;  %v13642_v20 = vpop.f32.mrf.mxu0  ;;  %v10507_v24 = vld [vmem:[%s10776_s30 + $0x28] sm:$0xff] }
 0x339   : > { %v6612_v54 = vmax.f32 %v5588_v0, 0.0  ;;  %v6611_v43 = vmax.f32 %v5587_v4, 0.0  ;;  %v5602_v28 = vadd.f32 %v13198_v26, %v4494_v57  ;;  %v5604_v53 = vadd.f32 %v13205_v29, %v4496_v46  ;;  %9891 = vmatmul.mubr.msk.f32.gmra.mxu0 %vm377_vm0, %v10506_v5  ;;  %v13649_v55 = vpop.f32.mrf.mxu1 }
 0x33a   : > { %v7983_v38 = vadd.f32 %v7982_v59, %v6610_v50  ;;  %v6613_v62 = vmax.f32 %v5589_v12, 0.0  ;;  %v5603_v27 = vadd.f32 %v13224_v33, %v4495_v9  ;;  %v4497_v61 = vmul.f32 %v13240_v51, %v13538_v45  ;;  %9955 = vmatmul.mubr.msk.f32.gmra.mxu1 %vm377_vm0, %v10506_v5  ;;  %3358 = vmatprep.mubr.f32.mxu0 %v10663_v6  ;;  %v13653_v2 = vpop.f32.mrf.mxu0 }
 0x33b   : > { %v8121_v58 = vadd.f32 %v8120_v48, %v6612_v54  ;;  %v8052_v41 = vadd.f32 %v8051_v21, %v6611_v43  ;;  %v6626_v60 = vmax.f32 %v5602_v28, 0.0  ;;  %v6628_v56 = vmax.f32 %v5604_v53, 0.0  ;;  %3807 = vmatprep.mubr.f32.mxu1 %v10663_v6  ;;  %v13659_v52 = vpop.f32.mrf.mxu1 }
 0x33c   : > { %v8190_v49 = vadd.f32 %v8189_v7, %v6613_v62  ;;  %v6627_v59 = vmax.f32 %v5603_v27, 0.0  ;;  %v5605_v37 = vadd.f32 %v13262_v13, %v4497_v61  ;;  %v4510_v45 = vmul.f32 %v13192_v40, %v13542_v1  ;;  %v13665_v14 = vpop.f32.mrf.mxu0  ;;  %v10508_v62 = vld [vmem:[%s10776_s30 + $0x30] sm:$0xff] }
 0x33d   : > { %v7984_v42 = vadd.f32 %v7983_v38, %v6626_v60  ;;  %v8122_v19 = vadd.f32 %v8121_v58, %v6628_v56  ;;  %v4512_v48 = vmul.f32 %v13201_v32, %v13549_v11  ;;  %v4511_v21 = vmul.f32 %v13220_v15, %v13553_v18  ;;  %9892 = vmatmul.mubr.msk.f32.gmra.mxu0 %vm377_vm0, %v10507_v24  ;;  %v13672_v46 = vpop.f32.mrf.mxu1 }
 0x33e   : > { %v8053_v0 = vadd.f32 %v8052_v41, %v6627_v59  ;;  %v6629_v4 = vmax.f32 %v5605_v37, 0.0  ;;  %v5618_v57 = vadd.f32 %v13198_v26, %v4510_v45  ;;  %v4513_v1 = vmul.f32 %v13240_v51, %v13559_v35  ;;  %9956 = vmatmul.mubr.msk.f32.gmra.mxu1 %vm377_vm0, %v10507_v24  ;;  %3364 = vmatprep.mubr.f32.mxu0 %v10663_v6  ;;  %v13682_v12 = vpop.f32.mrf.mxu0 }
 0x33f   : > { %v5620_v11 = vadd.f32 %v13205_v29, %v4512_v48  ;;  %v5619_v18 = vadd.f32 %v13224_v33, %v4511_v21  ;;  %v4526_v7 = vmul.f32 %v13192_v40, %v13565_v34  ;;  %v4528_v50 = vmul.f32 %v13201_v32, %v13572_v17  ;;  %3813 = vmatprep.mubr.f32.mxu1 %v10663_v6  ;;  %v13688_v28 = vpop.f32.mrf.mxu1 }
 0x340   : > { %v8191_v35 = vadd.f32 %v8190_v49, %v6629_v4  ;;  %v6642_v9 = vmax.f32 %v5618_v57, 0.0  ;;  %v5621_v54 = vadd.f32 %v13262_v13, %v4513_v1  ;;  %v4527_v43 = vmul.f32 %v13220_v15, %v13582_v44  ;;  %v13692_v17 = vpop.f32.mrf.mxu0  ;;  %v10509_v1 = vld [vmem:[%s10776_s30 + $0x38] sm:$0xff] }
 0x341   : > { %v6644_v53 = vmax.f32 %v5620_v11, 0.0  ;;  %v6643_v5 = vmax.f32 %v5619_v18, 0.0  ;;  %v5634_v34 = vadd.f32 %v13198_v26, %v4526_v7  ;;  %v5636_v38 = vadd.f32 %v13205_v29, %v4528_v50  ;;  %9893 = vmatmul.mubr.msk.f32.gmra.mxu0 %vm377_vm0, %v10508_v62  ;;  %v13699_v41 = vpop.f32.mrf.mxu1 }
 0x342   : > { %v7985_v27 = vadd.f32 %v7984_v42, %v6642_v9  ;;  %v6645_v61 = vmax.f32 %v5621_v54, 0.0  ;;  %v5635_v58 = vadd.f32 %v13224_v33, %v4527_v43  ;;  %v4529_v44 = vmul.f32 %v13240_v51, %v13588_v23  ;;  %9957 = vmatmul.mubr.msk.f32.gmra.mxu1 %vm377_vm0, %v10508_v62  ;;  %3370 = vmatprep.mubr.f32.mxu0 %v10663_v6  ;;  %v13703_v37 = vpop.f32.mrf.mxu0 }
 0x343   : > { %v8123_v60 = vadd.f32 %v8122_v19, %v6644_v53  ;;  %v8054_v56 = vadd.f32 %v8053_v0, %v6643_v5  ;;  %v6658_v49 = vmax.f32 %v5634_v34, 0.0  ;;  %v6660_v59 = vmax.f32 %v5636_v38, 0.0  ;;  %3819 = vmatprep.mubr.f32.mxu1 %v10663_v6  ;;  %v13709_v21 = vpop.f32.mrf.mxu1 }
 0x344   : > { %v8192_v45 = vadd.f32 %v8191_v35, %v6645_v61  ;;  %v6659_v42 = vmax.f32 %v5635_v58, 0.0  ;;  %v5637_v48 = vadd.f32 %v13262_v13, %v4529_v44  ;;  %v4542_v23 = vmul.f32 %v13192_v40, %v13592_v3  ;;  %v13715_v57 = vpop.f32.mrf.mxu0  ;;  %v10510_v61 = vld [vmem:[%s10776_s30 + $0x40] sm:$0xff] }
 0x345   : > { %v7986_v24 = vadd.f32 %v7985_v27, %v6658_v49  ;;  %v8124_v4 = vadd.f32 %v8123_v60, %v6660_v59  ;;  %v4544_v19 = vmul.f32 %v13201_v32, %v13599_v22  ;;  %v4543_v0 = vmul.f32 %v13220_v15, %v13603_v39  ;;  %9894 = vmatmul.mubr.msk.f32.gmra.mxu0 %vm377_vm0, %v10509_v1  ;;  %v13722_v50 = vpop.f32.mrf.mxu1 }
 0x346   : > { %v8055_v11 = vadd.f32 %v8054_v56, %v6659_v42  ;;  %v6661_v18 = vmax.f32 %v5637_v48, 0.0  ;;  %v5650_v7 = vadd.f32 %v13198_v26, %v4542_v23  ;;  %v4545_v3 = vmul.f32 %v13240_v51, %v13609_v16  ;;  %9958 = vmatmul.mubr.msk.f32.gmra.mxu1 %vm377_vm0, %v10509_v1  ;;  %3376 = vmatprep.mubr.f32.mxu0 %v10663_v6  ;;  %v13732_v54 = vpop.f32.mrf.mxu0 }
 0x347   : > { %v5652_v22 = vadd.f32 %v13205_v29, %v4544_v19  ;;  %v5651_v39 = vadd.f32 %v13224_v33, %v4543_v0  ;;  %v4558_v35 = vmul.f32 %v13192_v40, %v13615_v63  ;;  %v4560_v9 = vmul.f32 %v13201_v32, %v13622_v31  ;;  %3825 = vmatprep.mubr.f32.mxu1 %v10663_v6  ;;  %v13738_v34 = vpop.f32.mrf.mxu1 }
 0x348   : > { %v8193_v16 = vadd.f32 %v8192_v45, %v6661_v18  ;;  %v6674_v43 = vmax.f32 %v5650_v7, 0.0  ;;  %v5653_v53 = vadd.f32 %v13262_v13, %v4545_v3  ;;  %v4559_v5 = vmul.f32 %v13220_v15, %v13632_v8  ;;  %v13742_v31 = vpop.f32.mrf.mxu0  ;;  %v10511_v3 = vld [vmem:[%s10776_s30 + $0x48] sm:$0xff] }
 0x349   : > { %v6676_v38 = vmax.f32 %v5652_v22, 0.0  ;;  %v6675_v62 = vmax.f32 %v5651_v39, 0.0  ;;  %v5666_v63 = vadd.f32 %v13198_v26, %v4558_v35  ;;  %v5668_v27 = vadd.f32 %v13205_v29, %v4560_v9  ;;  %9895 = vmatmul.mubr.msk.f32.gmra.mxu0 %vm377_vm0, %v10510_v61  ;;  %v13749_v56 = vpop.f32.mrf.mxu1 }
 0x34a   : > { %v7987_v58 = vadd.f32 %v7986_v24, %v6674_v43  ;;  %v6677_v44 = vmax.f32 %v5653_v53, 0.0  ;;  %v5667_v60 = vadd.f32 %v13224_v33, %v4559_v5  ;;  %v4561_v8 = vmul.f32 %v13240_v51, %v13638_v10  ;;  %9959 = vmatmul.mubr.msk.f32.gmra.mxu1 %vm377_vm0, %v10510_v61  ;;  %3382 = vmatprep.mubr.f32.mxu0 %v10663_v6  ;;  %v13753_v48 = vpop.f32.mrf.mxu0 }
 0x34b   : > { %v8125_v49 = vadd.f32 %v8124_v4, %v6676_v38  ;;  %v8056_v59 = vadd.f32 %v8055_v11, %v6675_v62  ;;  %v6690_v45 = vmax.f32 %v5666_v63, 0.0  ;;  %v6692_v42 = vmax.f32 %v5668_v27, 0.0  ;;  %3831 = vmatprep.mubr.f32.mxu1 %v10663_v6  ;;  %v13759_v0 = vpop.f32.mrf.mxu1 }
 0x34c   : > { %v8194_v23 = vadd.f32 %v8193_v16, %v6677_v44  ;;  %v6691_v24 = vmax.f32 %v5667_v60, 0.0  ;;  %v5669_v19 = vadd.f32 %v13262_v13, %v4561_v8  ;;  %v4574_v10 = vmul.f32 %v13192_v40, %v13642_v20  ;;  %v13765_v7 = vpop.f32.mrf.mxu0  ;;  %v10512_v44 = vld [vmem:[%s10776_s30 + $0x50] sm:$0xff] }
 0x34d   : > { %v7988_v1 = vadd.f32 %v7987_v58, %v6690_v45  ;;  %v8126_v18 = vadd.f32 %v8125_v49, %v6692_v42  ;;  %v4576_v4 = vmul.f32 %v13201_v32, %v13649_v55  ;;  %v4575_v11 = vmul.f32 %v13220_v15, %v13653_v2  ;;  %9896 = vmatmul.mubr.msk.f32.gmra.mxu0 %vm377_vm0, %v10511_v3  ;;  %v13772_v9 = vpop.f32.mrf.mxu1 }
 0x34e   : > { %v8057_v22 = vadd.f32 %v8056_v59, %v6691_v24  ;;  %v6693_v39 = vmax.f32 %v5669_v19, 0.0  ;;  %v5682_v35 = vadd.f32 %v13198_v26, %v4574_v10  ;;  %v4577_v20 = vmul.f32 %v13240_v51, %v13659_v52  ;;  %9960 = vmatmul.mubr.msk.f32.gmra.mxu1 %vm377_vm0, %v10511_v3  ;;  %3388 = vmatprep.mubr.f32.mxu0 %v10663_v6  ;;  %v13782_v53 = vpop.f32.mrf.mxu0 }
 0x34f   : > { %v5684_v55 = vadd.f32 %v13205_v29, %v4576_v4  ;;  %v5683_v2 = vadd.f32 %v13224_v33, %v4575_v11  ;;  %v4590_v16 = vmul.f32 %v13192_v40, %v13665_v14  ;;  %v4592_v43 = vmul.f32 %v13201_v32, %v13672_v46  ;;  %3837 = vmatprep.mubr.f32.mxu1 %v10663_v6  ;;  %v13788_v63 = vpop.f32.mrf.mxu1 }
 0x350   : > { %v8195_v52 = vadd.f32 %v8194_v23, %v6693_v39  ;;  %v6706_v5 = vmax.f32 %v5682_v35, 0.0  ;;  %v5685_v38 = vadd.f32 %v13262_v13, %v4577_v20  ;;  %v4591_v62 = vmul.f32 %v13220_v15, %v13682_v12  ;;  %v13792_v46 = vpop.f32.mrf.mxu0  ;;  %v10513_v20 = vld [vmem:[%s10776_s30 + $0x58] sm:$0xff] }
 0x351   : > { %v6708_v27 = vmax.f32 %v5684_v55, 0.0  ;;  %v6707_v61 = vmax.f32 %v5683_v2, 0.0  ;;  %v5698_v14 = vadd.f32 %v13198_v26, %v4590_v16  ;;  %v5700_v58 = vadd.f32 %v13205_v29, %v4592_v43  ;;  %9897 = vmatmul.mubr.msk.f32.gmra.mxu0 %vm377_vm0, %v10512_v44  ;;  %v13799_v59 = vpop.f32.mrf.mxu1 }
 0x352   : > { %v7989_v60 = vadd.f32 %v7988_v1, %v6706_v5  ;;  %v6709_v8 = vmax.f32 %v5685_v38, 0.0  ;;  %v5699_v49 = vadd.f32 %v13224_v33, %v4591_v62  ;;  %v4593_v12 = vmul.f32 %v13240_v51, %v13688_v28  ;;  %9961 = vmatmul.mubr.msk.f32.gmra.mxu1 %vm377_vm0, %v10512_v44  ;;  %3394 = vmatprep.mubr.f32.mxu0 %v10663_v6  ;;  %v13803_v19 = vpop.f32.mrf.mxu0 }
 0x353   : > { %v8127_v45 = vadd.f32 %v8126_v18, %v6708_v27  ;;  %v8058_v42 = vadd.f32 %v8057_v22, %v6707_v61  ;;  %v6722_v23 = vmax.f32 %v5698_v14, 0.0  ;;  %v6724_v24 = vmax.f32 %v5700_v58, 0.0  ;;  %3843 = vmatprep.mubr.f32.mxu1 %v10663_v6  ;;  %v13809_v11 = vpop.f32.mrf.mxu1 }
 0x354   : > { %v8196_v10 = vadd.f32 %v8195_v52, %v6709_v8  ;;  %v6723_v1 = vmax.f32 %v5699_v49, 0.0  ;;  %v5701_v4 = vadd.f32 %v13262_v13, %v4593_v12  ;;  %v4606_v28 = vmul.f32 %v13192_v40, %v13692_v17  ;;  %v13815_v35 = vpop.f32.mrf.mxu0  ;;  %v10514_v8 = vld [vmem:[%s10776_s30 + $0x60] sm:$0xff] }
 0x355   : > { %v7990_v3 = vadd.f32 %v7989_v60, %v6722_v23  ;;  %v8128_v39 = vadd.f32 %v8127_v45, %v6724_v24  ;;  %v4608_v18 = vmul.f32 %v13201_v32, %v13699_v41  ;;  %v4607_v22 = vmul.f32 %v13220_v15, %v13703_v37  ;;  %9898 = vmatmul.mubr.msk.f32.gmra.mxu0 %vm377_vm0, %v10513_v20  ;;  %v13822_v43 = vpop.f32.mrf.mxu1 }
 0x356   : > { %v8059_v55 = vadd.f32 %v8058_v42, %v6723_v1  ;;  %v6725_v2 = vmax.f32 %v5701_v4, 0.0  ;;  %v5714_v16 = vadd.f32 %v13198_v26, %v4606_v28  ;;  %v4609_v17 = vmul.f32 %v13240_v51, %v13709_v21  ;;  %9962 = vmatmul.mubr.msk.f32.gmra.mxu1 %vm377_vm0, %v10513_v20  ;;  %3400 = vmatprep.mubr.f32.mxu0 %v10663_v6  ;;  %v13832_v38 = vpop.f32.mrf.mxu0 }
 0x357   : > { %v5716_v41 = vadd.f32 %v13205_v29, %v4608_v18  ;;  %v5715_v37 = vadd.f32 %v13224_v33, %v4607_v22  ;;  %v4622_v52 = vmul.f32 %v13192_v40, %v13715_v57  ;;  %v4624_v5 = vmul.f32 %v13201_v32, %v13722_v50  ;;  %3849 = vmatprep.mubr.f32.mxu1 %v10663_v6  ;;  %v13838_v14 = vpop.f32.mrf.mxu1 }
 0x358   : > { %v8197_v21 = vadd.f32 %v8196_v10, %v6725_v2  ;;  %v6738_v62 = vmax.f32 %v5714_v16, 0.0  ;;  %v5717_v27 = vadd.f32 %v13262_v13, %v4609_v17  ;;  %v4623_v61 = vmul.f32 %v13220_v15, %v13732_v54  ;;  %v13842_v50 = vpop.f32.mrf.mxu0  ;;  %v10515_v17 = vld [vmem:[%s10776_s30 + $0x68] sm:$0xff] }
 0x359   : > { %v6740_v58 = vmax.f32 %v5716_v41, 0.0  ;;  %v6739_v44 = vmax.f32 %v5715_v37, 0.0  ;;  %v5730_v57 = vadd.f32 %v13198_v26, %v4622_v52  ;;  %v5732_v60 = vadd.f32 %v13205_v29, %v4624_v5  ;;  %9899 = vmatmul.mubr.msk.f32.gmra.mxu0 %vm377_vm0, %v10514_v8  ;;  %v13849_v42 = vpop.f32.mrf.mxu1 }
 0x35a   : > { %v7991_v49 = vadd.f32 %v7990_v3, %v6738_v62  ;;  %v6741_v12 = vmax.f32 %v5717_v27, 0.0  ;;  %v5731_v45 = vadd.f32 %v13224_v33, %v4623_v61  ;;  %v4625_v54 = vmul.f32 %v13240_v51, %v13738_v34  ;;  %9963 = vmatmul.mubr.msk.f32.gmra.mxu1 %vm377_vm0, %v10514_v8  ;;  %3406 = vmatprep.mubr.f32.mxu0 %v10663_v6  ;;  %v13853_v4 = vpop.f32.mrf.mxu0 }
 0x35b   : > { %v8129_v23 = vadd.f32 %v8128_v39, %v6740_v58  ;;  %v8060_v24 = vadd.f32 %v8059_v55, %v6739_v44  ;;  %v6754_v10 = vmax.f32 %v5730_v57, 0.0  ;;  %v6756_v1 = vmax.f32 %v5732_v60, 0.0  ;;  %3855 = vmatprep.mubr.f32.mxu1 %v10663_v6  ;;  %v13859_v22 = vpop.f32.mrf.mxu1 }
 0x35c   : > { %v8198_v28 = vadd.f32 %v8197_v21, %v6741_v12  ;;  %v6755_v3 = vmax.f32 %v5731_v45, 0.0  ;;  %v5733_v18 = vadd.f32 %v13262_v13, %v4625_v54  ;;  %v4638_v34 = vmul.f32 %v13192_v40, %v13742_v31  ;;  %v13865_v16 = vpop.f32.mrf.mxu0  ;;  %v10516_v12 = vld [vmem:[%s10776_s30 + $0x70] sm:$0xff] }
 0x35d   : > { %v7992_v20 = vadd.f32 %v7991_v49, %v6754_v10  ;;  %v8130_v2 = vadd.f32 %v8129_v23, %v6756_v1  ;;  %v4640_v39 = vmul.f32 %v13201_v32, %v13749_v56  ;;  %v4639_v55 = vmul.f32 %v13220_v15, %v13753_v48  ;;  %9900 = vmatmul.mubr.msk.f32.gmra.mxu0 %vm377_vm0, %v10515_v17  ;;  %v13872_v5 = vpop.f32.mrf.mxu1 }
 0x35e   : > { %v8061_v41 = vadd.f32 %v8060_v24, %v6755_v3  ;;  %v6757_v37 = vmax.f32 %v5733_v18, 0.0  ;;  %v5746_v52 = vadd.f32 %v13198_v26, %v4638_v34  ;;  %v4641_v31 = vmul.f32 %v13240_v51, %v13759_v0  ;;  %9964 = vmatmul.mubr.msk.f32.gmra.mxu1 %vm377_vm0, %v10515_v17  ;;  %3412 = vmatprep.mubr.f32.mxu0 %v10663_v6  ;;  %v13882_v27 = vpop.f32.mrf.mxu0 }
 0x35f   : > { %v5748_v56 = vadd.f32 %v13205_v29, %v4640_v39  ;;  %v5747_v48 = vadd.f32 %v13224_v33, %v4639_v55  ;;  %v4654_v21 = vmul.f32 %v13192_v40, %v13765_v7  ;;  %v4656_v62 = vmul.f32 %v13201_v32, %v13772_v9  ;;  %3861 = vmatprep.mubr.f32.mxu1 %v10663_v6  ;;  %v13888_v57 = vpop.f32.mrf.mxu1 }
 0x360   : > { %v8199_v0 = vadd.f32 %v8198_v28, %v6757_v37  ;;  %v6770_v61 = vmax.f32 %v5746_v52, 0.0  ;;  %v5749_v58 = vadd.f32 %v13262_v13, %v4641_v31  ;;  %v4655_v44 = vmul.f32 %v13220_v15, %v13782_v53  ;;  %v13892_v9 = vpop.f32.mrf.mxu0  ;;  %v10517_v31 = vld [vmem:[%s10776_s30 + $0x78] sm:$0xff] }
 0x361   : > { %v6772_v60 = vmax.f32 %v5748_v56, 0.0  ;;  %v6771_v8 = vmax.f32 %v5747_v48, 0.0  ;;  %v5762_v7 = vadd.f32 %v13198_v26, %v4654_v21  ;;  %v5764_v49 = vadd.f32 %v13205_v29, %v4656_v62  ;;  %9901 = vmatmul.mubr.msk.f32.gmra.mxu0 %vm377_vm0, %v10516_v12  ;;  %v13899_v24 = vpop.f32.mrf.mxu1 }
 0x362   : > { %v7993_v45 = vadd.f32 %v7992_v20, %v6770_v61  ;;  %v6773_v54 = vmax.f32 %v5749_v58, 0.0  ;;  %v5763_v23 = vadd.f32 %v13224_v33, %v4655_v44  ;;  %v4657_v53 = vmul.f32 %v13240_v51, %v13788_v63  ;;  %9965 = vmatmul.mubr.msk.f32.gmra.mxu1 %vm377_vm0, %v10516_v12  ;;  %3418 = vmatprep.mubr.f32.mxu0 %v10663_v6  ;;  %v13903_v18 = vpop.f32.mrf.mxu0 }
 0x363   : > { %v8131_v10 = vadd.f32 %v8130_v2, %v6772_v60  ;;  %v8062_v1 = vadd.f32 %v8061_v41, %v6771_v8  ;;  %v6786_v28 = vmax.f32 %v5762_v7, 0.0  ;;  %v6788_v3 = vmax.f32 %v5764_v49, 0.0  ;;  %3867 = vmatprep.mubr.f32.mxu1 %v10663_v6  ;;  %v13909_v55 = vpop.f32.mrf.mxu1 }
 0x364   : > { %v8200_v34 = vadd.f32 %v8199_v0, %v6773_v54  ;;  %v6787_v20 = vmax.f32 %v5763_v23, 0.0  ;;  %v5765_v39 = vadd.f32 %v13262_v13, %v4657_v53  ;;  %v4670_v63 = vmul.f32 %v13192_v40, %v13792_v46  ;;  %v13915_v52 = vpop.f32.mrf.mxu0  ;;  %v10518_v54 = vld [vmem:[%s10776_s30 + $0x80] sm:$0xff] }
 0x365   : > { %v7994_v17 = vadd.f32 %v7993_v45, %v6786_v28  ;;  %v8132_v37 = vadd.f32 %v8131_v10, %v6788_v3  ;;  %v4672_v2 = vmul.f32 %v13201_v32, %v13799_v59  ;;  %v4671_v41 = vmul.f32 %v13220_v15, %v13803_v19  ;;  %9902 = vmatmul.mubr.msk.f32.gmra.mxu0 %vm377_vm0, %v10517_v31  ;;  %v13922_v62 = vpop.f32.mrf.mxu1 }
 0x366   : > { %v8063_v56 = vadd.f32 %v8062_v1, %v6787_v20  ;;  %v6789_v48 = vmax.f32 %v5765_v39, 0.0  ;;  %v5778_v21 = vadd.f32 %v13198_v26, %v4670_v63  ;;  %v4673_v46 = vmul.f32 %v13240_v51, %v13809_v11  ;;  %9966 = vmatmul.mubr.msk.f32.gmra.mxu1 %vm377_vm0, %v10517_v31  ;;  %3424 = vmatprep.mubr.f32.mxu0 %v10663_v6  ;;  %v13932_v58 = vpop.f32.mrf.mxu0 }
 0x367   : > { %v5780_v59 = vadd.f32 %v13205_v29, %v4672_v2  ;;  %v5779_v19 = vadd.f32 %v13224_v33, %v4671_v41  ;;  %v4686_v0 = vmul.f32 %v13192_v40, %v13815_v35  ;;  %v4688_v61 = vmul.f32 %v13201_v32, %v13822_v43  ;;  %3873 = vmatprep.mubr.f32.mxu1 %v10663_v6  ;;  %v13938_v7 = vpop.f32.mrf.mxu1 }
 0x368   : > { %v8201_v11 = vadd.f32 %v8200_v34, %v6789_v48  ;;  %v6802_v44 = vmax.f32 %v5778_v21, 0.0  ;;  %v5781_v60 = vadd.f32 %v13262_v13, %v4673_v46  ;;  %v4687_v8 = vmul.f32 %v13220_v15, %v13832_v38  ;;  %v13942_v43 = vpop.f32.mrf.mxu0  ;;  %v10519_v46 = vld [vmem:[%s10776_s30 + $0x88] sm:$0xff] }
 0x369   : > { %v6804_v49 = vmax.f32 %v5780_v59, 0.0  ;;  %v6803_v12 = vmax.f32 %v5779_v19, 0.0  ;;  %v5794_v35 = vadd.f32 %v13198_v26, %v4686_v0  ;;  %v5796_v45 = vadd.f32 %v13205_v29, %v4688_v61  ;;  %9903 = vmatmul.mubr.msk.f32.gmra.mxu0 %vm377_vm0, %v10518_v54  ;;  %v13949_v1 = vpop.f32.mrf.mxu1 }
 0x36a   : > { %v7995_v23 = vadd.f32 %v7994_v17, %v6802_v44  ;;  %v6805_v53 = vmax.f32 %v5781_v60, 0.0  ;;  %v5795_v10 = vadd.f32 %v13224_v33, %v4687_v8  ;;  %v4689_v38 = vmul.f32 %v13240_v51, %v13838_v14  ;;  %9967 = vmatmul.mubr.msk.f32.gmra.mxu1 %vm377_vm0, %v10518_v54  ;;  %3430 = vmatprep.mubr.f32.mxu0 %v10663_v6  ;;  %v13953_v39 = vpop.f32.mrf.mxu0 }
 0x36b   : > { %v8133_v28 = vadd.f32 %v8132_v37, %v6804_v49  ;;  %v8064_v3 = vadd.f32 %v8063_v56, %v6803_v12  ;;  %v6818_v34 = vmax.f32 %v5794_v35, 0.0  ;;  %v6820_v20 = vmax.f32 %v5796_v45, 0.0  ;;  %3879 = vmatprep.mubr.f32.mxu1 %v10663_v6  ;;  %v13959_v41 = vpop.f32.mrf.mxu1 }
 0x36c   : > { %v8202_v63 = vadd.f32 %v8201_v11, %v6805_v53  ;;  %v6819_v17 = vmax.f32 %v5795_v10, 0.0  ;;  %v5797_v2 = vadd.f32 %v13262_v13, %v4689_v38  ;;  %v4702_v14 = vmul.f32 %v13192_v40, %v13842_v50  ;;  %v13965_v21 = vpop.f32.mrf.mxu0  ;;  %v10520_v53 = vld [vmem:[%s10776_s30 + $0x90] sm:$0xff] }
 0x36d   : > { %v7996_v31 = vadd.f32 %v7995_v23, %v6818_v34  ;;  %v8134_v48 = vadd.f32 %v8133_v28, %v6820_v20  ;;  %v4704_v37 = vmul.f32 %v13201_v32, %v13849_v42  ;;  %v4703_v56 = vmul.f32 %v13220_v15, %v13853_v4  ;;  %9904 = vmatmul.mubr.msk.f32.gmra.mxu0 %vm377_vm0, %v10519_v46  ;;  %v13972_v61 = vpop.f32.mrf.mxu1 }
 0x36e   : > { %v8065_v59 = vadd.f32 %v8064_v3, %v6819_v17  ;;  %v6821_v19 = vmax.f32 %v5797_v2, 0.0  ;;  %v5810_v0 = vadd.f32 %v13198_v26, %v4702_v14  ;;  %v4705_v50 = vmul.f32 %v13240_v51, %v13859_v22  ;;  %9968 = vmatmul.mubr.msk.f32.gmra.mxu1 %vm377_vm0, %v10519_v46  ;;  %3436 = vmatprep.mubr.f32.mxu0 %v10663_v6  ;;  %v13982_v60 = vpop.f32.mrf.mxu0 }
 0x36f   : > { %v5812_v42 = vadd.f32 %v13205_v29, %v4704_v37  ;;  %v5811_v4 = vadd.f32 %v13224_v33, %v4703_v56  ;;  %v4718_v11 = vmul.f32 %v13192_v40, %v13865_v16  ;;  %v4720_v44 = vmul.f32 %v13201_v32, %v13872_v5  ;;  %3885 = vmatprep.mubr.f32.mxu1 %v10663_v6  ;;  %v13988_v35 = vpop.f32.mrf.mxu1 }
 0x370   : > { %v8203_v22 = vadd.f32 %v8202_v63, %v6821_v19  ;;  %v6834_v8 = vmax.f32 %v5810_v0, 0.0  ;;  %v5813_v49 = vadd.f32 %v13262_v13, %v4705_v50  ;;  %v4719_v12 = vmul.f32 %v13220_v15, %v13882_v27  ;;  %v13992_v5 = vpop.f32.mrf.mxu0  ;;  %v10521_v50 = vld [vmem:[%s10776_s30 + $0x98] sm:$0xff] }
 0x371   : > { %v6836_v45 = vmax.f32 %v5812_v42, 0.0  ;;  %v6835_v54 = vmax.f32 %v5811_v4, 0.0  ;;  %v5826_v16 = vadd.f32 %v13198_v26, %v4718_v11  ;;  %v5828_v23 = vadd.f32 %v13205_v29, %v4720_v44  ;;  %9905 = vmatmul.mubr.msk.f32.gmra.mxu0 %vm377_vm0, %v10520_v53  ;;  %v13999_v3 = vpop.f32.mrf.mxu1 }
 0x372   : > { %v7997_v10 = vadd.f32 %v7996_v31, %v6834_v8  ;;  %v6837_v38 = vmax.f32 %v5813_v49, 0.0  ;;  %v5827_v28 = vadd.f32 %v13224_v33, %v4719_v12  ;;  %v4721_v27 = vmul.f32 %v13240_v51, %v13888_v57  ;;  %9969 = vmatmul.mubr.msk.f32.gmra.mxu1 %vm377_vm0, %v10520_v53  ;;  %3442 = vmatprep.mubr.f32.mxu0 %v10663_v6  ;;  %v14003_v2 = vpop.f32.mrf.mxu0 }
 0x373   : > { %v8135_v34 = vadd.f32 %v8134_v48, %v6836_v45  ;;  %v8066_v20 = vadd.f32 %v8065_v59, %v6835_v54  ;;  %v6850_v63 = vmax.f32 %v5826_v16, 0.0  ;;  %v6852_v17 = vmax.f32 %v5828_v23, 0.0  ;;  %3891 = vmatprep.mubr.f32.mxu1 %v10663_v6  ;;  %v14009_v56 = vpop.f32.mrf.mxu1 }
 0x374   : > { %v8204_v14 = vadd.f32 %v8203_v22, %v6837_v38  ;;  %v6851_v31 = vmax.f32 %v5827_v28, 0.0  ;;  %v5829_v37 = vadd.f32 %v13262_v13, %v4721_v27  ;;  %v4734_v57 = vmul.f32 %v13192_v40, %v13892_v9  ;;  %v14015_v0 = vpop.f32.mrf.mxu0  ;;  %v10522_v38 = vld [vmem:[%s10776_s30 + $0xa0] sm:$0xff] }
 0x375   : > { %v7998_v46 = vadd.f32 %v7997_v10, %v6850_v63  ;;  %v8136_v19 = vadd.f32 %v8135_v34, %v6852_v17  ;;  %v4736_v48 = vmul.f32 %v13201_v32, %v13899_v24  ;;  %v4735_v59 = vmul.f32 %v13220_v15, %v13903_v18  ;;  %9906 = vmatmul.mubr.msk.f32.gmra.mxu0 %vm377_vm0, %v10521_v50  ;;  %v14022_v44 = vpop.f32.mrf.mxu1 }
 0x376   : > { %v8067_v42 = vadd.f32 %v8066_v20, %v6851_v31  ;;  %v6853_v4 = vmax.f32 %v5829_v37, 0.0  ;;  %v5842_v11 = vadd.f32 %v13198_v26, %v4734_v57  ;;  %v4737_v9 = vmul.f32 %v13240_v51, %v13909_v55  ;;  %9970 = vmatmul.mubr.msk.f32.gmra.mxu1 %vm377_vm0, %v10521_v50  ;;  %3448 = vmatprep.mubr.f32.mxu0 %v10663_v6  ;;  %v14032_v49 = vpop.f32.mrf.mxu0 }
 0x377   : > { %v5844_v24 = vadd.f32 %v13205_v29, %v4736_v48  ;;  %v5843_v18 = vadd.f32 %v13224_v33, %v4735_v59  ;;  %v4750_v22 = vmul.f32 %v13192_v40, %v13915_v52  ;;  %v4752_v8 = vmul.f32 %v13201_v32, %v13922_v62  ;;  %3897 = vmatprep.mubr.f32.mxu1 %v10663_v6  ;;  %v14038_v16 = vpop.f32.mrf.mxu1 }
 0x378   : > { %v8205_v55 = vadd.f32 %v8204_v14, %v6853_v4  ;;  %v6866_v12 = vmax.f32 %v5842_v11, 0.0  ;;  %v5845_v45 = vadd.f32 %v13262_v13, %v4737_v9  ;;  %v4751_v54 = vmul.f32 %v13220_v15, %v13932_v58  ;;  %v14042_v62 = vpop.f32.mrf.mxu0  ;;  %v10523_v9 = vld [vmem:[%s10776_s30 + $0xa8] sm:$0xff] }
 0x379   : > { %v6868_v23 = vmax.f32 %v5844_v24, 0.0  ;;  %v6867_v53 = vmax.f32 %v5843_v18, 0.0  ;;  %v5858_v52 = vadd.f32 %v13198_v26, %v4750_v22  ;;  %v5860_v10 = vadd.f32 %v13205_v29, %v4752_v8  ;;  %9907 = vmatmul.mubr.msk.f32.gmra.mxu0 %vm377_vm0, %v10522_v38  ;;  %v14049_v20 = vpop.f32.mrf.mxu1 }
 0x37a   : > { %v7999_v28 = vadd.f32 %v7998_v46, %v6866_v12  ;;  %v6869_v27 = vmax.f32 %v5845_v45, 0.0  ;;  %v5859_v34 = vadd.f32 %v13224_v33, %v4751_v54  ;;  %v4753_v58 = vmul.f32 %v13240_v51, %v13938_v7  ;;  %9971 = vmatmul.mubr.msk.f32.gmra.mxu1 %vm377_vm0, %v10522_v38  ;;  %3454 = vmatprep.mubr.f32.mxu0 %v10663_v6  ;;  %v14053_v37 = vpop.f32.mrf.mxu0 }
 0x37b   : > { %v8137_v63 = vadd.f32 %v8136_v19, %v6868_v23  ;;  %v8068_v17 = vadd.f32 %v8067_v42, %v6867_v53  ;;  %v6882_v14 = vmax.f32 %v5858_v52, 0.0  ;;  %v6884_v31 = vmax.f32 %v5860_v10, 0.0  ;;  %3903 = vmatprep.mubr.f32.mxu1 %v10663_v6  ;;  %v14059_v59 = vpop.f32.mrf.mxu1 }
 0x37c   : > { %v8206_v57 = vadd.f32 %v8205_v55, %v6869_v27  ;;  %v6883_v46 = vmax.f32 %v5859_v34, 0.0  ;;  %v5861_v48 = vadd.f32 %v13262_v13, %v4753_v58  ;;  %v4766_v7 = vmul.f32 %v13192_v40, %v13942_v43  ;;  %v14065_v11 = vpop.f32.mrf.mxu0  ;;  %v10524_v27 = vld [vmem:[%s10776_s30 + $0xb0] sm:$0xff] }
 0x37d   : > { %v8000_v50 = vadd.f32 %v7999_v28, %v6882_v14  ;;  %v8138_v4 = vadd.f32 %v8137_v63, %v6884_v31  ;;  %v4768_v19 = vmul.f32 %v13201_v32, %v13949_v1  ;;  %v4767_v42 = vmul.f32 %v13220_v15, %v13953_v39  ;;  %9908 = vmatmul.mubr.msk.f32.gmra.mxu0 %vm377_vm0, %v10523_v9  ;;  %v14072_v8 = vpop.f32.mrf.mxu1 }
 0x37e   : > { %v8069_v24 = vadd.f32 %v8068_v17, %v6883_v46  ;;  %v6885_v18 = vmax.f32 %v5861_v48, 0.0  ;;  %v5874_v22 = vadd.f32 %v13198_v26, %v4766_v7  ;;  %v4769_v43 = vmul.f32 %v13240_v51, %v13959_v41  ;;  %9972 = vmatmul.mubr.msk.f32.gmra.mxu1 %vm377_vm0, %v10523_v9  ;;  %3460 = vmatprep.mubr.f32.mxu0 %v10663_v6  ;;  %v14082_v45 = vpop.f32.mrf.mxu0 }
 0x37f   : > { %v5876_v1 = vadd.f32 %v13205_v29, %v4768_v19  ;;  %v5875_v39 = vadd.f32 %v13224_v33, %v4767_v42  ;;  %v4782_v55 = vmul.f32 %v13192_v40, %v13965_v21  ;;  %v4784_v12 = vmul.f32 %v13201_v32, %v13972_v61  ;;  %3909 = vmatprep.mubr.f32.mxu1 %v10663_v6  ;;  %v14088_v52 = vpop.f32.mrf.mxu1 }
 0x380   : > { %v8207_v41 = vadd.f32 %v8206_v57, %v6885_v18  ;;  %v6898_v54 = vmax.f32 %v5874_v22, 0.0  ;;  %v5877_v23 = vadd.f32 %v13262_v13, %v4769_v43  ;;  %v4783_v53 = vmul.f32 %v13220_v15, %v13982_v60  ;;  %v14092_v61 = vpop.f32.mrf.mxu0  ;;  %v10525_v43 = vld [vmem:[%s10776_s30 + $0xb8] sm:$0xff] }
 0x381   : > { %v6900_v10 = vmax.f32 %v5876_v1, 0.0  ;;  %v6899_v38 = vmax.f32 %v5875_v39, 0.0  ;;  %v5890_v21 = vadd.f32 %v13198_v26, %v4782_v55  ;;  %v5892_v28 = vadd.f32 %v13205_v29, %v4784_v12  ;;  %9909 = vmatmul.mubr.msk.f32.gmra.mxu0 %vm377_vm0, %v10524_v27  ;;  %v14099_v17 = vpop.f32.mrf.mxu1 }
 0x382   : > { %v8001_v34 = vadd.f32 %v8000_v50, %v6898_v54  ;;  %v6901_v58 = vmax.f32 %v5877_v23, 0.0  ;;  %v5891_v63 = vadd.f32 %v13224_v33, %v4783_v53  ;;  %v4785_v60 = vmul.f32 %v13240_v51, %v13988_v35  ;;  %9973 = vmatmul.mubr.msk.f32.gmra.mxu1 %vm377_vm0, %v10524_v27  ;;  %3466 = vmatprep.mubr.f32.mxu0 %v10663_v6  ;;  %v14103_v48 = vpop.f32.mrf.mxu0 }
 0x383   : > { %v8139_v14 = vadd.f32 %v8138_v4, %v6900_v10  ;;  %v8070_v31 = vadd.f32 %v8069_v24, %v6899_v38  ;;  %v6914_v57 = vmax.f32 %v5890_v21, 0.0  ;;  %v6916_v46 = vmax.f32 %v5892_v28, 0.0  ;;  %3915 = vmatprep.mubr.f32.mxu1 %v10663_v6  ;;  %v14109_v42 = vpop.f32.mrf.mxu1 }
 0x384   : > { %v8208_v7 = vadd.f32 %v8207_v41, %v6901_v58  ;;  %v6915_v50 = vmax.f32 %v5891_v63, 0.0  ;;  %v5893_v19 = vadd.f32 %v13262_v13, %v4785_v60  ;;  %v4798_v35 = vmul.f32 %v13192_v40, %v13992_v5  ;;  %v14115_v22 = vpop.f32.mrf.mxu0  ;;  %v10526_v58 = vld [vmem:[%s10776_s30 + $0xc0] sm:$0xff] }
 0x385   : > { %v8002_v9 = vadd.f32 %v8001_v34, %v6914_v57  ;;  %v8140_v18 = vadd.f32 %v8139_v14, %v6916_v46  ;;  %v4800_v4 = vmul.f32 %v13201_v32, %v13999_v3  ;;  %v4799_v24 = vmul.f32 %v13220_v15, %v14003_v2  ;;  %9910 = vmatmul.mubr.msk.f32.gmra.mxu0 %vm377_vm0, %v10525_v43  ;;  %v14122_v12 = vpop.f32.mrf.mxu1 }
 0x386   : > { %v8071_v1 = vadd.f32 %v8070_v31, %v6915_v50  ;;  %v6917_v39 = vmax.f32 %v5893_v19, 0.0  ;;  %v5906_v55 = vadd.f32 %v13198_v26, %v4798_v35  ;;  %v4801_v5 = vmul.f32 %v13240_v51, %v14009_v56  ;;  %9974 = vmatmul.mubr.msk.f32.gmra.mxu1 %vm377_vm0, %v10525_v43  ;;  %3472 = vmatprep.mubr.f32.mxu0 %v10663_v6  ;;  %v14132_v23 = vpop.f32.mrf.mxu0 }
 0x387   : > { %v5908_v3 = vadd.f32 %v13205_v29, %v4800_v4  ;;  %v5907_v2 = vadd.f32 %v13224_v33, %v4799_v24  ;;  %v4814_v41 = vmul.f32 %v13192_v40, %v14015_v0  ;;  %v4816_v54 = vmul.f32 %v13201_v32, %v14022_v44  ;;  %3921 = vmatprep.mubr.f32.mxu1 %v10663_v6  ;;  %v14138_v21 = vpop.f32.mrf.mxu1 }
 0x388   : > { %v8209_v56 = vadd.f32 %v8208_v7, %v6917_v39  ;;  %v6930_v53 = vmax.f32 %v5906_v55, 0.0  ;;  %v5909_v10 = vadd.f32 %v13262_v13, %v4801_v5  ;;  %v4815_v38 = vmul.f32 %v13220_v15, %v14032_v49  ;;  %v14142_v44 = vpop.f32.mrf.mxu0  ;;  %v10527_v5 = vld [vmem:[%s10776_s30 + $0xc8] sm:$0xff] }
 0x389   : > { %v6932_v28 = vmax.f32 %v5908_v3, 0.0  ;;  %v6931_v27 = vmax.f32 %v5907_v2, 0.0  ;;  %v5922_v0 = vadd.f32 %v13198_v26, %v4814_v41  ;;  %v5924_v34 = vadd.f32 %v13205_v29, %v4816_v54  ;;  %9911 = vmatmul.mubr.msk.f32.gmra.mxu0 %vm377_vm0, %v10526_v58  ;;  %v14149_v31 = vpop.f32.mrf.mxu1 }
 0x38a   : > { %v8003_v63 = vadd.f32 %v8002_v9, %v6930_v53  ;;  %v6933_v60 = vmax.f32 %v5909_v10, 0.0  ;;  %v5923_v14 = vadd.f32 %v13224_v33, %v4815_v38  ;;  %v4817_v49 = vmul.f32 %v13240_v51, %v14038_v16  ;;  %9975 = vmatmul.mubr.msk.f32.gmra.mxu1 %vm377_vm0, %v10526_v58  ;;  %3478 = vmatprep.mubr.f32.mxu0 %v10663_v6  ;;  %v14153_v19 = vpop.f32.mrf.mxu0 }
 0x38b   : > { %v8141_v57 = vadd.f32 %v8140_v18, %v6932_v28  ;;  %v8072_v46 = vadd.f32 %v8071_v1, %v6931_v27  ;;  %v6946_v7 = vmax.f32 %v5922_v0, 0.0  ;;  %v6948_v50 = vmax.f32 %v5924_v34, 0.0  ;;  %3927 = vmatprep.mubr.f32.mxu1 %v10663_v6  ;;  %v14159_v24 = vpop.f32.mrf.mxu1 }
 0x38c   : > { %v8210_v35 = vadd.f32 %v8209_v56, %v6933_v60  ;;  %v6947_v9 = vmax.f32 %v5923_v14, 0.0  ;;  %v5925_v4 = vadd.f32 %v13262_v13, %v4817_v49  ;;  %v4830_v16 = vmul.f32 %v13192_v40, %v14042_v62  ;;  %v14165_v55 = vpop.f32.mrf.mxu0  ;;  %v10528_v60 = vld [vmem:[%s10776_s30 + $0xd0] sm:$0xff] }
 0x38d   : > { %v8004_v43 = vadd.f32 %v8003_v63, %v6946_v7  ;;  %v8142_v39 = vadd.f32 %v8141_v57, %v6948_v50  ;;  %v4832_v18 = vmul.f32 %v13201_v32, %v14049_v20  ;;  %v4831_v1 = vmul.f32 %v13220_v15, %v14053_v37  ;;  %9912 = vmatmul.mubr.msk.f32.gmra.mxu0 %vm377_vm0, %v10527_v5  ;;  %v14172_v54 = vpop.f32.mrf.mxu1 }
 0x38e   : > { %v8073_v3 = vadd.f32 %v8072_v46, %v6947_v9  ;;  %v6949_v2 = vmax.f32 %v5925_v4, 0.0  ;;  %v5938_v41 = vadd.f32 %v13198_v26, %v4830_v16  ;;  %v4833_v62 = vmul.f32 %v13240_v51, %v14059_v59  ;;  %9976 = vmatmul.mubr.msk.f32.gmra.mxu1 %vm377_vm0, %v10527_v5  ;;  %3484 = vmatprep.mubr.f32.mxu0 %v10663_v6  ;;  %v14182_v10 = vpop.f32.mrf.mxu0 }
 0x38f   : > { %v5940_v20 = vadd.f32 %v13205_v29, %v4832_v18  ;;  %v5939_v37 = vadd.f32 %v13224_v33, %v4831_v1  ;;  %v4846_v56 = vmul.f32 %v13192_v40, %v14065_v11  ;;  %v4848_v53 = vmul.f32 %v13201_v32, %v14072_v8  ;;  %3933 = vmatprep.mubr.f32.mxu1 %v10663_v6  ;;  %v14188_v0 = vpop.f32.mrf.mxu1 }
 0x390   : > { %v8211_v59 = vadd.f32 %v8210_v35, %v6949_v2  ;;  %v6962_v38 = vmax.f32 %v5938_v41, 0.0  ;;  %v5941_v28 = vadd.f32 %v13262_v13, %v4833_v62  ;;  %v4847_v27 = vmul.f32 %v13220_v15, %v14082_v45  ;;  %v14192_v8 = vpop.f32.mrf.mxu0  ;;  %v10529_v62 = vld [vmem:[%s10776_s30 + $0xd8] sm:$0xff] }
 0x391   : > { %v6964_v34 = vmax.f32 %v5940_v20, 0.0  ;;  %v6963_v58 = vmax.f32 %v5939_v37, 0.0  ;;  %v5954_v11 = vadd.f32 %v13198_v26, %v4846_v56  ;;  %v5956_v63 = vadd.f32 %v13205_v29, %v4848_v53  ;;  %9913 = vmatmul.mubr.msk.f32.gmra.mxu0 %vm377_vm0, %v10528_v60  ;;  %v14199_v46 = vpop.f32.mrf.mxu1 }
 0x392   : > { %v8005_v14 = vadd.f32 %v8004_v43, %v6962_v38  ;;  %v6965_v49 = vmax.f32 %v5941_v28, 0.0  ;;  %v5955_v57 = vadd.f32 %v13224_v33, %v4847_v27  ;;  %v4849_v45 = vmul.f32 %v13240_v51, %v14088_v52  ;;  %9977 = vmatmul.mubr.msk.f32.gmra.mxu1 %vm377_vm0, %v10528_v60  ;;  %3490 = vmatprep.mubr.f32.mxu0 %v10663_v6  ;;  %v14203_v4 = vpop.f32.mrf.mxu0 }
 0x393   : > { %v8143_v7 = vadd.f32 %v8142_v39, %v6964_v34  ;;  %v8074_v50 = vadd.f32 %v8073_v3, %v6963_v58  ;;  %v6978_v35 = vmax.f32 %v5954_v11, 0.0  ;;  %v6980_v9 = vmax.f32 %v5956_v63, 0.0  ;;  %3939 = vmatprep.mubr.f32.mxu1 %v10663_v6  ;;  %v14209_v1 = vpop.f32.mrf.mxu1 }
 0x394   : > { %v8212_v16 = vadd.f32 %v8211_v59, %v6965_v49  ;;  %v6979_v43 = vmax.f32 %v5955_v57, 0.0  ;;  %v5957_v18 = vadd.f32 %v13262_v13, %v4849_v45  ;;  %v4862_v52 = vmul.f32 %v13192_v40, %v14092_v61  ;;  %v14215_v41 = vpop.f32.mrf.mxu0  ;;  %v10530_v49 = vld [vmem:[%s10776_s30 + $0xe0] sm:$0xff] }
 0x395   : > { %v8006_v5 = vadd.f32 %v8005_v14, %v6978_v35  ;;  %v8144_v2 = vadd.f32 %v8143_v7, %v6980_v9  ;;  %v4864_v39 = vmul.f32 %v13201_v32, %v14099_v17  ;;  %v4863_v3 = vmul.f32 %v13220_v15, %v14103_v48  ;;  %9914 = vmatmul.mubr.msk.f32.gmra.mxu0 %vm377_vm0, %v10529_v62  ;;  %v14222_v53 = vpop.f32.mrf.mxu1 }
 0x396   : > { %v8075_v20 = vadd.f32 %v8074_v50, %v6979_v43  ;;  %v6981_v37 = vmax.f32 %v5957_v18, 0.0  ;;  %v5970_v56 = vadd.f32 %v13198_v26, %v4862_v52  ;;  %v4865_v61 = vmul.f32 %v13240_v51, %v14109_v42  ;;  %9978 = vmatmul.mubr.msk.f32.gmra.mxu1 %vm377_vm0, %v10529_v62  ;;  %3496 = vmatprep.mubr.f32.mxu0 %v10663_v6  ;;  %v14232_v28 = vpop.f32.mrf.mxu0 }
 0x397   : > { %v5972_v17 = vadd.f32 %v13205_v29, %v4864_v39  ;;  %v5971_v48 = vadd.f32 %v13224_v33, %v4863_v3  ;;  %v4878_v59 = vmul.f32 %v13192_v40, %v14115_v22  ;;  %v4880_v38 = vmul.f32 %v13201_v32, %v14122_v12  ;;  %3945 = vmatprep.mubr.f32.mxu1 %v10663_v6  ;;  %v14238_v11 = vpop.f32.mrf.mxu1 }
 0x398   : > { %v8213_v42 = vadd.f32 %v8212_v16, %v6981_v37  ;;  %v6994_v27 = vmax.f32 %v5970_v56, 0.0  ;;  %v5973_v34 = vadd.f32 %v13262_v13, %v4865_v61  ;;  %v4879_v58 = vmul.f32 %v13220_v15, %v14132_v23  ;;  %v14242_v12 = vpop.f32.mrf.mxu0  ;;  %v10531_v61 = vld [vmem:[%s10776_s30 + $0xe8] sm:$0xff] }
 0x399   : > { %v6996_v63 = vmax.f32 %v5972_v17, 0.0  ;;  %v6995_v60 = vmax.f32 %v5971_v48, 0.0  ;;  %v5986_v22 = vadd.f32 %v13198_v26, %v4878_v59  ;;  %v5988_v14 = vadd.f32 %v13205_v29, %v4880_v38  ;;  %9915 = vmatmul.mubr.msk.f32.gmra.mxu0 %vm377_vm0, %v10530_v49  ;;  %v14249_v50 = vpop.f32.mrf.mxu1 }
 0x39a   : > { %v8007_v57 = vadd.f32 %v8006_v5, %v6994_v27  ;;  %v6997_v45 = vmax.f32 %v5973_v34, 0.0  ;;  %v5987_v7 = vadd.f32 %v13224_v33, %v4879_v58  ;;  %v4881_v23 = vmul.f32 %v13240_v51, %v14138_v21  ;;  %9979 = vmatmul.mubr.msk.f32.gmra.mxu1 %vm377_vm0, %v10530_v49  ;;  %3502 = vmatprep.mubr.f32.mxu0 %v10663_v6  ;;  %v14253_v18 = vpop.f32.mrf.mxu0 }
 0x39b   : > { %v8145_v35 = vadd.f32 %v8144_v2, %v6996_v63  ;;  %v8076_v9 = vadd.f32 %v8075_v20, %v6995_v60  ;;  %v7010_v16 = vmax.f32 %v5986_v22, 0.0  ;;  %v7012_v43 = vmax.f32 %v5988_v14, 0.0  ;;  %3951 = vmatprep.mubr.f32.mxu1 %v10663_v6  ;;  %v14259_v3 = vpop.f32.mrf.mxu1 }
 0x39c   : > { %v8214_v52 = vadd.f32 %v8213_v42, %v6997_v45  ;;  %v7011_v5 = vmax.f32 %v5987_v7, 0.0  ;;  %v5989_v39 = vadd.f32 %v13262_v13, %v4881_v23  ;;  %v4894_v21 = vmul.f32 %v13192_v40, %v14142_v44  ;;  %v14265_v56 = vpop.f32.mrf.mxu0  ;;  %v10532_v45 = vld [vmem:[%s10776_s30 + $0xf0] sm:$0xff] }
 0x39d   : > { %v8008_v62 = vadd.f32 %v8007_v57, %v7010_v16  ;;  %v8146_v37 = vadd.f32 %v8145_v35, %v7012_v43  ;;  %v4896_v2 = vmul.f32 %v13201_v32, %v14149_v31  ;;  %v4895_v20 = vmul.f32 %v13220_v15, %v14153_v19  ;;  %9916 = vmatmul.mubr.msk.f32.gmra.mxu0 %vm377_vm0, %v10531_v61  ;;  %v14272_v38 = vpop.f32.mrf.mxu1 }
 0x39e   : > { %v8077_v17 = vadd.f32 %v8076_v9, %v7011_v5  ;;  %v7013_v48 = vmax.f32 %v5989_v39, 0.0  ;;  %v6002_v59 = vadd.f32 %v13198_v26, %v4894_v21  ;;  %v4897_v44 = vmul.f32 %v13240_v51, %v14159_v24  ;;  %9980 = vmatmul.mubr.msk.f32.gmra.mxu1 %vm377_vm0, %v10531_v61  ;;  %3508 = vmatprep.mubr.f32.mxu0 %v10663_v6  ;;  %v14282_v34 = vpop.f32.mrf.mxu0 }
 0x39f   : > { %v6004_v31 = vadd.f32 %v13205_v29, %v4896_v2  ;;  %v6003_v19 = vadd.f32 %v13224_v33, %v4895_v20  ;;  %v4910_v42 = vmul.f32 %v13192_v40, %v14165_v55  ;;  %v4912_v27 = vmul.f32 %v13201_v32, %v14172_v54  ;;  %3957 = vmatprep.mubr.f32.mxu1 %v10663_v6  ;;  %v14288_v22 = vpop.f32.mrf.mxu1 }
 0x3a0   : > { %v8215_v24 = vadd.f32 %v8214_v52, %v7013_v48  ;;  %v7026_v58 = vmax.f32 %v6002_v59, 0.0  ;;  %v6005_v63 = vadd.f32 %v13262_v13, %v4897_v44  ;;  %v4911_v60 = vmul.f32 %v13220_v15, %v14182_v10  ;;  %v14292_v54 = vpop.f32.mrf.mxu0  ;;  %v10533_v44 = vld [vmem:[%s10776_s30 + $0xf8] sm:$0xff] }
 0x3a1   : > { %v7028_v14 = vmax.f32 %v6004_v31, 0.0  ;;  %v7027_v49 = vmax.f32 %v6003_v19, 0.0  ;;  %v6018_v55 = vadd.f32 %v13198_v26, %v4910_v42  ;;  %v6020_v57 = vadd.f32 %v13205_v29, %v4912_v27  ;;  %9917 = vmatmul.mubr.msk.f32.gmra.mxu0 %vm377_vm0, %v10532_v45  ;;  %v14299_v9 = vpop.f32.mrf.mxu1 }
 0x3a2   : > { %v8009_v7 = vadd.f32 %v8008_v62, %v7026_v58  ;;  %v7029_v23 = vmax.f32 %v6005_v63, 0.0  ;;  %v6019_v35 = vadd.f32 %v13224_v33, %v4911_v60  ;;  %v4913_v10 = vmul.f32 %v13240_v51, %v14188_v0  ;;  %9981 = vmatmul.mubr.msk.f32.gmra.mxu1 %vm377_vm0, %v10532_v45  ;;  %3514 = vmatprep.mubr.f32.mxu0 %v10663_v6  ;;  %v14303_v39 = vpop.f32.mrf.mxu0 }
 0x3a3   : > { %v8147_v16 = vadd.f32 %v8146_v37, %v7028_v14  ;;  %v8078_v43 = vadd.f32 %v8077_v17, %v7027_v49  ;;  %v7042_v52 = vmax.f32 %v6018_v55, 0.0  ;;  %v7044_v5 = vmax.f32 %v6020_v57, 0.0  ;;  %3963 = vmatprep.mubr.f32.mxu1 %v10663_v6  ;;  %v14309_v20 = vpop.f32.mrf.mxu1 }
 0x3a4   : > { %v8216_v21 = vadd.f32 %v8215_v24, %v7029_v23  ;;  %v7043_v62 = vmax.f32 %v6019_v35, 0.0  ;;  %v6021_v2 = vadd.f32 %v13262_v13, %v4913_v10  ;;  %v4926_v0 = vmul.f32 %v13192_v40, %v14192_v8  ;;  %v14315_v59 = vpop.f32.mrf.mxu0  ;;  %v10534_v23 = vld [vmem:[%s10776_s30 + $0x100] sm:$0xff] }
 0x3a5   : > { %v8010_v61 = vadd.f32 %v8009_v7, %v7042_v52  ;;  %v8148_v48 = vadd.f32 %v8147_v16, %v7044_v5  ;;  %v4928_v37 = vmul.f32 %v13201_v32, %v14199_v46  ;;  %v4927_v17 = vmul.f32 %v13220_v15, %v14203_v4  ;;  %9918 = vmatmul.mubr.msk.f32.gmra.mxu0 %vm377_vm0, %v10533_v44  ;;  %v14322_v27 = vpop.f32.mrf.mxu1 }
 0x3a6   : > { %v8079_v31 = vadd.f32 %v8078_v43, %v7043_v62  ;;  %v7045_v19 = vmax.f32 %v6021_v2, 0.0  ;;  %v6034_v42 = vadd.f32 %v13198_v26, %v4926_v0  ;;  %v4929_v8 = vmul.f32 %v13240_v51, %v14209_v1  ;;  %9982 = vmatmul.mubr.msk.f32.gmra.mxu1 %vm377_vm0, %v10533_v44  ;;  %3520 = vmatprep.mubr.f32.mxu0 %v10663_v6  ;;  %v14332_v63 = vpop.f32.mrf.mxu0 }
 0x3a7   : > { %v6036_v46 = vadd.f32 %v13205_v29, %v4928_v37  ;;  %v6035_v4 = vadd.f32 %v13224_v33, %v4927_v17  ;;  %v4942_v24 = vmul.f32 %v13192_v40, %v14215_v41  ;;  %v4944_v58 = vmul.f32 %v13201_v32, %v14222_v53  ;;  %3969 = vmatprep.mubr.f32.mxu1 %v10663_v6  ;;  %v14338_v55 = vpop.f32.mrf.mxu1 }
 0x3a8   : > { %v8217_v1 = vadd.f32 %v8216_v21, %v7045_v19  ;;  %v7058_v60 = vmax.f32 %v6034_v42, 0.0  ;;  %v6037_v14 = vadd.f32 %v13262_v13, %v4929_v8  ;;  %v4943_v49 = vmul.f32 %v13220_v15, %v14232_v28  ;;  %v14342_v53 = vpop.f32.mrf.mxu0  ;;  %v10535_v8 = vld [vmem:[%s10776_s30 + $0x108] sm:$0xff] }
 0x3a9   : > { %v7060_v57 = vmax.f32 %v6036_v46, 0.0  ;;  %v7059_v45 = vmax.f32 %v6035_v4, 0.0  ;;  %v6050_v41 = vadd.f32 %v13198_v26, %v4942_v24  ;;  %v6052_v7 = vadd.f32 %v13205_v29, %v4944_v58  ;;  %9919 = vmatmul.mubr.msk.f32.gmra.mxu0 %vm377_vm0, %v10534_v23  ;;  %v14349_v43 = vpop.f32.mrf.mxu1 }
 0x3aa   : > { %v8011_v35 = vadd.f32 %v8010_v61, %v7058_v60  ;;  %v7061_v10 = vmax.f32 %v6037_v14, 0.0  ;;  %v6051_v16 = vadd.f32 %v13224_v33, %v4943_v49  ;;  %v4945_v28 = vmul.f32 %v13240_v51, %v14238_v11  ;;  %9983 = vmatmul.mubr.msk.f32.gmra.mxu1 %vm377_vm0, %v10534_v23  ;;  %3526 = vmatprep.mubr.f32.mxu0 %v10663_v6  ;;  %v14353_v2 = vpop.f32.mrf.mxu0 }
 0x3ab   : > { %v8149_v52 = vadd.f32 %v8148_v48, %v7060_v57  ;;  %v8080_v5 = vadd.f32 %v8079_v31, %v7059_v45  ;;  %v7074_v21 = vmax.f32 %v6050_v41, 0.0  ;;  %v7076_v62 = vmax.f32 %v6052_v7, 0.0  ;;  %3975 = vmatprep.mubr.f32.mxu1 %v10663_v6  ;;  %v14359_v17 = vpop.f32.mrf.mxu1 }
 0x3ac   : > { %v8218_v0 = vadd.f32 %v8217_v1, %v7061_v10  ;;  %v7075_v61 = vmax.f32 %v6051_v16, 0.0  ;;  %v6053_v37 = vadd.f32 %v13262_v13, %v4945_v28  ;;  %v4958_v11 = vmul.f32 %v13192_v40, %v14242_v12  ;;  %v14365_v42 = vpop.f32.mrf.mxu0  ;;  %v10536_v10 = vld [vmem:[%s10776_s30 + $0x110] sm:$0xff] }
 0x3ad   : > { %v8012_v44 = vadd.f32 %v8011_v35, %v7074_v21  ;;  %v8150_v19 = vadd.f32 %v8149_v52, %v7076_v62  ;;  %v4960_v48 = vmul.f32 %v13201_v32, %v14249_v50  ;;  %v4959_v31 = vmul.f32 %v13220_v15, %v14253_v18  ;;  %9920 = vmatmul.mubr.msk.f32.gmra.mxu0 %vm377_vm0, %v10535_v8  ;;  %v14372_v58 = vpop.f32.mrf.mxu1 }
 0x3ae   : > { %v8081_v46 = vadd.f32 %v8080_v5, %v7075_v61  ;;  %v7077_v4 = vmax.f32 %v6053_v37, 0.0  ;;  %v6066_v24 = vadd.f32 %v13198_v26, %v4958_v11  ;;  %v4961_v12 = vmul.f32 %v13240_v51, %v14259_v3  ;;  %9984 = vmatmul.mubr.msk.f32.gmra.mxu1 %vm377_vm0, %v10535_v8  ;;  %3532 = vmatprep.mubr.f32.mxu0 %v10663_v6  ;;  %v14382_v14 = vpop.f32.mrf.mxu0 }
 0x3af   : > { %v6068_v50 = vadd.f32 %v13205_v29, %v4960_v48  ;;  %v6067_v18 = vadd.f32 %v13224_v33, %v4959_v31  ;;  %v4974_v1 = vmul.f32 %v13192_v40, %v14265_v56  ;;  %v4976_v60 = vmul.f32 %v13201_v32, %v14272_v38  ;;  %3981 = vmatprep.mubr.f32.mxu1 %v10663_v6  ;;  %v14388_v41 = vpop.f32.mrf.mxu1 }
 0x3b0   : > { %v8219_v3 = vadd.f32 %v8218_v0, %v7077_v4  ;;  %v7090_v49 = vmax.f32 %v6066_v24, 0.0  ;;  %v6069_v57 = vadd.f32 %v13262_v13, %v4961_v12  ;;  %v4975_v45 = vmul.f32 %v13220_v15, %v14282_v34  ;;  %v14392_v38 = vpop.f32.mrf.mxu0  ;;  %v10537_v12 = vld [vmem:[%s10776_s30 + $0x118] sm:$0xff] }
 0x3b1   : > { %v7092_v7 = vmax.f32 %v6068_v50, 0.0  ;;  %v7091_v23 = vmax.f32 %v6067_v18, 0.0  ;;  %v6082_v56 = vadd.f32 %v13198_v26, %v4974_v1  ;;  %v6084_v35 = vadd.f32 %v13205_v29, %v4976_v60  ;;  %9921 = vmatmul.mubr.msk.f32.gmra.mxu0 %vm377_vm0, %v10536_v10  ;;  %v14399_v5 = vpop.f32.mrf.mxu1 }
 0x3b2   : > { %v8013_v16 = vadd.f32 %v8012_v44, %v7090_v49  ;;  %v7093_v28 = vmax.f32 %v6069_v57, 0.0  ;;  %v6083_v52 = vadd.f32 %v13224_v33, %v4975_v45  ;;  %v4977_v34 = vmul.f32 %v13240_v51, %v14288_v22  ;;  %9985 = vmatmul.mubr.msk.f32.gmra.mxu1 %vm377_vm0, %v10536_v10  ;;  %3538 = vmatprep.mubr.f32.mxu0 %v10663_v6  ;;  %v14403_v37 = vpop.f32.mrf.mxu0 }
 0x3b3   : > { %v8151_v21 = vadd.f32 %v8150_v19, %v7092_v7  ;;  %v8082_v62 = vadd.f32 %v8081_v46, %v7091_v23  ;;  %v7106_v0 = vmax.f32 %v6082_v56, 0.0  ;;  %v7108_v61 = vmax.f32 %v6084_v35, 0.0  ;;  %3987 = vmatprep.mubr.f32.mxu1 %v10663_v6  ;;  %v14409_v31 = vpop.f32.mrf.mxu1 }
 0x3b4   : > { %v8220_v11 = vadd.f32 %v8219_v3, %v7093_v28  ;;  %v7107_v44 = vmax.f32 %v6083_v52, 0.0  ;;  %v6085_v48 = vadd.f32 %v13262_v13, %v4977_v34  ;;  %v4990_v22 = vmul.f32 %v13192_v40, %v14292_v54  ;;  %v14415_v24 = vpop.f32.mrf.mxu0  ;;  %v10538_v28 = vld [vmem:[%s10776_s30 + $0x120] sm:$0xff] }
 0x3b5   : > { %v8014_v8 = vadd.f32 %v8013_v16, %v7106_v0  ;;  %v8152_v4 = vadd.f32 %v8151_v21, %v7108_v61  ;;  %v4992_v19 = vmul.f32 %v13201_v32, %v14299_v9  ;;  %v4991_v46 = vmul.f32 %v13220_v15, %v14303_v39  ;;  %9922 = vmatmul.mubr.msk.f32.gmra.mxu0 %vm377_vm0, %v10537_v12  ;;  %v14422_v60 = vpop.f32.mrf.mxu1 }
 0x3b6   : > { %v8083_v50 = vadd.f32 %v8082_v62, %v7107_v44  ;;  %v7109_v18 = vmax.f32 %v6085_v48, 0.0  ;;  %v6098_v1 = vadd.f32 %v13198_v26, %v4990_v22  ;;  %v4993_v54 = vmul.f32 %v13240_v51, %v14309_v20  ;;  %9986 = vmatmul.mubr.msk.f32.gmra.mxu1 %vm377_vm0, %v10537_v12  ;;  %3544 = vmatprep.mubr.f32.mxu0 %v10663_v6  ;;  %v14432_v57 = vpop.f32.mrf.mxu0 }
 0x3b7   : > { %v6100_v9 = vadd.f32 %v13205_v29, %v4992_v19  ;;  %v6099_v39 = vadd.f32 %v13224_v33, %v4991_v46  ;;  %v5006_v3 = vmul.f32 %v13192_v40, %v14315_v59  ;;  %v5008_v49 = vmul.f32 %v13201_v32, %v14322_v27  ;;  %3993 = vmatprep.mubr.f32.mxu1 %v10663_v6  ;;  %v14438_v56 = vpop.f32.mrf.mxu1 }
 0x3b8   : > { %v8221_v20 = vadd.f32 %v8220_v11, %v7109_v18  ;;  %v7122_v45 = vmax.f32 %v6098_v1, 0.0  ;;  %v6101_v7 = vadd.f32 %v13262_v13, %v4993_v54  ;;  %v5007_v23 = vmul.f32 %v13220_v15, %v14332_v63  ;;  %v14442_v27 = vpop.f32.mrf.mxu0  ;;  %v10539_v54 = vld [vmem:[%s10776_s30 + $0x128] sm:$0xff] }
 0x3b9   : > { %v7124_v35 = vmax.f32 %v6100_v9, 0.0  ;;  %v7123_v10 = vmax.f32 %v6099_v39, 0.0  ;;  %v6114_v59 = vadd.f32 %v13198_v26, %v5006_v3  ;;  %v6116_v16 = vadd.f32 %v13205_v29, %v5008_v49  ;;  %9923 = vmatmul.mubr.msk.f32.gmra.mxu0 %vm377_vm0, %v10538_v28  ;;  %v14449_v62 = vpop.f32.mrf.mxu1 }
 0x3ba   : > { %v8015_v52 = vadd.f32 %v8014_v8, %v7122_v45  ;;  %v7125_v34 = vmax.f32 %v6101_v7, 0.0  ;;  %v6115_v21 = vadd.f32 %v13224_v33, %v5007_v23  ;;  %v5009_v63 = vmul.f32 %v13240_v51, %v14338_v55  ;;  %9987 = vmatmul.mubr.msk.f32.gmra.mxu1 %vm377_vm0, %v10538_v28  ;;  %3550 = vmatprep.mubr.f32.mxu0 %v10663_v6  ;;  %v14453_v48 = vpop.f32.mrf.mxu0 }
 0x3bb   : > { %v8153_v0 = vadd.f32 %v8152_v4, %v7124_v35  ;;  %v8084_v61 = vadd.f32 %v8083_v50, %v7123_v10  ;;  %v7138_v11 = vmax.f32 %v6114_v59, 0.0  ;;  %v7140_v44 = vmax.f32 %v6116_v16, 0.0  ;;  %3999 = vmatprep.mubr.f32.mxu1 %v10663_v6  ;;  %v14459_v46 = vpop.f32.mrf.mxu1 }
 0x3bc   : > { %v8222_v22 = vadd.f32 %v8221_v20, %v7125_v34  ;;  %v7139_v8 = vmax.f32 %v6115_v21, 0.0  ;;  %v6117_v19 = vadd.f32 %v13262_v13, %v5009_v63  ;;  %v5022_v55 = vmul.f32 %v13192_v40, %v14342_v53  ;;  %v14465_v1 = vpop.f32.mrf.mxu0  ;;  %v10540_v34 = vld [vmem:[%s10776_s30 + $0x130] sm:$0xff] }
 0x3bd   : > { %v8016_v12 = vadd.f32 %v8015_v52, %v7138_v11  ;;  %v8154_v18 = vadd.f32 %v8153_v0, %v7140_v44  ;;  %v5024_v4 = vmul.f32 %v13201_v32, %v14349_v43  ;;  %v5023_v50 = vmul.f32 %v13220_v15, %v14353_v2  ;;  %9924 = vmatmul.mubr.msk.f32.gmra.mxu0 %vm377_vm0, %v10539_v54  ;;  %v14472_v49 = vpop.f32.mrf.mxu1 }
 0x3be   : > { %v8085_v9 = vadd.f32 %v8084_v61, %v7139_v8  ;;  %v7141_v39 = vmax.f32 %v6117_v19, 0.0  ;;  %v6130_v3 = vadd.f32 %v13198_v26, %v5022_v55  ;;  %v5025_v53 = vmul.f32 %v13240_v51, %v14359_v17  ;;  %9988 = vmatmul.mubr.msk.f32.gmra.mxu1 %vm377_vm0, %v10539_v54  ;;  %3556 = vmatprep.mubr.f32.mxu0 %v10663_v6  ;;  %v14482_v7 = vpop.f32.mrf.mxu0 }
 0x3bf   : > { %v6132_v43 = vadd.f32 %v13205_v29, %v5024_v4  ;;  %v6131_v2 = vadd.f32 %v13224_v33, %v5023_v50  ;;  %v5038_v20 = vmul.f32 %v13192_v40, %v14365_v42  ;;  %v5040_v45 = vmul.f32 %v13201_v32, %v14372_v58  ;;  %4005 = vmatprep.mubr.f32.mxu1 %v10663_v6  ;;  %v14488_v59 = vpop.f32.mrf.mxu1 }
 0x3c0   : > { %v8223_v17 = vadd.f32 %v8222_v22, %v7141_v39  ;;  %v7154_v23 = vmax.f32 %v6130_v3, 0.0  ;;  %v6133_v35 = vadd.f32 %v13262_v13, %v5025_v53  ;;  %v5039_v10 = vmul.f32 %v13220_v15, %v14382_v14  ;;  %v14492_v58 = vpop.f32.mrf.mxu0  ;;  %v10541_v53 = vld [vmem:[%s10776_s30 + $0x138] sm:$0xff] }
 0x3c1   : > { %v7156_v16 = vmax.f32 %v6132_v43, 0.0  ;;  %v7155_v28 = vmax.f32 %v6131_v2, 0.0  ;;  %v6146_v42 = vadd.f32 %v13198_v26, %v5038_v20  ;;  %v6148_v52 = vadd.f32 %v13205_v29, %v5040_v45  ;;  %9925 = vmatmul.mubr.msk.f32.gmra.mxu0 %vm377_vm0, %v10540_v34  ;;  %v14499_v61 = vpop.f32.mrf.mxu1 }
 0x3c2   : > { %v8017_v21 = vadd.f32 %v8016_v12, %v7154_v23  ;;  %v7157_v63 = vmax.f32 %v6133_v35, 0.0  ;;  %v6147_v0 = vadd.f32 %v13224_v33, %v5039_v10  ;;  %v5041_v14 = vmul.f32 %v13240_v51, %v14388_v41  ;;  %9989 = vmatmul.mubr.msk.f32.gmra.mxu1 %vm377_vm0, %v10540_v34  ;;  %3562 = vmatprep.mubr.f32.mxu0 %v10663_v6  ;;  %v14503_v19 = vpop.f32.mrf.mxu0 }
 0x3c3   : > { %v8155_v11 = vadd.f32 %v8154_v18, %v7156_v16  ;;  %v8086_v44 = vadd.f32 %v8085_v9, %v7155_v28  ;;  %v7170_v22 = vmax.f32 %v6146_v42, 0.0  ;;  %v7172_v8 = vmax.f32 %v6148_v52, 0.0  ;;  %4011 = vmatprep.mubr.f32.mxu1 %v10663_v6  ;;  %v14509_v50 = vpop.f32.mrf.mxu1 }
 0x3c4   : > { %v8224_v55 = vadd.f32 %v8223_v17, %v7157_v63  ;;  %v7171_v12 = vmax.f32 %v6147_v0, 0.0  ;;  %v6149_v4 = vadd.f32 %v13262_v13, %v5041_v14  ;;  %v5054_v41 = vmul.f32 %v13192_v40, %v14392_v38  ;;  %v10542_v63 = vld [vmem:[%s10776_s30 + $0x140] sm:$0xff] }
 0x3c5   : > { %v8018_v54 = vadd.f32 %v8017_v21, %v7170_v22  ;;  %v8156_v39 = vadd.f32 %v8155_v11, %v7172_v8  ;;  %v5056_v18 = vmul.f32 %v13201_v32, %v14399_v5  ;;  %v5055_v9 = vmul.f32 %v13220_v15, %v14403_v37  ;;  %v14515_v3 = vpop.f32.mrf.mxu0  ;;  %9926 = vmatmul.mubr.msk.f32.gmra.mxu0 %vm377_vm0, %v10541_v53 }
 0x3c6   : > { %v8087_v43 = vadd.f32 %v8086_v44, %v7171_v12  ;;  %v7173_v2 = vmax.f32 %v6149_v4, 0.0  ;;  %v6162_v20 = vadd.f32 %v13198_v26, %v5054_v41  ;;  %v5057_v38 = vmul.f32 %v13240_v51, %v14409_v31  ;;  %v14522_v45 = vpop.f32.mrf.mxu1  ;;  %9990 = vmatmul.mubr.msk.f32.gmra.mxu1 %vm377_vm0, %v10541_v53  ;;  %3568 = vmatprep.mubr.f32.mxu0 %v10663_v6 }
 0x3c7   : > { %v6164_v5 = vadd.f32 %v13205_v29, %v5056_v18  ;;  %v6163_v37 = vadd.f32 %v13224_v33, %v5055_v9  ;;  %v5070_v17 = vmul.f32 %v13192_v40, %v14415_v24  ;;  %v5072_v23 = vmul.f32 %v13201_v32, %v14422_v60  ;;  %v14532_v35 = vpop.f32.mrf.mxu0  ;;  %4017 = vmatprep.mubr.f32.mxu1 %v10663_v6 }
 0x3c8   : > { %v8225_v31 = vadd.f32 %v8224_v55, %v7173_v2  ;;  %v7186_v10 = vmax.f32 %v6162_v20, 0.0  ;;  %v6165_v16 = vadd.f32 %v13262_v13, %v5057_v38  ;;  %v5071_v28 = vmul.f32 %v13220_v15, %v14432_v57  ;;  %v14538_v42 = vpop.f32.mrf.mxu1  ;;  %v10543_v38 = vld [vmem:[%s10776_s30 + $0x148] sm:$0xff] }
 0x3c9   : > { %v7188_v52 = vmax.f32 %v6164_v5, 0.0  ;;  %v7187_v34 = vmax.f32 %v6163_v37, 0.0  ;;  %v6178_v24 = vadd.f32 %v13198_v26, %v5070_v17  ;;  %v6180_v21 = vadd.f32 %v13205_v29, %v5072_v23  ;;  %v14542_v60 = vpop.f32.mrf.mxu0  ;;  %9927 = vmatmul.mubr.msk.f32.gmra.mxu0 %vm377_vm0, %v10542_v63 }
 0x3ca   : > { %v8019_v0 = vadd.f32 %v8018_v54, %v7186_v10  ;;  %v7189_v14 = vmax.f32 %v6165_v16, 0.0  ;;  %v6179_v11 = vadd.f32 %v13224_v33, %v5071_v28  ;;  %v5073_v57 = vmul.f32 %v13240_v51, %v14438_v56  ;;  %v14549_v44 = vpop.f32.mrf.mxu1  ;;  %9991 = vmatmul.mubr.msk.f32.gmra.mxu1 %vm377_vm0, %v10542_v63  ;;  %3574 = vmatprep.mubr.f32.mxu0 %v10663_v6 }
 0x3cb   : > { %v8157_v22 = vadd.f32 %v8156_v39, %v7188_v52  ;;  %v8088_v8 = vadd.f32 %v8087_v43, %v7187_v34  ;;  %v7202_v55 = vmax.f32 %v6178_v24, 0.0  ;;  %v7204_v12 = vmax.f32 %v6180_v21, 0.0  ;;  %v14553_v4 = vpop.f32.mrf.mxu0  ;;  %4023 = vmatprep.mubr.f32.mxu1 %v10663_v6 }
 0x3cc   : > { %v8226_v41 = vadd.f32 %v8225_v31, %v7189_v14  ;;  %v7203_v54 = vmax.f32 %v6179_v11, 0.0  ;;  %v6181_v18 = vadd.f32 %v13262_v13, %v5073_v57  ;;  %v5086_v56 = vmul.f32 %v13192_v40, %v14442_v27  ;;  %v14559_v9 = vpop.f32.mrf.mxu1  ;;  %v10544_v14 = vld [vmem:[%s10776_s30 + $0x150] sm:$0xff] }
 0x3cd   : > { %v8020_v53 = vadd.f32 %v8019_v0, %v7202_v55  ;;  %v8158_v2 = vadd.f32 %v8157_v22, %v7204_v12  ;;  %v5088_v39 = vmul.f32 %v13201_v32, %v14449_v62  ;;  %v5087_v43 = vmul.f32 %v13220_v15, %v14453_v48  ;;  %v14565_v20 = vpop.f32.mrf.mxu0  ;;  %9928 = vmatmul.mubr.msk.f32.gmra.mxu0 %vm377_vm0, %v10543_v38 }
 0x3ce   : > { %v8089_v5 = vadd.f32 %v8088_v8, %v7203_v54  ;;  %v7205_v37 = vmax.f32 %v6181_v18, 0.0  ;;  %v6194_v17 = vadd.f32 %v13198_v26, %v5086_v56  ;;  %v5089_v27 = vmul.f32 %v13240_v51, %v14459_v46  ;;  %v14572_v23 = vpop.f32.mrf.mxu1  ;;  %9992 = vmatmul.mubr.msk.f32.gmra.mxu1 %vm377_vm0, %v10543_v38  ;;  %3580 = vmatprep.mubr.f32.mxu0 %v10663_v6 }
 0x3cf   : > { %v6196_v62 = vadd.f32 %v13205_v29, %v5088_v39  ;;  %v6195_v48 = vadd.f32 %v13224_v33, %v5087_v43  ;;  %v5102_v31 = vmul.f32 %v13192_v40, %v14465_v1  ;;  %v5104_v10 = vmul.f32 %v13201_v32, %v14472_v49  ;;  %v14582_v16 = vpop.f32.mrf.mxu0  ;;  %4029 = vmatprep.mubr.f32.mxu1 %v10663_v6 }
 0x3d0   : > { %v8227_v46 = vadd.f32 %v8226_v41, %v7205_v37  ;;  %v7218_v28 = vmax.f32 %v6194_v17, 0.0  ;;  %v6197_v52 = vadd.f32 %v13262_v13, %v5089_v27  ;;  %v5103_v34 = vmul.f32 %v13220_v15, %v14482_v7  ;;  %v14588_v24 = vpop.f32.mrf.mxu1  ;;  %v10545_v27 = vld [vmem:[%s10776_s30 + $0x158] sm:$0xff] }
 0x3d1   : > { %v7220_v21 = vmax.f32 %v6196_v62, 0.0  ;;  %v7219_v63 = vmax.f32 %v6195_v48, 0.0  ;;  %v6210_v1 = vadd.f32 %v13198_v26, %v5102_v31  ;;  %v6212_v0 = vadd.f32 %v13205_v29, %v5104_v10  ;;  %v14592_v49 = vpop.f32.mrf.mxu0  ;;  %9929 = vmatmul.mubr.msk.f32.gmra.mxu0 %vm377_vm0, %v10544_v14 }
 0x3d2   : > { %v8021_v11 = vadd.f32 %v8020_v53, %v7218_v28  ;;  %v7221_v57 = vmax.f32 %v6197_v52, 0.0  ;;  %v6211_v22 = vadd.f32 %v13224_v33, %v5103_v34  ;;  %v5105_v7 = vmul.f32 %v13240_v51, %v14488_v59  ;;  %v14599_v8 = vpop.f32.mrf.mxu1  ;;  %9993 = vmatmul.mubr.msk.f32.gmra.mxu1 %vm377_vm0, %v10544_v14  ;;  %3586 = vmatprep.mubr.f32.mxu0 %v10663_v6 }
 0x3d3   : > { %v8159_v55 = vadd.f32 %v8158_v2, %v7220_v21  ;;  %v8090_v12 = vadd.f32 %v8089_v5, %v7219_v63  ;;  %v7234_v41 = vmax.f32 %v6210_v1, 0.0  ;;  %v7236_v54 = vmax.f32 %v6212_v0, 0.0  ;;  %v14603_v18 = vpop.f32.mrf.mxu0  ;;  %4035 = vmatprep.mubr.f32.mxu1 %v10663_v6 }
 0x3d4   : > { %v8228_v56 = vadd.f32 %v8227_v46, %v7221_v57  ;;  %v7235_v53 = vmax.f32 %v6211_v22, 0.0  ;;  %v6213_v39 = vadd.f32 %v13262_v13, %v5105_v7  ;;  %v5118_v59 = vmul.f32 %v13192_v40, %v14492_v58  ;;  %v14609_v43 = vpop.f32.mrf.mxu1  ;;  %v10546_v57 = vld [vmem:[%s10776_s30 + $0x160] sm:$0xff] }
 0x3d5   : > { %v8022_v38 = vadd.f32 %v8021_v11, %v7234_v41  ;;  %v8160_v37 = vadd.f32 %v8159_v55, %v7236_v54  ;;  %v5120_v2 = vmul.f32 %v13201_v32, %v14499_v61  ;;  %v5119_v5 = vmul.f32 %v13220_v15, %v14503_v19  ;;  %v14615_v17 = vpop.f32.mrf.mxu0  ;;  %9930 = vmatmul.mubr.msk.f32.gmra.mxu0 %vm377_vm0, %v10545_v27 }
 0x3d6   : > { %v8091_v62 = vadd.f32 %v8090_v12, %v7235_v53  ;;  %v7237_v48 = vmax.f32 %v6213_v39, 0.0  ;;  %v6226_v31 = vadd.f32 %v13198_v26, %v5118_v59  ;;  %v5121_v58 = vmul.f32 %v13240_v51, %v14509_v50  ;;  %v14622_v10 = vpop.f32.mrf.mxu1  ;;  %9994 = vmatmul.mubr.msk.f32.gmra.mxu1 %vm377_vm0, %v10545_v27  ;;  %3592 = vmatprep.mubr.f32.mxu0 %v10663_v6 }
 0x3d7   : > { %v6228_v61 = vadd.f32 %v13205_v29, %v5120_v2  ;;  %v6227_v19 = vadd.f32 %v13224_v33, %v5119_v5  ;;  %v5134_v46 = vmul.f32 %v13192_v40, %v14515_v3  ;;  %v5136_v28 = vmul.f32 %v13201_v32, %v14522_v45  ;;  %v14632_v52 = vpop.f32.mrf.mxu0  ;;  %4041 = vmatprep.mubr.f32.mxu1 %v10663_v6 }
 0x3d8   : > { %v8229_v50 = vadd.f32 %v8228_v56, %v7237_v48  ;;  %v7250_v34 = vmax.f32 %v6226_v31, 0.0  ;;  %v6229_v21 = vadd.f32 %v13262_v13, %v5121_v58  ;;  %v5135_v63 = vmul.f32 %v13220_v15, %v14532_v35  ;;  %v14638_v1 = vpop.f32.mrf.mxu1  ;;  %v10547_v58 = vld [vmem:[%s10776_s30 + $0x168] sm:$0xff] }
 0x3d9   : > { %v7252_v0 = vmax.f32 %v6228_v61, 0.0  ;;  %v7251_v14 = vmax.f32 %v6227_v19, 0.0  ;;  %v6242_v3 = vadd.f32 %v13198_v26, %v5134_v46  ;;  %v6244_v11 = vadd.f32 %v13205_v29, %v5136_v28  ;;  %v14642_v45 = vpop.f32.mrf.mxu0  ;;  %9931 = vmatmul.mubr.msk.f32.gmra.mxu0 %vm377_vm0, %v10546_v57 }
 0x3da   : > { %v8023_v22 = vadd.f32 %v8022_v38, %v7250_v34  ;;  %v7253_v7 = vmax.f32 %v6229_v21, 0.0  ;;  %v6243_v55 = vadd.f32 %v13224_v33, %v5135_v63  ;;  %v5137_v35 = vmul.f32 %v13240_v51, %v14538_v42  ;;  %v14649_v12 = vpop.f32.mrf.mxu1  ;;  %9995 = vmatmul.mubr.msk.f32.gmra.mxu1 %vm377_vm0, %v10546_v57  ;;  %3598 = vmatprep.mubr.f32.mxu0 %v10663_v6 }
 0x3db   : > { %v8161_v41 = vadd.f32 %v8160_v37, %v7252_v0  ;;  %v8092_v54 = vadd.f32 %v8091_v62, %v7251_v14  ;;  %v7266_v56 = vmax.f32 %v6242_v3, 0.0  ;;  %v7268_v53 = vmax.f32 %v6244_v11, 0.0  ;;  %v14653_v39 = vpop.f32.mrf.mxu0  ;;  %4047 = vmatprep.mubr.f32.mxu1 %v10663_v6 }
 0x3dc   : > { %v8230_v59 = vadd.f32 %v8229_v50, %v7253_v7  ;;  %v7267_v38 = vmax.f32 %v6243_v55, 0.0  ;;  %v6245_v2 = vadd.f32 %v13262_v13, %v5137_v35  ;;  %v5150_v42 = vmul.f32 %v13192_v40, %v14542_v60  ;;  %v14659_v5 = vpop.f32.mrf.mxu1  ;;  %v10548_v7 = vld [vmem:[%s10776_s30 + $0x170] sm:$0xff] }
 0x3dd   : > { %v8024_v27 = vadd.f32 %v8023_v22, %v7266_v56  ;;  %v8162_v48 = vadd.f32 %v8161_v41, %v7268_v53  ;;  %v5152_v37 = vmul.f32 %v13201_v32, %v14549_v44  ;;  %v5151_v62 = vmul.f32 %v13220_v15, %v14553_v4  ;;  %v14665_v31 = vpop.f32.mrf.mxu0  ;;  %9932 = vmatmul.mubr.msk.f32.gmra.mxu0 %vm377_vm0, %v10547_v58 }
 0x3de   : > { %v8093_v61 = vadd.f32 %v8092_v54, %v7267_v38  ;;  %v7269_v19 = vmax.f32 %v6245_v2, 0.0  ;;  %v6258_v46 = vadd.f32 %v13198_v26, %v5150_v42  ;;  %v5153_v60 = vmul.f32 %v13240_v51, %v14559_v9  ;;  %v14672_v28 = vpop.f32.mrf.mxu1  ;;  %9996 = vmatmul.mubr.msk.f32.gmra.mxu1 %vm377_vm0, %v10547_v58  ;;  %3604 = vmatprep.mubr.f32.mxu0 %v10663_v6 }
 0x3df   : > { %v6260_v44 = vadd.f32 %v13205_v29, %v5152_v37  ;;  %v6259_v4 = vadd.f32 %v13224_v33, %v5151_v62  ;;  %v5166_v50 = vmul.f32 %v13192_v40, %v14565_v20  ;;  %v5168_v34 = vmul.f32 %v13201_v32, %v14572_v23  ;;  %v14682_v21 = vpop.f32.mrf.mxu0  ;;  %4053 = vmatprep.mubr.f32.mxu1 %v10663_v6 }
 0x3e0   : > { %v8231_v9 = vadd.f32 %v8230_v59, %v7269_v19  ;;  %v7282_v63 = vmax.f32 %v6258_v46, 0.0  ;;  %v6261_v0 = vadd.f32 %v13262_v13, %v5153_v60  ;;  %v5167_v14 = vmul.f32 %v13220_v15, %v14582_v16  ;;  %v14688_v3 = vpop.f32.mrf.mxu1  ;;  %v10549_v60 = vld [vmem:[%s10776_s30 + $0x178] sm:$0xff] }
 0x3e1   : > { %v7284_v11 = vmax.f32 %v6260_v44, 0.0  ;;  %v7283_v57 = vmax.f32 %v6259_v4, 0.0  ;;  %v6274_v20 = vadd.f32 %v13198_v26, %v5166_v50  ;;  %v6276_v22 = vadd.f32 %v13205_v29, %v5168_v34  ;;  %v14692_v23 = vpop.f32.mrf.mxu0  ;;  %9933 = vmatmul.mubr.msk.f32.gmra.mxu0 %vm377_vm0, %v10548_v7 }
 0x3e2   : > { %v8025_v55 = vadd.f32 %v8024_v27, %v7282_v63  ;;  %v7285_v35 = vmax.f32 %v6261_v0, 0.0  ;;  %v6275_v41 = vadd.f32 %v13224_v33, %v5167_v14  ;;  %v5169_v16 = vmul.f32 %v13240_v51, %v14588_v24  ;;  %v14699_v54 = vpop.f32.mrf.mxu1  ;;  %9997 = vmatmul.mubr.msk.f32.gmra.mxu1 %vm377_vm0, %v10548_v7  ;;  %3610 = vmatprep.mubr.f32.mxu0 %v10663_v6 }
 0x3e3   : > { %v8163_v56 = vadd.f32 %v8162_v48, %v7284_v11  ;;  %v8094_v53 = vadd.f32 %v8093_v61, %v7283_v57  ;;  %v7298_v59 = vmax.f32 %v6274_v20, 0.0  ;;  %v7300_v38 = vmax.f32 %v6276_v22, 0.0  ;;  %v14703_v2 = vpop.f32.mrf.mxu0  ;;  %4059 = vmatprep.mubr.f32.mxu1 %v10663_v6 }
 0x3e4   : > { %v8232_v42 = vadd.f32 %v8231_v9, %v7285_v35  ;;  %v7299_v27 = vmax.f32 %v6275_v41, 0.0  ;;  %v6277_v37 = vadd.f32 %v13262_v13, %v5169_v16  ;;  %v5182_v24 = vmul.f32 %v13192_v40, %v14592_v49  ;;  %v14709_v62 = vpop.f32.mrf.mxu1  ;;  %v10550_v35 = vld [vmem:[%s10776_s30 + $0x180] sm:$0xff] }
 0x3e5   : > { %v8026_v58 = vadd.f32 %v8025_v55, %v7298_v59  ;;  %v8164_v19 = vadd.f32 %v8163_v56, %v7300_v38  ;;  %v5184_v48 = vmul.f32 %v13201_v32, %v14599_v8  ;;  %v5183_v61 = vmul.f32 %v13220_v15, %v14603_v18  ;;  %v14715_v46 = vpop.f32.mrf.mxu0  ;;  %9934 = vmatmul.mubr.msk.f32.gmra.mxu0 %vm377_vm0, %v10549_v60 }
 0x3e6   : > { %v8095_v44 = vadd.f32 %v8094_v53, %v7299_v27  ;;  %v7301_v4 = vmax.f32 %v6277_v37, 0.0  ;;  %v6290_v50 = vadd.f32 %v13198_v26, %v5182_v24  ;;  %v5185_v49 = vmul.f32 %v13240_v51, %v14609_v43  ;;  %v14722_v34 = vpop.f32.mrf.mxu1  ;;  %9998 = vmatmul.mubr.msk.f32.gmra.mxu1 %vm377_vm0, %v10549_v60  ;;  %3616 = vmatprep.mubr.f32.mxu0 %v10663_v6 }
 0x3e7   : > { %v6292_v8 = vadd.f32 %v13205_v29, %v5184_v48  ;;  %v6291_v18 = vadd.f32 %v13224_v33, %v5183_v61  ;;  %v5198_v9 = vmul.f32 %v13192_v40, %v14615_v17  ;;  %v5200_v63 = vmul.f32 %v13201_v32, %v14622_v10  ;;  %v14732_v0 = vpop.f32.mrf.mxu0  ;;  %4065 = vmatprep.mubr.f32.mxu1 %v10663_v6 }
 0x3e8   : > { %v8233_v43 = vadd.f32 %v8232_v42, %v7301_v4  ;;  %v7314_v14 = vmax.f32 %v6290_v50, 0.0  ;;  %v6293_v11 = vadd.f32 %v13262_v13, %v5185_v49  ;;  %v5199_v57 = vmul.f32 %v13220_v15, %v14632_v52  ;;  %v14738_v20 = vpop.f32.mrf.mxu1  ;;  %v10551_v49 = vld [vmem:[%s10776_s30 + $0x188] sm:$0xff] }
 0x3e9   : > { %v7316_v22 = vmax.f32 %v6292_v8, 0.0  ;;  %v7315_v7 = vmax.f32 %v6291_v18, 0.0  ;;  %v6306_v17 = vadd.f32 %v13198_v26, %v5198_v9  ;;  %v6308_v55 = vadd.f32 %v13205_v29, %v5200_v63  ;;  %v14742_v10 = vpop.f32.mrf.mxu0  ;;  %9935 = vmatmul.mubr.msk.f32.gmra.mxu0 %vm377_vm0, %v10550_v35 }
 0x3ea   : > { %v8027_v41 = vadd.f32 %v8026_v58, %v7314_v14  ;;  %v7317_v16 = vmax.f32 %v6293_v11, 0.0  ;;  %v6307_v56 = vadd.f32 %v13224_v33, %v5199_v57  ;;  %v5201_v52 = vmul.f32 %v13240_v51, %v14638_v1  ;;  %v14749_v53 = vpop.f32.mrf.mxu1  ;;  %9999 = vmatmul.mubr.msk.f32.gmra.mxu1 %vm377_vm0, %v10550_v35  ;;  %3622 = vmatprep.mubr.f32.mxu0 %v10663_v6 }
 0x3eb   : > { %v8165_v59 = vadd.f32 %v8164_v19, %v7316_v22  ;;  %v8096_v38 = vadd.f32 %v8095_v44, %v7315_v7  ;;  %v7330_v42 = vmax.f32 %v6306_v17, 0.0  ;;  %v7332_v27 = vmax.f32 %v6308_v55, 0.0  ;;  %v14753_v37 = vpop.f32.mrf.mxu0  ;;  %4071 = vmatprep.mubr.f32.mxu1 %v10663_v6 }
 0x3ec   : > { %v8234_v24 = vadd.f32 %v8233_v43, %v7317_v16  ;;  %v7331_v58 = vmax.f32 %v6307_v56, 0.0  ;;  %v6309_v48 = vadd.f32 %v13262_v13, %v5201_v52  ;;  %v5214_v1 = vmul.f32 %v13192_v40, %v14642_v45  ;;  %v14759_v61 = vpop.f32.mrf.mxu1  ;;  %v10552_v16 = vld [vmem:[%s10776_s30 + $0x190] sm:$0xff] }
 0x3ed   : > { %v8028_v60 = vadd.f32 %v8027_v41, %v7330_v42  ;;  %v8166_v4 = vadd.f32 %v8165_v59, %v7332_v27  ;;  %v5216_v19 = vmul.f32 %v13201_v32, %v14649_v12  ;;  %v5215_v44 = vmul.f32 %v13220_v15, %v14653_v39  ;;  %v14765_v50 = vpop.f32.mrf.mxu0  ;;  %9936 = vmatmul.mubr.msk.f32.gmra.mxu0 %vm377_vm0, %v10551_v49 }
 0x3ee   : > { %v8097_v8 = vadd.f32 %v8096_v38, %v7331_v58  ;;  %v7333_v18 = vmax.f32 %v6309_v48, 0.0  ;;  %v6322_v9 = vadd.f32 %v13198_v26, %v5214_v1  ;;  %v5217_v45 = vmul.f32 %v13240_v51, %v14659_v5  ;;  %v14772_v63 = vpop.f32.mrf.mxu1  ;;  %10000 = vmatmul.mubr.msk.f32.gmra.mxu1 %vm377_vm0, %v10551_v49  ;;  %3628 = vmatprep.mubr.f32.mxu0 %v10663_v6 }
 0x3ef   : > { %v6324_v12 = vadd.f32 %v13205_v29, %v5216_v19  ;;  %v6323_v39 = vadd.f32 %v13224_v33, %v5215_v44  ;;  %v5230_v43 = vmul.f32 %v13192_v40, %v14665_v31  ;;  %v5232_v14 = vmul.f32 %v13201_v32, %v14672_v28  ;;  %v14782_v11 = vpop.f32.mrf.mxu0  ;;  %4077 = vmatprep.mubr.f32.mxu1 %v10663_v6 }
 0x3f0   : > { %v8235_v5 = vadd.f32 %v8234_v24, %v7333_v18  ;;  %v7346_v57 = vmax.f32 %v6322_v9, 0.0  ;;  %v6325_v22 = vadd.f32 %v13262_v13, %v5217_v45  ;;  %v5231_v7 = vmul.f32 %v13220_v15, %v14682_v21  ;;  %v14788_v17 = vpop.f32.mrf.mxu1  ;;  %v10553_v45 = vld [vmem:[%s10776_s30 + $0x198] sm:$0xff] }
 0x3f1   : > { %v7348_v55 = vmax.f32 %v6324_v12, 0.0  ;;  %v7347_v35 = vmax.f32 %v6323_v39, 0.0  ;;  %v6338_v31 = vadd.f32 %v13198_v26, %v5230_v43  ;;  %v6340_v41 = vadd.f32 %v13205_v29, %v5232_v14  ;;  %v14792_v28 = vpop.f32.mrf.mxu0  ;;  %9937 = vmatmul.mubr.msk.f32.gmra.mxu0 %vm377_vm0, %v10552_v16 }
 0x3f2   : > { %v8029_v56 = vadd.f32 %v8028_v60, %v7346_v57  ;;  %v7349_v52 = vmax.f32 %v6325_v22, 0.0  ;;  %v6339_v59 = vadd.f32 %v13224_v33, %v5231_v7  ;;  %v5233_v21 = vmul.f32 %v13240_v51, %v14688_v3  ;;  %v14799_v38 = vpop.f32.mrf.mxu1  ;;  %10001 = vmatmul.mubr.msk.f32.gmra.mxu1 %vm377_vm0, %v10552_v16  ;;  %3634 = vmatprep.mubr.f32.mxu0 %v10663_v6 }
 0x3f3   : > { %v8167_v42 = vadd.f32 %v8166_v4, %v7348_v55  ;;  %v8098_v27 = vadd.f32 %v8097_v8, %v7347_v35  ;;  %v7362_v24 = vmax.f32 %v6338_v31, 0.0  ;;  %v7364_v58 = vmax.f32 %v6340_v41, 0.0  ;;  %v14803_v48 = vpop.f32.mrf.mxu0  ;;  %4083 = vmatprep.mubr.f32.mxu1 %v10663_v6 }
 0x3f4   : > { %v8236_v1 = vadd.f32 %v8235_v5, %v7349_v52  ;;  %v7363_v60 = vmax.f32 %v6339_v59, 0.0  ;;  %v6341_v19 = vadd.f32 %v13262_v13, %v5233_v21  ;;  %v5246_v3 = vmul.f32 %v13192_v40, %v14692_v23  ;;  %v14809_v44 = vpop.f32.mrf.mxu1 }
 0x3f5   : > { %v8030_v49 = vadd.f32 %v8029_v56, %v7362_v24  ;;  %v8168_v18 = vadd.f32 %v8167_v42, %v7364_v58  ;;  %v5248_v4 = vmul.f32 %v13201_v32, %v14699_v54  ;;  %v5247_v8 = vmul.f32 %v13220_v15, %v14703_v2  ;;  %v14815_v9 = vpop.f32.mrf.mxu0  ;;  %9938 = vmatmul.mubr.msk.f32.gmra.mxu0 %vm377_vm0, %v10553_v45 }
 0x3f6   : > { %v8099_v12 = vadd.f32 %v8098_v27, %v7363_v60  ;;  %v7365_v39 = vmax.f32 %v6341_v19, 0.0  ;;  %v6354_v43 = vadd.f32 %v13198_v26, %v5246_v3  ;;  %v5249_v23 = vmul.f32 %v13240_v51, %v14709_v62  ;;  %v14822_v14 = vpop.f32.mrf.mxu1  ;;  %10002 = vmatmul.mubr.msk.f32.gmra.mxu1 %vm377_vm0, %v10553_v45  ;;  %3640 = vmatprep.mubr.f32.mxu0 %v10663_v6  ;;  %v10556_v3 = vld [vmem:[%s16981_s3 + $0x8] sm:$0xff] }
 0x3f7   : > { %v6356_v54 = vadd.f32 %v13205_v29, %v5248_v4  ;;  %v6355_v2 = vadd.f32 %v13224_v33, %v5247_v8  ;;  %v5262_v5 = vmul.f32 %v13192_v40, %v14715_v46  ;;  %v5264_v57 = vmul.f32 %v13201_v32, %v14722_v34  ;;  %v14832_v22 = vpop.f32.mrf.mxu0  ;;  %4089 = vmatprep.mubr.f32.mxu1 %v10663_v6  ;;  %v10554_v34 = vld [vmem:[%s10776_s30 + $0x1a0] sm:$0xff]  ;;  %v10557_v4 = vld [vmem:[%s10776_s30 + $0x1a8] sm:$0xff] }
 0x3f8   : > { %v8237_v62 = vadd.f32 %v8236_v1, %v7365_v39  ;;  %v7378_v7 = vmax.f32 %v6354_v43, 0.0  ;;  %v6357_v55 = vadd.f32 %v13262_v13, %v5249_v23  ;;  %v5263_v35 = vmul.f32 %v13220_v15, %v14732_v0  ;;  %v14838_v31 = vpop.f32.mrf.mxu1 }
 0x3f9   : > { %v7380_v41 = vmax.f32 %v6356_v54, 0.0  ;;  %v7379_v16 = vmax.f32 %v6355_v2, 0.0  ;;  %v6370_v40 = vadd.f32 %v13198_v26, %v5262_v5  ;;  %v6372_v46 = vadd.f32 %v13205_v29, %v5264_v57  ;;  %v14842_v32 = vpop.f32.mrf.mxu0  ;;  %9939 = vmatmul.mubr.msk.f32.gmra.mxu0 %vm377_vm0, %v10554_v34 }
 0x3fa   : > { %v8031_v56 = vadd.f32 %v8030_v49, %v7378_v7  ;;  %v7381_v52 = vmax.f32 %v6357_v55, 0.0  ;;  %v6371_v59 = vadd.f32 %v13224_v33, %v5263_v35  ;;  %v5265_v15 = vmul.f32 %v13240_v51, %v14738_v20  ;;  %v14849_v0 = vpop.f32.mrf.mxu1  ;;  %10003 = vmatmul.mubr.msk.f32.gmra.mxu1 %vm377_vm0, %v10554_v34  ;;  %3646 = vmatprep.mubr.f32.mxu0 %v10663_v6  ;;  %v10555_v51 = vld [vmem:[%s16980_s2 + $0x8] sm:$0xff] }
 0x3fb   : > { %v8169_v26 = vadd.f32 %v8168_v18, %v7380_v41  ;;  %v8100_v29 = vadd.f32 %v8099_v12, %v7379_v16  ;;  %v7394_v21 = vmax.f32 %v6370_v40, 0.0  ;;  %v7396_v42 = vmax.f32 %v6372_v46, 0.0  ;;  %v14853_v27 = vpop.f32.mrf.mxu0  ;;  %4095 = vmatprep.mubr.f32.mxu1 %v10663_v6  ;;  %v10558_v40 = vld [vmem:[%s10776_s30 + $0x1b0] sm:$0xff] }
 0x3fc   : > { %v8238_v24 = vadd.f32 %v8237_v62, %v7381_v52  ;;  %v7395_v33 = vmax.f32 %v6371_v59, 0.0  ;;  %v6373_v58 = vadd.f32 %v13262_v13, %v5265_v15  ;;  %v14861_v20 = vrot.slane %v10555_v51, %v11777_v36  ;;  %v14863_v1 = vpop.f32.mrf.mxu1 }
 0x3fd   : > { %v8032_v60 = vadd.f32 %v8031_v56, %v7394_v21  ;;  %v8170_v19 = vadd.f32 %v8169_v26, %v7396_v42  ;;  %v14869_v49 = vrot.slane %v10556_v3, %v11777_v36  ;;  %v14872_v13 = vrot.slane %v10555_v51, %v11789_v47  ;;  %v14874_v18 = vpop.f32.mrf.mxu0  ;;  %9940 = vmatmul.mubr.msk.f32.gmra.mxu0 %vm377_vm0, %v10557_v4 }
 0x3fe   : > { %v8101_v8 = vadd.f32 %v8100_v29, %v7395_v33  ;;  %v7397_v45 = vmax.f32 %v6373_v58, 0.0  ;;  %v4258_v12 = vmul.f32 %v14861_v20, %v14742_v10  ;;  %v14881_v39 = vrot.slane %v10556_v3, %v11789_v47  ;;  %v14883_v43 = vpop.f32.mrf.mxu1  ;;  %10004 = vmatmul.mubr.msk.f32.gmra.mxu1 %vm377_vm0, %v10557_v4  ;;  %3652 = vmatprep.mubr.f32.mxu0 %v10663_v6 }
 0x3ff   : > { %v8033_v36 = vrot.slane %v8032_v60, 4  ;;  %v8171_v23 = vrot.slane %v8170_v19, 4  ;;  %v4260_v54 = vmul.f32 %v14872_v13, %v14749_v53  ;;  %v14890_v2 = vrot.slane %v10555_v51, %v11979_v25  ;;  %v14892_v5 = vpop.f32.mrf.mxu0  ;;  %4101 = vmatprep.mubr.f32.mxu1 %v10663_v6 }
 0x400   : > { %v8102_v47 = vrot.slane %v8101_v8, 4  ;;  %v8239_v10 = vadd.f32 %v8238_v24, %v7397_v45  ;;  %v14896_v57 = vadd.f32 %v14869_v49, %v4258_v12  ;;  %v14899_v62 = vrot.slane %v10556_v3, %v11979_v25  ;;  %v14901_v7 = vpop.f32.mrf.mxu1  ;;  %v10559_v45 = vld [vmem:[%s10776_s30 + $0x1b8] sm:$0xff] }
 0x401   : > { %v8034_v55 = vadd.f32 %v8033_v36, %v8032_v60  ;;  %v8172_v35 = vadd.f32 %v8171_v23, %v8170_v19  ;;  %v14904_v53 = vadd.f32 %v14881_v39, %v4260_v54  ;;  %v4259_v41 = vmul.f32 %v14890_v2, %v14753_v37  ;;  %v14908_v16 = vpop.f32.mrf.mxu0  ;;  %9941 = vmatmul.mubr.msk.f32.gmra.mxu0 %vm377_vm0, %v10558_v40 }
 0x402   : > { %v8103_v46 = vadd.f32 %v8102_v47, %v8101_v8  ;;  %v8240_v34 = vrot.slane %v8239_v10, 4  ;;  %v6390_v25 = vmax.f32 %v14896_v57, 0.0  ;;  %v14914_v56 = vrot.slane %v10555_v51, %v11985_v30  ;;  %v14916_v52 = vpop.f32.mrf.mxu1  ;;  %10005 = vmatmul.mubr.msk.f32.gmra.mxu1 %vm377_vm0, %v10558_v40  ;;  %3658 = vmatprep.mubr.f32.mxu0 %v10663_v6  ;;  %v7410_v57 = vld [vmem:[#allocation2 + $0x40] sm:$0xff] }
 0x403   : > { %v8035_v59 = vrot.slane %v8034_v55, 2  ;;  %v8173_v37 = vrot.slane %v8172_v35, 2  ;;  %v6392_v15 = vmax.f32 %v14904_v53, 0.0  ;;  %v14922_v26 = vadd.f32 %v14899_v62, %v4259_v41  ;;  %v14924_v29 = vpop.f32.mrf.mxu0  ;;  %4107 = vmatprep.mubr.f32.mxu1 %v10663_v6 }
 0x404   : > { %v8104_v21 = vrot.slane %v8103_v46, 2  ;;  %v8241_v42 = vadd.f32 %v8240_v34, %v8239_v10  ;;  %v4261_v24 = vmul.f32 %v14914_v56, %v14759_v61  ;;  %v14930_v33 = vrot.slane %v10556_v3, %v11985_v30  ;;  %v14932_v58 = vpop.f32.mrf.mxu1 }
 0x405   : > { %v8036_v51 = vadd.f32 %v8035_v59, %v8034_v55  ;;  %v8174_v60 = vadd.f32 %v8173_v37, %v8172_v35  ;;  %v6391_v19 = vmax.f32 %v14922_v26, 0.0  ;;  %v4274_v4 = vmul.f32 %v14861_v20, %v14765_v50  ;;  %v14937_v8 = vpop.f32.mrf.mxu0  ;;  %9942 = vmatmul.mubr.msk.f32.gmra.mxu0 %vm377_vm0, %v10559_v45  ;;  %v7411_v59 = vld [vmem:[#allocation2 + $0x20] sm:$0xff] }
 0x406   : > { %v8105_v12 = vadd.f32 %v8104_v21, %v8103_v46  ;;  %v8242_v36 = vrot.slane %v8241_v42, 2  ;;  %v14942_v61 = vadd.f32 %v14930_v33, %v4261_v24  ;;  %v4276_v30 = vmul.f32 %v14872_v13, %v14772_v63  ;;  %v14946_v3 = vpop.f32.mrf.mxu1  ;;  %10006 = vmatmul.mubr.msk.f32.gmra.mxu1 %vm377_vm0, %v10559_v45  ;;  %3664 = vmatprep.mubr.f32.mxu0 %v10663_v6  ;;  %v7412_v63 = vld [vmem:[#allocation2 + $0x10] sm:$0xff]  ;;  %v10560_v21 = vld [vmem:[%s10776_s30 + $0x1c0] sm:$0xff] }
 0x407   : > { %v8037_v50 = vrot.slane %v8036_v51, 1  ;;  %v8175_v23 = vrot.slane %v8174_v60, 1  ;;  %v5382_v54 = vadd.f32 %v14869_v49, %v4274_v4  ;;  %v4275_v47 = vmul.f32 %v14890_v2, %v14782_v11  ;;  %v14953_v10 = vpop.f32.mrf.mxu0  ;;  %4113 = vmatprep.mubr.f32.mxu1 %v10663_v6 }
 0x408   : > { %v8106_v55 = vrot.slane %v8105_v12, 1  ;;  %v8243_v35 = vadd.f32 %v8242_v36, %v8241_v42  ;;  %v6393_v53 = vmax.f32 %v14942_v61, 0.0  ;;  %v5384_v41 = vadd.f32 %v14881_v39, %v4276_v30  ;;  %v14958_v40 = vpop.f32.mrf.mxu1  ;;  %v7413_v61 = vld [vmem:[#allocation2 + $0x38] sm:$0xff] }
 0x409   : > { %v8038_v46 = vadd.f32 %v8037_v50, %v8036_v51  ;;  %v8176_v34 = vadd.f32 %v8175_v23, %v8174_v60  ;;  %v6406_v37 = vmax.f32 %v5382_v54, 0.0  ;;  %v5383_v11 = vadd.f32 %v14899_v62, %v4275_v47  ;;  %v14961_v26 = vpop.f32.mrf.mxu0  ;;  %9943 = vmatmul.mubr.msk.f32.gmra.mxu0 %vm377_vm0, %v10560_v21 }
 0x40a   : > { %v8107_v24 = vadd.f32 %v8106_v55, %v8105_v12  ;;  %v8244_v4 = vrot.slane %v8243_v35, 1  ;;  %v6408_v42 = vmax.f32 %v5384_v41, 0.0  ;;  %v4277_v45 = vmul.f32 %v14914_v56, %v14788_v17  ;;  %v14967_v36 = vpop.f32.mrf.mxu1  ;;  %10007 = vmatmul.mubr.msk.f32.gmra.mxu1 %vm377_vm0, %v10560_v21  ;;  %3670 = vmatprep.mubr.f32.mxu0 %v10663_v6 }
 0x40b   : > { %v8530_v51 = vadd.f32 %v8038_v46, %v7410_v57  ;;  %v8532_v60 = vadd.f32 %v8176_v34, %v7412_v63  ;;  %v8246_v30 = vadd.f32 %v6406_v37, %v6390_v25  ;;  %v6407_v50 = vmax.f32 %v5383_v11, 0.0  ;;  %v14971_v23 = vpop.f32.mrf.mxu0  ;;  %4119 = vmatprep.mubr.f32.mxu1 %v10663_v6 }
 0x40c   : > { %v8531_v12 = vadd.f32 %v8107_v24, %v7411_v59  ;;  %v8245_v54 = vadd.f32 %v8244_v4, %v8243_v35  ;;  %v8384_v47 = vadd.f32 %v6408_v42, %v6392_v15  ;;  %v5385_v17 = vadd.f32 %v14930_v33, %v4277_v45  ;;  %v14975_v55 = vpop.f32.mrf.mxu1  ;;  %v10561_v35 = vld [vmem:[%s10776_s30 + $0x1c8] sm:$0xff] }
 0x40d   : > { %8546 = vst [vmem:[#allocation2 + $0x40] sm:$0xff] %v8530_v51  ;;  %8548 = vst [vmem:[#allocation2 + $0x10] sm:$0xff] %v8532_v60  ;;  %v8315_v41 = vadd.f32 %v6407_v50, %v6391_v19  ;;  %v4290_v57 = vmul.f32 %v14861_v20, %v14792_v28  ;;  %v4292_v25 = vmul.f32 %v14872_v13, %v14799_v38  ;;  %v14983_v46 = vpop.f32.mrf.mxu0  ;;  %9944 = vmatmul.mubr.msk.f32.gmra.mxu0 %vm377_vm0, %v10561_v35  ;;  %v10562_v50 = vld [vmem:[%s10776_s30 + $0x1d0] sm:$0xff] }
 0x40e   : > { %v4291_v63 = vmul.f32 %v14890_v2, %v14803_v48  ;;  %8547 = vst [vmem:[#allocation2 + $0x20] sm:$0xff] %v8531_v12  ;;  %v8533_v15 = vadd.f32 %v8245_v54, %v7413_v61  ;;  %v6409_v34 = vmax.f32 %v5385_v17, 0.0  ;;  %v4293_v19 = vmul.f32 %v14914_v56, %v14809_v44  ;;  %v14991_v59 = vpop.f32.mrf.mxu1  ;;  %10008 = vmatmul.mubr.msk.f32.gmra.mxu1 %vm377_vm0, %v10561_v35 }
 0x40f   : > { %v4306_v28 = vmul.f32 %v14861_v20, %v14815_v9  ;;  %3676 = vmatprep.mubr.f32.mxu0 %v10663_v6  ;;  %v5398_v38 = vadd.f32 %v14869_v49, %v4290_v57  ;;  %v5400_v48 = vadd.f32 %v14881_v39, %v4292_v25  ;;  %v4308_v11 = vmul.f32 %v14872_v13, %v14822_v14  ;;  %v15000_v44 = vpop.f32.mrf.mxu0 }
 0x410   : > { %v5399_v37 = vadd.f32 %v14899_v62, %v4291_v63  ;;  %4125 = vmatprep.mubr.f32.mxu1 %v10663_v6  ;;  %8549 = vst [vmem:[#allocation2 + $0x38] sm:$0xff] %v8533_v15  ;;  %v8453_v9 = vadd.f32 %v6409_v34, %v6393_v53  ;;  %v5401_v21 = vadd.f32 %v14930_v33, %v4293_v19  ;;  %v15007_v42 = vpop.f32.mrf.mxu1 }
 0x411   : > { %v5414_v24 = vadd.f32 %v14869_v49, %v4306_v28  ;;  %v4307_v4 = vmul.f32 %v14890_v2, %v14832_v22  ;;  %v6422_v45 = vmax.f32 %v5398_v38, 0.0  ;;  %v6424_v51 = vmax.f32 %v5400_v48, 0.0  ;;  %v15010_v61 = vpop.f32.mrf.mxu0  ;;  %9945 = vmatmul.mubr.msk.f32.gmra.mxu0 %vm377_vm0, %v10562_v50 }
 0x412   : > { %v6423_v60 = vmax.f32 %v5399_v37, 0.0  ;;  %v5416_v14 = vadd.f32 %v14881_v39, %v4308_v11  ;;  %v6425_v53 = vmax.f32 %v5401_v21, 0.0  ;;  %v4309_v17 = vmul.f32 %v14914_v56, %v14838_v31  ;;  %v15017_v22 = vpop.f32.mrf.mxu1  ;;  %10009 = vmatmul.mubr.msk.f32.gmra.mxu1 %vm377_vm0, %v10562_v50  ;;  %3682 = vmatprep.mubr.f32.mxu0 %v10663_v6  ;;  %v10563_v11 = vld [vmem:[%s10776_s30 + $0x1d8] sm:$0xff] }
 0x413   : > { %v6438_v12 = vmax.f32 %v5414_v24, 0.0  ;;  %v5415_v54 = vadd.f32 %v14899_v62, %v4307_v4  ;;  %v8247_v57 = vadd.f32 %v8246_v30, %v6422_v45  ;;  %v8385_v25 = vadd.f32 %v8384_v47, %v6424_v51  ;;  %v15021_v15 = vpop.f32.mrf.mxu0  ;;  %4131 = vmatprep.mubr.f32.mxu1 %v10663_v6 }
 0x414   : > { %v8316_v63 = vadd.f32 %v8315_v41, %v6423_v60  ;;  %v6440_v35 = vmax.f32 %v5416_v14, 0.0  ;;  %v8454_v34 = vadd.f32 %v8453_v9, %v6425_v53  ;;  %v5417_v28 = vadd.f32 %v14930_v33, %v4309_v17  ;;  %v15027_v38 = vpop.f32.mrf.mxu1 }
 0x415   : > { %v6439_v19 = vmax.f32 %v5415_v54, 0.0  ;;  %v4322_v31 = vmul.f32 %v14861_v20, %v14842_v32  ;;  %v8248_v48 = vadd.f32 %v8247_v57, %v6438_v12  ;;  %v4324_v30 = vmul.f32 %v14872_v13, %v14849_v0  ;;  %v15033_v41 = vpop.f32.mrf.mxu0  ;;  %9946 = vmatmul.mubr.msk.f32.gmra.mxu0 %vm377_vm0, %v10563_v11 }
 0x416   : > { %v8386_v37 = vadd.f32 %v8385_v25, %v6440_v35  ;;  %v4323_v47 = vmul.f32 %v14890_v2, %v14853_v27  ;;  %v6441_v21 = vmax.f32 %v5417_v28, 0.0  ;;  %v4325_v32 = vmul.f32 %v14914_v56, %v14863_v1  ;;  %v15040_v4 = vpop.f32.mrf.mxu1  ;;  %10010 = vmatmul.mubr.msk.f32.gmra.mxu1 %vm377_vm0, %v10563_v11  ;;  %3688 = vmatprep.mubr.f32.mxu0 %v10663_v6  ;;  %v10564_v25 = vld [vmem:[%s10776_s30 + $0x1e0] sm:$0xff] }
 0x417   : > { %v8317_v9 = vadd.f32 %v8316_v63, %v6439_v19  ;;  %v5430_v24 = vadd.f32 %v14869_v49, %v4322_v31  ;;  %v5432_v0 = vadd.f32 %v14881_v39, %v4324_v30  ;;  %v4338_v45 = vmul.f32 %v14861_v20, %v14874_v18  ;;  %v15050_v60 = vpop.f32.mrf.mxu0  ;;  %4137 = vmatprep.mubr.f32.mxu1 %v10663_v6 }
 0x418   : > { %v5431_v27 = vadd.f32 %v14899_v62, %v4323_v47  ;;  %v4340_v51 = vmul.f32 %v14872_v13, %v14883_v43  ;;  %v8455_v1 = vadd.f32 %v8454_v34, %v6441_v21  ;;  %v5433_v50 = vadd.f32 %v14930_v33, %v4325_v32  ;;  %v15056_v12 = vpop.f32.mrf.mxu1 }
 0x419   : > { %v6454_v14 = vmax.f32 %v5430_v24, 0.0  ;;  %v4339_v53 = vmul.f32 %v14890_v2, %v14892_v5  ;;  %v6456_v54 = vmax.f32 %v5432_v0, 0.0  ;;  %v5446_v18 = vadd.f32 %v14869_v49, %v4338_v45  ;;  %v15060_v43 = vpop.f32.mrf.mxu0  ;;  %9947 = vmatmul.mubr.msk.f32.gmra.mxu0 %vm377_vm0, %v10564_v25 }
 0x41a   : > { %v6455_v17 = vmax.f32 %v5431_v27, 0.0  ;;  %v5448_v57 = vadd.f32 %v14881_v39, %v4340_v51  ;;  %v6457_v35 = vmax.f32 %v5433_v50, 0.0  ;;  %v4341_v5 = vmul.f32 %v14914_v56, %v14901_v7  ;;  %v15067_v19 = vpop.f32.mrf.mxu1  ;;  %10011 = vmatmul.mubr.msk.f32.gmra.mxu1 %vm377_vm0, %v10564_v25  ;;  %3694 = vmatprep.mubr.f32.mxu0 %v10663_v6  ;;  %v10565_v51 = vld [vmem:[%s10776_s30 + $0x1e8] sm:$0xff] }
 0x41b   : > { %v8249_v63 = vadd.f32 %v8248_v48, %v6454_v14  ;;  %v5447_v34 = vadd.f32 %v14899_v62, %v4339_v53  ;;  %v8387_v28 = vadd.f32 %v8386_v37, %v6456_v54  ;;  %v6470_v30 = vmax.f32 %v5446_v18, 0.0  ;;  %v15071_v11 = vpop.f32.mrf.mxu0  ;;  %4143 = vmatprep.mubr.f32.mxu1 %v10663_v6 }
 0x41c   : > { %v8318_v31 = vadd.f32 %v8317_v9, %v6455_v17  ;;  %v6472_v47 = vmax.f32 %v5448_v57, 0.0  ;;  %v8456_v48 = vadd.f32 %v8455_v1, %v6457_v35  ;;  %v5449_v24 = vadd.f32 %v14930_v33, %v4341_v5  ;;  %v15077_v32 = vpop.f32.mrf.mxu1 }
 0x41d   : > { %v6471_v21 = vmax.f32 %v5447_v34, 0.0  ;;  %v4354_v7 = vmul.f32 %v14861_v20, %v14908_v16  ;;  %v8250_v0 = vadd.f32 %v8249_v63, %v6470_v30  ;;  %v4356_v37 = vmul.f32 %v14872_v13, %v14916_v52  ;;  %v15083_v45 = vpop.f32.mrf.mxu0  ;;  %9948 = vmatmul.mubr.msk.f32.gmra.mxu0 %vm377_vm0, %v10565_v51 }
 0x41e   : > { %v8388_v27 = vadd.f32 %v8387_v28, %v6472_v47  ;;  %v4355_v9 = vmul.f32 %v14890_v2, %v14924_v29  ;;  %v6473_v14 = vmax.f32 %v5449_v24, 0.0  ;;  %v4357_v16 = vmul.f32 %v14914_v56, %v14932_v58  ;;  %v15090_v53 = vpop.f32.mrf.mxu1  ;;  %10012 = vmatmul.mubr.msk.f32.gmra.mxu1 %vm377_vm0, %v10565_v51  ;;  %3700 = vmatprep.mubr.f32.mxu0 %v10663_v6 }
 0x41f   : > { %v8319_v1 = vadd.f32 %v8318_v31, %v6471_v21  ;;  %v5462_v50 = vadd.f32 %v14869_v49, %v4354_v7  ;;  %v5464_v52 = vadd.f32 %v14881_v39, %v4356_v37  ;;  %v4370_v54 = vmul.f32 %v14861_v20, %v14937_v8  ;;  %v15100_v18 = vpop.f32.mrf.mxu0  ;;  %4149 = vmatprep.mubr.f32.mxu1 %v10663_v6  ;;  %v10566_v31 = vld [vmem:[%s10776_s30 + $0x1f0] sm:$0xff] }
 0x420   : > { %v5463_v29 = vadd.f32 %v14899_v62, %v4355_v9  ;;  %v4372_v17 = vmul.f32 %v14872_v13, %v14946_v3  ;;  %v8457_v58 = vadd.f32 %v8456_v48, %v6473_v14  ;;  %v5465_v25 = vadd.f32 %v14930_v33, %v4357_v16  ;;  %v15106_v35 = vpop.f32.mrf.mxu1 }
 0x421   : > { %v6486_v57 = vmax.f32 %v5462_v50, 0.0  ;;  %v4371_v63 = vmul.f32 %v14890_v2, %v14953_v10  ;;  %v6488_v34 = vmax.f32 %v5464_v52, 0.0  ;;  %v5478_v8 = vadd.f32 %v14869_v49, %v4370_v54  ;;  %v15110_v3 = vpop.f32.mrf.mxu0  ;;  %9949 = vmatmul.mubr.msk.f32.gmra.mxu0 %vm377_vm0, %v10566_v31 }
 0x422   : > { %v6487_v5 = vmax.f32 %v5463_v29, 0.0  ;;  %v5480_v28 = vadd.f32 %v14881_v39, %v4372_v17  ;;  %v6489_v47 = vmax.f32 %v5465_v25, 0.0  ;;  %v4373_v10 = vmul.f32 %v14914_v56, %v14958_v40  ;;  %v15117_v21 = vpop.f32.mrf.mxu1  ;;  %10013 = vmatmul.mubr.msk.f32.gmra.mxu1 %vm377_vm0, %v10566_v31  ;;  %3706 = vmatprep.mubr.f32.mxu0 %v10663_v6 }
 0x423   : > { %v8251_v30 = vadd.f32 %v8250_v0, %v6486_v57  ;;  %v5479_v48 = vadd.f32 %v14899_v62, %v4371_v63  ;;  %v8389_v24 = vadd.f32 %v8388_v27, %v6488_v34  ;;  %v6502_v37 = vmax.f32 %v5478_v8, 0.0  ;;  %v15121_v51 = vpop.f32.mrf.mxu0  ;;  %4155 = vmatprep.mubr.f32.mxu1 %v10663_v6  ;;  %v10567_v6 = vld [vmem:[%s10776_s30 + $0x1f8] sm:$0xff] }
 0x424   : > { %v8320_v7 = vadd.f32 %v8319_v1, %v6487_v5  ;;  %v6504_v9 = vmax.f32 %v5480_v28, 0.0  ;;  %v8458_v0 = vadd.f32 %v8457_v58, %v6489_v47  ;;  %v5481_v50 = vadd.f32 %v14930_v33, %v4373_v10  ;;  %v15127_v16 = vpop.f32.mrf.mxu1 }
 0x425   : > { %v6503_v14 = vmax.f32 %v5479_v48, 0.0  ;;  %v4386_v40 = vmul.f32 %v14861_v20, %v14961_v26  ;;  %v8252_v52 = vadd.f32 %v8251_v30, %v6502_v37  ;;  %v4388_v27 = vmul.f32 %v14872_v13, %v14967_v36  ;;  %v15133_v54 = vpop.f32.mrf.mxu0  ;;  %9950 = vmatmul.mubr.msk.f32.gmra.mxu0 %vm377_vm0, %v10567_v6 }
 0x426   : > { %v8390_v29 = vadd.f32 %v8389_v24, %v6504_v9  ;;  %v4387_v1 = vmul.f32 %v14890_v2, %v14971_v23  ;;  %v6505_v58 = vmax.f32 %v5481_v50, 0.0  ;;  %v4389_v26 = vmul.f32 %v14914_v56, %v14975_v55  ;;  %v15140_v25 = vpop.f32.mrf.mxu1  ;;  %10014 = vmatmul.mubr.msk.f32.gmra.mxu1 %vm377_vm0, %v10567_v6 }
 0x427   : > { %v8321_v17 = vadd.f32 %v8320_v7, %v6503_v14  ;;  %v5494_v57 = vadd.f32 %v14869_v49, %v4386_v40  ;;  %v5496_v36 = vadd.f32 %v14881_v39, %v4388_v27  ;;  %v4402_v63 = vmul.f32 %v14861_v20, %v14983_v46  ;;  %v15149_v5 = vpop.f32.mrf.mxu0 }
 0x428   : > { %v5495_v23 = vadd.f32 %v14899_v62, %v4387_v1  ;;  %v4404_v34 = vmul.f32 %v14872_v13, %v14991_v59  ;;  %v8459_v8 = vadd.f32 %v8458_v0, %v6505_v58  ;;  %v5497_v55 = vadd.f32 %v14930_v33, %v4389_v26  ;;  %v15154_v30 = vpop.f32.mrf.mxu1 }
 0x429   : > { %v6518_v28 = vmax.f32 %v5494_v57, 0.0  ;;  %v4403_v31 = vmul.f32 %v14890_v2, %v15000_v44  ;;  %v6520_v47 = vmax.f32 %v5496_v36, 0.0  ;;  %v5510_v10 = vadd.f32 %v14869_v49, %v4402_v63  ;;  %v15158_v24 = vpop.f32.mrf.mxu0 }
 0x42a   : > { %v6519_v48 = vmax.f32 %v5495_v23, 0.0  ;;  %v5512_v46 = vadd.f32 %v14881_v39, %v4404_v34  ;;  %v6521_v7 = vmax.f32 %v5497_v55, 0.0  ;;  %v4405_v9 = vmul.f32 %v14914_v56, %v15007_v42  ;;  %v15163_v0 = vpop.f32.mrf.mxu1 }
 0x42b   : > { %v8253_v59 = vadd.f32 %v8252_v52, %v6518_v28  ;;  %v5511_v37 = vadd.f32 %v14899_v62, %v4403_v31  ;;  %v8391_v44 = vadd.f32 %v8390_v29, %v6520_v47  ;;  %v6534_v50 = vmax.f32 %v5510_v10, 0.0  ;;  %v15165_v27 = vpop.f32.mrf.mxu0 }
 0x42c   : > { %v8322_v14 = vadd.f32 %v8321_v17, %v6519_v48  ;;  %v6536_v40 = vmax.f32 %v5512_v46, 0.0  ;;  %v8460_v1 = vadd.f32 %v8459_v8, %v6521_v7  ;;  %v5513_v58 = vadd.f32 %v14930_v33, %v4405_v9  ;;  %v15170_v57 = vpop.f32.mrf.mxu1 }
 0x42d   : > { %v6535_v6 = vmax.f32 %v5511_v37, 0.0  ;;  %v4418_v52 = vmul.f32 %v14861_v20, %v15010_v61  ;;  %v8254_v26 = vadd.f32 %v8253_v59, %v6534_v50  ;;  %v4420_v42 = vmul.f32 %v14872_v13, %v15017_v22  ;;  %v15176_v17 = vpop.f32.mrf.mxu0 }
 0x42e   : > { %v8392_v36 = vadd.f32 %v8391_v44, %v6536_v40  ;;  %v4419_v29 = vmul.f32 %v14890_v2, %v15021_v15  ;;  %v6537_v63 = vmax.f32 %v5513_v58, 0.0  ;;  %v4421_v8 = vmul.f32 %v14914_v56, %v15027_v38  ;;  %v15181_v61 = vpop.f32.mrf.mxu1 }
 0x42f   : > { %v8323_v23 = vadd.f32 %v8322_v14, %v6535_v6  ;;  %v5526_v34 = vadd.f32 %v14869_v49, %v4418_v52  ;;  %v5528_v28 = vadd.f32 %v14881_v39, %v4420_v42  ;;  %v4434_v22 = vmul.f32 %v14861_v20, %v15033_v41  ;;  %v15189_v31 = vpop.f32.mrf.mxu0 }
 0x430   : > { %v5527_v55 = vadd.f32 %v14899_v62, %v4419_v29  ;;  %v4436_v15 = vmul.f32 %v14872_v13, %v15040_v4  ;;  %v8461_v47 = vadd.f32 %v8460_v1, %v6537_v63  ;;  %v5529_v10 = vadd.f32 %v14930_v33, %v4421_v8  ;;  %v15194_v46 = vpop.f32.mrf.mxu1 }
 0x431   : > { %v6550_v48 = vmax.f32 %v5526_v34, 0.0  ;;  %v4435_v38 = vmul.f32 %v14890_v2, %v15050_v60  ;;  %v6552_v59 = vmax.f32 %v5528_v28, 0.0  ;;  %v5542_v37 = vadd.f32 %v14869_v49, %v4434_v22  ;;  %v15198_v9 = vpop.f32.mrf.mxu0 }
 0x432   : > { %v6551_v7 = vmax.f32 %v5527_v55, 0.0  ;;  %v5544_v41 = vadd.f32 %v14881_v39, %v4436_v15  ;;  %v6553_v44 = vmax.f32 %v5529_v10, 0.0  ;;  %v4437_v50 = vmul.f32 %v14914_v56, %v15056_v12  ;;  %v15203_v40 = vpop.f32.mrf.mxu1 }
 0x433   : > { %v8255_v4 = vadd.f32 %v8254_v26, %v6550_v48  ;;  %v5543_v14 = vadd.f32 %v14899_v62, %v4435_v38  ;;  %v8393_v60 = vadd.f32 %v8392_v36, %v6552_v59  ;;  %v6566_v6 = vmax.f32 %v5542_v37, 0.0  ;;  %v15205_v52 = vpop.f32.mrf.mxu0 }
 0x434   : > { %v8324_v1 = vadd.f32 %v8323_v23, %v6551_v7  ;;  %v6568_v58 = vmax.f32 %v5544_v41, 0.0  ;;  %v8462_v42 = vadd.f32 %v8461_v47, %v6553_v44  ;;  %v5545_v63 = vadd.f32 %v14930_v33, %v4437_v50  ;;  %v15210_v34 = vpop.f32.mrf.mxu1 }
 0x435   : > { %v6567_v29 = vmax.f32 %v5543_v14, 0.0  ;;  %v4450_v26 = vmul.f32 %v14861_v20, %v15060_v43  ;;  %v8256_v8 = vadd.f32 %v8255_v4, %v6566_v6  ;;  %v4452_v12 = vmul.f32 %v14872_v13, %v15067_v19  ;;  %v15216_v23 = vpop.f32.mrf.mxu0 }
 0x436   : > { %v8394_v28 = vadd.f32 %v8393_v60, %v6568_v58  ;;  %v4451_v36 = vmul.f32 %v14890_v2, %v15071_v11  ;;  %v6569_v22 = vmax.f32 %v5545_v63, 0.0  ;;  %v4453_v47 = vmul.f32 %v14914_v56, %v15077_v32  ;;  %v15221_v43 = vpop.f32.mrf.mxu1 }
 0x437   : > { %v8325_v55 = vadd.f32 %v8324_v1, %v6567_v29  ;;  %v5558_v15 = vadd.f32 %v14869_v49, %v4450_v26  ;;  %v5560_v48 = vadd.f32 %v14881_v39, %v4452_v12  ;;  %v4466_v19 = vmul.f32 %v14861_v20, %v15083_v45  ;;  %v15229_v38 = vpop.f32.mrf.mxu0 }
 0x438   : > { %v5559_v10 = vadd.f32 %v14899_v62, %v4451_v36  ;;  %v4468_v11 = vmul.f32 %v14872_v13, %v15090_v53  ;;  %v8463_v59 = vadd.f32 %v8462_v42, %v6569_v22  ;;  %v5561_v37 = vadd.f32 %v14930_v33, %v4453_v47  ;;  %v15234_v41 = vpop.f32.mrf.mxu1 }
 0x439   : > { %v6582_v7 = vmax.f32 %v5558_v15, 0.0  ;;  %v4467_v32 = vmul.f32 %v14890_v2, %v15100_v18  ;;  %v6584_v4 = vmax.f32 %v5560_v48, 0.0  ;;  %v5574_v14 = vadd.f32 %v14869_v49, %v4466_v19  ;;  %v15238_v50 = vpop.f32.mrf.mxu0 }
 0x43a   : > { %v6583_v44 = vmax.f32 %v5559_v10, 0.0  ;;  %v5576_v45 = vadd.f32 %v14881_v39, %v4468_v11  ;;  %v6585_v60 = vmax.f32 %v5561_v37, 0.0  ;;  %v4469_v6 = vmul.f32 %v14914_v56, %v15106_v35  ;;  %v15243_v58 = vpop.f32.mrf.mxu1 }
 0x43b   : > { %v8257_v53 = vadd.f32 %v8256_v8, %v6582_v7  ;;  %v5575_v1 = vadd.f32 %v14899_v62, %v4467_v32  ;;  %v8395_v18 = vadd.f32 %v8394_v28, %v6584_v4  ;;  %v6598_v29 = vmax.f32 %v5574_v14, 0.0  ;;  %v15245_v26 = vpop.f32.mrf.mxu0 }
 0x43c   : > { %v8326_v42 = vadd.f32 %v8325_v55, %v6583_v44  ;;  %v6600_v63 = vmax.f32 %v5576_v45, 0.0  ;;  %v8464_v12 = vadd.f32 %v8463_v59, %v6585_v60  ;;  %v5577_v22 = vadd.f32 %v14930_v33, %v4469_v6  ;;  %v15250_v15 = vpop.f32.mrf.mxu1 }
 0x43d   : > { %v6599_v36 = vmax.f32 %v5575_v1, 0.0  ;;  %v4482_v8 = vmul.f32 %v14861_v20, %v15110_v3  ;;  %v8258_v47 = vadd.f32 %v8257_v53, %v6598_v29  ;;  %v4484_v35 = vmul.f32 %v14872_v13, %v15117_v21  ;;  %v15256_v55 = vpop.f32.mrf.mxu0 }
 0x43e   : > { %v8396_v48 = vadd.f32 %v8395_v18, %v6600_v63  ;;  %v4483_v28 = vmul.f32 %v14890_v2, %v15121_v51  ;;  %v6601_v19 = vmax.f32 %v5577_v22, 0.0  ;;  %v4485_v59 = vmul.f32 %v14914_v56, %v15127_v16  ;;  %v15261_v3 = vpop.f32.mrf.mxu1 }
 0x43f   : > { %v8327_v10 = vadd.f32 %v8326_v42, %v6599_v36  ;;  %v5590_v11 = vadd.f32 %v14869_v49, %v4482_v8  ;;  %v5592_v7 = vadd.f32 %v14881_v39, %v4484_v35  ;;  %v4498_v21 = vmul.f32 %v14861_v20, %v15133_v54  ;;  %v15269_v32 = vpop.f32.mrf.mxu0 }
 0x440   : > { %v5591_v37 = vadd.f32 %v14899_v62, %v4483_v28  ;;  %v4500_v51 = vmul.f32 %v14872_v13, %v15140_v25  ;;  %v8465_v4 = vadd.f32 %v8464_v12, %v6601_v19  ;;  %v5593_v14 = vadd.f32 %v14930_v33, %v4485_v59  ;;  %v15274_v45 = vpop.f32.mrf.mxu1 }
 0x441   : > { %v6614_v44 = vmax.f32 %v5590_v11, 0.0  ;;  %v4499_v16 = vmul.f32 %v14890_v2, %v15149_v5  ;;  %v6616_v53 = vmax.f32 %v5592_v7, 0.0  ;;  %v5606_v1 = vadd.f32 %v14869_v49, %v4498_v21  ;;  %v15278_v6 = vpop.f32.mrf.mxu0 }
 0x442   : > { %v6615_v60 = vmax.f32 %v5591_v37, 0.0  ;;  %v5608_v54 = vadd.f32 %v14881_v39, %v4500_v51  ;;  %v6617_v18 = vmax.f32 %v5593_v14, 0.0  ;;  %v4501_v29 = vmul.f32 %v14914_v56, %v15154_v30  ;;  %v15283_v63 = vpop.f32.mrf.mxu1 }
 0x443   : > { %v8259_v25 = vadd.f32 %v8258_v47, %v6614_v44  ;;  %v5607_v42 = vadd.f32 %v14899_v62, %v4499_v16  ;;  %v8397_v5 = vadd.f32 %v8396_v48, %v6616_v53  ;;  %v6630_v36 = vmax.f32 %v5606_v1, 0.0  ;;  %v15285_v8 = vpop.f32.mrf.mxu0 }
 0x444   : > { %v8328_v12 = vadd.f32 %v8327_v10, %v6615_v60  ;;  %v6632_v22 = vmax.f32 %v5608_v54, 0.0  ;;  %v8466_v35 = vadd.f32 %v8465_v4, %v6617_v18  ;;  %v5609_v19 = vadd.f32 %v14930_v33, %v4501_v29  ;;  %v15290_v11 = vpop.f32.mrf.mxu1 }
 0x445   : > { %v6631_v28 = vmax.f32 %v5607_v42, 0.0  ;;  %v4514_v47 = vmul.f32 %v14861_v20, %v15158_v24  ;;  %v8260_v59 = vadd.f32 %v8259_v25, %v6630_v36  ;;  %v4516_v30 = vmul.f32 %v14872_v13, %v15163_v0  ;;  %v15296_v10 = vpop.f32.mrf.mxu0 }
 0x446   : > { %v8398_v7 = vadd.f32 %v8397_v5, %v6632_v22  ;;  %v4515_v48 = vmul.f32 %v14890_v2, %v15165_v27  ;;  %v6633_v21 = vmax.f32 %v5609_v19, 0.0  ;;  %v4517_v4 = vmul.f32 %v14914_v56, %v15170_v57  ;;  %v15301_v24 = vpop.f32.mrf.mxu1 }
 0x447   : > { %v8329_v37 = vadd.f32 %v8328_v12, %v6631_v28  ;;  %v5622_v51 = vadd.f32 %v14869_v49, %v4514_v47  ;;  %v5624_v44 = vadd.f32 %v14881_v39, %v4516_v30  ;;  %v4530_v0 = vmul.f32 %v14861_v20, %v15176_v17  ;;  %v15309_v16 = vpop.f32.mrf.mxu0 }
 0x448   : > { %v5623_v14 = vadd.f32 %v14899_v62, %v4515_v48  ;;  %v4532_v27 = vmul.f32 %v14872_v13, %v15181_v61  ;;  %v8467_v53 = vadd.f32 %v8466_v35, %v6633_v21  ;;  %v5625_v1 = vadd.f32 %v14930_v33, %v4517_v4  ;;  %v15314_v54 = vpop.f32.mrf.mxu1 }
 0x449   : > { %v6646_v60 = vmax.f32 %v5622_v51, 0.0  ;;  %v4531_v57 = vmul.f32 %v14890_v2, %v15189_v31  ;;  %v6648_v25 = vmax.f32 %v5624_v44, 0.0  ;;  %v5638_v42 = vadd.f32 %v14869_v49, %v4530_v0  ;;  %v15318_v29 = vpop.f32.mrf.mxu0 }
 0x44a   : > { %v6647_v18 = vmax.f32 %v5623_v14, 0.0  ;;  %v5640_v17 = vadd.f32 %v14881_v39, %v4532_v27  ;;  %v6649_v5 = vmax.f32 %v5625_v1, 0.0  ;;  %v4533_v36 = vmul.f32 %v14914_v56, %v15194_v46  ;;  %v15323_v22 = vpop.f32.mrf.mxu1 }
 0x44b   : > { %v8261_v61 = vadd.f32 %v8260_v59, %v6646_v60  ;;  %v5639_v12 = vadd.f32 %v14899_v62, %v4531_v57  ;;  %v8399_v31 = vadd.f32 %v8398_v7, %v6648_v25  ;;  %v6662_v28 = vmax.f32 %v5638_v42, 0.0  ;;  %v15325_v47 = vpop.f32.mrf.mxu0 }
 0x44c   : > { %v8330_v35 = vadd.f32 %v8329_v37, %v6647_v18  ;;  %v6664_v19 = vmax.f32 %v5640_v17, 0.0  ;;  %v8468_v30 = vadd.f32 %v8467_v53, %v6649_v5  ;;  %v5641_v21 = vadd.f32 %v14930_v33, %v4533_v36  ;;  %v15330_v51 = vpop.f32.mrf.mxu1 }
 0x44d   : > { %v6663_v48 = vmax.f32 %v5639_v12, 0.0  ;;  %v4546_v59 = vmul.f32 %v14861_v20, %v15198_v9  ;;  %v8262_v4 = vadd.f32 %v8261_v61, %v6662_v28  ;;  %v4548_v46 = vmul.f32 %v14872_v13, %v15203_v40  ;;  %v15336_v37 = vpop.f32.mrf.mxu0 }
 0x44e   : > { %v8400_v44 = vadd.f32 %v8399_v31, %v6664_v19  ;;  %v4547_v7 = vmul.f32 %v14890_v2, %v15205_v52  ;;  %v6665_v0 = vmax.f32 %v5641_v21, 0.0  ;;  %v4549_v53 = vmul.f32 %v14914_v56, %v15210_v34  ;;  %v15341_v9 = vpop.f32.mrf.mxu1 }
 0x44f   : > { %v8331_v14 = vadd.f32 %v8330_v35, %v6663_v48  ;;  %v5654_v27 = vadd.f32 %v14869_v49, %v4546_v59  ;;  %v5656_v60 = vadd.f32 %v14881_v39, %v4548_v46  ;;  %v4562_v40 = vmul.f32 %v14861_v20, %v15216_v23  ;;  %v15349_v57 = vpop.f32.mrf.mxu0 }
 0x450   : > { %v5655_v1 = vadd.f32 %v14899_v62, %v4547_v7  ;;  %v4564_v52 = vmul.f32 %v14872_v13, %v15221_v43  ;;  %v8469_v25 = vadd.f32 %v8468_v30, %v6665_v0  ;;  %v5657_v42 = vadd.f32 %v14930_v33, %v4549_v53  ;;  %v15354_v17 = vpop.f32.mrf.mxu1 }
 0x451   : > { %v6678_v18 = vmax.f32 %v5654_v27, 0.0  ;;  %v4563_v34 = vmul.f32 %v14890_v2, %v15229_v38  ;;  %v6680_v61 = vmax.f32 %v5656_v60, 0.0  ;;  %v5670_v12 = vadd.f32 %v14869_v49, %v4562_v40  ;;  %v15358_v36 = vpop.f32.mrf.mxu0 }
 0x452   : > { %v6679_v5 = vmax.f32 %v5655_v1, 0.0  ;;  %v5672_v23 = vadd.f32 %v14881_v39, %v4564_v52  ;;  %v6681_v31 = vmax.f32 %v5657_v42, 0.0  ;;  %v4565_v28 = vmul.f32 %v14914_v56, %v15234_v41  ;;  %v15363_v19 = vpop.f32.mrf.mxu1 }
 0x453   : > { %v8263_v43 = vadd.f32 %v8262_v4, %v6678_v18  ;;  %v5671_v35 = vadd.f32 %v14899_v62, %v4563_v34  ;;  %v8401_v38 = vadd.f32 %v8400_v44, %v6680_v61  ;;  %v6694_v48 = vmax.f32 %v5670_v12, 0.0  ;;  %v15365_v59 = vpop.f32.mrf.mxu0 }
 0x454   : > { %v8332_v30 = vadd.f32 %v8331_v14, %v6679_v5  ;;  %v6696_v21 = vmax.f32 %v5672_v23, 0.0  ;;  %v8470_v46 = vadd.f32 %v8469_v25, %v6681_v31  ;;  %v5673_v0 = vadd.f32 %v14930_v33, %v4565_v28  ;;  %v15370_v27 = vpop.f32.mrf.mxu1 }
 0x455   : > { %v6695_v7 = vmax.f32 %v5671_v35, 0.0  ;;  %v4578_v4 = vmul.f32 %v14861_v20, %v15238_v50  ;;  %v8264_v53 = vadd.f32 %v8263_v43, %v6694_v48  ;;  %v4580_v41 = vmul.f32 %v14872_v13, %v15243_v58  ;;  %v15376_v14 = vpop.f32.mrf.mxu0 }
 0x456   : > { %v8402_v60 = vadd.f32 %v8401_v38, %v6696_v21  ;;  %v4579_v44 = vmul.f32 %v14890_v2, %v15245_v26  ;;  %v6697_v40 = vmax.f32 %v5673_v0, 0.0  ;;  %v4581_v25 = vmul.f32 %v14914_v56, %v15250_v15  ;;  %v15381_v50 = vpop.f32.mrf.mxu1 }
 0x457   : > { %v8333_v1 = vadd.f32 %v8332_v30, %v6695_v7  ;;  %v5686_v52 = vadd.f32 %v14869_v49, %v4578_v4  ;;  %v5688_v18 = vadd.f32 %v14881_v39, %v4580_v41  ;;  %v4594_v58 = vmul.f32 %v14861_v20, %v15256_v55  ;;  %v15389_v34 = vpop.f32.mrf.mxu0 }
 0x458   : > { %v5687_v42 = vadd.f32 %v14899_v62, %v4579_v44  ;;  %v4596_v26 = vmul.f32 %v14872_v13, %v15261_v3  ;;  %v8471_v61 = vadd.f32 %v8470_v46, %v6697_v40  ;;  %v5689_v12 = vadd.f32 %v14930_v33, %v4581_v25  ;;  %v15394_v23 = vpop.f32.mrf.mxu1 }
 0x459   : > { %v6710_v5 = vmax.f32 %v5686_v52, 0.0  ;;  %v4595_v15 = vmul.f32 %v14890_v2, %v15269_v32  ;;  %v6712_v43 = vmax.f32 %v5688_v18, 0.0  ;;  %v5702_v35 = vadd.f32 %v14869_v49, %v4594_v58  ;;  %v15398_v28 = vpop.f32.mrf.mxu0 }
 0x45a   : > { %v6711_v31 = vmax.f32 %v5687_v42, 0.0  ;;  %v5704_v55 = vadd.f32 %v14881_v39, %v4596_v26  ;;  %v6713_v38 = vmax.f32 %v5689_v12, 0.0  ;;  %v4597_v48 = vmul.f32 %v14914_v56, %v15274_v45  ;;  %v15403_v21 = vpop.f32.mrf.mxu1 }
 0x45b   : > { %v8265_v3 = vadd.f32 %v8264_v53, %v6710_v5  ;;  %v5703_v30 = vadd.f32 %v14899_v62, %v4595_v15  ;;  %v8403_v32 = vadd.f32 %v8402_v60, %v6712_v43  ;;  %v6726_v7 = vmax.f32 %v5702_v35, 0.0  ;;  %v15405_v4 = vpop.f32.mrf.mxu0 }
 0x45c   : > { %v8334_v46 = vadd.f32 %v8333_v1, %v6711_v31  ;;  %v6728_v0 = vmax.f32 %v5704_v55, 0.0  ;;  %v8472_v41 = vadd.f32 %v8471_v61, %v6713_v38  ;;  %v5705_v40 = vadd.f32 %v14930_v33, %v4597_v48  ;;  %v15410_v52 = vpop.f32.mrf.mxu1 }
 0x45d   : > { %v6727_v44 = vmax.f32 %v5703_v30, 0.0  ;;  %v4610_v53 = vmul.f32 %v14861_v20, %v15278_v6  ;;  %v8266_v25 = vadd.f32 %v8265_v3, %v6726_v7  ;;  %v4612_v45 = vmul.f32 %v14872_v13, %v15283_v63  ;;  %v15416_v1 = vpop.f32.mrf.mxu0 }
 0x45e   : > { %v8404_v18 = vadd.f32 %v8403_v32, %v6728_v0  ;;  %v4611_v60 = vmul.f32 %v14890_v2, %v15285_v8  ;;  %v6729_v58 = vmax.f32 %v5705_v40, 0.0  ;;  %v4613_v61 = vmul.f32 %v14914_v56, %v15290_v11  ;;  %v15421_v6 = vpop.f32.mrf.mxu1 }
 0x45f   : > { %v8335_v42 = vadd.f32 %v8334_v46, %v6727_v44  ;;  %v5718_v26 = vadd.f32 %v14869_v49, %v4610_v53  ;;  %v5720_v5 = vadd.f32 %v14881_v39, %v4612_v45  ;;  %v4626_v63 = vmul.f32 %v14861_v20, %v15296_v10  ;;  %v15429_v15 = vpop.f32.mrf.mxu0 }
 0x460   : > { %v5719_v12 = vadd.f32 %v14899_v62, %v4611_v60  ;;  %v4628_v8 = vmul.f32 %v14872_v13, %v15301_v24  ;;  %v8473_v43 = vadd.f32 %v8472_v41, %v6729_v58  ;;  %v5721_v35 = vadd.f32 %v14930_v33, %v4613_v61  ;;  %v15434_v55 = vpop.f32.mrf.mxu1 }
 0x461   : > { %v6742_v31 = vmax.f32 %v5718_v26, 0.0  ;;  %v4627_v11 = vmul.f32 %v14890_v2, %v15309_v16  ;;  %v6744_v3 = vmax.f32 %v5720_v5, 0.0  ;;  %v5734_v30 = vadd.f32 %v14869_v49, %v4626_v63  ;;  %v15438_v48 = vpop.f32.mrf.mxu0 }
 0x462   : > { %v6743_v38 = vmax.f32 %v5719_v12, 0.0  ;;  %v5736_v10 = vadd.f32 %v14881_v39, %v4628_v8  ;;  %v6745_v32 = vmax.f32 %v5721_v35, 0.0  ;;  %v4629_v7 = vmul.f32 %v14914_v56, %v15314_v54  ;;  %v15443_v0 = vpop.f32.mrf.mxu1 }
 0x463   : > { %v8267_v24 = vadd.f32 %v8266_v25, %v6742_v31  ;;  %v5735_v46 = vadd.f32 %v14899_v62, %v4627_v11  ;;  %v8405_v16 = vadd.f32 %v8404_v18, %v6744_v3  ;;  %v6758_v44 = vmax.f32 %v5734_v30, 0.0  ;;  %v15445_v53 = vpop.f32.mrf.mxu0 }
 0x464   : > { %v8336_v41 = vadd.f32 %v8335_v42, %v6743_v38  ;;  %v6760_v40 = vmax.f32 %v5736_v10, 0.0  ;;  %v8474_v45 = vadd.f32 %v8473_v43, %v6745_v32  ;;  %v5737_v58 = vadd.f32 %v14930_v33, %v4629_v7  ;;  %v15450_v26 = vpop.f32.mrf.mxu1 }
 0x465   : > { %v6759_v60 = vmax.f32 %v5735_v46, 0.0  ;;  %v4642_v25 = vmul.f32 %v14861_v20, %v15318_v29  ;;  %v8268_v61 = vadd.f32 %v8267_v24, %v6758_v44  ;;  %v4644_v54 = vmul.f32 %v14872_v13, %v15323_v22  ;;  %v15456_v42 = vpop.f32.mrf.mxu0 }
 0x466   : > { %v8406_v5 = vadd.f32 %v8405_v16, %v6760_v40  ;;  %v4643_v18 = vmul.f32 %v14890_v2, %v15325_v47  ;;  %v6761_v63 = vmax.f32 %v5737_v58, 0.0  ;;  %v4645_v43 = vmul.f32 %v14914_v56, %v15330_v51  ;;  %v15461_v29 = vpop.f32.mrf.mxu1 }
 0x467   : > { %v8337_v12 = vadd.f32 %v8336_v41, %v6759_v60  ;;  %v5750_v8 = vadd.f32 %v14869_v49, %v4642_v25  ;;  %v5752_v31 = vadd.f32 %v14881_v39, %v4644_v54  ;;  %v4658_v22 = vmul.f32 %v14861_v20, %v15336_v37  ;;  %v15469_v11 = vpop.f32.mrf.mxu0 }
 0x468   : > { %v5751_v35 = vadd.f32 %v14899_v62, %v4643_v18  ;;  %v4660_v47 = vmul.f32 %v14872_v13, %v15341_v9  ;;  %v8475_v3 = vadd.f32 %v8474_v45, %v6761_v63  ;;  %v5753_v30 = vadd.f32 %v14930_v33, %v4645_v43  ;;  %v15474_v10 = vpop.f32.mrf.mxu1 }
 0x469   : > { %v6774_v38 = vmax.f32 %v5750_v8, 0.0  ;;  %v4659_v51 = vmul.f32 %v14890_v2, %v15349_v57  ;;  %v6776_v24 = vmax.f32 %v5752_v31, 0.0  ;;  %v5766_v46 = vadd.f32 %v14869_v49, %v4658_v22  ;;  %v15478_v7 = vpop.f32.mrf.mxu0 }
 0x46a   : > { %v6775_v32 = vmax.f32 %v5751_v35, 0.0  ;;  %v5768_v37 = vadd.f32 %v14881_v39, %v4660_v47  ;;  %v6777_v16 = vmax.f32 %v5753_v30, 0.0  ;;  %v4661_v44 = vmul.f32 %v14914_v56, %v15354_v17  ;;  %v15483_v40 = vpop.f32.mrf.mxu1 }
 0x46b   : > { %v8269_v9 = vadd.f32 %v8268_v61, %v6774_v38  ;;  %v5767_v41 = vadd.f32 %v14899_v62, %v4659_v51  ;;  %v8407_v57 = vadd.f32 %v8406_v5, %v6776_v24  ;;  %v6790_v60 = vmax.f32 %v5766_v46, 0.0  ;;  %v15485_v25 = vpop.f32.mrf.mxu0 }
 0x46c   : > { %v8338_v45 = vadd.f32 %v8337_v12, %v6775_v32  ;;  %v6792_v58 = vmax.f32 %v5768_v37, 0.0  ;;  %v8476_v54 = vadd.f32 %v8475_v3, %v6777_v16  ;;  %v5769_v63 = vadd.f32 %v14930_v33, %v4661_v44  ;;  %v15490_v8 = vpop.f32.mrf.mxu1 }
 0x46d   : > { %v6791_v18 = vmax.f32 %v5767_v41, 0.0  ;;  %v4674_v61 = vmul.f32 %v14861_v20, %v15358_v36  ;;  %v8270_v43 = vadd.f32 %v8269_v9, %v6790_v60  ;;  %v4676_v17 = vmul.f32 %v14872_v13, %v15363_v19  ;;  %v15496_v12 = vpop.f32.mrf.mxu0 }
 0x46e   : > { %v8408_v31 = vadd.f32 %v8407_v57, %v6792_v58  ;;  %v4675_v5 = vmul.f32 %v14890_v2, %v15365_v59  ;;  %v6793_v22 = vmax.f32 %v5769_v63, 0.0  ;;  %v4677_v3 = vmul.f32 %v14914_v56, %v15370_v27  ;;  %v15501_v36 = vpop.f32.mrf.mxu1 }
 0x46f   : > { %v8339_v35 = vadd.f32 %v8338_v45, %v6791_v18  ;;  %v5782_v47 = vadd.f32 %v14869_v49, %v4674_v61  ;;  %v5784_v38 = vadd.f32 %v14881_v39, %v4676_v17  ;;  %v4690_v19 = vmul.f32 %v14861_v20, %v15376_v14  ;;  %v15509_v51 = vpop.f32.mrf.mxu0 }
 0x470   : > { %v5783_v30 = vadd.f32 %v14899_v62, %v4675_v5  ;;  %v4692_v59 = vmul.f32 %v14872_v13, %v15381_v50  ;;  %v8477_v24 = vadd.f32 %v8476_v54, %v6793_v22  ;;  %v5785_v46 = vadd.f32 %v14930_v33, %v4677_v3  ;;  %v15514_v37 = vpop.f32.mrf.mxu1 }
 0x471   : > { %v6806_v32 = vmax.f32 %v5782_v47, 0.0  ;;  %v4691_v27 = vmul.f32 %v14890_v2, %v15389_v34  ;;  %v6808_v9 = vmax.f32 %v5784_v38, 0.0  ;;  %v5798_v41 = vadd.f32 %v14869_v49, %v4690_v19  ;;  %v15518_v44 = vpop.f32.mrf.mxu0 }
 0x472   : > { %v6807_v16 = vmax.f32 %v5783_v30, 0.0  ;;  %v5800_v14 = vadd.f32 %v14881_v39, %v4692_v59  ;;  %v6809_v57 = vmax.f32 %v5785_v46, 0.0  ;;  %v4693_v60 = vmul.f32 %v14914_v56, %v15394_v23  ;;  %v15523_v58 = vpop.f32.mrf.mxu1 }
 0x473   : > { %v8271_v50 = vadd.f32 %v8270_v43, %v6806_v32  ;;  %v5799_v45 = vadd.f32 %v14899_v62, %v4691_v27  ;;  %v8409_v34 = vadd.f32 %v8408_v31, %v6808_v9  ;;  %v6822_v18 = vmax.f32 %v5798_v41, 0.0  ;;  %v15525_v61 = vpop.f32.mrf.mxu0 }
 0x474   : > { %v8340_v54 = vadd.f32 %v8339_v35, %v6807_v16  ;;  %v6824_v63 = vmax.f32 %v5800_v14, 0.0  ;;  %v8478_v17 = vadd.f32 %v8477_v24, %v6809_v57  ;;  %v5801_v22 = vadd.f32 %v14930_v33, %v4693_v60  ;;  %v15530_v47 = vpop.f32.mrf.mxu1 }
 0x475   : > { %v6823_v5 = vmax.f32 %v5799_v45, 0.0  ;;  %v4706_v43 = vmul.f32 %v14861_v20, %v15398_v28  ;;  %v8272_v3 = vadd.f32 %v8271_v50, %v6822_v18  ;;  %v4708_v23 = vmul.f32 %v14872_v13, %v15403_v21  ;;  %v15536_v35 = vpop.f32.mrf.mxu0 }
 0x476   : > { %v8410_v38 = vadd.f32 %v8409_v34, %v6824_v63  ;;  %v4707_v31 = vmul.f32 %v14890_v2, %v15405_v4  ;;  %v6825_v19 = vmax.f32 %v5801_v22, 0.0  ;;  %v4709_v24 = vmul.f32 %v14914_v56, %v15410_v52  ;;  %v15541_v28 = vpop.f32.mrf.mxu1 }
 0x477   : > { %v8341_v30 = vadd.f32 %v8340_v54, %v6823_v5  ;;  %v5814_v59 = vadd.f32 %v14869_v49, %v4706_v43  ;;  %v5816_v32 = vadd.f32 %v14881_v39, %v4708_v23  ;;  %v4722_v21 = vmul.f32 %v14861_v20, %v15416_v1  ;;  %v15549_v27 = vpop.f32.mrf.mxu0 }
 0x478   : > { %v5815_v46 = vadd.f32 %v14899_v62, %v4707_v31  ;;  %v4724_v4 = vmul.f32 %v14872_v13, %v15421_v6  ;;  %v8479_v9 = vadd.f32 %v8478_v17, %v6825_v19  ;;  %v5817_v41 = vadd.f32 %v14930_v33, %v4709_v24  ;;  %v15554_v14 = vpop.f32.mrf.mxu1 }
 0x479   : > { %v6838_v16 = vmax.f32 %v5814_v59, 0.0  ;;  %v4723_v52 = vmul.f32 %v14890_v2, %v15429_v15  ;;  %v6840_v50 = vmax.f32 %v5816_v32, 0.0  ;;  %v5830_v45 = vadd.f32 %v14869_v49, %v4722_v21  ;;  %v15558_v60 = vpop.f32.mrf.mxu0 }
 0x47a   : > { %v6839_v57 = vmax.f32 %v5815_v46, 0.0  ;;  %v5832_v1 = vadd.f32 %v14881_v39, %v4724_v4  ;;  %v6841_v34 = vmax.f32 %v5817_v41, 0.0  ;;  %v4725_v18 = vmul.f32 %v14914_v56, %v15434_v55  ;;  %v15563_v63 = vpop.f32.mrf.mxu1 }
 0x47b   : > { %v8273_v6 = vadd.f32 %v8272_v3, %v6838_v16  ;;  %v5831_v54 = vadd.f32 %v14899_v62, %v4723_v52  ;;  %v8411_v15 = vadd.f32 %v8410_v38, %v6840_v50  ;;  %v6854_v5 = vmax.f32 %v5830_v45, 0.0  ;;  %v15565_v43 = vpop.f32.mrf.mxu0 }
 0x47c   : > { %v8342_v17 = vadd.f32 %v8341_v30, %v6839_v57  ;;  %v6856_v22 = vmax.f32 %v5832_v1, 0.0  ;;  %v8480_v23 = vadd.f32 %v8479_v9, %v6841_v34  ;;  %v5833_v19 = vadd.f32 %v14930_v33, %v4725_v18  ;;  %v15570_v59 = vpop.f32.mrf.mxu1 }
 0x47d   : > { %v6855_v31 = vmax.f32 %v5831_v54, 0.0  ;;  %v4738_v3 = vmul.f32 %v14861_v20, %v15438_v48  ;;  %v8274_v24 = vadd.f32 %v8273_v6, %v6854_v5  ;;  %v4740_v55 = vmul.f32 %v14872_v13, %v15443_v0  ;;  %v15576_v30 = vpop.f32.mrf.mxu0 }
 0x47e   : > { %v8412_v32 = vadd.f32 %v8411_v15, %v6856_v22  ;;  %v4739_v38 = vmul.f32 %v14890_v2, %v15445_v53  ;;  %v6857_v21 = vmax.f32 %v5833_v19, 0.0  ;;  %v4741_v9 = vmul.f32 %v14914_v56, %v15450_v26  ;;  %v15581_v48 = vpop.f32.mrf.mxu1 }
 0x47f   : > { %v8343_v46 = vadd.f32 %v8342_v17, %v6855_v31  ;;  %v5846_v4 = vadd.f32 %v14869_v49, %v4738_v3  ;;  %v5848_v16 = vadd.f32 %v14881_v39, %v4740_v55  ;;  %v4754_v0 = vmul.f32 %v14861_v20, %v15456_v42  ;;  %v15589_v52 = vpop.f32.mrf.mxu0 }
 0x480   : > { %v5847_v41 = vadd.f32 %v14899_v62, %v4739_v38  ;;  %v4756_v53 = vmul.f32 %v14872_v13, %v15461_v29  ;;  %v8481_v50 = vadd.f32 %v8480_v23, %v6857_v21  ;;  %v5849_v45 = vadd.f32 %v14930_v33, %v4741_v9  ;;  %v15594_v1 = vpop.f32.mrf.mxu1 }
 0x481   : > { %v6870_v57 = vmax.f32 %v5846_v4, 0.0  ;;  %v4755_v26 = vmul.f32 %v14890_v2, %v15469_v11  ;;  %v6872_v6 = vmax.f32 %v5848_v16, 0.0  ;;  %v5862_v54 = vadd.f32 %v14869_v49, %v4754_v0  ;;  %v15598_v18 = vpop.f32.mrf.mxu0 }
 0x482   : > { %v6871_v34 = vmax.f32 %v5847_v41, 0.0  ;;  %v5864_v42 = vadd.f32 %v14881_v39, %v4756_v53  ;;  %v6873_v15 = vmax.f32 %v5849_v45, 0.0  ;;  %v4757_v5 = vmul.f32 %v14914_v56, %v15474_v10  ;;  %v15603_v22 = vpop.f32.mrf.mxu1 }
 0x483   : > { %v8275_v29 = vadd.f32 %v8274_v24, %v6870_v57  ;;  %v5863_v17 = vadd.f32 %v14899_v62, %v4755_v26  ;;  %v8413_v11 = vadd.f32 %v8412_v32, %v6872_v6  ;;  %v6886_v31 = vmax.f32 %v5862_v54, 0.0  ;;  %v15605_v3 = vpop.f32.mrf.mxu0 }
 0x484   : > { %v8344_v23 = vadd.f32 %v8343_v46, %v6871_v34  ;;  %v6888_v19 = vmax.f32 %v5864_v42, 0.0  ;;  %v8482_v55 = vadd.f32 %v8481_v50, %v6873_v15  ;;  %v5865_v21 = vadd.f32 %v14930_v33, %v4757_v5  ;;  %v15610_v4 = vpop.f32.mrf.mxu1 }
 0x485   : > { %v6887_v38 = vmax.f32 %v5863_v17, 0.0  ;;  %v4770_v24 = vmul.f32 %v14861_v20, %v15478_v7  ;;  %v8276_v9 = vadd.f32 %v8275_v29, %v6886_v31  ;;  %v4772_v10 = vmul.f32 %v14872_v13, %v15483_v40  ;;  %v15616_v46 = vpop.f32.mrf.mxu0 }
 0x486   : > { %v8414_v16 = vadd.f32 %v8413_v11, %v6888_v19  ;;  %v4771_v32 = vmul.f32 %v14890_v2, %v15485_v25  ;;  %v6889_v0 = vmax.f32 %v5865_v21, 0.0  ;;  %v4773_v50 = vmul.f32 %v14914_v56, %v15490_v8  ;;  %v15621_v7 = vpop.f32.mrf.mxu1 }
 0x487   : > { %v8345_v41 = vadd.f32 %v8344_v23, %v6887_v38  ;;  %v5878_v53 = vadd.f32 %v14869_v49, %v4770_v24  ;;  %v5880_v57 = vadd.f32 %v14881_v39, %v4772_v10  ;;  %v4786_v40 = vmul.f32 %v14861_v20, %v15496_v12  ;;  %v15629_v26 = vpop.f32.mrf.mxu0 }
 0x488   : > { %v5879_v45 = vadd.f32 %v14899_v62, %v4771_v32  ;;  %v4788_v25 = vmul.f32 %v14872_v13, %v15501_v36  ;;  %v8483_v6 = vadd.f32 %v8482_v55, %v6889_v0  ;;  %v5881_v54 = vadd.f32 %v14930_v33, %v4773_v50  ;;  %v15634_v42 = vpop.f32.mrf.mxu1 }
 0x489   : > { %v6902_v34 = vmax.f32 %v5878_v53, 0.0  ;;  %v4787_v8 = vmul.f32 %v14890_v2, %v15509_v51  ;;  %v6904_v29 = vmax.f32 %v5880_v57, 0.0  ;;  %v5894_v17 = vadd.f32 %v14869_v49, %v4786_v40  ;;  %v15638_v5 = vpop.f32.mrf.mxu0 }
 0x48a   : > { %v6903_v15 = vmax.f32 %v5879_v45, 0.0  ;;  %v5896_v12 = vadd.f32 %v14881_v39, %v4788_v25  ;;  %v6905_v36 = vmax.f32 %v5881_v54, 0.0  ;;  %v4789_v23 = vmul.f32 %v14914_v56, %v15514_v37  ;;  %v15643_v31 = vpop.f32.mrf.mxu1 }
 0x48b   : > { %v5895_v11 = vadd.f32 %v14899_v62, %v4787_v8  ;;  %v8277_v19 = vadd.f32 %v8276_v9, %v6902_v34  ;;  %v8415_v51 = vadd.f32 %v8414_v16, %v6904_v29  ;;  %v6918_v55 = vmax.f32 %v5894_v17, 0.0  ;;  %v15645_v38 = vpop.f32.mrf.mxu0 }
 0x48c   : > { %v8346_v21 = vadd.f32 %v8345_v41, %v6903_v15  ;;  %v6920_v24 = vmax.f32 %v5896_v12, 0.0  ;;  %v5897_v10 = vadd.f32 %v14930_v33, %v4789_v23  ;;  %v4802_v32 = vmul.f32 %v14861_v20, %v15518_v44  ;;  %v15650_v0 = vpop.f32.mrf.mxu1 }
 0x48d   : > { %v8484_v53 = vadd.f32 %v8483_v6, %v6905_v36  ;;  %v6919_v50 = vmax.f32 %v5895_v11, 0.0  ;;  %v4804_v37 = vmul.f32 %v14872_v13, %v15523_v58  ;;  %v4803_v9 = vmul.f32 %v14890_v2, %v15525_v61  ;;  %v15656_v16 = vpop.f32.mrf.mxu0 }
 0x48e   : > { %v8278_v57 = vadd.f32 %v8277_v19, %v6918_v55  ;;  %v6921_v41 = vmax.f32 %v5897_v10, 0.0  ;;  %v5910_v45 = vadd.f32 %v14869_v49, %v4802_v32  ;;  %v4805_v40 = vmul.f32 %v14914_v56, %v15530_v47  ;;  %v15661_v44 = vpop.f32.mrf.mxu1 }
 0x48f   : > { %v5912_v25 = vadd.f32 %v14881_v39, %v4804_v37  ;;  %v5911_v6 = vadd.f32 %v14899_v62, %v4803_v9  ;;  %v4818_v58 = vmul.f32 %v14861_v20, %v15536_v35  ;;  %v4820_v61 = vmul.f32 %v14872_v13, %v15541_v28  ;;  %v15669_v34 = vpop.f32.mrf.mxu0 }
 0x490   : > { %v8416_v54 = vadd.f32 %v8415_v51, %v6920_v24  ;;  %v6934_v8 = vmax.f32 %v5910_v45, 0.0  ;;  %v5913_v29 = vadd.f32 %v14930_v33, %v4805_v40  ;;  %v4819_v47 = vmul.f32 %v14890_v2, %v15549_v27  ;;  %v15674_v15 = vpop.f32.mrf.mxu1 }
 0x491   : > { %v6936_v17 = vmax.f32 %v5912_v25, 0.0  ;;  %v6935_v12 = vmax.f32 %v5911_v6, 0.0  ;;  %v5926_v36 = vadd.f32 %v14869_v49, %v4818_v58  ;;  %v5928_v35 = vadd.f32 %v14881_v39, %v4820_v61  ;;  %v15678_v11 = vpop.f32.mrf.mxu0 }
 0x492   : > { %v8347_v28 = vadd.f32 %v8346_v21, %v6919_v50  ;;  %v6937_v23 = vmax.f32 %v5913_v29, 0.0  ;;  %v5927_v19 = vadd.f32 %v14899_v62, %v4819_v47  ;;  %v4821_v51 = vmul.f32 %v14914_v56, %v15554_v14  ;;  %v15683_v55 = vpop.f32.mrf.mxu1 }
 0x493   : > { %v8485_v27 = vadd.f32 %v8484_v53, %v6921_v41  ;;  %v8279_v24 = vadd.f32 %v8278_v57, %v6934_v8  ;;  %v8417_v10 = vadd.f32 %v8416_v54, %v6936_v17  ;;  %v6950_v32 = vmax.f32 %v5926_v36, 0.0  ;;  %v15685_v37 = vpop.f32.mrf.mxu0 }
 0x494   : > { %v8348_v9 = vadd.f32 %v8347_v28, %v6935_v12  ;;  %v6952_v45 = vmax.f32 %v5928_v35, 0.0  ;;  %v5929_v40 = vadd.f32 %v14930_v33, %v4821_v51  ;;  %v4834_v21 = vmul.f32 %v14861_v20, %v15558_v60  ;;  %v15690_v50 = vpop.f32.mrf.mxu1 }
 0x495   : > { %v8486_v25 = vadd.f32 %v8485_v27, %v6937_v23  ;;  %v6951_v6 = vmax.f32 %v5927_v19, 0.0  ;;  %v4836_v14 = vmul.f32 %v14872_v13, %v15563_v63  ;;  %v4835_v53 = vmul.f32 %v14890_v2, %v15565_v43  ;;  %v15696_v57 = vpop.f32.mrf.mxu0 }
 0x496   : > { %v8280_v41 = vadd.f32 %v8279_v24, %v6950_v32  ;;  %v6953_v58 = vmax.f32 %v5929_v40, 0.0  ;;  %v5942_v61 = vadd.f32 %v14869_v49, %v4834_v21  ;;  %v4837_v54 = vmul.f32 %v14914_v56, %v15570_v59  ;;  %v15701_v60 = vpop.f32.mrf.mxu1 }
 0x497   : > { %v5944_v8 = vadd.f32 %v14881_v39, %v4836_v14  ;;  %v5943_v29 = vadd.f32 %v14899_v62, %v4835_v53  ;;  %v4850_v63 = vmul.f32 %v14861_v20, %v15576_v30  ;;  %v4852_v43 = vmul.f32 %v14872_v13, %v15581_v48  ;;  %v15709_v47 = vpop.f32.mrf.mxu0 }
 0x498   : > { %v8418_v17 = vadd.f32 %v8417_v10, %v6952_v45  ;;  %v6966_v12 = vmax.f32 %v5942_v61, 0.0  ;;  %v5945_v36 = vadd.f32 %v14930_v33, %v4837_v54  ;;  %v4851_v59 = vmul.f32 %v14890_v2, %v15589_v52  ;;  %v15714_v35 = vpop.f32.mrf.mxu1 }
 0x499   : > { %v6968_v28 = vmax.f32 %v5944_v8, 0.0  ;;  %v6967_v23 = vmax.f32 %v5943_v29, 0.0  ;;  %v5958_v19 = vadd.f32 %v14869_v49, %v4850_v63  ;;  %v5960_v30 = vadd.f32 %v14881_v39, %v4852_v43  ;;  %v15718_v51 = vpop.f32.mrf.mxu0 }
 0x49a   : > { %v8349_v48 = vadd.f32 %v8348_v9, %v6951_v6  ;;  %v6969_v27 = vmax.f32 %v5945_v36, 0.0  ;;  %v5959_v24 = vadd.f32 %v14899_v62, %v4851_v59  ;;  %v4853_v10 = vmul.f32 %v14914_v56, %v15594_v1  ;;  %v15723_v32 = vpop.f32.mrf.mxu1 }
 0x49b   : > { %v8487_v52 = vadd.f32 %v8486_v25, %v6953_v58  ;;  %v8281_v45 = vadd.f32 %v8280_v41, %v6966_v12  ;;  %v8419_v40 = vadd.f32 %v8418_v17, %v6968_v28  ;;  %v6982_v21 = vmax.f32 %v5958_v19, 0.0  ;;  %v15725_v14 = vpop.f32.mrf.mxu0 }
 0x49c   : > { %v8350_v53 = vadd.f32 %v8349_v48, %v6967_v23  ;;  %v6984_v61 = vmax.f32 %v5960_v30, 0.0  ;;  %v5961_v54 = vadd.f32 %v14930_v33, %v4853_v10  ;;  %v4866_v9 = vmul.f32 %v14861_v20, %v15598_v18  ;;  %v15730_v6 = vpop.f32.mrf.mxu1 }
 0x49d   : > { %v8488_v8 = vadd.f32 %v8487_v52, %v6969_v27  ;;  %v6983_v29 = vmax.f32 %v5959_v24, 0.0  ;;  %v4868_v1 = vmul.f32 %v14872_v13, %v15603_v22  ;;  %v4867_v25 = vmul.f32 %v14890_v2, %v15605_v3  ;;  %v15736_v41 = vpop.f32.mrf.mxu0 }
 0x49e   : > { %v8282_v58 = vadd.f32 %v8281_v45, %v6982_v21  ;;  %v6985_v63 = vmax.f32 %v5961_v54, 0.0  ;;  %v5974_v43 = vadd.f32 %v14869_v49, %v4866_v9  ;;  %v4869_v17 = vmul.f32 %v14914_v56, %v15610_v4  ;;  %v15741_v18 = vpop.f32.mrf.mxu1 }
 0x49f   : > { %v5976_v12 = vadd.f32 %v14881_v39, %v4868_v1  ;;  %v5975_v36 = vadd.f32 %v14899_v62, %v4867_v25  ;;  %v4882_v22 = vmul.f32 %v14861_v20, %v15616_v46  ;;  %v4884_v3 = vmul.f32 %v14872_v13, %v15621_v7  ;;  %v15749_v59 = vpop.f32.mrf.mxu0 }
 0x4a0   : > { %v8420_v28 = vadd.f32 %v8419_v40, %v6984_v61  ;;  %v6998_v23 = vmax.f32 %v5974_v43, 0.0  ;;  %v5977_v19 = vadd.f32 %v14930_v33, %v4869_v17  ;;  %v4883_v4 = vmul.f32 %v14890_v2, %v15629_v26  ;;  %v15754_v30 = vpop.f32.mrf.mxu1 }
 0x4a1   : > { %v7000_v48 = vmax.f32 %v5976_v12, 0.0  ;;  %v6999_v27 = vmax.f32 %v5975_v36, 0.0  ;;  %v5990_v24 = vadd.f32 %v14869_v49, %v4882_v22  ;;  %v5992_v46 = vadd.f32 %v14881_v39, %v4884_v3  ;;  %v15758_v10 = vpop.f32.mrf.mxu0 }
 0x4a2   : > { %v8351_v7 = vadd.f32 %v8350_v53, %v6983_v29  ;;  %v7001_v52 = vmax.f32 %v5977_v19, 0.0  ;;  %v5991_v45 = vadd.f32 %v14899_v62, %v4883_v4  ;;  %v4885_v40 = vmul.f32 %v14914_v56, %v15634_v42  ;;  %v15763_v21 = vpop.f32.mrf.mxu1 }
 0x4a3   : > { %v8489_v26 = vadd.f32 %v8488_v8, %v6985_v63  ;;  %v8283_v61 = vadd.f32 %v8282_v58, %v6998_v23  ;;  %v8421_v54 = vadd.f32 %v8420_v28, %v7000_v48  ;;  %v7014_v9 = vmax.f32 %v5990_v24, 0.0  ;;  %v15765_v1 = vpop.f32.mrf.mxu0 }
 0x4a4   : > { %v8352_v25 = vadd.f32 %v8351_v7, %v6999_v27  ;;  %v7016_v43 = vmax.f32 %v5992_v46, 0.0  ;;  %v5993_v17 = vadd.f32 %v14930_v33, %v4885_v40  ;;  %v4898_v53 = vmul.f32 %v14861_v20, %v15638_v5  ;;  %v15770_v29 = vpop.f32.mrf.mxu1 }
 0x4a5   : > { %v8490_v12 = vadd.f32 %v8489_v26, %v7001_v52  ;;  %v7015_v36 = vmax.f32 %v5991_v45, 0.0  ;;  %v4900_v42 = vmul.f32 %v14872_v13, %v15643_v31  ;;  %v4899_v8 = vmul.f32 %v14890_v2, %v15645_v38  ;;  %v15776_v58 = vpop.f32.mrf.mxu0 }
 0x4a6   : > { %v8284_v63 = vadd.f32 %v8283_v61, %v7014_v9  ;;  %v7017_v22 = vmax.f32 %v5993_v17, 0.0  ;;  %v6006_v3 = vadd.f32 %v14869_v49, %v4898_v53  ;;  %v4901_v28 = vmul.f32 %v14914_v56, %v15650_v0  ;;  %v15781_v5 = vpop.f32.mrf.mxu1 }
 0x4a7   : > { %v6008_v23 = vadd.f32 %v14881_v39, %v4900_v42  ;;  %v6007_v19 = vadd.f32 %v14899_v62, %v4899_v8  ;;  %v4914_v31 = vmul.f32 %v14861_v20, %v15656_v16  ;;  %v4916_v38 = vmul.f32 %v14872_v13, %v15661_v44  ;;  %v15789_v4 = vpop.f32.mrf.mxu0 }
 0x4a8   : > { %v8422_v48 = vadd.f32 %v8421_v54, %v7016_v43  ;;  %v7030_v27 = vmax.f32 %v6006_v3, 0.0  ;;  %v6009_v24 = vadd.f32 %v14930_v33, %v4901_v28  ;;  %v4915_v0 = vmul.f32 %v14890_v2, %v15669_v34  ;;  %v15794_v46 = vpop.f32.mrf.mxu1 }
 0x4a9   : > { %v7032_v7 = vmax.f32 %v6008_v23, 0.0  ;;  %v7031_v52 = vmax.f32 %v6007_v19, 0.0  ;;  %v6022_v45 = vadd.f32 %v14869_v49, %v4914_v31  ;;  %v6024_v16 = vadd.f32 %v14881_v39, %v4916_v38  ;;  %v15798_v40 = vpop.f32.mrf.mxu0 }
 0x4aa   : > { %v8353_v44 = vadd.f32 %v8352_v25, %v7015_v36  ;;  %v7033_v26 = vmax.f32 %v6009_v24, 0.0  ;;  %v6023_v61 = vadd.f32 %v14899_v62, %v4915_v0  ;;  %v4917_v54 = vmul.f32 %v14914_v56, %v15674_v15  ;;  %v15803_v9 = vpop.f32.mrf.mxu1 }
 0x4ab   : > { %v8491_v34 = vadd.f32 %v8490_v12, %v7017_v22  ;;  %v8285_v43 = vadd.f32 %v8284_v63, %v7030_v27  ;;  %v8423_v17 = vadd.f32 %v8422_v48, %v7032_v7  ;;  %v7046_v53 = vmax.f32 %v6022_v45, 0.0  ;;  %v15805_v42 = vpop.f32.mrf.mxu0 }
 0x4ac   : > { %v8354_v8 = vadd.f32 %v8353_v44, %v7031_v52  ;;  %v7048_v3 = vmax.f32 %v6024_v16, 0.0  ;;  %v6025_v28 = vadd.f32 %v14930_v33, %v4917_v54  ;;  %v4930_v25 = vmul.f32 %v14861_v20, %v15678_v11  ;;  %v15810_v36 = vpop.f32.mrf.mxu1 }
 0x4ad   : > { %v8492_v23 = vadd.f32 %v8491_v34, %v7033_v26  ;;  %v7047_v19 = vmax.f32 %v6023_v61, 0.0  ;;  %v4932_v15 = vmul.f32 %v14872_v13, %v15683_v55  ;;  %v4931_v12 = vmul.f32 %v14890_v2, %v15685_v37  ;;  %v15816_v63 = vpop.f32.mrf.mxu0 }
 0x4ae   : > { %v8286_v22 = vadd.f32 %v8285_v43, %v7046_v53  ;;  %v7049_v31 = vmax.f32 %v6025_v28, 0.0  ;;  %v6038_v38 = vadd.f32 %v14869_v49, %v4930_v25  ;;  %v4933_v48 = vmul.f32 %v14914_v56, %v15690_v50  ;;  %v15821_v11 = vpop.f32.mrf.mxu1 }
 0x4af   : > { %v6040_v27 = vadd.f32 %v14881_v39, %v4932_v15  ;;  %v6039_v24 = vadd.f32 %v14899_v62, %v4931_v12  ;;  %v4946_v55 = vmul.f32 %v14861_v20, %v15696_v57  ;;  %v4948_v37 = vmul.f32 %v14872_v13, %v15701_v60  ;;  %v15829_v0 = vpop.f32.mrf.mxu0 }
 0x4b0   : > { %v8424_v7 = vadd.f32 %v8423_v17, %v7048_v3  ;;  %v7062_v52 = vmax.f32 %v6038_v38, 0.0  ;;  %v6041_v45 = vadd.f32 %v14930_v33, %v4933_v48  ;;  %v4947_v50 = vmul.f32 %v14890_v2, %v15709_v47  ;;  %v15834_v16 = vpop.f32.mrf.mxu1 }
 0x4b1   : > { %v7064_v44 = vmax.f32 %v6040_v27, 0.0  ;;  %v7063_v26 = vmax.f32 %v6039_v24, 0.0  ;;  %v6054_v61 = vadd.f32 %v14869_v49, %v4946_v55  ;;  %v6056_v57 = vadd.f32 %v14881_v39, %v4948_v37  ;;  %v15838_v54 = vpop.f32.mrf.mxu0 }
 0x4b2   : > { %v8355_v60 = vadd.f32 %v8354_v8, %v7047_v19  ;;  %v7065_v34 = vmax.f32 %v6041_v45, 0.0  ;;  %v6055_v43 = vadd.f32 %v14899_v62, %v4947_v50  ;;  %v4949_v17 = vmul.f32 %v14914_v56, %v15714_v35  ;;  %v15843_v53 = vpop.f32.mrf.mxu1 }
 0x4b3   : > { %v8493_v47 = vadd.f32 %v8492_v23, %v7049_v31  ;;  %v8287_v3 = vadd.f32 %v8286_v22, %v7062_v52  ;;  %v8425_v28 = vadd.f32 %v8424_v7, %v7064_v44  ;;  %v7078_v25 = vmax.f32 %v6054_v61, 0.0  ;;  %v15845_v15 = vpop.f32.mrf.mxu0 }
 0x4b4   : > { %v8356_v12 = vadd.f32 %v8355_v60, %v7063_v26  ;;  %v7080_v38 = vmax.f32 %v6056_v57, 0.0  ;;  %v6057_v48 = vadd.f32 %v14930_v33, %v4949_v17  ;;  %v4962_v8 = vmul.f32 %v14861_v20, %v15718_v51  ;;  %v15850_v19 = vpop.f32.mrf.mxu1 }
 0x4b5   : > { %v8494_v27 = vadd.f32 %v8493_v47, %v7065_v34  ;;  %v7079_v24 = vmax.f32 %v6055_v43, 0.0  ;;  %v4964_v35 = vmul.f32 %v14872_v13, %v15723_v32  ;;  %v4963_v23 = vmul.f32 %v14890_v2, %v15725_v14  ;;  %v15856_v22 = vpop.f32.mrf.mxu0 }
 0x4b6   : > { %v8288_v31 = vadd.f32 %v8287_v3, %v7078_v25  ;;  %v7081_v55 = vmax.f32 %v6057_v48, 0.0  ;;  %v6070_v37 = vadd.f32 %v14869_v49, %v4962_v8  ;;  %v4965_v7 = vmul.f32 %v14914_v56, %v15730_v6  ;;  %v15861_v51 = vpop.f32.mrf.mxu1 }
 0x4b7   : > { %v6072_v52 = vadd.f32 %v14881_v39, %v4964_v35  ;;  %v6071_v45 = vadd.f32 %v14899_v62, %v4963_v23  ;;  %v4978_v32 = vmul.f32 %v14861_v20, %v15736_v41  ;;  %v4980_v14 = vmul.f32 %v14872_v13, %v15741_v18  ;;  %v15869_v50 = vpop.f32.mrf.mxu0 }
 0x4b8   : > { %v8426_v44 = vadd.f32 %v8425_v28, %v7080_v38  ;;  %v7094_v26 = vmax.f32 %v6070_v37, 0.0  ;;  %v6073_v61 = vadd.f32 %v14930_v33, %v4965_v7  ;;  %v4979_v6 = vmul.f32 %v14890_v2, %v15749_v59  ;;  %v15874_v57 = vpop.f32.mrf.mxu1 }
 0x4b9   : > { %v7096_v60 = vmax.f32 %v6072_v52, 0.0  ;;  %v7095_v34 = vmax.f32 %v6071_v45, 0.0  ;;  %v6086_v43 = vadd.f32 %v14869_v49, %v4978_v32  ;;  %v6088_v41 = vadd.f32 %v14881_v39, %v4980_v14  ;;  %v15878_v17 = vpop.f32.mrf.mxu0 }
 0x4ba   : > { %v8357_v18 = vadd.f32 %v8356_v12, %v7079_v24  ;;  %v7097_v47 = vmax.f32 %v6073_v61, 0.0  ;;  %v6087_v3 = vadd.f32 %v14899_v62, %v4979_v6  ;;  %v4981_v28 = vmul.f32 %v14914_v56, %v15754_v30  ;;  %v15883_v25 = vpop.f32.mrf.mxu1 }
 0x4bb   : > { %v8495_v59 = vadd.f32 %v8494_v27, %v7081_v55  ;;  %v8289_v38 = vadd.f32 %v8288_v31, %v7094_v26  ;;  %v8427_v48 = vadd.f32 %v8426_v44, %v7096_v60  ;;  %v7110_v8 = vmax.f32 %v6086_v43, 0.0  ;;  %v15885_v35 = vpop.f32.mrf.mxu0 }
 0x4bc   : > { %v8358_v23 = vadd.f32 %v8357_v18, %v7095_v34  ;;  %v7112_v37 = vmax.f32 %v6088_v41, 0.0  ;;  %v6089_v7 = vadd.f32 %v14930_v33, %v4981_v28  ;;  %v4994_v12 = vmul.f32 %v14861_v20, %v15758_v10  ;;  %v15890_v24 = vpop.f32.mrf.mxu1 }
 0x4bd   : > { %v8496_v52 = vadd.f32 %v8495_v59, %v7097_v47  ;;  %v7111_v45 = vmax.f32 %v6087_v3, 0.0  ;;  %v4996_v30 = vmul.f32 %v14872_v13, %v15763_v21  ;;  %v4995_v27 = vmul.f32 %v14890_v2, %v15765_v1  ;;  %v15896_v31 = vpop.f32.mrf.mxu0 }
 0x4be   : > { %v8290_v55 = vadd.f32 %v8289_v38, %v7110_v8  ;;  %v7113_v32 = vmax.f32 %v6089_v7, 0.0  ;;  %v6102_v14 = vadd.f32 %v14869_v49, %v4994_v12  ;;  %v4997_v44 = vmul.f32 %v14914_v56, %v15770_v29  ;;  %v15901_v10 = vpop.f32.mrf.mxu1 }
 0x4bf   : > { %v6104_v26 = vadd.f32 %v14881_v39, %v4996_v30  ;;  %v6103_v61 = vadd.f32 %v14899_v62, %v4995_v27  ;;  %v5010_v21 = vmul.f32 %v14861_v20, %v15776_v58  ;;  %v5012_v1 = vmul.f32 %v14872_v13, %v15781_v5  ;;  %v15909_v6 = vpop.f32.mrf.mxu0 }
 0x4c0   : > { %v8428_v60 = vadd.f32 %v8427_v48, %v7112_v37  ;;  %v7126_v34 = vmax.f32 %v6102_v14, 0.0  ;;  %v6105_v43 = vadd.f32 %v14930_v33, %v4997_v44  ;;  %v5011_v29 = vmul.f32 %v14890_v2, %v15789_v4  ;;  %v15914_v41 = vpop.f32.mrf.mxu1 }
 0x4c1   : > { %v7128_v18 = vmax.f32 %v6104_v26, 0.0  ;;  %v7127_v47 = vmax.f32 %v6103_v61, 0.0  ;;  %v6118_v3 = vadd.f32 %v14869_v49, %v5010_v21  ;;  %v6120_v58 = vadd.f32 %v14881_v39, %v5012_v1  ;;  %v15918_v28 = vpop.f32.mrf.mxu0 }
 0x4c2   : > { %v8359_v5 = vadd.f32 %v8358_v23, %v7111_v45  ;;  %v7129_v59 = vmax.f32 %v6105_v43, 0.0  ;;  %v6119_v38 = vadd.f32 %v14899_v62, %v5011_v29  ;;  %v5013_v48 = vmul.f32 %v14914_v56, %v15794_v46  ;;  %v15923_v8 = vpop.f32.mrf.mxu1 }
 0x4c3   : > { %v8497_v4 = vadd.f32 %v8496_v52, %v7113_v32  ;;  %v8291_v37 = vadd.f32 %v8290_v55, %v7126_v34  ;;  %v8429_v7 = vadd.f32 %v8428_v60, %v7128_v18  ;;  %v7142_v12 = vmax.f32 %v6118_v3, 0.0  ;;  %v15925_v30 = vpop.f32.mrf.mxu0 }
 0x4c4   : > { %v8360_v27 = vadd.f32 %v8359_v5, %v7127_v47  ;;  %v7144_v14 = vmax.f32 %v6120_v58, 0.0  ;;  %v6121_v44 = vadd.f32 %v14930_v33, %v5013_v48  ;;  %v5026_v23 = vmul.f32 %v14861_v20, %v15798_v40  ;;  %v15930_v45 = vpop.f32.mrf.mxu1 }
 0x4c5   : > { %v8498_v26 = vadd.f32 %v8497_v4, %v7129_v59  ;;  %v7143_v61 = vmax.f32 %v6119_v38, 0.0  ;;  %v5028_v46 = vmul.f32 %v14872_v13, %v15803_v9  ;;  %v5027_v52 = vmul.f32 %v14890_v2, %v15805_v42  ;;  %v15936_v55 = vpop.f32.mrf.mxu0 }
 0x4c6   : > { %v8292_v32 = vadd.f32 %v8291_v37, %v7142_v12  ;;  %v7145_v21 = vmax.f32 %v6121_v44, 0.0  ;;  %v6134_v1 = vadd.f32 %v14869_v49, %v5026_v23  ;;  %v5029_v60 = vmul.f32 %v14914_v56, %v15810_v36  ;;  %v15941_v40 = vpop.f32.mrf.mxu1 }
 0x4c7   : > { %v6136_v34 = vadd.f32 %v14881_v39, %v5028_v46  ;;  %v6135_v43 = vadd.f32 %v14899_v62, %v5027_v52  ;;  %v5042_v9 = vmul.f32 %v14861_v20, %v15816_v63  ;;  %v5044_v42 = vmul.f32 %v14872_v13, %v15821_v11  ;;  %v15949_v29 = vpop.f32.mrf.mxu0 }
 0x4c8   : > { %v8430_v18 = vadd.f32 %v8429_v7, %v7144_v14  ;;  %v7158_v47 = vmax.f32 %v6134_v1, 0.0  ;;  %v6137_v3 = vadd.f32 %v14930_v33, %v5029_v60  ;;  %v5043_v36 = vmul.f32 %v14890_v2, %v15829_v0  ;;  %v15954_v58 = vpop.f32.mrf.mxu1 }
 0x4c9   : > { %v7160_v5 = vmax.f32 %v6136_v34, 0.0  ;;  %v7159_v59 = vmax.f32 %v6135_v43, 0.0  ;;  %v6150_v38 = vadd.f32 %v14869_v49, %v5042_v9  ;;  %v6152_v63 = vadd.f32 %v14881_v39, %v5044_v42  ;;  %v15958_v48 = vpop.f32.mrf.mxu0 }
 0x4ca   : > { %v8361_v11 = vadd.f32 %v8360_v27, %v7143_v61  ;;  %v7161_v4 = vmax.f32 %v6137_v3, 0.0  ;;  %v6151_v37 = vadd.f32 %v14899_v62, %v5043_v36  ;;  %v5045_v7 = vmul.f32 %v14914_v56, %v15834_v16  ;;  %v15963_v12 = vpop.f32.mrf.mxu1 }
 0x4cb   : > { %v8499_v0 = vadd.f32 %v8498_v26, %v7145_v21  ;;  %v8293_v14 = vadd.f32 %v8292_v32, %v7158_v47  ;;  %v8431_v44 = vadd.f32 %v8430_v18, %v7160_v5  ;;  %v7174_v23 = vmax.f32 %v6150_v38, 0.0  ;;  %v15965_v46 = vpop.f32.mrf.mxu0 }
 0x4cc   : > { %v8362_v52 = vadd.f32 %v8361_v11, %v7159_v59  ;;  %v7176_v1 = vmax.f32 %v6152_v63, 0.0  ;;  %v6153_v60 = vadd.f32 %v14930_v33, %v5045_v7  ;;  %v5058_v27 = vmul.f32 %v14861_v20, %v15838_v54  ;;  %v15970_v61 = vpop.f32.mrf.mxu1 }
 0x4cd   : > { %v8500_v34 = vadd.f32 %v8499_v0, %v7161_v4  ;;  %v7175_v43 = vmax.f32 %v6151_v37, 0.0  ;;  %v5060_v16 = vmul.f32 %v14872_v13, %v15843_v53  ;;  %v5059_v26 = vmul.f32 %v14890_v2, %v15845_v15  ;;  %v15976_v32 = vpop.f32.mrf.mxu0 }
 0x4ce   : > { %v8294_v21 = vadd.f32 %v8293_v14, %v7174_v23  ;;  %v7177_v9 = vmax.f32 %v6153_v60, 0.0  ;;  %v6166_v42 = vadd.f32 %v14869_v49, %v5058_v27  ;;  %v5061_v18 = vmul.f32 %v14914_v56, %v15850_v19  ;;  %v15981_v54 = vpop.f32.mrf.mxu1 }
 0x4cf   : > { %v6168_v47 = vadd.f32 %v14881_v39, %v5060_v16  ;;  %v6167_v3 = vadd.f32 %v14899_v62, %v5059_v26  ;;  %v5074_v53 = vmul.f32 %v14861_v20, %v15856_v22  ;;  %v5076_v15 = vmul.f32 %v14872_v13, %v15861_v51  ;;  %v15989_v36 = vpop.f32.mrf.mxu0 }
 0x4d0   : > { %v8432_v5 = vadd.f32 %v8431_v44, %v7176_v1  ;;  %v7190_v59 = vmax.f32 %v6166_v42, 0.0  ;;  %v6169_v38 = vadd.f32 %v14930_v33, %v5061_v18  ;;  %v5075_v19 = vmul.f32 %v14890_v2, %v15869_v50  ;;  %v15994_v63 = vpop.f32.mrf.mxu1 }
 0x4d1   : > { %v7192_v11 = vmax.f32 %v6168_v47, 0.0  ;;  %v7191_v4 = vmax.f32 %v6167_v3, 0.0  ;;  %v6182_v37 = vadd.f32 %v14869_v49, %v5074_v53  ;;  %v6184_v22 = vadd.f32 %v14881_v39, %v5076_v15  ;;  %v15998_v7 = vpop.f32.mrf.mxu0 }
 0x4d2   : > { %v8363_v51 = vadd.f32 %v8362_v52, %v7175_v43  ;;  %v7193_v0 = vmax.f32 %v6169_v38, 0.0  ;;  %v6183_v14 = vadd.f32 %v14899_v62, %v5075_v19  ;;  %v5077_v44 = vmul.f32 %v14914_v56, %v15874_v57  ;;  %v16003_v27 = vpop.f32.mrf.mxu1 }
 0x4d3   : > { %v8501_v23 = vadd.f32 %v8500_v34, %v7177_v9  ;;  %v8295_v1 = vadd.f32 %v8294_v21, %v7190_v59  ;;  %v8433_v50 = vadd.f32 %v8432_v5, %v7192_v11  ;;  %v7206_v60 = vmax.f32 %v6182_v37, 0.0  ;;  %v16012_v34 = vpop.f32.mrf.mxu0 }
 0x4d4   : > { %v8364_v16 = vadd.f32 %v8363_v51, %v7191_v4  ;;  %v7208_v26 = vmax.f32 %v6184_v22, 0.0  ;;  %v6185_v42 = vadd.f32 %v14930_v33, %v5077_v44  ;;  %v5090_v18 = vmul.f32 %v14861_v20, %v15878_v17 }
 0x4d5   : > { %v8502_v52 = vadd.f32 %v8501_v23, %v7193_v0  ;;  %v7207_v43 = vmax.f32 %v6183_v14, 0.0  ;;  %v5092_v47 = vmul.f32 %v14872_v13, %v15883_v25  ;;  %v5091_v57 = vmul.f32 %v14890_v2, %v15885_v35  ;;  %v16023_v35 = vpop.f32.mrf.mxu1  ;;  %v16030_v51 = vpop.f32.mrf.mxu0 }
 0x4d6   : > { %v8296_v21 = vadd.f32 %v8295_v1, %v7206_v60  ;;  %v7209_v9 = vmax.f32 %v6185_v42, 0.0  ;;  %v6198_v3 = vadd.f32 %v14869_v49, %v5090_v18  ;;  %v5093_v53 = vmul.f32 %v14914_v56, %v15890_v24 }
 0x4d7   : > { %v6200_v15 = vadd.f32 %v14881_v39, %v5092_v47  ;;  %v6199_v17 = vadd.f32 %v14899_v62, %v5091_v57  ;;  %v5106_v5 = vmul.f32 %v14861_v20, %v15896_v31  ;;  %v5108_v25 = vmul.f32 %v14872_v13, %v15901_v10 }
 0x4d8   : > { %v8434_v59 = vadd.f32 %v8433_v50, %v7208_v26  ;;  %v7222_v38 = vmax.f32 %v6198_v3, 0.0  ;;  %v6201_v19 = vadd.f32 %v14930_v33, %v5093_v53  ;;  %v5107_v11 = vmul.f32 %v14890_v2, %v15909_v6  ;;  %v16035_v6 = vpop.f32.mrf.mxu1 }
 0x4d9   : > { %v7224_v24 = vmax.f32 %v6200_v15, 0.0  ;;  %v7223_v4 = vmax.f32 %v6199_v17, 0.0  ;;  %v6214_v37 = vadd.f32 %v14869_v49, %v5106_v5  ;;  %v6216_v22 = vadd.f32 %v14881_v39, %v5108_v25 }
 0x4da   : > { %v8365_v31 = vadd.f32 %v8364_v16, %v7207_v43  ;;  %v7225_v0 = vmax.f32 %v6201_v19, 0.0  ;;  %v6215_v10 = vadd.f32 %v14899_v62, %v5107_v11  ;;  %v5109_v14 = vmul.f32 %v14914_v56, %v15914_v41 }
 0x4db   : > { %v8503_v44 = vadd.f32 %v8502_v52, %v7209_v9  ;;  %v8297_v23 = vadd.f32 %v8296_v21, %v7222_v38  ;;  %v8435_v1 = vadd.f32 %v8434_v59, %v7224_v24  ;;  %v7238_v50 = vmax.f32 %v6214_v37, 0.0  ;;  %v16044_v52 = vpop.f32.mrf.mxu0 }
 0x4dc   : > { %v8366_v60 = vadd.f32 %v8365_v31, %v7223_v4  ;;  %v7240_v26 = vmax.f32 %v6216_v22, 0.0  ;;  %v6217_v42 = vadd.f32 %v14930_v33, %v5109_v14  ;;  %v5122_v18 = vmul.f32 %v14861_v20, %v15918_v28 }
 0x4dd   : > { %v8504_v16 = vadd.f32 %v8503_v44, %v7225_v0  ;;  %v7239_v43 = vmax.f32 %v6215_v10, 0.0  ;;  %v5124_v47 = vmul.f32 %v14872_v13, %v15923_v8  ;;  %v5123_v41 = vmul.f32 %v14890_v2, %v15925_v30  ;;  %v16055_v30 = vpop.f32.mrf.mxu1  ;;  %v16062_v24 = vpop.f32.mrf.mxu0 }
 0x4de   : > { %v8298_v57 = vadd.f32 %v8297_v23, %v7238_v50  ;;  %v7241_v21 = vmax.f32 %v6217_v42, 0.0  ;;  %v6230_v9 = vadd.f32 %v14869_v49, %v5122_v18  ;;  %v5125_v3 = vmul.f32 %v14914_v56, %v15930_v45 }
 0x4df   : > { %v6232_v53 = vadd.f32 %v14881_v39, %v5124_v47  ;;  %v6231_v28 = vadd.f32 %v14899_v62, %v5123_v41  ;;  %v5138_v15 = vmul.f32 %v14861_v20, %v15936_v55  ;;  %v5140_v8 = vmul.f32 %v14872_v13, %v15941_v40  ;;  %v16076_v42 = vpop.f32.mrf.mxu0 }
 0x4e0   : > { %v8436_v17 = vadd.f32 %v8435_v1, %v7240_v26  ;;  %v7254_v5 = vmax.f32 %v6230_v9, 0.0  ;;  %v6233_v25 = vadd.f32 %v14930_v33, %v5125_v3  ;;  %v5139_v59 = vmul.f32 %v14890_v2, %v15949_v29  ;;  %v16067_v29 = vpop.f32.mrf.mxu1 }
 0x4e1   : > { %v7256_v45 = vmax.f32 %v6232_v53, 0.0  ;;  %v7255_v38 = vmax.f32 %v6231_v28, 0.0  ;;  %v6246_v19 = vadd.f32 %v14869_v49, %v5138_v15  ;;  %v6248_v11 = vadd.f32 %v14881_v39, %v5140_v8 }
 0x4e2   : > { %v8367_v55 = vadd.f32 %v8366_v60, %v7239_v43  ;;  %v7257_v4 = vmax.f32 %v6233_v25, 0.0  ;;  %v6247_v40 = vadd.f32 %v14899_v62, %v5139_v59  ;;  %v5141_v37 = vmul.f32 %v14914_v56, %v15954_v58 }
 0x4e3   : > { %v8505_v22 = vadd.f32 %v8504_v16, %v7241_v21  ;;  %v8299_v31 = vadd.f32 %v8298_v57, %v7254_v5  ;;  %v8437_v0 = vadd.f32 %v8436_v17, %v7256_v45  ;;  %v7270_v10 = vmax.f32 %v6246_v19, 0.0  ;;  %v3696_v17 = vpop.f32.mrf.mxu0 }
 0x4e4   : > { %v8368_v14 = vadd.f32 %v8367_v55, %v7255_v38  ;;  %v7272_v44 = vmax.f32 %v6248_v11, 0.0  ;;  %v6249_v23 = vadd.f32 %v14930_v33, %v5141_v37  ;;  %v5154_v1 = vmul.f32 %v14861_v20, %v15958_v48 }
 0x4e5   : > { %v8506_v50 = vadd.f32 %v8505_v22, %v7257_v4  ;;  %v7271_v60 = vmax.f32 %v6247_v40, 0.0  ;;  %v5156_v26 = vmul.f32 %v14872_v13, %v15963_v12  ;;  %v5155_v58 = vmul.f32 %v14890_v2, %v15965_v46  ;;  %v16087_v46 = vpop.f32.mrf.mxu1 }
 0x4e6   : > { %v8300_v18 = vadd.f32 %v8299_v31, %v7270_v10  ;;  %v7273_v16 = vmax.f32 %v6249_v23, 0.0  ;;  %v6262_v43 = vadd.f32 %v14869_v49, %v5154_v1  ;;  %v5157_v47 = vmul.f32 %v14914_v56, %v15970_v61 }
 0x4e7   : > { %v6264_v41 = vadd.f32 %v14881_v39, %v5156_v26  ;;  %v6263_v48 = vadd.f32 %v14899_v62, %v5155_v58  ;;  %v5170_v57 = vmul.f32 %v14861_v20, %v15976_v32  ;;  %v5172_v12 = vmul.f32 %v14872_v13, %v15981_v54  ;;  %v4145_v11 = vpop.f32.mrf.mxu1 }
 0x4e8   : > { %v8438_v21 = vadd.f32 %v8437_v0, %v7272_v44  ;;  %v7286_v9 = vmax.f32 %v6262_v43, 0.0  ;;  %v6265_v3 = vadd.f32 %v14930_v33, %v5157_v47  ;;  %v5171_v53 = vmul.f32 %v14890_v2, %v15989_v36  ;;  %v3698_v0 = vpop.f32.mrf.mxu0 }
 0x4e9   : > { %v7288_v61 = vmax.f32 %v6264_v41, 0.0  ;;  %v7287_v28 = vmax.f32 %v6263_v48, 0.0  ;;  %v6278_v15 = vadd.f32 %v14869_v49, %v5170_v57  ;;  %v6280_v8 = vadd.f32 %v14881_v39, %v5172_v12 }
 0x4ea   : > { %v8369_v32 = vadd.f32 %v8368_v14, %v7271_v60  ;;  %v7289_v5 = vmax.f32 %v6265_v3, 0.0  ;;  %v6279_v54 = vadd.f32 %v14899_v62, %v5171_v53  ;;  %v5173_v25 = vmul.f32 %v14914_v56, %v15994_v63  ;;  %v4147_v60 = vpop.f32.mrf.mxu1  ;;  %v3702_v41 = vpop.f32.mrf.mxu0 }
 0x4eb   : > { %v8507_v59 = vadd.f32 %v8506_v50, %v7273_v16  ;;  %v8301_v45 = vadd.f32 %v8300_v18, %v7286_v9  ;;  %v8439_v38 = vadd.f32 %v8438_v21, %v7288_v61  ;;  %v7302_v19 = vmax.f32 %v6278_v15, 0.0 }
 0x4ec   : > { %v8370_v36 = vadd.f32 %v8369_v32, %v7287_v28  ;;  %v7304_v55 = vmax.f32 %v6280_v8, 0.0  ;;  %v6281_v4 = vadd.f32 %v14930_v33, %v5173_v25  ;;  %v5186_v40 = vmul.f32 %v14861_v20, %v15998_v7  ;;  %v4151_v53 = vpop.f32.mrf.mxu1 }
 0x4ed   : > { %v8508_v37 = vadd.f32 %v8507_v59, %v7289_v5  ;;  %v7303_v22 = vmax.f32 %v6279_v54, 0.0  ;;  %v5188_v31 = vmul.f32 %v14872_v13, %v16003_v27  ;;  %v5187_v63 = vmul.f32 %v14890_v2, %v16012_v34  ;;  %v3704_v54 = vpop.f32.mrf.mxu0 }
 0x4ee   : > { %v8302_v10 = vadd.f32 %v8301_v45, %v7302_v19  ;;  %v7305_v14 = vmax.f32 %v6281_v4, 0.0  ;;  %v6294_v44 = vadd.f32 %v14869_v49, %v5186_v40  ;;  %v5189_v23 = vmul.f32 %v14914_v56, %v16023_v35 }
 0x4ef   : > { %v6296_v1 = vadd.f32 %v14881_v39, %v5188_v31  ;;  %v6295_v7 = vadd.f32 %v14899_v62, %v5187_v63  ;;  %v5202_v50 = vmul.f32 %v14861_v20, %v16030_v51  ;;  %v5204_v27 = vmul.f32 %v14872_v13, %v16035_v6 }
 0x4f0   : > { %v8440_v34 = vadd.f32 %v8439_v38, %v7304_v55  ;;  %v7318_v26 = vmax.f32 %v6294_v44, 0.0  ;;  %v6297_v58 = vadd.f32 %v14930_v33, %v5189_v23  ;;  %v5203_v18 = vmul.f32 %v14890_v2, %v16044_v52 }
 0x4f1   : > { %v7320_v16 = vmax.f32 %v6296_v1, 0.0  ;;  %v7319_v35 = vmax.f32 %v6295_v7, 0.0  ;;  %v6310_v43 = vadd.f32 %v14869_v49, %v5202_v50  ;;  %v6312_v47 = vadd.f32 %v14881_v39, %v5204_v27 }
 0x4f2   : > { %v8371_v48 = vadd.f32 %v8370_v36, %v7303_v22  ;;  %v7321_v51 = vmax.f32 %v6297_v58, 0.0  ;;  %v6311_v57 = vadd.f32 %v14899_v62, %v5203_v18  ;;  %v5205_v6 = vmul.f32 %v14914_v56, %v16055_v30 }
 0x4f3   : > { %v8509_v12 = vadd.f32 %v8508_v37, %v7305_v14  ;;  %v8303_v21 = vadd.f32 %v8302_v10, %v7318_v26  ;;  %v8441_v9 = vadd.f32 %v8440_v34, %v7320_v16  ;;  %v7334_v3 = vmax.f32 %v6310_v43, 0.0  ;;  %v3708_v10 = vpop.f32.mrf.mxu0 }
 0x4f4   : > { %v8372_v52 = vadd.f32 %v8371_v48, %v7319_v35  ;;  %v7336_v61 = vmax.f32 %v6312_v47, 0.0  ;;  %v6313_v28 = vadd.f32 %v14930_v33, %v5205_v6  ;;  %v5218_v15 = vmul.f32 %v14861_v20, %v16062_v24 }
 0x4f5   : > { %v8510_v8 = vadd.f32 %v8509_v12, %v7321_v51  ;;  %v7335_v32 = vmax.f32 %v6311_v57, 0.0  ;;  %v5220_v5 = vmul.f32 %v14872_v13, %v16067_v29  ;;  %v5219_v30 = vmul.f32 %v14890_v2, %v16076_v42  ;;  %v4153_v29 = vpop.f32.mrf.mxu1  ;;  %v3710_v47 = vpop.f32.mrf.mxu0 }
 0x4f6   : > { %v8304_v25 = vadd.f32 %v8303_v21, %v7334_v3  ;;  %v7337_v59 = vmax.f32 %v6313_v28, 0.0  ;;  %v6326_v45 = vadd.f32 %v14869_v49, %v5218_v15  ;;  %v5221_v38 = vmul.f32 %v14914_v56, %v16087_v46 }
 0x4f7   : > { %v6328_v19 = vadd.f32 %v14881_v39, %v5220_v5  ;;  %v6327_v24 = vadd.f32 %v14899_v62, %v5219_v30  ;;  %v5234_v36 = vmul.f32 %v14861_v20, %v3696_v17  ;;  %v5236_v55 = vmul.f32 %v14872_v13, %v4145_v11  ;;  %v4157_v27 = vpop.f32.mrf.mxu1 }
 0x4f8   : > { %v8442_v4 = vadd.f32 %v8441_v9, %v7336_v61  ;;  %v7350_v40 = vmax.f32 %v6326_v45, 0.0  ;;  %v6329_v42 = vadd.f32 %v14930_v33, %v5221_v38  ;;  %v5235_v37 = vmul.f32 %v14890_v2, %v3698_v0 }
 0x4f9   : > { %v7352_v22 = vmax.f32 %v6328_v19, 0.0  ;;  %v7351_v31 = vmax.f32 %v6327_v24, 0.0  ;;  %v6342_v63 = vadd.f32 %v14869_v49, %v5234_v36  ;;  %v6344_v46 = vadd.f32 %v14881_v39, %v5236_v55  ;;  %v4159_v9 = vpop.f32.mrf.mxu1 }
 0x4fa   : > { %v8373_v14 = vadd.f32 %v8372_v52, %v7335_v32  ;;  %v7353_v44 = vmax.f32 %v6329_v42, 0.0  ;;  %v6343_v17 = vadd.f32 %v14899_v62, %v5235_v37  ;;  %v5237_v11 = vmul.f32 %v14914_v56, %v4147_v60 }
 0x4fb   : > { %v8511_v23 = vadd.f32 %v8510_v8, %v7337_v59  ;;  %v8305_v1 = vadd.f32 %v8304_v25, %v7350_v40  ;;  %v7366_v7 = vmax.f32 %v6342_v63, 0.0  ;;  %v7368_v50 = vmax.f32 %v6344_v46, 0.0 }
 0x4fc   : > { %v8443_v34 = vadd.f32 %v8442_v4, %v7352_v22  ;;  %v8374_v0 = vadd.f32 %v8373_v14, %v7351_v31  ;;  %v6345_v26 = vadd.f32 %v14930_v33, %v5237_v11  ;;  %v5250_v58 = vmul.f32 %v14861_v20, %v3702_v41 }
 0x4fd   : > { %v8512_v18 = vadd.f32 %v8511_v23, %v7353_v44  ;;  %v7367_v16 = vmax.f32 %v6343_v17, 0.0  ;;  %v5252_v35 = vmul.f32 %v14872_v13, %v4151_v53  ;;  %v5251_v43 = vmul.f32 %v14890_v2, %v3704_v54 }
 0x4fe   : > { %v8306_v48 = vadd.f32 %v8305_v1, %v7366_v7  ;;  %v8444_v60 = vadd.f32 %v8443_v34, %v7368_v50  ;;  %v6358_v51 = vadd.f32 %v14869_v49, %v5250_v58  ;;  %v5253_v57 = vmul.f32 %v14914_v56, %v4153_v29  ;;  %v7414_v7 = vld [vmem:[#allocation2 + $0x60] sm:$0xff]  ;;  %v7416_v50 = vld [vmem:[#allocation2 + $0x78] sm:$0xff]  ;;  %v7415_v58 = vld [vmem:[#allocation2 + $0x70] sm:$0xff] }
 0x4ff   : > { %v6360_v6 = vadd.f32 %v14881_v39, %v5252_v35  ;;  %v6359_v12 = vadd.f32 %v14899_v62, %v5251_v43  ;;  %v5266_v21 = vmul.f32 %v14861_v20, %v3708_v10  ;;  %v5268_v41 = vmul.f32 %v14872_v13, %v4157_v27 }
 0x500   : > { %v7369_v3 = vmax.f32 %v6345_v26, 0.0  ;;  %v7382_v53 = vmax.f32 %v6358_v51, 0.0  ;;  %v6361_v52 = vadd.f32 %v14930_v33, %v5253_v57  ;;  %v5267_v61 = vmul.f32 %v14890_v2, %v3710_v47  ;;  %v7417_v47 = vld [vmem:[#allocation2 + $0x28] sm:$0xff] }
 0x501   : > { %v7384_v28 = vmax.f32 %v6360_v6, 0.0  ;;  %v7383_v15 = vmax.f32 %v6359_v12, 0.0  ;;  %v6374_v8 = vadd.f32 %v14869_v49, %v5266_v21  ;;  %v6376_v32 = vadd.f32 %v14881_v39, %v5268_v41 }
 0x502   : > { %v8375_v5 = vadd.f32 %v8374_v0, %v7367_v16  ;;  %v7385_v30 = vmax.f32 %v6361_v52, 0.0  ;;  %v6375_v54 = vadd.f32 %v14899_v62, %v5267_v61  ;;  %v5269_v20 = vmul.f32 %v14914_v56, %v4159_v9 }
 0x503   : > { %v8307_v13 = vadd.f32 %v8306_v48, %v7382_v53  ;;  %v8445_v25 = vadd.f32 %v8444_v60, %v7384_v28  ;;  %v7398_v59 = vmax.f32 %v6374_v8, 0.0  ;;  %v7400_v45 = vmax.f32 %v6376_v32, 0.0 }
 0x504   : > { %v8513_v38 = vadd.f32 %v8512_v18, %v7369_v3  ;;  %v8376_v19 = vadd.f32 %v8375_v5, %v7383_v15  ;;  %v7399_v24 = vmax.f32 %v6375_v54, 0.0  ;;  %v6377_v2 = vadd.f32 %v14930_v33, %v5269_v20 }
 0x505   : > { %v8308_v36 = vadd.f32 %v8307_v13, %v7398_v59  ;;  %v8446_v55 = vadd.f32 %v8445_v25, %v7400_v45 }
 0x506   : > { %v8514_v49 = vadd.f32 %v8513_v38, %v7385_v30  ;;  %v8377_v29 = vadd.f32 %v8376_v19, %v7399_v24  ;;  %v7401_v39 = vmax.f32 %v6377_v2, 0.0 }
 0x507   : > { %v8309_v4 = vrot.slane %v8308_v36, 4  ;;  %v8447_v40 = vrot.slane %v8446_v55, 4 }
 0x508   : > { %v8378_v42 = vrot.slane %v8377_v29, 4  ;;  %v8515_v62 = vadd.f32 %v8514_v49, %v7401_v39 }
 0x509   : > { %v8310_v37 = vadd.f32 %v8309_v4, %v8308_v36  ;;  %v8448_v56 = vadd.f32 %v8447_v40, %v8446_v55 }
 0x50a   : > { %v8379_v22 = vadd.f32 %v8378_v42, %v8377_v29  ;;  %v8516_v31 = vrot.slane %v8515_v62, 4 }
 0x50b   : > { %v8311_v63 = vrot.slane %v8310_v37, 2  ;;  %v8449_v46 = vrot.slane %v8448_v56, 2 }
 0x50c   : > { %v8380_v10 = vrot.slane %v8379_v22, 2  ;;  %v8517_v14 = vadd.f32 %v8516_v31, %v8515_v62 }
 0x50d   : > { %v8312_v44 = vadd.f32 %v8311_v63, %v8310_v37  ;;  %v8450_v17 = vadd.f32 %v8449_v46, %v8448_v56 }
 0x50e   : > { %v8381_v33 = vadd.f32 %v8380_v10, %v8379_v22  ;;  %v8518_v11 = vrot.slane %v8517_v14, 2 }
 0x50f   : > { %v8313_v23 = vrot.slane %v8312_v44, 1  ;;  %v8451_v1 = vrot.slane %v8450_v17, 1 }
 0x510   : > { %v8382_v27 = vrot.slane %v8381_v33, 1  ;;  %v8519_v34 = vadd.f32 %v8518_v11, %v8517_v14 }
 0x511   : > { %v8314_v0 = vadd.f32 %v8313_v23, %v8312_v44  ;;  %v8452_v26 = vadd.f32 %v8451_v1, %v8450_v17 }
 0x512   : > { %v8383_v18 = vadd.f32 %v8382_v27, %v8381_v33  ;;  %v8520_v16 = vrot.slane %v8519_v34, 1 }
 0x513   : > { %v8534_v35 = vadd.f32 %v8314_v0, %v7414_v7  ;;  %v8536_v43 = vadd.f32 %v8452_v26, %v7416_v50 }
 0x514   : > { %v8535_v48 = vadd.f32 %v8383_v18, %v7415_v58  ;;  %v8521_v60 = vadd.f32 %v8520_v16, %v8519_v34  ;;  %8557 = sbr.rel (%p10015_p1) target bundleno = 1646 (0x66e), region = 52 }
 0x515   : > { %8550 = vst [vmem:[#allocation2 + $0x60] sm:$0xff] %v8534_v35  ;;  %8552 = vst [vmem:[#allocation2 + $0x78] sm:$0xff] %v8536_v43 }
 0x516   : > { %8551 = vst [vmem:[#allocation2 + $0x70] sm:$0xff] %v8535_v48  ;;  %v8537_v51 = vadd.f32 %v8521_v60, %v7417_v47 }
 0x518   : > { %8553 = vst [vmem:[#allocation2 + $0x28] sm:$0xff] %v8537_v51 }
 0x519   : > { %v8621_v57 = vld [vmem:[%s16982_s4 + $0xf8] sm:$0xff]  ;;  %v8620_v41 = vld [vmem:[%s16982_s4 + $0xf0] sm:$0xff]  ;;  %v8619_v52 = vld [vmem:[%s16982_s4 + $0xe8] sm:$0xff] }
 0x51a   : > { %v8653_v6 = vld [vmem:[%s16982_s4 + $0x1f8] sm:$0xff]  ;;  %10019 = vmatprep.subr.mxu0 %v8621_v57  ;;  %v8652_v9 = vld [vmem:[%s16982_s4 + $0x1f0] sm:$0xff]  ;;  %v8651_v61 = vld [vmem:[%s16982_s4 + $0x1e8] sm:$0xff] }
 0x51b   : > { %v8605_v12 = vld [vmem:[%s16982_s4 + $0x78] sm:$0xff]  ;;  %10054 = vmatprep.subr.mxu1 %v8653_v6  ;;  %v8604_v3 = vld [vmem:[%s16982_s4 + $0x70] sm:$0xff]  ;;  %v8603_v28 = vld [vmem:[%s16982_s4 + $0x68] sm:$0xff] }
 0x51c   : > { %v8637_v21 = vld [vmem:[%s16982_s4 + $0x178] sm:$0xff]  ;;  %10020 = vmatpush3.msra.mxu0 %v8605_v12  ;;  %v8636_v53 = vld [vmem:[%s16982_s4 + $0x170] sm:$0xff]  ;;  %v8635_v15 = vld [vmem:[%s16982_s4 + $0x168] sm:$0xff] }
 0x51d   : > { %10055 = vmatpush3.msra.mxu1 %v8637_v21  ;;  %10021 = vmatprep.subr.mxu0 %v8620_v41  ;;  %v8618_v8 = vld [vmem:[%s16982_s4 + $0xe0] sm:$0xff]  ;;  %v8617_v54 = vld [vmem:[%s16982_s4 + $0xd8] sm:$0xff]  ;;  %v8616_v59 = vld [vmem:[%s16982_s4 + $0xd0] sm:$0xff] }
 0x51e   : > { %10056 = vmatprep.subr.mxu1 %v8652_v9  ;;  %10022 = vmatpush3.msra.mxu0 %v8604_v3  ;;  %v8650_v32 = vld [vmem:[%s16982_s4 + $0x1e0] sm:$0xff]  ;;  %v8649_v20 = vld [vmem:[%s16982_s4 + $0x1d8] sm:$0xff]  ;;  %v8648_v45 = vld [vmem:[%s16982_s4 + $0x1d0] sm:$0xff] }
 0x51f   : > { %10057 = vmatpush3.msra.mxu1 %v8636_v53  ;;  %10023 = vmatprep.subr.mxu0 %v8619_v52  ;;  %v8602_v5 = vld [vmem:[%s16982_s4 + $0x60] sm:$0xff]  ;;  %v8601_v13 = vld [vmem:[%s16982_s4 + $0x58] sm:$0xff]  ;;  %v8600_v38 = vld [vmem:[%s16982_s4 + $0x50] sm:$0xff] }
 0x520   : > { %10058 = vmatprep.subr.mxu1 %v8651_v61  ;;  %v8634_v30 = vld [vmem:[%s16982_s4 + $0x160] sm:$0xff]  ;;  %10024 = vmatpush3.msra.mxu0 %v8603_v28  ;;  %v8633_v25 = vld [vmem:[%s16982_s4 + $0x158] sm:$0xff]  ;;  %v8632_v19 = vld [vmem:[%s16982_s4 + $0x150] sm:$0xff] }
 0x521   : > { %10059 = vmatpush3.msra.mxu1 %v8635_v15  ;;  %10025 = vmatprep.subr.mxu0 %v8618_v8  ;;  %v8615_v24 = vld [vmem:[%s16982_s4 + $0xc8] sm:$0xff]  ;;  %v8614_v49 = vld [vmem:[%s16982_s4 + $0xc0] sm:$0xff]  ;;  %v8613_v40 = vld [vmem:[%s16982_s4 + $0xb8] sm:$0xff] }
 0x522   : > { %10060 = vmatprep.subr.mxu1 %v8650_v32  ;;  %10026 = vmatpush3.msra.mxu0 %v8602_v5  ;;  %v8647_v2 = vld [vmem:[%s16982_s4 + $0x1c8] sm:$0xff]  ;;  %v8646_v29 = vld [vmem:[%s16982_s4 + $0x1c0] sm:$0xff]  ;;  %v8645_v42 = vld [vmem:[%s16982_s4 + $0x1b8] sm:$0xff] }
 0x523   : > { %10061 = vmatpush3.msra.mxu1 %v8634_v30  ;;  %10027 = vmatprep.subr.mxu0 %v8617_v54  ;;  %v8599_v36 = vld [vmem:[%s16982_s4 + $0x48] sm:$0xff]  ;;  %v8598_v39 = vld [vmem:[%s16982_s4 + $0x40] sm:$0xff]  ;;  %v8597_v62 = vld [vmem:[%s16982_s4 + $0x38] sm:$0xff] }
 0x524   : > { %10062 = vmatprep.subr.mxu1 %v8649_v20  ;;  %10028 = vmatpush3.msra.mxu0 %v8601_v13  ;;  %v8631_v55 = vld [vmem:[%s16982_s4 + $0x148] sm:$0xff]  ;;  %v8630_v4 = vld [vmem:[%s16982_s4 + $0x140] sm:$0xff]  ;;  %v8629_v37 = vld [vmem:[%s16982_s4 + $0x138] sm:$0xff] }
 0x525   : > { %10063 = vmatpush3.msra.mxu1 %v8633_v25  ;;  %10029 = vmatprep.subr.mxu0 %v8616_v59  ;;  %v8612_v56 = vld [vmem:[%s16982_s4 + $0xb0] sm:$0xff]  ;;  %v8611_v46 = vld [vmem:[%s16982_s4 + $0xa8] sm:$0xff]  ;;  %v8610_v17 = vld [vmem:[%s16982_s4 + $0xa0] sm:$0xff] }
 0x526   : > { %10064 = vmatprep.subr.mxu1 %v8648_v45  ;;  %10030 = vmatpush3.msra.mxu0 %v8600_v38  ;;  %v8644_v22 = vld [vmem:[%s16982_s4 + $0x1b0] sm:$0xff]  ;;  %v8643_v10 = vld [vmem:[%s16982_s4 + $0x1a8] sm:$0xff]  ;;  %v8642_v33 = vld [vmem:[%s16982_s4 + $0x1a0] sm:$0xff] }
 0x527   : > { %10065 = vmatpush3.msra.mxu1 %v8632_v19  ;;  %10031 = vmatprep.subr.mxu0 %v8615_v24  ;;  %v8596_v31 = vld [vmem:[%s16982_s4 + $0x30] sm:$0xff]  ;;  %v8595_v14 = vld [vmem:[%s16982_s4 + $0x28] sm:$0xff]  ;;  %v8594_v11 = vld [vmem:[%s16982_s4 + $0x20] sm:$0xff] }
 0x528   : > { %10066 = vmatprep.subr.mxu1 %v8647_v2  ;;  %10032 = vmatpush3.msra.mxu0 %v8599_v36  ;;  %v8628_v63 = vld [vmem:[%s16982_s4 + $0x130] sm:$0xff]  ;;  %v8627_v44 = vld [vmem:[%s16982_s4 + $0x128] sm:$0xff]  ;;  %v8626_v23 = vld [vmem:[%s16982_s4 + $0x120] sm:$0xff] }
 0x529   : > { %10067 = vmatpush3.msra.mxu1 %v8631_v55  ;;  %10033 = vmatprep.subr.mxu0 %v8614_v49  ;;  %v8609_v1 = vld [vmem:[%s16982_s4 + $0x98] sm:$0xff]  ;;  %v8608_v34 = vld [vmem:[%s16982_s4 + $0x90] sm:$0xff]  ;;  %v8607_v18 = vld [vmem:[%s16982_s4 + $0x88] sm:$0xff] }
 0x52a   : > { %10068 = vmatprep.subr.mxu1 %v8646_v29  ;;  %10034 = vmatpush3.msra.mxu0 %v8598_v39  ;;  %v8641_v7 = vld [vmem:[%s16982_s4 + $0x198] sm:$0xff]  ;;  %v8640_v0 = vld [vmem:[%s16982_s4 + $0x190] sm:$0xff]  ;;  %v8559_v16 = vld [vmem:[#allocation2] sm:$0xff] }
 0x52b   : > { %10069 = vmatpush3.msra.mxu1 %v8630_v4  ;;  %10035 = vmatprep.subr.mxu0 %v8613_v40  ;;  %v8593_v50 = vld [vmem:[%s16982_s4 + $0x18] sm:$0xff]  ;;  %v8592_v26 = vld [vmem:[%s16982_s4 + $0x10] sm:$0xff]  ;;  %v8639_v35 = vld [vmem:[%s16982_s4 + $0x188] sm:$0xff]  ;;  %v8575_v12 = vmul.f32 0.0009765625, %v8559_v16 }
 0x52c   : > { %10070 = vmatprep.subr.mxu1 %v8645_v42  ;;  %10036 = vmatpush3.msra.mxu0 %v8597_v62  ;;  %v8625_v27 = vld [vmem:[%s16982_s4 + $0x118] sm:$0xff]  ;;  %v8624_v58 = vld [vmem:[%s16982_s4 + $0x110] sm:$0xff]  ;;  %v8591_v43 = vld [vmem:[%s16982_s4 + $0x8] sm:$0xff] }
 0x52d   : > { %10071 = vmatpush3.msra.mxu1 %v8629_v37  ;;  %10037 = vmatprep.subr.mxu0 %v8612_v56  ;;  %v8561_v47 = vld [vmem:[#allocation2 + $0x18] sm:$0xff]  ;;  %v8623_v48 = vld [vmem:[%s16982_s4 + $0x108] sm:$0xff]  ;;  %v8558_v60 = vld [vmem:[#allocation2 + $0x30] sm:$0xff] }
 0x52e   : > { %10072 = vmatprep.subr.mxu1 %v8644_v22  ;;  %10038 = vmatpush3.msra.mxu0 %v8596_v31  ;;  %v8560_v51 = vld [vmem:[#allocation2 + $0x58] sm:$0xff]  ;;  %v8606_v57 = vld [vmem:[%s16982_s4 + $0x80] sm:$0xff]  ;;  %v8577_v41 = vmul.f32 0.0009765625, %v8561_v47  ;;  %v8574_v3 = vmul.f32 0.0009765625, %v8558_v60  ;;  %v8684_v8 = vld [vmem:[%s16982_s4 + $0x2f0] sm:$0xff] }
 0x52f   : > { %10073 = vmatpush3.msra.mxu1 %v8628_v63  ;;  %10039 = vmatprep.subr.mxu0 %v8611_v46  ;;  %v8638_v6 = vld [vmem:[%s16982_s4 + $0x180] sm:$0xff]  ;;  %v8576_v53 = vmul.f32 0.0009765625, %v8560_v51  ;;  %v8685_v52 = vld [vmem:[%s16982_s4 + $0x2f8] sm:$0xff]  ;;  %v8716_v32 = vld [vmem:[%s16982_s4 + $0x3f0] sm:$0xff] }
 0x530   : > { %10074 = vmatprep.subr.mxu1 %v8643_v10  ;;  %10040 = vmatpush3.msra.mxu0 %v8595_v14  ;;  %v8590_v21 = vld [vmem:[%s16982_s4] sm:$0xff]  ;;  %v8717_v61 = vld [vmem:[%s16982_s4 + $0x3f8] sm:$0xff]  ;;  %v8668_v5 = vld [vmem:[%s16982_s4 + $0x270] sm:$0xff] }
 0x531   : > { %10075 = vmatpush3.msra.mxu1 %v8627_v44  ;;  %10041 = vmatprep.subr.mxu0 %v8610_v17  ;;  %v8622_v9 = vld [vmem:[%s16982_s4 + $0x100] sm:$0xff]  ;;  %v8669_v28 = vld [vmem:[%s16982_s4 + $0x278] sm:$0xff]  ;;  %v8700_v30 = vld [vmem:[%s16982_s4 + $0x370] sm:$0xff] }
 0x532   : > { %10076 = vmatprep.subr.mxu1 %v8642_v33  ;;  %10042 = vmatpush3.msra.mxu0 %v8594_v11  ;;  %v8701_v15 = vld [vmem:[%s16982_s4 + $0x378] sm:$0xff]  ;;  %v8683_v54 = vld [vmem:[%s16982_s4 + $0x2e8] sm:$0xff]  ;;  %v8682_v59 = vld [vmem:[%s16982_s4 + $0x2e0] sm:$0xff] }
 0x533   : > { %10077 = vmatpush3.msra.mxu1 %v8626_v23  ;;  %10043 = vmatprep.subr.mxu0 %v8609_v1  ;;  %v8715_v20 = vld [vmem:[%s16982_s4 + $0x3e8] sm:$0xff]  ;;  %v8714_v45 = vld [vmem:[%s16982_s4 + $0x3e0] sm:$0xff]  ;;  %v8681_v24 = vld [vmem:[%s16982_s4 + $0x2d8] sm:$0xff] }
 0x534   : > { %10078 = vmatprep.subr.mxu1 %v8641_v7  ;;  %10044 = vmatpush3.msra.mxu0 %v8593_v50  ;;  %v8667_v13 = vld [vmem:[%s16982_s4 + $0x268] sm:$0xff]  ;;  %v8666_v38 = vld [vmem:[%s16982_s4 + $0x260] sm:$0xff]  ;;  %v8713_v2 = vld [vmem:[%s16982_s4 + $0x3d8] sm:$0xff] }
 0x535   : > { %10079 = vmatpush3.msra.mxu1 %v8625_v27  ;;  %10045 = vmatprep.subr.mxu0 %v8608_v34  ;;  %v8699_v25 = vld [vmem:[%s16982_s4 + $0x368] sm:$0xff]  ;;  %v8698_v19 = vld [vmem:[%s16982_s4 + $0x360] sm:$0xff]  ;;  %v8665_v36 = vld [vmem:[%s16982_s4 + $0x258] sm:$0xff] }
 0x536   : > { %10080 = vmatprep.subr.mxu1 %v8640_v0  ;;  %10046 = vmatpush3.msra.mxu0 %v8592_v26  ;;  %v8697_v55 = vld [vmem:[%s16982_s4 + $0x358] sm:$0xff]  ;;  %v8680_v49 = vld [vmem:[%s16982_s4 + $0x2d0] sm:$0xff]  ;;  %v8679_v40 = vld [vmem:[%s16982_s4 + $0x2c8] sm:$0xff] }
 0x537   : > { %10081 = vmatpush3.msra.mxu1 %v8624_v58  ;;  %10047 = vmatprep.subr.mxu0 %v8607_v18  ;;  %v8712_v29 = vld [vmem:[%s16982_s4 + $0x3d0] sm:$0xff]  ;;  %v8711_v42 = vld [vmem:[%s16982_s4 + $0x3c8] sm:$0xff]  ;;  %v8678_v56 = vld [vmem:[%s16982_s4 + $0x2c0] sm:$0xff] }
 0x538   : > { %10082 = vmatprep.subr.mxu1 %v8639_v35  ;;  %10048 = vmatpush3.msra.mxu0 %v8591_v43  ;;  %v8664_v39 = vld [vmem:[%s16982_s4 + $0x250] sm:$0xff]  ;;  %v8663_v62 = vld [vmem:[%s16982_s4 + $0x248] sm:$0xff]  ;;  %v8710_v22 = vld [vmem:[%s16982_s4 + $0x3c0] sm:$0xff] }
 0x539   : > { %10083 = vmatpush3.msra.mxu1 %v8623_v48  ;;  %10049 = vmatprep.subr.mxu0 %v8606_v57  ;;  %v8696_v4 = vld [vmem:[%s16982_s4 + $0x350] sm:$0xff]  ;;  %v8695_v37 = vld [vmem:[%s16982_s4 + $0x348] sm:$0xff]  ;;  %v8662_v31 = vld [vmem:[%s16982_s4 + $0x240] sm:$0xff] }
 0x53a   : > { %10084 = vmatprep.subr.mxu1 %v8638_v6  ;;  %10050 = vmatpush3.msra.mxu0 %v8590_v21  ;;  %v8694_v63 = vld [vmem:[%s16982_s4 + $0x340] sm:$0xff]  ;;  %v8677_v46 = vld [vmem:[%s16982_s4 + $0x2b8] sm:$0xff]  ;;  %v8676_v17 = vld [vmem:[%s16982_s4 + $0x2b0] sm:$0xff] }
 0x53b   : > { %8910 = vmatprep.mubr.f32.mxu0 %v8575_v12  ;;  %10085 = vmatpush3.msra.mxu1 %v8622_v9  ;;  %v8709_v10 = vld [vmem:[%s16982_s4 + $0x3b8] sm:$0xff]  ;;  %v8708_v33 = vld [vmem:[%s16982_s4 + $0x3b0] sm:$0xff]  ;;  %v8675_v1 = vld [vmem:[%s16982_s4 + $0x2a8] sm:$0xff] }
 0x53c   : > { %8980 = vmatprep.mubr.f32.mxu1 %v8577_v41  ;;  %8911 = vmatmul.mubr.f32.vlgmr.msra.gmra.mxu0 %v8574_v3  ;;  %v8661_v14 = vld [vmem:[%s16982_s4 + $0x238] sm:$0xff]  ;;  %v8660_v11 = vld [vmem:[%s16982_s4 + $0x230] sm:$0xff]  ;;  %v8707_v7 = vld [vmem:[%s16982_s4 + $0x3a8] sm:$0xff] }
 0x53d   : > { %8981 = vmatmul.mubr.f32.vlgmr.msra.gmra.mxu1 %v8576_v53  ;;  %10089 = vmatprep.subr.mxu0 %v8685_v52  ;;  %v8693_v44 = vld [vmem:[%s16982_s4 + $0x338] sm:$0xff]  ;;  %v8692_v23 = vld [vmem:[%s16982_s4 + $0x330] sm:$0xff]  ;;  %v8659_v50 = vld [vmem:[%s16982_s4 + $0x228] sm:$0xff] }
 0x53e   : > { %10124 = vmatprep.subr.mxu1 %v8717_v61  ;;  %10090 = vmatpush3.msra.mxu0 %v8669_v28  ;;  %v8691_v27 = vld [vmem:[%s16982_s4 + $0x328] sm:$0xff]  ;;  %v8674_v34 = vld [vmem:[%s16982_s4 + $0x2a0] sm:$0xff]  ;;  %v8673_v18 = vld [vmem:[%s16982_s4 + $0x298] sm:$0xff] }
 0x53f   : > { %10125 = vmatpush3.msra.mxu1 %v8701_v15  ;;  %10091 = vmatprep.subr.mxu0 %v8684_v8  ;;  %v8706_v0 = vld [vmem:[%s16982_s4 + $0x3a0] sm:$0xff]  ;;  %v8705_v16 = vld [vmem:[%s16982_s4 + $0x398] sm:$0xff]  ;;  %v8672_v47 = vld [vmem:[%s16982_s4 + $0x290] sm:$0xff] }
 0x540   : > { %10126 = vmatprep.subr.mxu1 %v8716_v32  ;;  %10092 = vmatpush3.msra.mxu0 %v8668_v5  ;;  %v8658_v26 = vld [vmem:[%s16982_s4 + $0x220] sm:$0xff]  ;;  %v8657_v35 = vld [vmem:[%s16982_s4 + $0x218] sm:$0xff]  ;;  %v8704_v48 = vld [vmem:[%s16982_s4 + $0x390] sm:$0xff] }
 0x541   : > { %10127 = vmatpush3.msra.mxu1 %v8700_v30  ;;  %10093 = vmatprep.subr.mxu0 %v8683_v54  ;;  %v8690_v58 = vld [vmem:[%s16982_s4 + $0x320] sm:$0xff]  ;;  %v8689_v43 = vld [vmem:[%s16982_s4 + $0x318] sm:$0xff]  ;;  %v8656_v60 = vld [vmem:[%s16982_s4 + $0x210] sm:$0xff] }
 0x542   : > { %10128 = vmatprep.subr.mxu1 %v8715_v20  ;;  %10094 = vmatpush3.msra.mxu0 %v8667_v13  ;;  %v8688_v51 = vld [vmem:[%s16982_s4 + $0x310] sm:$0xff]  ;;  %v8563_v57 = vld [vmem:[#allocation2 + $0x68] sm:$0xff]  ;;  %v8670_v53 = vld [vmem:[%s16982_s4 + $0x280] sm:$0xff] }
 0x543   : > { %10129 = vmatpush3.msra.mxu1 %v8699_v25  ;;  %10095 = vmatprep.subr.mxu0 %v8682_v59  ;;  %v8671_v6 = vld [vmem:[%s16982_s4 + $0x288] sm:$0xff]  ;;  %v8562_v21 = vld [vmem:[#allocation2 + $0x50] sm:$0xff]  ;;  %v8702_v52 = vld [vmem:[%s16982_s4 + $0x380] sm:$0xff]  ;;  %v8579_v61 = vmul.f32 0.0009765625, %v8563_v57 }
 0x544   : > { %10130 = vmatprep.subr.mxu1 %v8714_v45  ;;  %10096 = vmatpush3.msra.mxu0 %v8666_v38  ;;  %v8703_v12 = vld [vmem:[%s16982_s4 + $0x388] sm:$0xff]  ;;  %v8654_v15 = vld [vmem:[%s16982_s4 + $0x200] sm:$0xff]  ;;  %v8578_v8 = vmul.f32 0.0009765625, %v8562_v21  ;;  %v8749_v30 = vld [vmem:[%s16982_s4 + $0x4f8] sm:$0xff] }
 0x545   : > { %10131 = vmatpush3.msra.mxu1 %v8698_v19  ;;  %10097 = vmatprep.subr.mxu0 %v8681_v24  ;;  %v8655_v41 = vld [vmem:[%s16982_s4 + $0x208] sm:$0xff]  ;;  %v8686_v32 = vld [vmem:[%s16982_s4 + $0x300] sm:$0xff]  ;;  %v8781_v20 = vld [vmem:[%s16982_s4 + $0x5f8] sm:$0xff] }
 0x546   : > { %10132 = vmatprep.subr.mxu1 %v8713_v2  ;;  %10098 = vmatpush3.msra.mxu0 %v8665_v36  ;;  %v8687_v9 = vld [vmem:[%s16982_s4 + $0x308] sm:$0xff]  ;;  %v8733_v13 = vld [vmem:[%s16982_s4 + $0x478] sm:$0xff]  ;;  %v8748_v59 = vld [vmem:[%s16982_s4 + $0x4f0] sm:$0xff] }
 0x547   : > { %10133 = vmatpush3.msra.mxu1 %v8697_v55  ;;  %10099 = vmatprep.subr.mxu0 %v8680_v49  ;;  %v8565_v3 = vld [vmem:[#allocation2 + $0x48] sm:$0xff]  ;;  %v8765_v25 = vld [vmem:[%s16982_s4 + $0x578] sm:$0xff]  ;;  %v8780_v45 = vld [vmem:[%s16982_s4 + $0x5f0] sm:$0xff] }
 0x548   : > { %10134 = vmatprep.subr.mxu1 %v8712_v29  ;;  %10100 = vmatpush3.msra.mxu0 %v8664_v39  ;;  %v8564_v28 = vld [vmem:[#allocation2 + $0x8] sm:$0xff]  ;;  %v8581_v5 = vmul.f32 0.0009765625, %v8565_v3  ;;  %v8732_v38 = vld [vmem:[%s16982_s4 + $0x470] sm:$0xff]  ;;  %v8746_v49 = vld [vmem:[%s16982_s4 + $0x4e0] sm:$0xff] }
 0x549   : > { %10135 = vmatpush3.msra.mxu1 %v8696_v4  ;;  %10101 = vmatprep.subr.mxu0 %v8679_v40  ;;  %v8580_v54 = vmul.f32 0.0009765625, %v8564_v28  ;;  %v8764_v19 = vld [vmem:[%s16982_s4 + $0x570] sm:$0xff]  ;;  %v8747_v24 = vld [vmem:[%s16982_s4 + $0x4e8] sm:$0xff]  ;;  %v8778_v29 = vld [vmem:[%s16982_s4 + $0x5e0] sm:$0xff] }
 0x54a   : > { %10136 = vmatprep.subr.mxu1 %v8711_v42  ;;  %10102 = vmatpush3.msra.mxu0 %v8663_v62  ;;  %v8779_v2 = vld [vmem:[%s16982_s4 + $0x5e8] sm:$0xff]  ;;  %v8730_v39 = vld [vmem:[%s16982_s4 + $0x460] sm:$0xff]  ;;  %v8745_v40 = vld [vmem:[%s16982_s4 + $0x4d8] sm:$0xff] }
 0x54b   : > { %10137 = vmatpush3.msra.mxu1 %v8695_v37  ;;  %10103 = vmatprep.subr.mxu0 %v8678_v56  ;;  %v8731_v36 = vld [vmem:[%s16982_s4 + $0x468] sm:$0xff]  ;;  %v8762_v4 = vld [vmem:[%s16982_s4 + $0x560] sm:$0xff]  ;;  %v8777_v42 = vld [vmem:[%s16982_s4 + $0x5d8] sm:$0xff] }
 0x54c   : > { %10138 = vmatprep.subr.mxu1 %v8710_v22  ;;  %10104 = vmatpush3.msra.mxu0 %v8662_v31  ;;  %v8763_v55 = vld [vmem:[%s16982_s4 + $0x568] sm:$0xff]  ;;  %v8729_v62 = vld [vmem:[%s16982_s4 + $0x458] sm:$0xff]  ;;  %v8744_v56 = vld [vmem:[%s16982_s4 + $0x4d0] sm:$0xff] }
 0x54d   : > { %10139 = vmatpush3.msra.mxu1 %v8694_v63  ;;  %10105 = vmatprep.subr.mxu0 %v8677_v46  ;;  %v8761_v37 = vld [vmem:[%s16982_s4 + $0x558] sm:$0xff]  ;;  %v8776_v22 = vld [vmem:[%s16982_s4 + $0x5d0] sm:$0xff]  ;;  %v8743_v46 = vld [vmem:[%s16982_s4 + $0x4c8] sm:$0xff] }
 0x54e   : > { %10140 = vmatprep.subr.mxu1 %v8709_v10  ;;  %10106 = vmatpush3.msra.mxu0 %v8661_v14  ;;  %v8728_v31 = vld [vmem:[%s16982_s4 + $0x450] sm:$0xff]  ;;  %v8775_v10 = vld [vmem:[%s16982_s4 + $0x5c8] sm:$0xff]  ;;  %v8737_v57 = vld [vmem:[%s16982_s4 + $0x498] sm:$0xff] }
 0x54f   : > { %10141 = vmatpush3.msra.mxu1 %v8693_v44  ;;  %10107 = vmatprep.subr.mxu0 %v8676_v17  ;;  %v8760_v63 = vld [vmem:[%s16982_s4 + $0x550] sm:$0xff]  ;;  %v8727_v14 = vld [vmem:[%s16982_s4 + $0x448] sm:$0xff]  ;;  %v8742_v17 = vld [vmem:[%s16982_s4 + $0x4c0] sm:$0xff] }
 0x550   : > { %10142 = vmatprep.subr.mxu1 %v8708_v33  ;;  %10108 = vmatpush3.msra.mxu0 %v8660_v11  ;;  %v8759_v44 = vld [vmem:[%s16982_s4 + $0x548] sm:$0xff]  ;;  %v8774_v33 = vld [vmem:[%s16982_s4 + $0x5c0] sm:$0xff]  ;;  %v8753_v21 = vld [vmem:[%s16982_s4 + $0x518] sm:$0xff] }
 0x551   : > { %10143 = vmatpush3.msra.mxu1 %v8692_v23  ;;  %10109 = vmatprep.subr.mxu0 %v8675_v1  ;;  %v8726_v11 = vld [vmem:[%s16982_s4 + $0x440] sm:$0xff]  ;;  %v8741_v1 = vld [vmem:[%s16982_s4 + $0x4b8] sm:$0xff]  ;;  %v8720_v3 = vld [vmem:[%s16982_s4 + $0x410] sm:$0xff] }
 0x552   : > { %10144 = vmatprep.subr.mxu1 %v8707_v7  ;;  %10110 = vmatpush3.msra.mxu0 %v8659_v50  ;;  %v8758_v23 = vld [vmem:[%s16982_s4 + $0x540] sm:$0xff]  ;;  %v8773_v7 = vld [vmem:[%s16982_s4 + $0x5b8] sm:$0xff]  ;;  %v8767_v28 = vld [vmem:[%s16982_s4 + $0x588] sm:$0xff] }
 0x553   : > { %10145 = vmatpush3.msra.mxu1 %v8691_v27  ;;  %10111 = vmatprep.subr.mxu0 %v8674_v34  ;;  %v8725_v50 = vld [vmem:[%s16982_s4 + $0x438] sm:$0xff]  ;;  %v8740_v34 = vld [vmem:[%s16982_s4 + $0x4b0] sm:$0xff] }
 0x554   : > { %10146 = vmatprep.subr.mxu1 %v8706_v0  ;;  %10112 = vmatpush3.msra.mxu0 %v8658_v26  ;;  %v8757_v27 = vld [vmem:[%s16982_s4 + $0x538] sm:$0xff]  ;;  %v8772_v0 = vld [vmem:[%s16982_s4 + $0x5b0] sm:$0xff] }
 0x555   : > { %10147 = vmatpush3.msra.mxu1 %v8690_v58  ;;  %10113 = vmatprep.subr.mxu0 %v8673_v18  ;;  %v8724_v26 = vld [vmem:[%s16982_s4 + $0x430] sm:$0xff]  ;;  %v8739_v18 = vld [vmem:[%s16982_s4 + $0x4a8] sm:$0xff] }
 0x556   : > { %10148 = vmatprep.subr.mxu1 %v8705_v16  ;;  %10114 = vmatpush3.msra.mxu0 %v8657_v35  ;;  %v8756_v58 = vld [vmem:[%s16982_s4 + $0x530] sm:$0xff]  ;;  %v8771_v16 = vld [vmem:[%s16982_s4 + $0x5a8] sm:$0xff] }
 0x557   : > { %10149 = vmatpush3.msra.mxu1 %v8689_v43  ;;  %10115 = vmatprep.subr.mxu0 %v8672_v47  ;;  %v8723_v35 = vld [vmem:[%s16982_s4 + $0x428] sm:$0xff]  ;;  %v8738_v47 = vld [vmem:[%s16982_s4 + $0x4a0] sm:$0xff] }
 0x558   : > { %10150 = vmatprep.subr.mxu1 %v8704_v48  ;;  %10116 = vmatpush3.msra.mxu0 %v8656_v60  ;;  %v8755_v43 = vld [vmem:[%s16982_s4 + $0x528] sm:$0xff]  ;;  %v8770_v48 = vld [vmem:[%s16982_s4 + $0x5a0] sm:$0xff] }
 0x559   : > { %10151 = vmatpush3.msra.mxu1 %v8688_v51  ;;  %10117 = vmatprep.subr.mxu0 %v8671_v6  ;;  %v8722_v60 = vld [vmem:[%s16982_s4 + $0x420] sm:$0xff]  ;;  %v8769_v6 = vld [vmem:[%s16982_s4 + $0x598] sm:$0xff] }
 0x55a   : > { %10152 = vmatprep.subr.mxu1 %v8703_v12  ;;  %10118 = vmatpush3.msra.mxu0 %v8655_v41  ;;  %v8754_v51 = vld [vmem:[%s16982_s4 + $0x520] sm:$0xff]  ;;  %v8721_v12 = vld [vmem:[%s16982_s4 + $0x418] sm:$0xff]  ;;  %v8736_v41 = vld [vmem:[%s16982_s4 + $0x490] sm:$0xff] }
 0x55b   : > { %10153 = vmatpush3.msra.mxu1 %v8687_v9  ;;  %10119 = vmatprep.subr.mxu0 %v8670_v53  ;;  %v8768_v9 = vld [vmem:[%s16982_s4 + $0x590] sm:$0xff] }
 0x55c   : > { %10154 = vmatprep.subr.mxu1 %v8702_v52  ;;  %10120 = vmatpush3.msra.mxu0 %v8654_v15  ;;  %v8752_v53 = vld [vmem:[%s16982_s4 + $0x510] sm:$0xff]  ;;  %v8567_v52 = vld [vmem:[#allocation2 + $0x20] sm:$0xff] }
 0x55d   : > { %9050 = vmatprep.mubr.f32.mxu0 %v8579_v61  ;;  %10155 = vmatpush3.msra.mxu1 %v8686_v32  ;;  %v8735_v61 = vld [vmem:[%s16982_s4 + $0x488] sm:$0xff]  ;;  %v8566_v15 = vld [vmem:[#allocation2 + $0x40] sm:$0xff] }
 0x55e   : > { %9051 = vmatmul.mubr.f32.vlgmr.msra.gmra.mxu0 %v8578_v8  ;;  %9120 = vmatprep.mubr.f32.mxu1 %v8581_v5  ;;  %v8719_v8 = vld [vmem:[%s16982_s4 + $0x408] sm:$0xff]  ;;  %v8569_v5 = vld [vmem:[#allocation2 + $0x38] sm:$0xff] }
 0x55f   : > { %10159 = vmatprep.subr.mxu0 %v8749_v30  ;;  %10194 = vmatprep.subr.mxu1 %v8781_v20  ;;  %v8751_v32 = vld [vmem:[%s16982_s4 + $0x508] sm:$0xff]  ;;  %v8734_v30 = vld [vmem:[%s16982_s4 + $0x480] sm:$0xff]  ;;  %v8583_v20 = vmul.f32 0.0009765625, %v8567_v52  ;;  %v8801_v52 = vld [vmem:[%s16982_s4 + $0x698] sm:$0xff] }
 0x560   : > { %9121 = vmatmul.mubr.f32.vlgmr.msra.gmra.mxu1 %v8580_v54  ;;  %10160 = vmatpush3.msra.mxu0 %v8733_v13  ;;  %v8766_v54 = vld [vmem:[%s16982_s4 + $0x580] sm:$0xff]  ;;  %v8568_v13 = vld [vmem:[#allocation2 + $0x10] sm:$0xff] }
 0x561   : > { %10195 = vmatpush3.msra.mxu1 %v8765_v25  ;;  %10161 = vmatprep.subr.mxu0 %v8748_v59  ;;  %v8718_v25 = vld [vmem:[%s16982_s4 + $0x400] sm:$0xff]  ;;  %v8582_v59 = vmul.f32 0.0009765625, %v8566_v15  ;;  %v8817_v15 = vld [vmem:[%s16982_s4 + $0x718] sm:$0xff] }
 0x562   : > { %10196 = vmatprep.subr.mxu1 %v8780_v45  ;;  %10162 = vmatpush3.msra.mxu0 %v8732_v38  ;;  %v8750_v45 = vld [vmem:[%s16982_s4 + $0x500] sm:$0xff]  ;;  %v8585_v38 = vmul.f32 0.0009765625, %v8569_v5  ;;  %v8784_v5 = vld [vmem:[%s16982_s4 + $0x610] sm:$0xff] }
 0x563   : > { %10197 = vmatpush3.msra.mxu1 %v8764_v19  ;;  %10163 = vmatprep.subr.mxu0 %v8747_v24  ;;  %v8813_v19 = vld [vmem:[%s16982_s4 + $0x6f8] sm:$0xff]  ;;  %v8584_v24 = vmul.f32 0.0009765625, %v8568_v13  ;;  %v8831_v13 = vld [vmem:[%s16982_s4 + $0x788] sm:$0xff] }
 0x564   : > { %10198 = vmatprep.subr.mxu1 %v8779_v2  ;;  %10164 = vmatpush3.msra.mxu0 %v8731_v36  ;;  %v8845_v2 = vld [vmem:[%s16982_s4 + $0x7f8] sm:$0xff] }
 0x565   : > { %10199 = vmatpush3.msra.mxu1 %v8763_v55  ;;  %10165 = vmatprep.subr.mxu0 %v8746_v49  ;;  %v8797_v36 = vld [vmem:[%s16982_s4 + $0x678] sm:$0xff]  ;;  %v8812_v49 = vld [vmem:[%s16982_s4 + $0x6f0] sm:$0xff] }
 0x566   : > { %10200 = vmatprep.subr.mxu1 %v8778_v29  ;;  %10166 = vmatpush3.msra.mxu0 %v8730_v39  ;;  %v8829_v55 = vld [vmem:[%s16982_s4 + $0x778] sm:$0xff]  ;;  %v8844_v29 = vld [vmem:[%s16982_s4 + $0x7f0] sm:$0xff] }
 0x567   : > { %10201 = vmatpush3.msra.mxu1 %v8762_v4  ;;  %10167 = vmatprep.subr.mxu0 %v8745_v40  ;;  %v8796_v39 = vld [vmem:[%s16982_s4 + $0x670] sm:$0xff]  ;;  %v8811_v40 = vld [vmem:[%s16982_s4 + $0x6e8] sm:$0xff] }
 0x568   : > { %10202 = vmatprep.subr.mxu1 %v8777_v42  ;;  %10168 = vmatpush3.msra.mxu0 %v8729_v62  ;;  %v8828_v4 = vld [vmem:[%s16982_s4 + $0x770] sm:$0xff]  ;;  %v8843_v42 = vld [vmem:[%s16982_s4 + $0x7e8] sm:$0xff] }
 0x569   : > { %10203 = vmatpush3.msra.mxu1 %v8761_v37  ;;  %10169 = vmatprep.subr.mxu0 %v8744_v56  ;;  %v8795_v62 = vld [vmem:[%s16982_s4 + $0x668] sm:$0xff]  ;;  %v8810_v56 = vld [vmem:[%s16982_s4 + $0x6e0] sm:$0xff] }
 0x56a   : > { %10204 = vmatprep.subr.mxu1 %v8776_v22  ;;  %10170 = vmatpush3.msra.mxu0 %v8728_v31  ;;  %v8827_v37 = vld [vmem:[%s16982_s4 + $0x768] sm:$0xff]  ;;  %v8842_v22 = vld [vmem:[%s16982_s4 + $0x7e0] sm:$0xff] }
 0x56b   : > { %10205 = vmatpush3.msra.mxu1 %v8760_v63  ;;  %10171 = vmatprep.subr.mxu0 %v8743_v46  ;;  %v8794_v31 = vld [vmem:[%s16982_s4 + $0x660] sm:$0xff]  ;;  %v8809_v46 = vld [vmem:[%s16982_s4 + $0x6d8] sm:$0xff] }
 0x56c   : > { %10206 = vmatprep.subr.mxu1 %v8775_v10  ;;  %10172 = vmatpush3.msra.mxu0 %v8727_v14  ;;  %v8826_v63 = vld [vmem:[%s16982_s4 + $0x760] sm:$0xff]  ;;  %v8841_v10 = vld [vmem:[%s16982_s4 + $0x7d8] sm:$0xff] }
 0x56d   : > { %10207 = vmatpush3.msra.mxu1 %v8759_v44  ;;  %10173 = vmatprep.subr.mxu0 %v8742_v17  ;;  %v8793_v14 = vld [vmem:[%s16982_s4 + $0x658] sm:$0xff]  ;;  %v8808_v17 = vld [vmem:[%s16982_s4 + $0x6d0] sm:$0xff] }
 0x56e   : > { %10208 = vmatprep.subr.mxu1 %v8774_v33  ;;  %10174 = vmatpush3.msra.mxu0 %v8726_v11  ;;  %v8825_v44 = vld [vmem:[%s16982_s4 + $0x758] sm:$0xff]  ;;  %v8840_v33 = vld [vmem:[%s16982_s4 + $0x7d0] sm:$0xff] }
 0x56f   : > { %10209 = vmatpush3.msra.mxu1 %v8758_v23  ;;  %10175 = vmatprep.subr.mxu0 %v8741_v1  ;;  %v8792_v11 = vld [vmem:[%s16982_s4 + $0x650] sm:$0xff]  ;;  %v8807_v1 = vld [vmem:[%s16982_s4 + $0x6c8] sm:$0xff] }
 0x570   : > { %10210 = vmatprep.subr.mxu1 %v8773_v7  ;;  %10176 = vmatpush3.msra.mxu0 %v8725_v50  ;;  %v8824_v23 = vld [vmem:[%s16982_s4 + $0x750] sm:$0xff]  ;;  %v8839_v7 = vld [vmem:[%s16982_s4 + $0x7c8] sm:$0xff] }
 0x571   : > { %10211 = vmatpush3.msra.mxu1 %v8757_v27  ;;  %10177 = vmatprep.subr.mxu0 %v8740_v34  ;;  %v8791_v50 = vld [vmem:[%s16982_s4 + $0x648] sm:$0xff]  ;;  %v8806_v34 = vld [vmem:[%s16982_s4 + $0x6c0] sm:$0xff] }
 0x572   : > { %10212 = vmatprep.subr.mxu1 %v8772_v0  ;;  %10178 = vmatpush3.msra.mxu0 %v8724_v26  ;;  %v8823_v27 = vld [vmem:[%s16982_s4 + $0x748] sm:$0xff]  ;;  %v8838_v0 = vld [vmem:[%s16982_s4 + $0x7c0] sm:$0xff] }
 0x573   : > { %10213 = vmatpush3.msra.mxu1 %v8756_v58  ;;  %10179 = vmatprep.subr.mxu0 %v8739_v18  ;;  %v8790_v26 = vld [vmem:[%s16982_s4 + $0x640] sm:$0xff]  ;;  %v8805_v18 = vld [vmem:[%s16982_s4 + $0x6b8] sm:$0xff] }
 0x574   : > { %10214 = vmatprep.subr.mxu1 %v8771_v16  ;;  %10180 = vmatpush3.msra.mxu0 %v8723_v35  ;;  %v8822_v58 = vld [vmem:[%s16982_s4 + $0x740] sm:$0xff]  ;;  %v8837_v16 = vld [vmem:[%s16982_s4 + $0x7b8] sm:$0xff] }
 0x575   : > { %10215 = vmatpush3.msra.mxu1 %v8755_v43  ;;  %10181 = vmatprep.subr.mxu0 %v8738_v47  ;;  %v8789_v35 = vld [vmem:[%s16982_s4 + $0x638] sm:$0xff]  ;;  %v8804_v47 = vld [vmem:[%s16982_s4 + $0x6b0] sm:$0xff] }
 0x576   : > { %10216 = vmatprep.subr.mxu1 %v8770_v48  ;;  %10182 = vmatpush3.msra.mxu0 %v8722_v60  ;;  %v8821_v43 = vld [vmem:[%s16982_s4 + $0x738] sm:$0xff]  ;;  %v8836_v48 = vld [vmem:[%s16982_s4 + $0x7b0] sm:$0xff] }
 0x577   : > { %10217 = vmatpush3.msra.mxu1 %v8754_v51  ;;  %10183 = vmatprep.subr.mxu0 %v8737_v57  ;;  %v8788_v60 = vld [vmem:[%s16982_s4 + $0x630] sm:$0xff]  ;;  %v8803_v57 = vld [vmem:[%s16982_s4 + $0x6a8] sm:$0xff] }
 0x578   : > { %10218 = vmatprep.subr.mxu1 %v8769_v6  ;;  %10184 = vmatpush3.msra.mxu0 %v8721_v12  ;;  %v8820_v51 = vld [vmem:[%s16982_s4 + $0x730] sm:$0xff]  ;;  %v8835_v6 = vld [vmem:[%s16982_s4 + $0x7a8] sm:$0xff] }
 0x579   : > { %10219 = vmatpush3.msra.mxu1 %v8753_v21  ;;  %10185 = vmatprep.subr.mxu0 %v8736_v41  ;;  %v8787_v12 = vld [vmem:[%s16982_s4 + $0x628] sm:$0xff]  ;;  %v8802_v41 = vld [vmem:[%s16982_s4 + $0x6a0] sm:$0xff] }
 0x57a   : > { %10220 = vmatprep.subr.mxu1 %v8768_v9  ;;  %10186 = vmatpush3.msra.mxu0 %v8720_v3  ;;  %v8819_v21 = vld [vmem:[%s16982_s4 + $0x728] sm:$0xff]  ;;  %v8834_v9 = vld [vmem:[%s16982_s4 + $0x7a0] sm:$0xff] }
 0x57b   : > { %10221 = vmatpush3.msra.mxu1 %v8752_v53  ;;  %10187 = vmatprep.subr.mxu0 %v8735_v61  ;;  %v8786_v3 = vld [vmem:[%s16982_s4 + $0x620] sm:$0xff]  ;;  %v8833_v61 = vld [vmem:[%s16982_s4 + $0x798] sm:$0xff] }
 0x57c   : > { %10222 = vmatprep.subr.mxu1 %v8767_v28  ;;  %10188 = vmatpush3.msra.mxu0 %v8719_v8  ;;  %v8818_v53 = vld [vmem:[%s16982_s4 + $0x720] sm:$0xff]  ;;  %v8785_v28 = vld [vmem:[%s16982_s4 + $0x618] sm:$0xff]  ;;  %v8800_v8 = vld [vmem:[%s16982_s4 + $0x690] sm:$0xff] }
 0x57d   : > { %10223 = vmatpush3.msra.mxu1 %v8751_v32  ;;  %10189 = vmatprep.subr.mxu0 %v8734_v30  ;;  %v8832_v32 = vld [vmem:[%s16982_s4 + $0x790] sm:$0xff] }
 0x57e   : > { %10224 = vmatprep.subr.mxu1 %v8766_v54  ;;  %10190 = vmatpush3.msra.mxu0 %v8718_v25  ;;  %v8816_v30 = vld [vmem:[%s16982_s4 + $0x710] sm:$0xff]  ;;  %v8799_v54 = vld [vmem:[%s16982_s4 + $0x688] sm:$0xff] }
 0x57f   : > { %9190 = vmatprep.mubr.f32.mxu0 %v8583_v20  ;;  %10225 = vmatpush3.msra.mxu1 %v8750_v45  ;;  %v8571_v20 = vld [vmem:[#allocation2 + $0x70] sm:$0xff]  ;;  %v8783_v25 = vld [vmem:[%s16982_s4 + $0x608] sm:$0xff] }
 0x580   : > { %9191 = vmatmul.mubr.f32.vlgmr.msra.gmra.mxu0 %v8582_v59  ;;  %9260 = vmatprep.mubr.f32.mxu1 %v8585_v38  ;;  %v8573_v59 = vld [vmem:[#allocation2 + $0x28] sm:$0xff]  ;;  %v8570_v38 = vld [vmem:[#allocation2 + $0x60] sm:$0xff] }
 0x581   : > { %10229 = vmatprep.subr.mxu0 %v8813_v19  ;;  %10264 = vmatprep.subr.mxu1 %v8845_v2  ;;  %v8815_v45 = vld [vmem:[%s16982_s4 + $0x708] sm:$0xff]  ;;  %v8572_v19 = vld [vmem:[#allocation2 + $0x78] sm:$0xff]  ;;  %v8830_v2 = vld [vmem:[%s16982_s4 + $0x780] sm:$0xff] }
 0x582   : > { %9261 = vmatmul.mubr.f32.vlgmr.msra.gmra.mxu1 %v8584_v24  ;;  %10230 = vmatpush3.msra.mxu0 %v8797_v36  ;;  %v8798_v24 = vld [vmem:[%s16982_s4 + $0x680] sm:$0xff]  ;;  %v8587_v36 = vmul.f32 0.0009765625, %v8571_v20 }
 0x583   : > { %10265 = vmatpush3.msra.mxu1 %v8829_v55  ;;  %10231 = vmatprep.subr.mxu0 %v8812_v49  ;;  %v8782_v55 = vld [vmem:[%s16982_s4 + $0x600] sm:$0xff]  ;;  %v8589_v49 = vmul.f32 0.0009765625, %v8573_v59 }
 0x584   : > { %10266 = vmatprep.subr.mxu1 %v8844_v29  ;;  %10232 = vmatpush3.msra.mxu0 %v8796_v39  ;;  %v8814_v29 = vld [vmem:[%s16982_s4 + $0x700] sm:$0xff]  ;;  %v8586_v39 = vmul.f32 0.0009765625, %v8570_v38 }
 0x585   : > { %10267 = vmatpush3.msra.mxu1 %v8828_v4  ;;  %10233 = vmatprep.subr.mxu0 %v8811_v40  ;;  %v8588_v4 = vmul.f32 0.0009765625, %v8572_v19 }
 0x586   : > { %10268 = vmatprep.subr.mxu1 %v8843_v42  ;;  %10234 = vmatpush3.msra.mxu0 %v8795_v62 }
 0x587   : > { %10269 = vmatpush3.msra.mxu1 %v8827_v37  ;;  %10235 = vmatprep.subr.mxu0 %v8810_v56 }
 0x588   : > { %10270 = vmatprep.subr.mxu1 %v8842_v22  ;;  %10236 = vmatpush3.msra.mxu0 %v8794_v31 }
 0x589   : > { %10271 = vmatpush3.msra.mxu1 %v8826_v63  ;;  %10237 = vmatprep.subr.mxu0 %v8809_v46 }
 0x58a   : > { %10272 = vmatprep.subr.mxu1 %v8841_v10  ;;  %10238 = vmatpush3.msra.mxu0 %v8793_v14 }
 0x58b   : > { %10273 = vmatpush3.msra.mxu1 %v8825_v44  ;;  %10239 = vmatprep.subr.mxu0 %v8808_v17 }
 0x58c   : > { %10274 = vmatprep.subr.mxu1 %v8840_v33  ;;  %10240 = vmatpush3.msra.mxu0 %v8792_v11 }
 0x58d   : > { %10275 = vmatpush3.msra.mxu1 %v8824_v23  ;;  %10241 = vmatprep.subr.mxu0 %v8807_v1 }
 0x58e   : > { %10276 = vmatprep.subr.mxu1 %v8839_v7  ;;  %10242 = vmatpush3.msra.mxu0 %v8791_v50 }
 0x58f   : > { %10277 = vmatpush3.msra.mxu1 %v8823_v27  ;;  %10243 = vmatprep.subr.mxu0 %v8806_v34 }
 0x590   : > { %10278 = vmatprep.subr.mxu1 %v8838_v0  ;;  %10244 = vmatpush3.msra.mxu0 %v8790_v26 }
 0x591   : > { %10279 = vmatpush3.msra.mxu1 %v8822_v58  ;;  %10245 = vmatprep.subr.mxu0 %v8805_v18 }
 0x592   : > { %10280 = vmatprep.subr.mxu1 %v8837_v16  ;;  %10246 = vmatpush3.msra.mxu0 %v8789_v35 }
 0x593   : > { %10281 = vmatpush3.msra.mxu1 %v8821_v43  ;;  %10247 = vmatprep.subr.mxu0 %v8804_v47 }
 0x594   : > { %10282 = vmatprep.subr.mxu1 %v8836_v48  ;;  %10248 = vmatpush3.msra.mxu0 %v8788_v60  ;;  %v9406_v60 = vld [vmem:[%s16983_s5] sm:$0x1] }
 0x595   : > { %10283 = vmatpush3.msra.mxu1 %v8820_v51  ;;  %10249 = vmatprep.subr.mxu0 %v8803_v57 }
 0x596   : > { %10284 = vmatprep.subr.mxu1 %v8835_v6  ;;  %10250 = vmatpush3.msra.mxu0 %v8787_v12 }
 0x597   : > { %10285 = vmatpush3.msra.mxu1 %v8819_v21  ;;  %10251 = vmatprep.subr.mxu0 %v8802_v41 }
 0x598   : > { %10286 = vmatprep.subr.mxu1 %v8834_v9  ;;  %10252 = vmatpush3.msra.mxu0 %v8786_v3 }
 0x599   : > { %10287 = vmatpush3.msra.mxu1 %v8818_v53  ;;  %10253 = vmatprep.subr.mxu0 %v8801_v52 }
 0x59a   : > { %10288 = vmatprep.subr.mxu1 %v8833_v61  ;;  %10254 = vmatpush3.msra.mxu0 %v8785_v28 }
 0x59b   : > { %10289 = vmatpush3.msra.mxu1 %v8817_v15  ;;  %10255 = vmatprep.subr.mxu0 %v8800_v8 }
 0x59c   : > { %10290 = vmatprep.subr.mxu1 %v8832_v32  ;;  %10256 = vmatpush3.msra.mxu0 %v8784_v5 }
 0x59d   : > { %10291 = vmatpush3.msra.mxu1 %v8816_v30  ;;  %10257 = vmatprep.subr.mxu0 %v8799_v54 }
 0x59e   : > { %10292 = vmatprep.subr.mxu1 %v8831_v13  ;;  %10258 = vmatpush3.msra.mxu0 %v8783_v25 }
 0x59f   : > { %10293 = vmatpush3.msra.mxu1 %v8815_v45  ;;  %10259 = vmatprep.subr.mxu0 %v8798_v24 }
 0x5a0   : > { %10294 = vmatprep.subr.mxu1 %v8830_v2  ;;  %10260 = vmatpush3.msra.mxu0 %v8782_v55 }
 0x5a1   : > { %9330 = vmatprep.mubr.f32.mxu0 %v8587_v36  ;;  %10295 = vmatpush3.msra.mxu1 %v8814_v29 }
 0x5a2   : > { %9400 = vmatprep.mubr.f32.mxu1 %v8589_v49  ;;  %9331 = vmatmul.mubr.f32.vlgmr.msra.gmra.mxu0 %v8586_v39 }
 0x5a3   : > { %9401 = vmatmul.mubr.f32.vlgmr.msra.gmra.mxu1 %v8588_v4 }
 0x5fc   : > { %v10051_v40 = vpop.f32.mrf.mxu0 }
 0x5fd   : > { %v10086_v42 = vpop.f32.mrf.mxu1 }
 0x5fe   : > { %v10052_v62 = vpop.f32.mrf.mxu0 }
 0x5ff   : > { %v10087_v56 = vpop.f32.mrf.mxu1  ;;  %v10053_v63 = vadd.f32 %v10052_v62, %v10051_v40 }
 0x600   : > { %v10088_v46 = vadd.f32 %v10087_v56, %v10086_v42 }
 0x602   : > { %v8983_v17 = vadd.f32 %v10088_v46, %v10053_v63 }
 0x61e   : > { %v10121_v37 = vpop.f32.mrf.mxu0 }
 0x620   : > { %v10156_v22 = vpop.f32.mrf.mxu1  ;;  %v10122_v31 = vpop.f32.mrf.mxu0 }
 0x621   : > { %v10123_v14 = vadd.f32 %v10122_v31, %v10121_v37 }
 0x622   : > { %v10157_v44 = vpop.f32.mrf.mxu1 }
 0x623   : > { %v9053_v23 = vadd.f32 %v10123_v14, %v8983_v17  ;;  %v10158_v1 = vadd.f32 %v10157_v44, %v10156_v22 }
 0x625   : > { %v9123_v27 = vadd.f32 %v10158_v1, %v9053_v23 }
 0x640   : > { %v10191_v10 = vpop.f32.mrf.mxu0 }
 0x642   : > { %v10226_v33 = vpop.f32.mrf.mxu1  ;;  %v10192_v11 = vpop.f32.mrf.mxu0 }
 0x643   : > { %v10193_v7 = vadd.f32 %v10192_v11, %v10191_v10 }
 0x644   : > { %v10227_v50 = vpop.f32.mrf.mxu1 }
 0x645   : > { %v9193_v34 = vadd.f32 %v10193_v7, %v9123_v27  ;;  %v10228_v0 = vadd.f32 %v10227_v50, %v10226_v33 }
 0x647   : > { %v9263_v35 = vadd.f32 %v10228_v0, %v9193_v34 }
 0x662   : > { %v10261_v26 = vpop.f32.mrf.mxu0 }
 0x663   : > { %v10296_v58 = vpop.f32.mrf.mxu1 }
 0x664   : > { %v10262_v18 = vpop.f32.mrf.mxu0 }
 0x665   : > { %v10297_v16 = vpop.f32.mrf.mxu1  ;;  %v10263_v43 = vadd.f32 %v10262_v18, %v10261_v26 }
 0x666   : > { %v10298_v48 = vadd.f32 %v10297_v16, %v10296_v58 }
 0x667   : > { %v9333_v47 = vadd.f32 %v10263_v43, %v9263_v35 }
 0x669   : > { %v9403_v51 = vadd.f32 %v10298_v48, %v9333_v47 }
 0x66b   : > { %v9407_v57 = vadd.f32 %v9406_v60, %v9403_v51 }
 0x66d   : > { %9408 = vst [vmem:[%s10780_s11] sm:$0x1] %v9407_v57 }
 0x66e PF: > { %s10016_s17 = sshll.u32 %s10648_s25, 4  ;;  %s9422_s24 = sshll.u32 %s10780_s11, 4  ;;  %s9423_s24 = int_to_ptr.vmem [resolvable:$true] %s9422_s24 }
 0x66f   : > { %s9420_s20 = scalar_lea.hbm %s16984_s6, %s10016_s17  ;;  %s9410_s29 = scalar_lea.sflag [#allocation4], %s265_s14 }
 0x670   : > { %s10568_s30 = scalar_lea.vmem %s9423_s24, 16  ;;  %s10664_s12 = smov [#allocation3]  }
 0x671   : > { %p10569_p2 = scmp.ne.s32.totalorder %s9423_s24, %s10568_s30  ;;  %s10572_s15 = sshll.u32 %s10664_s12, 4  ;;  %s10573_s15 = int_to_ptr.vmem [resolvable:$false] %s10572_s15 }
 0x672   : > { %s10574_s16 = scalar_lea.vmem %s10573_s15, 32  ;;  %p10575_p6 = scmp.lt.s32.totalorder %s9423_s24, %s10573_s15 }
 0x673   : > { %p10570_p4 = pnand %p10569_p2, %p10749_p3  ;;  %p10576_p7 = scmp.lt.s32.totalorder %s10574_s16, %s10568_s30 }
 0x675   : > { %p10571_p5 = pneg %p10570_p4  ;;  %p10577_p8 = por %p10576_p7, %p10575_p6 }
 0x677   : > { %p10578_p10 = pnand %p10577_p8, %p10571_p5 }
 0x679   : > { %10581 = shalt.err (!%p10578_p10)
}
 0x67a   : > { %s10582_s25 = scalar_lea.hbm %s9420_s20, 16  ;;  %s10586_s17 = scalar_lea.hbm %s16984_s6, 32 }
 0x67b   : > { %p10583_p11 = scmp.ne.s32.totalorder %s9420_s20, %s10582_s25  ;;  %p10587_p0 = scmp.lt.s32.totalorder %s9420_s20, %s16984_s6 }
 0x67c   : > { %p10588_p1 = scmp.lt.s32.totalorder %s10586_s17, %s10582_s25 }
 0x67d   : > { %p10584_p12 = pnand %p10583_p11, %p10749_p3 }
 0x67e   : > { %p10589_p2 = por %p10588_p1, %p10587_p0 }
 0x67f   : > { %p10585_p13 = pneg %p10584_p12 }
 0x681   : > { %p10590_p4 = pnand %p10589_p2, %p10585_p13 }
 0x683   : > { %10593 = shalt.err (!%p10590_p4)
}
 0x684   : > { %10299 = dma.vmem_to_hbm [thread:$0]  (%p10749_p3), %s9423_s24, 16, %s9420_s20, %s9410_s29  }
 0x685 PF: > { %p10305_p5 = scmp.ge.s32.totalorder %s10660_s28, 2  ;;  %s9434_s30 = sand.u32 1, %s10632_s21  }
 0x686   : > { %s9435_s12 = scalar_lea.sflag [#allocation4], %s9434_s30 }
 0x687   : > { %p10302_p6 = pnand %p10305_p5, %p10759_p9 }
 0x689   : > { %p10303_p7 = pneg %p10302_p6 }
 0x68b   : > { %10627 = dma.done.wait (%p10303_p7), %s9435_s12, 16  }
 0x68c   : > { %10629 = vsyncadd (%p10303_p7), %s9435_s12, 4294967280  ;;  %s19_s28 = sadd.s32 1, %s10660_s28   ;;  %s16987_s21 = smov %s10636_s22 }
 0x68d   : > { %p16_p8 = scmp.ge.s32.totalorder %s19_s28, 6   ;;  %s16988_s22 = smov %s10640_s23 }
 0x68e   : > { %s16989_s23 = smov %s10767_s13  ;;  %s16990_s24 = smov %s10652_s26 }
 0x68f   : > { %s16991_s25 = smov %s10656_s27  ;;  %s16992_s26 = smov %s16995_s7 }
 0x690   : > { %s16993_s27 = smov %s16999_s8  ;;  %18 = sbr.rel (!%p16_p8) target bundleno = 5 (0x5), region = 87 }
 0x695   :  { %9439 = vsyncpa [#allocation4], 1 }
 0x696   :  { %9441 = vsyncpa [#allocation4 + $0x1], 1 }

</bundles_post_ra>
